<compile_context>
chip_gen: v6e
topology: v6e:2x2x1
jax: 0.10.0
libtpu: 0.0.40
codegen_flags: <defaults>
</compile_context>

<pallas_src>
import jax
import jax.numpy as jnp
from jax import lax
from jax.experimental import pallas as pl
from jax.experimental.pallas import tpu as pltpu


K = 5        # conv kernel size
P = 2        # conv padding
C_IN = 3     # input channels
C1 = 16      # conv1 out channels
C2 = 32      # conv2 out channels


# ----------------------------------------------------------------------------
# Fused kernel: per grid step = one image, everything stays on-chip.
# ----------------------------------------------------------------------------
def _make_fused_kernel(L):
    L2 = L // 2
    L4 = L // 4

    def kernel(x_ref, w1_ref, b1_ref, w2_ref, b2_ref, fcw_ref, fcb_ref,
               o_ref, xpad1, cols1, xpad2, cols2):
        # -------- layer 1: conv5x5(pad=2) + bias + relu + maxpool2 --------
        xpad1[...] = jnp.zeros_like(xpad1)            # in-kernel zero padding
        xpad1[P:P + L, P:P + L, :] = x_ref[0]         # (L, L, C_IN) NHWC image
        # im2col: one (L*L, K*K*C_IN) patch matrix, then a single MXU matmul.
        for kh in range(K):
            for kw in range(K):
                t = kh * K + kw
                cols1[:, t * C_IN:(t + 1) * C_IN] = (
                    xpad1[kh:kh + L, kw:kw + L, :].reshape(L * L, C_IN))
        y = jnp.dot(cols1[...], w1_ref[...],
                    preferred_element_type=jnp.float32)          # (L*L, C1)
        y = jnp.maximum(y + b1_ref[...], 0.0)
        # maxpool 2x2 (pairwise max over split leading dims; lane dim untouched)
        y = y.reshape(L, L2, 2, C1)
        y = jnp.maximum(y[:, :, 0, :], y[:, :, 1, :])            # (L, L2, C1)
        y = y.reshape(L2, 2, L2, C1)
        p1 = jnp.maximum(y[:, 0, :, :], y[:, 1, :, :])           # (L2, L2, C1)

        # -------- layer 2: conv5x5(pad=2) + bias + relu + maxpool2 --------
        xpad2[...] = jnp.zeros_like(xpad2)
        xpad2[P:P + L2, P:P + L2, :] = p1
        for kh in range(K):
            for kw in range(K):
                t = kh * K + kw
                cols2[:, t * C1:(t + 1) * C1] = (
                    xpad2[kh:kh + L2, kw:kw + L2, :].reshape(L2 * L2, C1))
        y = jnp.dot(cols2[...], w2_ref[...],
                    preferred_element_type=jnp.float32)          # (L2*L2, C2)
        y = jnp.maximum(y + b2_ref[...], 0.0)
        y = y.reshape(L2, L4, 2, C2)
        y = jnp.maximum(y[:, :, 0, :], y[:, :, 1, :])            # (L2, L4, C2)
        y = y.reshape(L4, 2, L4, C2)
        p2 = jnp.maximum(y[:, 0, :, :], y[:, 1, :, :])           # (L4, L4, C2)

        # -------- fc (weight pre-permuted to NHWC flatten order) --------
        feat = p2.reshape(L4 * L4, C2)                           # (L4*L4, C2)
        r = jnp.sum(feat * fcw_ref[...], axis=0, keepdims=True)  # (1, C2)
        r = jnp.sum(r, axis=1, keepdims=True)                    # (1, 1)
        o_ref[0] = r + fcb_ref[...]

    return kernel


def _fused_cnn1(x_nhwc, prep):
    N, L, L_, cin = x_nhwc.shape
    assert L == L_ and cin == C_IN and L % 4 == 0
    L2, L4 = L // 2, L // 4
    # NOTE: whole-image blocks are fine at this size; for large L this should
    # be tiled spatially (strip height a multiple of 8 with a 4-row halo).
    return pl.pallas_call(
        _make_fused_kernel(L),
        out_shape=jax.ShapeDtypeStruct((N, 1, 1), jnp.float32),
        grid=(N,),
        in_specs=[
            pl.BlockSpec((1, L, L, C_IN), lambda n: (n, 0, 0, 0)),   # image
            pl.BlockSpec((K * K * C_IN, C1), lambda n: (0, 0)),      # w1 (75,16)
            pl.BlockSpec((1, C1), lambda n: (0, 0)),                 # b1
            pl.BlockSpec((K * K * C1, C2), lambda n: (0, 0)),        # w2 (400,32)
            pl.BlockSpec((1, C2), lambda n: (0, 0)),                 # b2
            pl.BlockSpec((L4 * L4, C2), lambda n: (0, 0)),           # fc weight
            pl.BlockSpec((1, 1), lambda n: (0, 0)),                  # fc bias
        ],
        out_specs=pl.BlockSpec((1, 1, 1), lambda n: (n, 0, 0)),
        scratch_shapes=[
            pltpu.VMEM((L + 2 * P, L + 2 * P, C_IN), jnp.float32),   # xpad1
            pltpu.VMEM((L * L, K * K * C_IN), jnp.float32),          # cols1
            pltpu.VMEM((L2 + 2 * P, L2 + 2 * P, C1), jnp.float32),   # xpad2
            pltpu.VMEM((L2 * L2, K * K * C1), jnp.float32),          # cols2
        ],
        compiler_params=pltpu.CompilerParams(
            dimension_semantics=("parallel",)),
    )(x_nhwc, prep["w1"], prep["b1"], prep["w2"], prep["b2"],
      prep["fcw"], prep["fcb"])


# ----------------------------------------------------------------------------
# One-time parameter preparation (all layout work hoisted out of the forward).
# ----------------------------------------------------------------------------
def prepare_params(params, L):
    L4 = L // 4
    # conv weights OIHW -> (kh, kw, ci, co) -> (K*K*Cin, Cout) matching im2col.
    w1 = jnp.transpose(params["conv1_w"], (2, 3, 1, 0)).reshape(K * K * C_IN, C1)
    w2 = jnp.transpose(params["conv2_w"], (2, 3, 1, 0)).reshape(K * K * C1, C2)
    # FC weight (1, C2*L4*L4) in torch CHW flatten order -> (H*W, C) NHWC order.
    fcw = (params["fc_w"].reshape(C2, L4, L4)
           .transpose(1, 2, 0).reshape(L4 * L4, C2))
    return {
        "w1": w1.astype(jnp.float32),
        "b1": params["conv1_b"].reshape(1, C1).astype(jnp.float32),
        "w2": w2.astype(jnp.float32),
        "b2": params["conv2_b"].reshape(1, C2).astype(jnp.float32),
        "fcw": fcw.astype(jnp.float32),
        "fcb": params["fc_b"].reshape(1, 1).astype(jnp.float32),
    }


def init_params(key, L):
    ks = jax.random.split(key, 6)

    def uniform(k, shape, fan_in):
        bound = 1.0 / jnp.sqrt(fan_in)
        return jax.random.uniform(k, shape, jnp.float32, -bound, bound)

    F = C2 * (L // 4) * (L // 4)
    return {
        "conv1_w": uniform(ks[0], (C1, C_IN, K, K), C_IN * K * K),  # OIHW
        "conv1_b": uniform(ks[1], (C1,), C_IN * K * K),
        "conv2_w": uniform(ks[2], (C2, C1, K, K), C1 * K * K),
        "conv2_b": uniform(ks[3], (C2,), C1 * K * K),
        "fc_w":    uniform(ks[4], (1, F), F),                       # (out, in)
        "fc_b":    uniform(ks[5], (1,), F),
    }


# ----------------------------------------------------------------------------
# Forward (Pallas) and pure-JAX reference.
# ----------------------------------------------------------------------------
@jax.jit
def cnn1_forward(x_nchw, prep):
    x = jnp.transpose(x_nchw.astype(jnp.float32), (0, 2, 3, 1))   # NCHW -> NHWC
    out = _fused_cnn1(x, prep)                                    # (N, 1, 1)
    return out.reshape(out.shape[0], 1)


def cnn1_reference(x_nchw, params):
    x = x_nchw.astype(jnp.float32)

    def conv(x, w, b):
        y = lax.conv_general_dilated(
            x, w, window_strides=(1, 1), padding=[(P, P), (P, P)],
            dimension_numbers=("NCHW", "OIHW", "NCHW"))
        return jax.nn.relu(y + b.reshape(1, -1, 1, 1))

    def pool(x):
        return lax.reduce_window(
            x, -jnp.inf, lax.max, (1, 1, 2, 2), (1, 1, 2, 2), "VALID")

    x = pool(conv(x, params["conv1_w"], params["conv1_b"]))
    x = pool(conv(x, params["conv2_w"], params["conv2_b"]))
    x = x.reshape(x.shape[0], -1)
    return x @ params["fc_w"].T + params["fc_b"]


if __name__ == "__main__":
    L = 16          # spatial size (must be divisible by 4)
    N = 2           # batch
    key = jax.random.PRNGKey(0)
    k_x, k_p = jax.random.split(key)
    x = jax.random.normal(k_x, (N, C_IN, L, L), jnp.float32)      # NCHW like torch
    params = init_params(k_p, L)
    prep = prepare_params(params, L)                              # one-time layout prep

    out = jax.block_until_ready(cnn1_forward(x, prep))
    ref = cnn1_reference(x, params)
    assert out.shape == (N, 1)
    assert jnp.allclose(out, ref, atol=1e-3, rtol=1e-3), (out, ref)

    print("KERNEL_OK")
</pallas_src>

<mosaic_0001>
module attributes {stable_mosaic.version = 11 : i64} {
  func.func @kernel(%arg0: i32, %arg1: memref<1x16x16x3xf32, #tpu.memory_space<vmem>>, %arg2: memref<75x16xf32, #tpu.memory_space<vmem>>, %arg3: memref<1x16xf32, #tpu.memory_space<vmem>>, %arg4: memref<400x32xf32, #tpu.memory_space<vmem>>, %arg5: memref<1x32xf32, #tpu.memory_space<vmem>>, %arg6: memref<16x32xf32, #tpu.memory_space<vmem>>, %arg7: memref<1x1xf32, #tpu.memory_space<vmem>>, %arg8: memref<1x1x1xf32, #tpu.memory_space<vmem>>, %arg9: memref<20x20x3xf32, #tpu.memory_space<vmem>>, %arg10: memref<256x75xf32, #tpu.memory_space<vmem>>, %arg11: memref<12x12x16xf32, #tpu.memory_space<vmem>>, %arg12: memref<64x400xf32, #tpu.memory_space<vmem>>) attributes {dimension_semantics = [#tpu.dimension_semantics<parallel>], iteration_bounds = array<i64: 2>, scalar_prefetch = 0 : i64, scratch_operands = 4 : i64, tpu.core_type = #tpu.core_type<tc>, window_params = [{transform_indices = @transform_0, window_bounds = array<i64: 1, 16, 16, 3>}, {pipeline_mode = #tpu.pipeline_mode<synchronous>, transform_indices = @transform_1, window_bounds = array<i64: 75, 16>}, {pipeline_mode = #tpu.pipeline_mode<synchronous>, transform_indices = @transform_2, window_bounds = array<i64: 1, 16>}, {pipeline_mode = #tpu.pipeline_mode<synchronous>, transform_indices = @transform_3, window_bounds = array<i64: 400, 32>}, {pipeline_mode = #tpu.pipeline_mode<synchronous>, transform_indices = @transform_4, window_bounds = array<i64: 1, 32>}, {pipeline_mode = #tpu.pipeline_mode<synchronous>, transform_indices = @transform_5, window_bounds = array<i64: 16, 32>}, {pipeline_mode = #tpu.pipeline_mode<synchronous>, transform_indices = @transform_6, window_bounds = array<i64: 1, 1>}, {transform_indices = @transform_7, window_bounds = array<i64: 1, 1, 1>}]} {
    %cst = arith.constant 0.000000e+00 : f32
    %0 = vector.broadcast %cst : f32 to vector<20x20x3xf32>
    %c0 = arith.constant 0 : index
    %c0_0 = arith.constant 0 : index
    %c0_1 = arith.constant 0 : index
    %1 = vector.load %arg9[%c0, %c0_0, %c0_1] : memref<20x20x3xf32, #tpu.memory_space<vmem>>, vector<20x20x3xf32>
    tpu.vector_store %arg9[%c0, %c0_0, %c0_1], %0 {strides = array<i32>} : memref<20x20x3xf32, #tpu.memory_space<vmem>>, vector<20x20x3xf32>,
    %c0_2 = arith.constant 0 : index
    %c0_3 = arith.constant 0 : index
    %c0_4 = arith.constant 0 : index
    %c0_5 = arith.constant 0 : index
    %2 = vector.load %arg1[%c0_2, %c0_3, %c0_4, %c0_5] : memref<1x16x16x3xf32, #tpu.memory_space<vmem>>, vector<1x16x16x3xf32>
    %3 = vector.shape_cast %2 : vector<1x16x16x3xf32> to vector<16x16x3xf32>
    %c2 = arith.constant 2 : index
    %c2_6 = arith.constant 2 : index
    %c0_7 = arith.constant 0 : index
    %4 = vector.load %arg9[%c2, %c2_6, %c0_7] : memref<20x20x3xf32, #tpu.memory_space<vmem>>, vector<16x16x3xf32>
    tpu.vector_store %arg9[%c2, %c2_6, %c0_7], %3 {strides = array<i32>} : memref<20x20x3xf32, #tpu.memory_space<vmem>>, vector<16x16x3xf32>,
    %c0_8 = arith.constant 0 : index
    %c0_9 = arith.constant 0 : index
    %c0_10 = arith.constant 0 : index
    %5 = vector.load %arg9[%c0_8, %c0_9, %c0_10] : memref<20x20x3xf32, #tpu.memory_space<vmem>>, vector<16x16x3xf32>
    %6 = vector.shape_cast %5 : vector<16x16x3xf32> to vector<256x3xf32>
    %c0_11 = arith.constant 0 : index
    %c0_12 = arith.constant 0 : index
    %7 = vector.load %arg10[%c0_11, %c0_12] : memref<256x75xf32, #tpu.memory_space<vmem>>, vector<256x3xf32>
    tpu.vector_store %arg10[%c0_11, %c0_12], %6 {strides = array<i32>} : memref<256x75xf32, #tpu.memory_space<vmem>>, vector<256x3xf32>,
    %c0_13 = arith.constant 0 : index
    %c1 = arith.constant 1 : index
    %c0_14 = arith.constant 0 : index
    %8 = vector.load %arg9[%c0_13, %c1, %c0_14] : memref<20x20x3xf32, #tpu.memory_space<vmem>>, vector<16x16x3xf32>
    %9 = vector.shape_cast %8 : vector<16x16x3xf32> to vector<256x3xf32>
    %c0_15 = arith.constant 0 : index
    %c3 = arith.constant 3 : index
    %10 = vector.load %arg10[%c0_15, %c3] : memref<256x75xf32, #tpu.memory_space<vmem>>, vector<256x3xf32>
    tpu.vector_store %arg10[%c0_15, %c3], %9 {strides = array<i32>} : memref<256x75xf32, #tpu.memory_space<vmem>>, vector<256x3xf32>,
    %c0_16 = arith.constant 0 : index
    %c2_17 = arith.constant 2 : index
    %c0_18 = arith.constant 0 : index
    %11 = vector.load %arg9[%c0_16, %c2_17, %c0_18] : memref<20x20x3xf32, #tpu.memory_space<vmem>>, vector<16x16x3xf32>
    %12 = vector.shape_cast %11 : vector<16x16x3xf32> to vector<256x3xf32>
    %c0_19 = arith.constant 0 : index
    %c6 = arith.constant 6 : index
    %13 = vector.load %arg10[%c0_19, %c6] : memref<256x75xf32, #tpu.memory_space<vmem>>, vector<256x3xf32>
    tpu.vector_store %arg10[%c0_19, %c6], %12 {strides = array<i32>} : memref<256x75xf32, #tpu.memory_space<vmem>>, vector<256x3xf32>,
    %c0_20 = arith.constant 0 : index
    %c3_21 = arith.constant 3 : index
    %c0_22 = arith.constant 0 : index
    %14 = vector.load %arg9[%c0_20, %c3_21, %c0_22] : memref<20x20x3xf32, #tpu.memory_space<vmem>>, vector<16x16x3xf32>
    %15 = vector.shape_cast %14 : vector<16x16x3xf32> to vector<256x3xf32>
    %c0_23 = arith.constant 0 : index
    %c9 = arith.constant 9 : index
    %16 = vector.load %arg10[%c0_23, %c9] : memref<256x75xf32, #tpu.memory_space<vmem>>, vector<256x3xf32>
    tpu.vector_store %arg10[%c0_23, %c9], %15 {strides = array<i32>} : memref<256x75xf32, #tpu.memory_space<vmem>>, vector<256x3xf32>,
    %c0_24 = arith.constant 0 : index
    %c4 = arith.constant 4 : index
    %c0_25 = arith.constant 0 : index
    %17 = vector.load %arg9[%c0_24, %c4, %c0_25] : memref<20x20x3xf32, #tpu.memory_space<vmem>>, vector<16x16x3xf32>
    %18 = vector.shape_cast %17 : vector<16x16x3xf32> to vector<256x3xf32>
    %c0_26 = arith.constant 0 : index
    %c12 = arith.constant 12 : index
    %19 = vector.load %arg10[%c0_26, %c12] : memref<256x75xf32, #tpu.memory_space<vmem>>, vector<256x3xf32>
    tpu.vector_store %arg10[%c0_26, %c12], %18 {strides = array<i32>} : memref<256x75xf32, #tpu.memory_space<vmem>>, vector<256x3xf32>,
    %c1_27 = arith.constant 1 : index
    %c0_28 = arith.constant 0 : index
    %c0_29 = arith.constant 0 : index
    %20 = vector.load %arg9[%c1_27, %c0_28, %c0_29] : memref<20x20x3xf32, #tpu.memory_space<vmem>>, vector<16x16x3xf32>
    %21 = vector.shape_cast %20 : vector<16x16x3xf32> to vector<256x3xf32>
    %c0_30 = arith.constant 0 : index
    %c15 = arith.constant 15 : index
    %22 = vector.load %arg10[%c0_30, %c15] : memref<256x75xf32, #tpu.memory_space<vmem>>, vector<256x3xf32>
    tpu.vector_store %arg10[%c0_30, %c15], %21 {strides = array<i32>} : memref<256x75xf32, #tpu.memory_space<vmem>>, vector<256x3xf32>,
    %c1_31 = arith.constant 1 : index
    %c1_32 = arith.constant 1 : index
    %c0_33 = arith.constant 0 : index
    %23 = vector.load %arg9[%c1_31, %c1_32, %c0_33] : memref<20x20x3xf32, #tpu.memory_space<vmem>>, vector<16x16x3xf32>
    %24 = vector.shape_cast %23 : vector<16x16x3xf32> to vector<256x3xf32>
    %c0_34 = arith.constant 0 : index
    %c18 = arith.constant 18 : index
    %25 = vector.load %arg10[%c0_34, %c18] : memref<256x75xf32, #tpu.memory_space<vmem>>, vector<256x3xf32>
    tpu.vector_store %arg10[%c0_34, %c18], %24 {strides = array<i32>} : memref<256x75xf32, #tpu.memory_space<vmem>>, vector<256x3xf32>,
    %c1_35 = arith.constant 1 : index
    %c2_36 = arith.constant 2 : index
    %c0_37 = arith.constant 0 : index
    %26 = vector.load %arg9[%c1_35, %c2_36, %c0_37] : memref<20x20x3xf32, #tpu.memory_space<vmem>>, vector<16x16x3xf32>
    %27 = vector.shape_cast %26 : vector<16x16x3xf32> to vector<256x3xf32>
    %c0_38 = arith.constant 0 : index
    %c21 = arith.constant 21 : index
    %28 = vector.load %arg10[%c0_38, %c21] : memref<256x75xf32, #tpu.memory_space<vmem>>, vector<256x3xf32>
    tpu.vector_store %arg10[%c0_38, %c21], %27 {strides = array<i32>} : memref<256x75xf32, #tpu.memory_space<vmem>>, vector<256x3xf32>,
    %c1_39 = arith.constant 1 : index
    %c3_40 = arith.constant 3 : index
    %c0_41 = arith.constant 0 : index
    %29 = vector.load %arg9[%c1_39, %c3_40, %c0_41] : memref<20x20x3xf32, #tpu.memory_space<vmem>>, vector<16x16x3xf32>
    %30 = vector.shape_cast %29 : vector<16x16x3xf32> to vector<256x3xf32>
    %c0_42 = arith.constant 0 : index
    %c24 = arith.constant 24 : index
    %31 = vector.load %arg10[%c0_42, %c24] : memref<256x75xf32, #tpu.memory_space<vmem>>, vector<256x3xf32>
    tpu.vector_store %arg10[%c0_42, %c24], %30 {strides = array<i32>} : memref<256x75xf32, #tpu.memory_space<vmem>>, vector<256x3xf32>,
    %c1_43 = arith.constant 1 : index
    %c4_44 = arith.constant 4 : index
    %c0_45 = arith.constant 0 : index
    %32 = vector.load %arg9[%c1_43, %c4_44, %c0_45] : memref<20x20x3xf32, #tpu.memory_space<vmem>>, vector<16x16x3xf32>
    %33 = vector.shape_cast %32 : vector<16x16x3xf32> to vector<256x3xf32>
    %c0_46 = arith.constant 0 : index
    %c27 = arith.constant 27 : index
    %34 = vector.load %arg10[%c0_46, %c27] : memref<256x75xf32, #tpu.memory_space<vmem>>, vector<256x3xf32>
    tpu.vector_store %arg10[%c0_46, %c27], %33 {strides = array<i32>} : memref<256x75xf32, #tpu.memory_space<vmem>>, vector<256x3xf32>,
    %c2_47 = arith.constant 2 : index
    %c0_48 = arith.constant 0 : index
    %c0_49 = arith.constant 0 : index
    %35 = vector.load %arg9[%c2_47, %c0_48, %c0_49] : memref<20x20x3xf32, #tpu.memory_space<vmem>>, vector<16x16x3xf32>
    %36 = vector.shape_cast %35 : vector<16x16x3xf32> to vector<256x3xf32>
    %c0_50 = arith.constant 0 : index
    %c30 = arith.constant 30 : index
    %37 = vector.load %arg10[%c0_50, %c30] : memref<256x75xf32, #tpu.memory_space<vmem>>, vector<256x3xf32>
    tpu.vector_store %arg10[%c0_50, %c30], %36 {strides = array<i32>} : memref<256x75xf32, #tpu.memory_space<vmem>>, vector<256x3xf32>,
    %c2_51 = arith.constant 2 : index
    %c1_52 = arith.constant 1 : index
    %c0_53 = arith.constant 0 : index
    %38 = vector.load %arg9[%c2_51, %c1_52, %c0_53] : memref<20x20x3xf32, #tpu.memory_space<vmem>>, vector<16x16x3xf32>
    %39 = vector.shape_cast %38 : vector<16x16x3xf32> to vector<256x3xf32>
    %c0_54 = arith.constant 0 : index
    %c33 = arith.constant 33 : index
    %40 = vector.load %arg10[%c0_54, %c33] : memref<256x75xf32, #tpu.memory_space<vmem>>, vector<256x3xf32>
    tpu.vector_store %arg10[%c0_54, %c33], %39 {strides = array<i32>} : memref<256x75xf32, #tpu.memory_space<vmem>>, vector<256x3xf32>,
    %c2_55 = arith.constant 2 : index
    %c2_56 = arith.constant 2 : index
    %c0_57 = arith.constant 0 : index
    %41 = vector.load %arg9[%c2_55, %c2_56, %c0_57] : memref<20x20x3xf32, #tpu.memory_space<vmem>>, vector<16x16x3xf32>
    %42 = vector.shape_cast %41 : vector<16x16x3xf32> to vector<256x3xf32>
    %c0_58 = arith.constant 0 : index
    %c36 = arith.constant 36 : index
    %43 = vector.load %arg10[%c0_58, %c36] : memref<256x75xf32, #tpu.memory_space<vmem>>, vector<256x3xf32>
    tpu.vector_store %arg10[%c0_58, %c36], %42 {strides = array<i32>} : memref<256x75xf32, #tpu.memory_space<vmem>>, vector<256x3xf32>,
    %c2_59 = arith.constant 2 : index
    %c3_60 = arith.constant 3 : index
    %c0_61 = arith.constant 0 : index
    %44 = vector.load %arg9[%c2_59, %c3_60, %c0_61] : memref<20x20x3xf32, #tpu.memory_space<vmem>>, vector<16x16x3xf32>
    %45 = vector.shape_cast %44 : vector<16x16x3xf32> to vector<256x3xf32>
    %c0_62 = arith.constant 0 : index
    %c39 = arith.constant 39 : index
    %46 = vector.load %arg10[%c0_62, %c39] : memref<256x75xf32, #tpu.memory_space<vmem>>, vector<256x3xf32>
    tpu.vector_store %arg10[%c0_62, %c39], %45 {strides = array<i32>} : memref<256x75xf32, #tpu.memory_space<vmem>>, vector<256x3xf32>,
    %c2_63 = arith.constant 2 : index
    %c4_64 = arith.constant 4 : index
    %c0_65 = arith.constant 0 : index
    %47 = vector.load %arg9[%c2_63, %c4_64, %c0_65] : memref<20x20x3xf32, #tpu.memory_space<vmem>>, vector<16x16x3xf32>
    %48 = vector.shape_cast %47 : vector<16x16x3xf32> to vector<256x3xf32>
    %c0_66 = arith.constant 0 : index
    %c42 = arith.constant 42 : index
    %49 = vector.load %arg10[%c0_66, %c42] : memref<256x75xf32, #tpu.memory_space<vmem>>, vector<256x3xf32>
    tpu.vector_store %arg10[%c0_66, %c42], %48 {strides = array<i32>} : memref<256x75xf32, #tpu.memory_space<vmem>>, vector<256x3xf32>,
    %c3_67 = arith.constant 3 : index
    %c0_68 = arith.constant 0 : index
    %c0_69 = arith.constant 0 : index
    %50 = vector.load %arg9[%c3_67, %c0_68, %c0_69] : memref<20x20x3xf32, #tpu.memory_space<vmem>>, vector<16x16x3xf32>
    %51 = vector.shape_cast %50 : vector<16x16x3xf32> to vector<256x3xf32>
    %c0_70 = arith.constant 0 : index
    %c45 = arith.constant 45 : index
    %52 = vector.load %arg10[%c0_70, %c45] : memref<256x75xf32, #tpu.memory_space<vmem>>, vector<256x3xf32>
    tpu.vector_store %arg10[%c0_70, %c45], %51 {strides = array<i32>} : memref<256x75xf32, #tpu.memory_space<vmem>>, vector<256x3xf32>,
    %c3_71 = arith.constant 3 : index
    %c1_72 = arith.constant 1 : index
    %c0_73 = arith.constant 0 : index
    %53 = vector.load %arg9[%c3_71, %c1_72, %c0_73] : memref<20x20x3xf32, #tpu.memory_space<vmem>>, vector<16x16x3xf32>
    %54 = vector.shape_cast %53 : vector<16x16x3xf32> to vector<256x3xf32>
    %c0_74 = arith.constant 0 : index
    %c48 = arith.constant 48 : index
    %55 = vector.load %arg10[%c0_74, %c48] : memref<256x75xf32, #tpu.memory_space<vmem>>, vector<256x3xf32>
    tpu.vector_store %arg10[%c0_74, %c48], %54 {strides = array<i32>} : memref<256x75xf32, #tpu.memory_space<vmem>>, vector<256x3xf32>,
    %c3_75 = arith.constant 3 : index
    %c2_76 = arith.constant 2 : index
    %c0_77 = arith.constant 0 : index
    %56 = vector.load %arg9[%c3_75, %c2_76, %c0_77] : memref<20x20x3xf32, #tpu.memory_space<vmem>>, vector<16x16x3xf32>
    %57 = vector.shape_cast %56 : vector<16x16x3xf32> to vector<256x3xf32>
    %c0_78 = arith.constant 0 : index
    %c51 = arith.constant 51 : index
    %58 = vector.load %arg10[%c0_78, %c51] : memref<256x75xf32, #tpu.memory_space<vmem>>, vector<256x3xf32>
    tpu.vector_store %arg10[%c0_78, %c51], %57 {strides = array<i32>} : memref<256x75xf32, #tpu.memory_space<vmem>>, vector<256x3xf32>,
    %c3_79 = arith.constant 3 : index
    %c3_80 = arith.constant 3 : index
    %c0_81 = arith.constant 0 : index
    %59 = vector.load %arg9[%c3_79, %c3_80, %c0_81] : memref<20x20x3xf32, #tpu.memory_space<vmem>>, vector<16x16x3xf32>
    %60 = vector.shape_cast %59 : vector<16x16x3xf32> to vector<256x3xf32>
    %c0_82 = arith.constant 0 : index
    %c54 = arith.constant 54 : index
    %61 = vector.load %arg10[%c0_82, %c54] : memref<256x75xf32, #tpu.memory_space<vmem>>, vector<256x3xf32>
    tpu.vector_store %arg10[%c0_82, %c54], %60 {strides = array<i32>} : memref<256x75xf32, #tpu.memory_space<vmem>>, vector<256x3xf32>,
    %c3_83 = arith.constant 3 : index
    %c4_84 = arith.constant 4 : index
    %c0_85 = arith.constant 0 : index
    %62 = vector.load %arg9[%c3_83, %c4_84, %c0_85] : memref<20x20x3xf32, #tpu.memory_space<vmem>>, vector<16x16x3xf32>
    %63 = vector.shape_cast %62 : vector<16x16x3xf32> to vector<256x3xf32>
    %c0_86 = arith.constant 0 : index
    %c57 = arith.constant 57 : index
    %64 = vector.load %arg10[%c0_86, %c57] : memref<256x75xf32, #tpu.memory_space<vmem>>, vector<256x3xf32>
    tpu.vector_store %arg10[%c0_86, %c57], %63 {strides = array<i32>} : memref<256x75xf32, #tpu.memory_space<vmem>>, vector<256x3xf32>,
    %c4_87 = arith.constant 4 : index
    %c0_88 = arith.constant 0 : index
    %c0_89 = arith.constant 0 : index
    %65 = vector.load %arg9[%c4_87, %c0_88, %c0_89] : memref<20x20x3xf32, #tpu.memory_space<vmem>>, vector<16x16x3xf32>
    %66 = vector.shape_cast %65 : vector<16x16x3xf32> to vector<256x3xf32>
    %c0_90 = arith.constant 0 : index
    %c60 = arith.constant 60 : index
    %67 = vector.load %arg10[%c0_90, %c60] : memref<256x75xf32, #tpu.memory_space<vmem>>, vector<256x3xf32>
    tpu.vector_store %arg10[%c0_90, %c60], %66 {strides = array<i32>} : memref<256x75xf32, #tpu.memory_space<vmem>>, vector<256x3xf32>,
    %c4_91 = arith.constant 4 : index
    %c1_92 = arith.constant 1 : index
    %c0_93 = arith.constant 0 : index
    %68 = vector.load %arg9[%c4_91, %c1_92, %c0_93] : memref<20x20x3xf32, #tpu.memory_space<vmem>>, vector<16x16x3xf32>
    %69 = vector.shape_cast %68 : vector<16x16x3xf32> to vector<256x3xf32>
    %c0_94 = arith.constant 0 : index
    %c63 = arith.constant 63 : index
    %70 = vector.load %arg10[%c0_94, %c63] : memref<256x75xf32, #tpu.memory_space<vmem>>, vector<256x3xf32>
    tpu.vector_store %arg10[%c0_94, %c63], %69 {strides = array<i32>} : memref<256x75xf32, #tpu.memory_space<vmem>>, vector<256x3xf32>,
    %c4_95 = arith.constant 4 : index
    %c2_96 = arith.constant 2 : index
    %c0_97 = arith.constant 0 : index
    %71 = vector.load %arg9[%c4_95, %c2_96, %c0_97] : memref<20x20x3xf32, #tpu.memory_space<vmem>>, vector<16x16x3xf32>
    %72 = vector.shape_cast %71 : vector<16x16x3xf32> to vector<256x3xf32>
    %c0_98 = arith.constant 0 : index
    %c66 = arith.constant 66 : index
    %73 = vector.load %arg10[%c0_98, %c66] : memref<256x75xf32, #tpu.memory_space<vmem>>, vector<256x3xf32>
    tpu.vector_store %arg10[%c0_98, %c66], %72 {strides = array<i32>} : memref<256x75xf32, #tpu.memory_space<vmem>>, vector<256x3xf32>,
    %c4_99 = arith.constant 4 : index
    %c3_100 = arith.constant 3 : index
    %c0_101 = arith.constant 0 : index
    %74 = vector.load %arg9[%c4_99, %c3_100, %c0_101] : memref<20x20x3xf32, #tpu.memory_space<vmem>>, vector<16x16x3xf32>
    %75 = vector.shape_cast %74 : vector<16x16x3xf32> to vector<256x3xf32>
    %c0_102 = arith.constant 0 : index
    %c69 = arith.constant 69 : index
    %76 = vector.load %arg10[%c0_102, %c69] : memref<256x75xf32, #tpu.memory_space<vmem>>, vector<256x3xf32>
    tpu.vector_store %arg10[%c0_102, %c69], %75 {strides = array<i32>} : memref<256x75xf32, #tpu.memory_space<vmem>>, vector<256x3xf32>,
    %c4_103 = arith.constant 4 : index
    %c4_104 = arith.constant 4 : index
    %c0_105 = arith.constant 0 : index
    %77 = vector.load %arg9[%c4_103, %c4_104, %c0_105] : memref<20x20x3xf32, #tpu.memory_space<vmem>>, vector<16x16x3xf32>
    %78 = vector.shape_cast %77 : vector<16x16x3xf32> to vector<256x3xf32>
    %c0_106 = arith.constant 0 : index
    %c72 = arith.constant 72 : index
    %79 = vector.load %arg10[%c0_106, %c72] : memref<256x75xf32, #tpu.memory_space<vmem>>, vector<256x3xf32>
    tpu.vector_store %arg10[%c0_106, %c72], %78 {strides = array<i32>} : memref<256x75xf32, #tpu.memory_space<vmem>>, vector<256x3xf32>,
    %c0_107 = arith.constant 0 : index
    %c0_108 = arith.constant 0 : index
    %80 = vector.load %arg10[%c0_107, %c0_108] : memref<256x75xf32, #tpu.memory_space<vmem>>, vector<256x75xf32>
    %c0_109 = arith.constant 0 : index
    %c0_110 = arith.constant 0 : index
    %81 = vector.load %arg2[%c0_109, %c0_110] : memref<75x16xf32, #tpu.memory_space<vmem>>, vector<75x16xf32>
    %cst_111 = arith.constant dense<0.000000e+00> : vector<256x16xf32>
    %82 = tpu.matmul %80, %81, %cst_111 {dimension_numbers = #tpu.dot_dimension_numbers<[1], [0], [0], [1], [0, 0, 1, 1], [], []>} : vector<256x75xf32>, vector<75x16xf32>, vector<256x16xf32> -> vector<256x16xf32>
    %c0_112 = arith.constant 0 : index
    %c0_113 = arith.constant 0 : index
    %83 = vector.load %arg3[%c0_112, %c0_113] : memref<1x16xf32, #tpu.memory_space<vmem>>, vector<1x16xf32>
    %84 = vector.broadcast %83 : vector<1x16xf32> to vector<256x16xf32>
    %85 = arith.addf %82, %84 : vector<256x16xf32>
    %cst_114 = arith.constant 0.000000e+00 : f32
    %86 = vector.broadcast %cst_114 : f32 to vector<256x16xf32>
    %87 = arith.maximumf %85, %86 : vector<256x16xf32>
    %88 = vector.shape_cast %87 : vector<256x16xf32> to vector<16x8x2x16xf32>
    %89 = vector.extract_strided_slice %88 {offsets = [0, 0, 0, 0], sizes = [16, 8, 1, 16], strides = [1, 1, 1, 1]} : vector<16x8x2x16xf32> to vector<16x8x1x16xf32>
    %90 = vector.shape_cast %89 : vector<16x8x1x16xf32> to vector<16x8x16xf32>
    %91 = vector.extract_strided_slice %88 {offsets = [0, 0, 1, 0], sizes = [16, 8, 1, 16], strides = [1, 1, 1, 1]} : vector<16x8x2x16xf32> to vector<16x8x1x16xf32>
    %92 = vector.shape_cast %91 : vector<16x8x1x16xf32> to vector<16x8x16xf32>
    %93 = arith.maximumf %90, %92 : vector<16x8x16xf32>
    %94 = vector.shape_cast %93 : vector<16x8x16xf32> to vector<8x2x8x16xf32>
    %95 = vector.extract_strided_slice %94 {offsets = [0, 0, 0, 0], sizes = [8, 1, 8, 16], strides = [1, 1, 1, 1]} : vector<8x2x8x16xf32> to vector<8x1x8x16xf32>
    %96 = vector.shape_cast %95 : vector<8x1x8x16xf32> to vector<8x8x16xf32>
    %97 = vector.extract_strided_slice %94 {offsets = [0, 1, 0, 0], sizes = [8, 1, 8, 16], strides = [1, 1, 1, 1]} : vector<8x2x8x16xf32> to vector<8x1x8x16xf32>
    %98 = vector.shape_cast %97 : vector<8x1x8x16xf32> to vector<8x8x16xf32>
    %99 = arith.maximumf %96, %98 : vector<8x8x16xf32>
    %cst_115 = arith.constant 0.000000e+00 : f32
    %100 = vector.broadcast %cst_115 : f32 to vector<12x12x16xf32>
    %c0_116 = arith.constant 0 : index
    %c0_117 = arith.constant 0 : index
    %c0_118 = arith.constant 0 : index
    %101 = vector.load %arg11[%c0_116, %c0_117, %c0_118] : memref<12x12x16xf32, #tpu.memory_space<vmem>>, vector<12x12x16xf32>
    tpu.vector_store %arg11[%c0_116, %c0_117, %c0_118], %100 {strides = array<i32>} : memref<12x12x16xf32, #tpu.memory_space<vmem>>, vector<12x12x16xf32>,
    %c2_119 = arith.constant 2 : index
    %c2_120 = arith.constant 2 : index
    %c0_121 = arith.constant 0 : index
    %102 = vector.load %arg11[%c2_119, %c2_120, %c0_121] : memref<12x12x16xf32, #tpu.memory_space<vmem>>, vector<8x8x16xf32>
    tpu.vector_store %arg11[%c2_119, %c2_120, %c0_121], %99 {strides = array<i32>} : memref<12x12x16xf32, #tpu.memory_space<vmem>>, vector<8x8x16xf32>,
    %c0_122 = arith.constant 0 : index
    %c0_123 = arith.constant 0 : index
    %c0_124 = arith.constant 0 : index
    %103 = vector.load %arg11[%c0_122, %c0_123, %c0_124] : memref<12x12x16xf32, #tpu.memory_space<vmem>>, vector<8x8x16xf32>
    %104 = vector.shape_cast %103 : vector<8x8x16xf32> to vector<64x16xf32>
    %c0_125 = arith.constant 0 : index
    %c0_126 = arith.constant 0 : index
    %105 = vector.load %arg12[%c0_125, %c0_126] : memref<64x400xf32, #tpu.memory_space<vmem>>, vector<64x16xf32>
    tpu.vector_store %arg12[%c0_125, %c0_126], %104 {strides = array<i32>} : memref<64x400xf32, #tpu.memory_space<vmem>>, vector<64x16xf32>,
    %c0_127 = arith.constant 0 : index
    %c1_128 = arith.constant 1 : index
    %c0_129 = arith.constant 0 : index
    %106 = vector.load %arg11[%c0_127, %c1_128, %c0_129] : memref<12x12x16xf32, #tpu.memory_space<vmem>>, vector<8x8x16xf32>
    %107 = vector.shape_cast %106 : vector<8x8x16xf32> to vector<64x16xf32>
    %c0_130 = arith.constant 0 : index
    %c16 = arith.constant 16 : index
    %108 = vector.load %arg12[%c0_130, %c16] : memref<64x400xf32, #tpu.memory_space<vmem>>, vector<64x16xf32>
    tpu.vector_store %arg12[%c0_130, %c16], %107 {strides = array<i32>} : memref<64x400xf32, #tpu.memory_space<vmem>>, vector<64x16xf32>,
    %c0_131 = arith.constant 0 : index
    %c2_132 = arith.constant 2 : index
    %c0_133 = arith.constant 0 : index
    %109 = vector.load %arg11[%c0_131, %c2_132, %c0_133] : memref<12x12x16xf32, #tpu.memory_space<vmem>>, vector<8x8x16xf32>
    %110 = vector.shape_cast %109 : vector<8x8x16xf32> to vector<64x16xf32>
    %c0_134 = arith.constant 0 : index
    %c32 = arith.constant 32 : index
    %111 = vector.load %arg12[%c0_134, %c32] : memref<64x400xf32, #tpu.memory_space<vmem>>, vector<64x16xf32>
    tpu.vector_store %arg12[%c0_134, %c32], %110 {strides = array<i32>} : memref<64x400xf32, #tpu.memory_space<vmem>>, vector<64x16xf32>,
    %c0_135 = arith.constant 0 : index
    %c3_136 = arith.constant 3 : index
    %c0_137 = arith.constant 0 : index
    %112 = vector.load %arg11[%c0_135, %c3_136, %c0_137] : memref<12x12x16xf32, #tpu.memory_space<vmem>>, vector<8x8x16xf32>
    %113 = vector.shape_cast %112 : vector<8x8x16xf32> to vector<64x16xf32>
    %c0_138 = arith.constant 0 : index
    %c48_139 = arith.constant 48 : index
    %114 = vector.load %arg12[%c0_138, %c48_139] : memref<64x400xf32, #tpu.memory_space<vmem>>, vector<64x16xf32>
    tpu.vector_store %arg12[%c0_138, %c48_139], %113 {strides = array<i32>} : memref<64x400xf32, #tpu.memory_space<vmem>>, vector<64x16xf32>,
    %c0_140 = arith.constant 0 : index
    %c4_141 = arith.constant 4 : index
    %c0_142 = arith.constant 0 : index
    %115 = vector.load %arg11[%c0_140, %c4_141, %c0_142] : memref<12x12x16xf32, #tpu.memory_space<vmem>>, vector<8x8x16xf32>
    %116 = vector.shape_cast %115 : vector<8x8x16xf32> to vector<64x16xf32>
    %c0_143 = arith.constant 0 : index
    %c64 = arith.constant 64 : index
    %117 = vector.load %arg12[%c0_143, %c64] : memref<64x400xf32, #tpu.memory_space<vmem>>, vector<64x16xf32>
    tpu.vector_store %arg12[%c0_143, %c64], %116 {strides = array<i32>} : memref<64x400xf32, #tpu.memory_space<vmem>>, vector<64x16xf32>,
    %c1_144 = arith.constant 1 : index
    %c0_145 = arith.constant 0 : index
    %c0_146 = arith.constant 0 : index
    %118 = vector.load %arg11[%c1_144, %c0_145, %c0_146] : memref<12x12x16xf32, #tpu.memory_space<vmem>>, vector<8x8x16xf32>
    %119 = vector.shape_cast %118 : vector<8x8x16xf32> to vector<64x16xf32>
    %c0_147 = arith.constant 0 : index
    %c80 = arith.constant 80 : index
    %120 = vector.load %arg12[%c0_147, %c80] : memref<64x400xf32, #tpu.memory_space<vmem>>, vector<64x16xf32>
    tpu.vector_store %arg12[%c0_147, %c80], %119 {strides = array<i32>} : memref<64x400xf32, #tpu.memory_space<vmem>>, vector<64x16xf32>,
    %c1_148 = arith.constant 1 : index
    %c1_149 = arith.constant 1 : index
    %c0_150 = arith.constant 0 : index
    %121 = vector.load %arg11[%c1_148, %c1_149, %c0_150] : memref<12x12x16xf32, #tpu.memory_space<vmem>>, vector<8x8x16xf32>
    %122 = vector.shape_cast %121 : vector<8x8x16xf32> to vector<64x16xf32>
    %c0_151 = arith.constant 0 : index
    %c96 = arith.constant 96 : index
    %123 = vector.load %arg12[%c0_151, %c96] : memref<64x400xf32, #tpu.memory_space<vmem>>, vector<64x16xf32>
    tpu.vector_store %arg12[%c0_151, %c96], %122 {strides = array<i32>} : memref<64x400xf32, #tpu.memory_space<vmem>>, vector<64x16xf32>,
    %c1_152 = arith.constant 1 : index
    %c2_153 = arith.constant 2 : index
    %c0_154 = arith.constant 0 : index
    %124 = vector.load %arg11[%c1_152, %c2_153, %c0_154] : memref<12x12x16xf32, #tpu.memory_space<vmem>>, vector<8x8x16xf32>
    %125 = vector.shape_cast %124 : vector<8x8x16xf32> to vector<64x16xf32>
    %c0_155 = arith.constant 0 : index
    %c112 = arith.constant 112 : index
    %126 = vector.load %arg12[%c0_155, %c112] : memref<64x400xf32, #tpu.memory_space<vmem>>, vector<64x16xf32>
    tpu.vector_store %arg12[%c0_155, %c112], %125 {strides = array<i32>} : memref<64x400xf32, #tpu.memory_space<vmem>>, vector<64x16xf32>,
    %c1_156 = arith.constant 1 : index
    %c3_157 = arith.constant 3 : index
    %c0_158 = arith.constant 0 : index
    %127 = vector.load %arg11[%c1_156, %c3_157, %c0_158] : memref<12x12x16xf32, #tpu.memory_space<vmem>>, vector<8x8x16xf32>
    %128 = vector.shape_cast %127 : vector<8x8x16xf32> to vector<64x16xf32>
    %c0_159 = arith.constant 0 : index
    %c128 = arith.constant 128 : index
    %129 = vector.load %arg12[%c0_159, %c128] : memref<64x400xf32, #tpu.memory_space<vmem>>, vector<64x16xf32>
    tpu.vector_store %arg12[%c0_159, %c128], %128 {strides = array<i32>} : memref<64x400xf32, #tpu.memory_space<vmem>>, vector<64x16xf32>,
    %c1_160 = arith.constant 1 : index
    %c4_161 = arith.constant 4 : index
    %c0_162 = arith.constant 0 : index
    %130 = vector.load %arg11[%c1_160, %c4_161, %c0_162] : memref<12x12x16xf32, #tpu.memory_space<vmem>>, vector<8x8x16xf32>
    %131 = vector.shape_cast %130 : vector<8x8x16xf32> to vector<64x16xf32>
    %c0_163 = arith.constant 0 : index
    %c144 = arith.constant 144 : index
    %132 = vector.load %arg12[%c0_163, %c144] : memref<64x400xf32, #tpu.memory_space<vmem>>, vector<64x16xf32>
    tpu.vector_store %arg12[%c0_163, %c144], %131 {strides = array<i32>} : memref<64x400xf32, #tpu.memory_space<vmem>>, vector<64x16xf32>,
    %c2_164 = arith.constant 2 : index
    %c0_165 = arith.constant 0 : index
    %c0_166 = arith.constant 0 : index
    %133 = vector.load %arg11[%c2_164, %c0_165, %c0_166] : memref<12x12x16xf32, #tpu.memory_space<vmem>>, vector<8x8x16xf32>
    %134 = vector.shape_cast %133 : vector<8x8x16xf32> to vector<64x16xf32>
    %c0_167 = arith.constant 0 : index
    %c160 = arith.constant 160 : index
    %135 = vector.load %arg12[%c0_167, %c160] : memref<64x400xf32, #tpu.memory_space<vmem>>, vector<64x16xf32>
    tpu.vector_store %arg12[%c0_167, %c160], %134 {strides = array<i32>} : memref<64x400xf32, #tpu.memory_space<vmem>>, vector<64x16xf32>,
    %c2_168 = arith.constant 2 : index
    %c1_169 = arith.constant 1 : index
    %c0_170 = arith.constant 0 : index
    %136 = vector.load %arg11[%c2_168, %c1_169, %c0_170] : memref<12x12x16xf32, #tpu.memory_space<vmem>>, vector<8x8x16xf32>
    %137 = vector.shape_cast %136 : vector<8x8x16xf32> to vector<64x16xf32>
    %c0_171 = arith.constant 0 : index
    %c176 = arith.constant 176 : index
    %138 = vector.load %arg12[%c0_171, %c176] : memref<64x400xf32, #tpu.memory_space<vmem>>, vector<64x16xf32>
    tpu.vector_store %arg12[%c0_171, %c176], %137 {strides = array<i32>} : memref<64x400xf32, #tpu.memory_space<vmem>>, vector<64x16xf32>,
    %c2_172 = arith.constant 2 : index
    %c2_173 = arith.constant 2 : index
    %c0_174 = arith.constant 0 : index
    %139 = vector.load %arg11[%c2_172, %c2_173, %c0_174] : memref<12x12x16xf32, #tpu.memory_space<vmem>>, vector<8x8x16xf32>
    %140 = vector.shape_cast %139 : vector<8x8x16xf32> to vector<64x16xf32>
    %c0_175 = arith.constant 0 : index
    %c192 = arith.constant 192 : index
    %141 = vector.load %arg12[%c0_175, %c192] : memref<64x400xf32, #tpu.memory_space<vmem>>, vector<64x16xf32>
    tpu.vector_store %arg12[%c0_175, %c192], %140 {strides = array<i32>} : memref<64x400xf32, #tpu.memory_space<vmem>>, vector<64x16xf32>,
    %c2_176 = arith.constant 2 : index
    %c3_177 = arith.constant 3 : index
    %c0_178 = arith.constant 0 : index
    %142 = vector.load %arg11[%c2_176, %c3_177, %c0_178] : memref<12x12x16xf32, #tpu.memory_space<vmem>>, vector<8x8x16xf32>
    %143 = vector.shape_cast %142 : vector<8x8x16xf32> to vector<64x16xf32>
    %c0_179 = arith.constant 0 : index
    %c208 = arith.constant 208 : index
    %144 = vector.load %arg12[%c0_179, %c208] : memref<64x400xf32, #tpu.memory_space<vmem>>, vector<64x16xf32>
    tpu.vector_store %arg12[%c0_179, %c208], %143 {strides = array<i32>} : memref<64x400xf32, #tpu.memory_space<vmem>>, vector<64x16xf32>,
    %c2_180 = arith.constant 2 : index
    %c4_181 = arith.constant 4 : index
    %c0_182 = arith.constant 0 : index
    %145 = vector.load %arg11[%c2_180, %c4_181, %c0_182] : memref<12x12x16xf32, #tpu.memory_space<vmem>>, vector<8x8x16xf32>
    %146 = vector.shape_cast %145 : vector<8x8x16xf32> to vector<64x16xf32>
    %c0_183 = arith.constant 0 : index
    %c224 = arith.constant 224 : index
    %147 = vector.load %arg12[%c0_183, %c224] : memref<64x400xf32, #tpu.memory_space<vmem>>, vector<64x16xf32>
    tpu.vector_store %arg12[%c0_183, %c224], %146 {strides = array<i32>} : memref<64x400xf32, #tpu.memory_space<vmem>>, vector<64x16xf32>,
    %c3_184 = arith.constant 3 : index
    %c0_185 = arith.constant 0 : index
    %c0_186 = arith.constant 0 : index
    %148 = vector.load %arg11[%c3_184, %c0_185, %c0_186] : memref<12x12x16xf32, #tpu.memory_space<vmem>>, vector<8x8x16xf32>
    %149 = vector.shape_cast %148 : vector<8x8x16xf32> to vector<64x16xf32>
    %c0_187 = arith.constant 0 : index
    %c240 = arith.constant 240 : index
    %150 = vector.load %arg12[%c0_187, %c240] : memref<64x400xf32, #tpu.memory_space<vmem>>, vector<64x16xf32>
    tpu.vector_store %arg12[%c0_187, %c240], %149 {strides = array<i32>} : memref<64x400xf32, #tpu.memory_space<vmem>>, vector<64x16xf32>,
    %c3_188 = arith.constant 3 : index
    %c1_189 = arith.constant 1 : index
    %c0_190 = arith.constant 0 : index
    %151 = vector.load %arg11[%c3_188, %c1_189, %c0_190] : memref<12x12x16xf32, #tpu.memory_space<vmem>>, vector<8x8x16xf32>
    %152 = vector.shape_cast %151 : vector<8x8x16xf32> to vector<64x16xf32>
    %c0_191 = arith.constant 0 : index
    %c256 = arith.constant 256 : index
    %153 = vector.load %arg12[%c0_191, %c256] : memref<64x400xf32, #tpu.memory_space<vmem>>, vector<64x16xf32>
    tpu.vector_store %arg12[%c0_191, %c256], %152 {strides = array<i32>} : memref<64x400xf32, #tpu.memory_space<vmem>>, vector<64x16xf32>,
    %c3_192 = arith.constant 3 : index
    %c2_193 = arith.constant 2 : index
    %c0_194 = arith.constant 0 : index
    %154 = vector.load %arg11[%c3_192, %c2_193, %c0_194] : memref<12x12x16xf32, #tpu.memory_space<vmem>>, vector<8x8x16xf32>
    %155 = vector.shape_cast %154 : vector<8x8x16xf32> to vector<64x16xf32>
    %c0_195 = arith.constant 0 : index
    %c272 = arith.constant 272 : index
    %156 = vector.load %arg12[%c0_195, %c272] : memref<64x400xf32, #tpu.memory_space<vmem>>, vector<64x16xf32>
    tpu.vector_store %arg12[%c0_195, %c272], %155 {strides = array<i32>} : memref<64x400xf32, #tpu.memory_space<vmem>>, vector<64x16xf32>,
    %c3_196 = arith.constant 3 : index
    %c3_197 = arith.constant 3 : index
    %c0_198 = arith.constant 0 : index
    %157 = vector.load %arg11[%c3_196, %c3_197, %c0_198] : memref<12x12x16xf32, #tpu.memory_space<vmem>>, vector<8x8x16xf32>
    %158 = vector.shape_cast %157 : vector<8x8x16xf32> to vector<64x16xf32>
    %c0_199 = arith.constant 0 : index
    %c288 = arith.constant 288 : index
    %159 = vector.load %arg12[%c0_199, %c288] : memref<64x400xf32, #tpu.memory_space<vmem>>, vector<64x16xf32>
    tpu.vector_store %arg12[%c0_199, %c288], %158 {strides = array<i32>} : memref<64x400xf32, #tpu.memory_space<vmem>>, vector<64x16xf32>,
    %c3_200 = arith.constant 3 : index
    %c4_201 = arith.constant 4 : index
    %c0_202 = arith.constant 0 : index
    %160 = vector.load %arg11[%c3_200, %c4_201, %c0_202] : memref<12x12x16xf32, #tpu.memory_space<vmem>>, vector<8x8x16xf32>
    %161 = vector.shape_cast %160 : vector<8x8x16xf32> to vector<64x16xf32>
    %c0_203 = arith.constant 0 : index
    %c304 = arith.constant 304 : index
    %162 = vector.load %arg12[%c0_203, %c304] : memref<64x400xf32, #tpu.memory_space<vmem>>, vector<64x16xf32>
    tpu.vector_store %arg12[%c0_203, %c304], %161 {strides = array<i32>} : memref<64x400xf32, #tpu.memory_space<vmem>>, vector<64x16xf32>,
    %c4_204 = arith.constant 4 : index
    %c0_205 = arith.constant 0 : index
    %c0_206 = arith.constant 0 : index
    %163 = vector.load %arg11[%c4_204, %c0_205, %c0_206] : memref<12x12x16xf32, #tpu.memory_space<vmem>>, vector<8x8x16xf32>
    %164 = vector.shape_cast %163 : vector<8x8x16xf32> to vector<64x16xf32>
    %c0_207 = arith.constant 0 : index
    %c320 = arith.constant 320 : index
    %165 = vector.load %arg12[%c0_207, %c320] : memref<64x400xf32, #tpu.memory_space<vmem>>, vector<64x16xf32>
    tpu.vector_store %arg12[%c0_207, %c320], %164 {strides = array<i32>} : memref<64x400xf32, #tpu.memory_space<vmem>>, vector<64x16xf32>,
    %c4_208 = arith.constant 4 : index
    %c1_209 = arith.constant 1 : index
    %c0_210 = arith.constant 0 : index
    %166 = vector.load %arg11[%c4_208, %c1_209, %c0_210] : memref<12x12x16xf32, #tpu.memory_space<vmem>>, vector<8x8x16xf32>
    %167 = vector.shape_cast %166 : vector<8x8x16xf32> to vector<64x16xf32>
    %c0_211 = arith.constant 0 : index
    %c336 = arith.constant 336 : index
    %168 = vector.load %arg12[%c0_211, %c336] : memref<64x400xf32, #tpu.memory_space<vmem>>, vector<64x16xf32>
    tpu.vector_store %arg12[%c0_211, %c336], %167 {strides = array<i32>} : memref<64x400xf32, #tpu.memory_space<vmem>>, vector<64x16xf32>,
    %c4_212 = arith.constant 4 : index
    %c2_213 = arith.constant 2 : index
    %c0_214 = arith.constant 0 : index
    %169 = vector.load %arg11[%c4_212, %c2_213, %c0_214] : memref<12x12x16xf32, #tpu.memory_space<vmem>>, vector<8x8x16xf32>
    %170 = vector.shape_cast %169 : vector<8x8x16xf32> to vector<64x16xf32>
    %c0_215 = arith.constant 0 : index
    %c352 = arith.constant 352 : index
    %171 = vector.load %arg12[%c0_215, %c352] : memref<64x400xf32, #tpu.memory_space<vmem>>, vector<64x16xf32>
    tpu.vector_store %arg12[%c0_215, %c352], %170 {strides = array<i32>} : memref<64x400xf32, #tpu.memory_space<vmem>>, vector<64x16xf32>,
    %c4_216 = arith.constant 4 : index
    %c3_217 = arith.constant 3 : index
    %c0_218 = arith.constant 0 : index
    %172 = vector.load %arg11[%c4_216, %c3_217, %c0_218] : memref<12x12x16xf32, #tpu.memory_space<vmem>>, vector<8x8x16xf32>
    %173 = vector.shape_cast %172 : vector<8x8x16xf32> to vector<64x16xf32>
    %c0_219 = arith.constant 0 : index
    %c368 = arith.constant 368 : index
    %174 = vector.load %arg12[%c0_219, %c368] : memref<64x400xf32, #tpu.memory_space<vmem>>, vector<64x16xf32>
    tpu.vector_store %arg12[%c0_219, %c368], %173 {strides = array<i32>} : memref<64x400xf32, #tpu.memory_space<vmem>>, vector<64x16xf32>,
    %c4_220 = arith.constant 4 : index
    %c4_221 = arith.constant 4 : index
    %c0_222 = arith.constant 0 : index
    %175 = vector.load %arg11[%c4_220, %c4_221, %c0_222] : memref<12x12x16xf32, #tpu.memory_space<vmem>>, vector<8x8x16xf32>
    %176 = vector.shape_cast %175 : vector<8x8x16xf32> to vector<64x16xf32>
    %c0_223 = arith.constant 0 : index
    %c384 = arith.constant 384 : index
    %177 = vector.load %arg12[%c0_223, %c384] : memref<64x400xf32, #tpu.memory_space<vmem>>, vector<64x16xf32>
    tpu.vector_store %arg12[%c0_223, %c384], %176 {strides = array<i32>} : memref<64x400xf32, #tpu.memory_space<vmem>>, vector<64x16xf32>,
    %c0_224 = arith.constant 0 : index
    %c0_225 = arith.constant 0 : index
    %178 = vector.load %arg12[%c0_224, %c0_225] : memref<64x400xf32, #tpu.memory_space<vmem>>, vector<64x400xf32>
    %c0_226 = arith.constant 0 : index
    %c0_227 = arith.constant 0 : index
    %179 = vector.load %arg4[%c0_226, %c0_227] : memref<400x32xf32, #tpu.memory_space<vmem>>, vector<400x32xf32>
    %cst_228 = arith.constant dense<0.000000e+00> : vector<64x32xf32>
    %180 = tpu.matmul %178, %179, %cst_228 {dimension_numbers = #tpu.dot_dimension_numbers<[1], [0], [0], [1], [0, 0, 1, 1], [], []>} : vector<64x400xf32>, vector<400x32xf32>, vector<64x32xf32> -> vector<64x32xf32>
    %c0_229 = arith.constant 0 : index
    %c0_230 = arith.constant 0 : index
    %181 = vector.load %arg5[%c0_229, %c0_230] : memref<1x32xf32, #tpu.memory_space<vmem>>, vector<1x32xf32>
    %182 = vector.broadcast %181 : vector<1x32xf32> to vector<64x32xf32>
    %183 = arith.addf %180, %182 : vector<64x32xf32>
    %cst_231 = arith.constant 0.000000e+00 : f32
    %184 = vector.broadcast %cst_231 : f32 to vector<64x32xf32>
    %185 = arith.maximumf %183, %184 : vector<64x32xf32>
    %186 = vector.shape_cast %185 : vector<64x32xf32> to vector<8x4x2x32xf32>
    %187 = vector.extract_strided_slice %186 {offsets = [0, 0, 0, 0], sizes = [8, 4, 1, 32], strides = [1, 1, 1, 1]} : vector<8x4x2x32xf32> to vector<8x4x1x32xf32>
    %188 = vector.shape_cast %187 : vector<8x4x1x32xf32> to vector<8x4x32xf32>
    %189 = vector.extract_strided_slice %186 {offsets = [0, 0, 1, 0], sizes = [8, 4, 1, 32], strides = [1, 1, 1, 1]} : vector<8x4x2x32xf32> to vector<8x4x1x32xf32>
    %190 = vector.shape_cast %189 : vector<8x4x1x32xf32> to vector<8x4x32xf32>
    %191 = arith.maximumf %188, %190 : vector<8x4x32xf32>
    %192 = vector.shape_cast %191 : vector<8x4x32xf32> to vector<4x2x4x32xf32>
    %193 = vector.extract_strided_slice %192 {offsets = [0, 0, 0, 0], sizes = [4, 1, 4, 32], strides = [1, 1, 1, 1]} : vector<4x2x4x32xf32> to vector<4x1x4x32xf32>
    %194 = vector.shape_cast %193 : vector<4x1x4x32xf32> to vector<4x4x32xf32>
    %195 = vector.extract_strided_slice %192 {offsets = [0, 1, 0, 0], sizes = [4, 1, 4, 32], strides = [1, 1, 1, 1]} : vector<4x2x4x32xf32> to vector<4x1x4x32xf32>
    %196 = vector.shape_cast %195 : vector<4x1x4x32xf32> to vector<4x4x32xf32>
    %197 = arith.maximumf %194, %196 : vector<4x4x32xf32>
    %198 = vector.shape_cast %197 : vector<4x4x32xf32> to vector<16x32xf32>
    %c0_232 = arith.constant 0 : index
    %c0_233 = arith.constant 0 : index
    %199 = vector.load %arg6[%c0_232, %c0_233] : memref<16x32xf32, #tpu.memory_space<vmem>>, vector<16x32xf32>
    %200 = arith.mulf %198, %199 : vector<16x32xf32>
    %cst_234 = arith.constant dense<0.000000e+00> : vector<32xf32>
    %201 = vector.multi_reduction <add>, %200, %cst_234 [0] : vector<16x32xf32> to vector<32xf32>
    %202 = vector.shape_cast %201 : vector<32xf32> to vector<1x32xf32>
    %cst_235 = arith.constant dense<0.000000e+00> : vector<1xf32>
    %203 = vector.multi_reduction <add>, %202, %cst_235 [1] : vector<1x32xf32> to vector<1xf32>
    %204 = vector.shape_cast %203 : vector<1xf32> to vector<1x1xf32>
    %c0_236 = arith.constant 0 : index
    %c0_237 = arith.constant 0 : index
    %205 = vector.load %arg7[%c0_236, %c0_237] : memref<1x1xf32, #tpu.memory_space<vmem>>, vector<1x1xf32>
    %206 = arith.addf %204, %205 : vector<1x1xf32>
    %c0_238 = arith.constant 0 : index
    %c0_239 = arith.constant 0 : index
    %c0_240 = arith.constant 0 : index
    %207 = vector.load %arg8[%c0_238, %c0_239, %c0_240] : memref<1x1x1xf32, #tpu.memory_space<vmem>>, vector<1x1x1xf32>
    %208 = vector.shape_cast %207 : vector<1x1x1xf32> to vector<1x1xf32>
    %209 = vector.shape_cast %206 : vector<1x1xf32> to vector<1x1x1xf32>
    tpu.vector_store %arg8[%c0_238, %c0_239, %c0_240], %209 {strides = array<i32>} : memref<1x1x1xf32, #tpu.memory_space<vmem>>, vector<1x1x1xf32>,
    return
  }
  func.func @transform_0(%arg0: i32) -> (i32, i32, i32, i32) {
    %c0_i32 = arith.constant 0 : i32
    %c0_i32_0 = arith.constant 0 : i32
    %c0_i32_1 = arith.constant 0 : i32
    %c0_i32_2 = arith.constant 0 : i32
    return %arg0, %c0_i32, %c0_i32_0, %c0_i32_1 : i32, i32, i32, i32
  }
  func.func @transform_1(%arg0: i32) -> (i32, i32) {
    %c0_i32 = arith.constant 0 : i32
    %c0_i32_0 = arith.constant 0 : i32
    %c0_i32_1 = arith.constant 0 : i32
    return %c0_i32, %c0_i32_0 : i32, i32
  }
  func.func @transform_2(%arg0: i32) -> (i32, i32) {
    %c0_i32 = arith.constant 0 : i32
    %c0_i32_0 = arith.constant 0 : i32
    %c0_i32_1 = arith.constant 0 : i32
    return %c0_i32, %c0_i32_0 : i32, i32
  }
  func.func @transform_3(%arg0: i32) -> (i32, i32) {
    %c0_i32 = arith.constant 0 : i32
    %c0_i32_0 = arith.constant 0 : i32
    %c0_i32_1 = arith.constant 0 : i32
    return %c0_i32, %c0_i32_0 : i32, i32
  }
  func.func @transform_4(%arg0: i32) -> (i32, i32) {
    %c0_i32 = arith.constant 0 : i32
    %c0_i32_0 = arith.constant 0 : i32
    %c0_i32_1 = arith.constant 0 : i32
    return %c0_i32, %c0_i32_0 : i32, i32
  }
  func.func @transform_5(%arg0: i32) -> (i32, i32) {
    %c0_i32 = arith.constant 0 : i32
    %c0_i32_0 = arith.constant 0 : i32
    %c0_i32_1 = arith.constant 0 : i32
    return %c0_i32, %c0_i32_0 : i32, i32
  }
  func.func @transform_6(%arg0: i32) -> (i32, i32) {
    %c0_i32 = arith.constant 0 : i32
    %c0_i32_0 = arith.constant 0 : i32
    %c0_i32_1 = arith.constant 0 : i32
    return %c0_i32, %c0_i32_0 : i32, i32
  }
  func.func @transform_7(%arg0: i32) -> (i32, i32, i32) {
    %c0_i32 = arith.constant 0 : i32
    %c0_i32_0 = arith.constant 0 : i32
    %c0_i32_1 = arith.constant 0 : i32
    return %arg0, %c0_i32, %c0_i32_0 : i32, i32, i32
  }
}

</mosaic_0001>

<bundles_post_ra>
// kernel: cnn1_forward.1
= control target key start
LH: loop header
LB: loop body
LE: loop exit
PB: predicated region body
PF: predicated region fallthrough
CT: control target
= control target key end

     0   :  { %s9734_s26 = smov 0   ;;  %s13320_s0 = inlined_call_operand.vmem [shape: f32[2,16,16,3], index: 0, kind: input, shape index: {}]   ;;  %s13321_s1 = inlined_call_operand.vmem [shape: f32[75,16], index: 1, kind: input, shape index: {}]   ;;  %s13322_s2 = inlined_call_operand.vmem [shape: f32[1,16], index: 2, kind: input, shape index: {}]   ;;  %s13323_s3 = inlined_call_operand.vmem [shape: f32[400,32], index: 3, kind: input, shape index: {}]   ;;  %s13324_s4 = inlined_call_operand.vmem [shape: f32[1,32], index: 4, kind: input, shape index: {}]   ;;  %s13325_s5 = inlined_call_operand.vmem [shape: f32[16,32], index: 5, kind: input, shape index: {}]   ;;  %s13326_s6 = inlined_call_operand.<no memory space> [shape: f32[1,1], index: 6, kind: input, shape index: {}]   ;;  %s13327_s7 = inlined_call_operand.vmem [shape: f32[2,1,1], index: 7, kind: output, shape index: {}]  }
   0x1   :  { %v12_v0 = vstv %s13326_s6 }
   0x2   :  { %13 = vst [vmem:[#allocation6] sm:$0x1] %v12_v0 }
   0x3 LB: > { %s9188_s27 = sadd.s32 4294967295, %s9657_s26   ;;  %p9192_p0 = scmp.ge.s32.totalorder %s9657_s26, 1  ;;  %s9657_s26 = sphi %s9734_s26, %s19_s26  }
   0x4   : > { %p239_p1 = scmp.lt.s32.totalorder %s9657_s26, 3 }
   0x6   : > { %p240_p2 = pnand %p9192_p0, %p239_p1 }
   0x7   : > { %p9744_p3 = scmp.lt.s32.totalorder (!%p240_p2), %s9188_s27, 1  ;;  %s9660_s9 = smov (!%p240_p2), 3  }
   0x8   : > { %243 = sbr.rel (%p240_p2) target bundleno = 2562 (0xa02), region = 48  ;;  %s9661_s10 = smov (!%p240_p2), 6  }
   0x9   : > { %s9662_s11 = smov (!%p240_p2), 9   ;;  %s9663_s12 = smov (!%p240_p2), 12  }
   0xa   : > { %s9664_s13 = smov (!%p240_p2), 15   ;;  %s9665_s14 = smov (!%p240_p2), 18  }
   0xb   : > { %s9666_s15 = smov (!%p240_p2), 21   ;;  %s9667_s16 = smov (!%p240_p2), 24  }
   0xc   : > { %s9668_s17 = smov (!%p240_p2), 27   ;;  %s9669_s18 = smov (!%p240_p2), 30  }
   0xd   : > { %vm277_vm0 = vcmask 23552   ;;  %vm280_vm1 = vcmask 19456   ;;  %v9659_v1 = vmov 0.0   ;;  %s13330_s27 = smov (!%p9744_p3, %s9188_s27), 1  ;;  %vm628_vm2 = vcmask 48152   ;;  %s9670_s19 = smov 33  }
   0xe   : > { %278 = vst.msk [vmem:[#allocation2] sm:$0xff] %vm277_vm0, %v9659_v1  ;;  %279 = vst.msk [vmem:[#allocation2 + $0x8] sm:$0xff] %vm277_vm0, %v9659_v1  ;;  %s9400_s28 = sshll.u32 %s13330_s27, 8  ;;  %vm821_vm3 = vcmask 72752   ;;  %vm1014_vm4 = vcmask 97352   ;;  %vm1207_vm5 = vcmask 121952  }
   0xf   : > { %282 = vst.msk [vmem:[#allocation2 + $0x18] sm:$0xff] %vm277_vm0, %v9659_v1  ;;  %283 = vst.msk [vmem:[#allocation2 + $0x20] sm:$0xff] %vm277_vm0, %v9659_v1  ;;  %s9878_s8 = scalar_lea.vmem %s13320_s0, %s9400_s28  ;;  %vm1401_vm6 = vcmask 146552   ;;  %vm1594_vm7 = vcmask 171152   ;;  %vm1787_vm8 = vcmask 195752   ;;  %vm1980_vm9 = vcmask 220352  }
  0x10   : > { %285 = vst.msk [vmem:[#allocation2 + $0x30] sm:$0xff] %vm277_vm0, %v9659_v1  ;;  %286 = vst.msk [vmem:[#allocation2 + $0x38] sm:$0xff] %vm277_vm0, %v9659_v1  ;;  %v339_v2 = vld [vmem:[%s9878_s8] sm:$0xff]  ;;  %v340_v3 = vld [vmem:[%s9878_s8 + $0x8] sm:$0xff]  ;;  %vm2173_vm10 = vcmask 244952   ;;  %vm2366_vm11 = vcmask 269552  }
  0x11   : > { %288 = vst.msk [vmem:[#allocation2 + $0x48] sm:$0xff] %vm277_vm0, %v9659_v1  ;;  %289 = vst.msk [vmem:[#allocation2 + $0x50] sm:$0xff] %vm277_vm0, %v9659_v1  ;;  %v341_v4 = vld [vmem:[%s9878_s8 + $0x10] sm:$0xff]  ;;  %v342_v5 = vld [vmem:[%s9878_s8 + $0x18] sm:$0xff]  ;;  %s9671_s20 = smov 36   ;;  %vm2559_vm12 = vcmask 294152  }
  0x12   : > { %291 = vst.msk [vmem:[#allocation2 + $0x60] sm:$0xff] %vm277_vm0, %v9659_v1  ;;  %292 = vst.msk [vmem:[#allocation2 + $0x68] sm:$0xff] %vm277_vm0, %v9659_v1  ;;  %v343_v6 = vld [vmem:[%s9878_s8 + $0x20] sm:$0xff]  ;;  %v344_v7 = vld [vmem:[%s9878_s8 + $0x28] sm:$0xff]  ;;  %s9672_s21 = smov 39   ;;  %vm2752_vm13 = vcmask 318752  }
  0x13   : > { %294 = vst.msk [vmem:[#allocation2 + $0x78] sm:$0xff] %vm277_vm0, %v9659_v1  ;;  %295 = vst.msk [vmem:[#allocation2 + $0x80] sm:$0xff] %vm277_vm0, %v9659_v1  ;;  %v345_v12 = vld [vmem:[%s9878_s8 + $0x30] sm:$0xff]  ;;  %v346_v13 = vld [vmem:[%s9878_s8 + $0x38] sm:$0xff]  ;;  %s9673_s22 = smov 42   ;;  %vm2945_vm14 = vcmask 343352  }
  0x14   : > { %297 = vst.msk [vmem:[#allocation2 + $0x90] sm:$0xff] %vm277_vm0, %v9659_v1  ;;  %298 = vst.msk [vmem:[#allocation2 + $0x98] sm:$0xff] %vm277_vm0, %v9659_v1  ;;  %v347_v14 = vld [vmem:[%s9878_s8 + $0x40] sm:$0xff]  ;;  %v348_v15 = vld [vmem:[%s9878_s8 + $0x48] sm:$0xff]  ;;  %s9674_s23 = smov 45   ;;  %vm3138_vm15 = vcmask 367952  }
  0x15   : > { %300 = vst.msk [vmem:[#allocation2 + $0xa8] sm:$0xff] %vm277_vm0, %v9659_v1  ;;  %301 = vst.msk [vmem:[#allocation2 + $0xb0] sm:$0xff] %vm277_vm0, %v9659_v1  ;;  %v468_v8 = vld [vmem:[#allocation2 + $0x1] sm:$0xff]  ;;  %v349_v16 = vld [vmem:[%s9878_s8 + $0x50] sm:$0xff]  ;;  %s9675_s24 = smov 48   ;;  %s9676_s25 = smov 51  }
  0x16   : > { %303 = vst.msk [vmem:[#allocation2 + $0xc0] sm:$0xff] %vm277_vm0, %v9659_v1  ;;  %304 = vst.msk [vmem:[#allocation2 + $0xc8] sm:$0xff] %vm277_vm0, %v9659_v1  ;;  %v470_v9 = vld [vmem:[#allocation2 + $0x19] sm:$0xff]  ;;  %532 = vrot.lane.b32.xlu0 %v468_v8, %s9660_s9  ;;  %v352_v19 = vld [vmem:[%s9878_s8 + $0x68] sm:$0xff]  ;;  %s9677_s6 = smov 54   ;;  %s9678_s28 = smov 57  }
  0x17   : > { %306 = vst.msk [vmem:[#allocation2 + $0xd8] sm:$0xff] %vm277_vm0, %v9659_v1  ;;  %307 = vst.msk [vmem:[#allocation2 + $0xe0] sm:$0xff] %vm277_vm0, %v9659_v1  ;;  %536 = vrot.lane.b32.xlu1 %v470_v9, %s9660_s9  ;;  %v350_v17 = vld [vmem:[%s9878_s8 + $0x58] sm:$0xff]  ;;  %v351_v18 = vld [vmem:[%s9878_s8 + $0x60] sm:$0xff]  ;;  %s9679_s29 = smov 60  }
  0x18   : > { %309 = vst.msk [vmem:[#allocation2 + $0xf0] sm:$0xff] %vm277_vm0, %v9659_v1  ;;  %310 = vst.msk [vmem:[#allocation2 + $0xf8] sm:$0xff] %vm277_vm0, %v9659_v1  ;;  %v353_v20 = vld [vmem:[%s9878_s8 + $0x70] sm:$0xff]  ;;  %v354_v21 = vld [vmem:[%s9878_s8 + $0x78] sm:$0xff] }
  0x19   : > { %312 = vst.msk [vmem:[#allocation2 + $0x108] sm:$0xff] %vm277_vm0, %v9659_v1  ;;  %313 = vst.msk [vmem:[#allocation2 + $0x110] sm:$0xff] %vm277_vm0, %v9659_v1  ;;  %v355_v22 = vld [vmem:[%s9878_s8 + $0x80] sm:$0xff]  ;;  %v356_v23 = vld [vmem:[%s9878_s8 + $0x88] sm:$0xff] }
  0x1a   : > { %315 = vst.msk [vmem:[#allocation2 + $0x120] sm:$0xff] %vm277_vm0, %v9659_v1  ;;  %316 = vst.msk [vmem:[#allocation2 + $0x128] sm:$0xff] %vm277_vm0, %v9659_v1  ;;  %v357_v24 = vld [vmem:[%s9878_s8 + $0x90] sm:$0xff]  ;;  %v358_v27 = vld [vmem:[%s9878_s8 + $0x98] sm:$0xff] }
  0x1b   : > { %318 = vst.msk [vmem:[#allocation2 + $0x138] sm:$0xff] %vm277_vm0, %v9659_v1  ;;  %319 = vst.msk [vmem:[#allocation2 + $0x140] sm:$0xff] %vm277_vm0, %v9659_v1  ;;  %v359_v28 = vld [vmem:[%s9878_s8 + $0xa0] sm:$0xff]  ;;  %v360_v29 = vld [vmem:[%s9878_s8 + $0xa8] sm:$0xff] }
  0x1c   : > { %321 = vst.msk [vmem:[#allocation2 + $0x150] sm:$0xff] %vm277_vm0, %v9659_v1  ;;  %322 = vst.msk [vmem:[#allocation2 + $0x158] sm:$0xff] %vm277_vm0, %v9659_v1  ;;  %v361_v30 = vld [vmem:[%s9878_s8 + $0xb0] sm:$0xff]  ;;  %v362_v35 = vld [vmem:[%s9878_s8 + $0xb8] sm:$0xff] }
  0x1d   : > { %324 = vst.msk [vmem:[#allocation2 + $0x168] sm:$0xff] %vm277_vm0, %v9659_v1  ;;  %325 = vst.msk [vmem:[#allocation2 + $0x170] sm:$0xff] %vm277_vm0, %v9659_v1  ;;  %v363_v36 = vld [vmem:[%s9878_s8 + $0xc0] sm:$0xff]  ;;  %v364_v37 = vld [vmem:[%s9878_s8 + $0xc8] sm:$0xff] }
  0x1e   : > { %327 = vst.msk [vmem:[#allocation2 + $0x180] sm:$0xff] %vm277_vm0, %v9659_v1  ;;  %328 = vst.msk [vmem:[#allocation2 + $0x188] sm:$0xff] %vm277_vm0, %v9659_v1  ;;  %v365_v38 = vld [vmem:[%s9878_s8 + $0xd0] sm:$0xff]  ;;  %v366_v39 = vld [vmem:[%s9878_s8 + $0xd8] sm:$0xff] }
  0x1f   : > { %330 = vst.msk [vmem:[#allocation2 + $0x198] sm:$0xff] %vm277_vm0, %v9659_v1  ;;  %331 = vst.msk [vmem:[#allocation2 + $0x1a0] sm:$0xff] %vm277_vm0, %v9659_v1  ;;  %v404_v46 = vld [vmem:[#allocation2] sm:$0xff]  ;;  %v9951_v47 = vld [vmem:[#allocation2 + $0x18] sm:$0xff] }
  0x20   : > { %333 = vst.msk [vmem:[#allocation2 + $0x1b0] sm:$0xff] %vm277_vm0, %v9659_v1  ;;  %334 = vst.msk [vmem:[#allocation2 + $0x1b8] sm:$0xff] %vm277_vm0, %v9659_v1  ;;  %v405_v48 = vld [vmem:[#allocation2 + $0x8] sm:$0xff]  ;;  %v9955_v49 = vld [vmem:[#allocation2 + $0x20] sm:$0xff] }
  0x21   : > { %336 = vst.msk [vmem:[#allocation2 + $0x1c8] sm:$0xff] %vm277_vm0, %v9659_v1  ;;  %337 = vst.msk [vmem:[#allocation2 + $0x1d0] sm:$0xff] %vm277_vm0, %v9659_v1 }
  0x22   : > { %281 = vst.msk [vmem:[#allocation2 + $0x10] sm:$0xf] %vm280_vm1, %v9659_v1  ;;  %284 = vst.msk [vmem:[#allocation2 + $0x28] sm:$0xf] %vm280_vm1, %v9659_v1 }
  0x23   : > { %287 = vst.msk [vmem:[#allocation2 + $0x40] sm:$0xf] %vm280_vm1, %v9659_v1  ;;  %290 = vst.msk [vmem:[#allocation2 + $0x58] sm:$0xf] %vm280_vm1, %v9659_v1 }
  0x24   : > { %293 = vst.msk [vmem:[#allocation2 + $0x70] sm:$0xf] %vm280_vm1, %v9659_v1  ;;  %296 = vst.msk [vmem:[#allocation2 + $0x88] sm:$0xf] %vm280_vm1, %v9659_v1 }
  0x25   : > { %299 = vst.msk [vmem:[#allocation2 + $0xa0] sm:$0xf] %vm280_vm1, %v9659_v1  ;;  %302 = vst.msk [vmem:[#allocation2 + $0xb8] sm:$0xf] %vm280_vm1, %v9659_v1 }
  0x26   : > { %305 = vst.msk [vmem:[#allocation2 + $0xd0] sm:$0xf] %vm280_vm1, %v9659_v1  ;;  %308 = vst.msk [vmem:[#allocation2 + $0xe8] sm:$0xf] %vm280_vm1, %v9659_v1 }
  0x27   : > { %311 = vst.msk [vmem:[#allocation2 + $0x100] sm:$0xf] %vm280_vm1, %v9659_v1  ;;  %314 = vst.msk [vmem:[#allocation2 + $0x118] sm:$0xf] %vm280_vm1, %v9659_v1 }
  0x28   : > { %317 = vst.msk [vmem:[#allocation2 + $0x130] sm:$0xf] %vm280_vm1, %v9659_v1  ;;  %320 = vst.msk [vmem:[#allocation2 + $0x148] sm:$0xf] %vm280_vm1, %v9659_v1 }
  0x29   : > { %323 = vst.msk [vmem:[#allocation2 + $0x160] sm:$0xf] %vm280_vm1, %v9659_v1  ;;  %326 = vst.msk [vmem:[#allocation2 + $0x178] sm:$0xf] %vm280_vm1, %v9659_v1  ;;  %v469_v10 = vld [vmem:[#allocation2 + $0x9] sm:$0xff]  ;;  %v471_v11 = vld [vmem:[#allocation2 + $0x21] sm:$0xff] }
  0x2a   : > { %329 = vst.msk [vmem:[#allocation2 + $0x190] sm:$0xf] %vm280_vm1, %v9659_v1  ;;  %332 = vst.msk [vmem:[#allocation2 + $0x1a8] sm:$0xf] %vm280_vm1, %v9659_v1  ;;  %534 = vrot.lane.b32.xlu0 %v469_v10, %s9660_s9  ;;  %538 = vrot.lane.b32.xlu1 %v471_v11, %s9660_s9 }
  0x2b   : > { %335 = vst.msk [vmem:[#allocation2 + $0x1c0] sm:$0xf] %vm280_vm1, %v9659_v1  ;;  %338 = vst.msk [vmem:[#allocation2 + $0x1d8] sm:$0xf] %vm280_vm1, %v9659_v1  ;;  %vm3525_vm1 = vcmask 417152  }
  0x2c   : > { %372 = vst.msk [vmem:[#allocation2 + $0x32] sm:$0xff] %vm277_vm0, %v339_v2  ;;  %373 = vst.msk [vmem:[#allocation2 + $0x3a] sm:$0xff] %vm277_vm0, %v340_v3 }
  0x2d   : > { %374 = vst.msk [vmem:[#allocation2 + $0x4a] sm:$0xff] %vm277_vm0, %v341_v4  ;;  %375 = vst.msk [vmem:[#allocation2 + $0x52] sm:$0xff] %vm277_vm0, %v342_v5 }
  0x2e   : > { %376 = vst.msk [vmem:[#allocation2 + $0x62] sm:$0xff] %vm277_vm0, %v343_v6  ;;  %377 = vst.msk [vmem:[#allocation2 + $0x6a] sm:$0xff] %vm277_vm0, %v344_v7 }
  0x2f   : > { %378 = vst.msk [vmem:[#allocation2 + $0x7a] sm:$0xff] %vm277_vm0, %v345_v12  ;;  %379 = vst.msk [vmem:[#allocation2 + $0x82] sm:$0xff] %vm277_vm0, %v346_v13 }
  0x30   : > { %380 = vst.msk [vmem:[#allocation2 + $0x92] sm:$0xff] %vm277_vm0, %v347_v14  ;;  %381 = vst.msk [vmem:[#allocation2 + $0x9a] sm:$0xff] %vm277_vm0, %v348_v15 }
  0x31   : > { %382 = vst.msk [vmem:[#allocation2 + $0xaa] sm:$0xff] %vm277_vm0, %v349_v16  ;;  %383 = vst.msk [vmem:[#allocation2 + $0xb2] sm:$0xff] %vm277_vm0, %v350_v17 }
  0x32   : > { %384 = vst.msk [vmem:[#allocation2 + $0xc2] sm:$0xff] %vm277_vm0, %v351_v18  ;;  %385 = vst.msk [vmem:[#allocation2 + $0xca] sm:$0xff] %vm277_vm0, %v352_v19 }
  0x33   : > { %386 = vst.msk [vmem:[#allocation2 + $0xda] sm:$0xff] %vm277_vm0, %v353_v20  ;;  %387 = vst.msk [vmem:[#allocation2 + $0xe2] sm:$0xff] %vm277_vm0, %v354_v21  ;;  %v472_v25 = vld [vmem:[#allocation2 + $0x31] sm:$0xff]  ;;  %v473_v26 = vld [vmem:[#allocation2 + $0x39] sm:$0xff] }
  0x34   : > { %388 = vst.msk [vmem:[#allocation2 + $0xf2] sm:$0xff] %vm277_vm0, %v355_v22  ;;  %389 = vst.msk [vmem:[#allocation2 + $0xfa] sm:$0xff] %vm277_vm0, %v356_v23  ;;  %540 = vrot.lane.b32.xlu0 %v472_v25, %s9660_s9  ;;  %542 = vrot.lane.b32.xlu1 %v473_v26, %s9660_s9  ;;  %v474_v31 = vld [vmem:[#allocation2 + $0x49] sm:$0xff]  ;;  %v475_v32 = vld [vmem:[#allocation2 + $0x51] sm:$0xff] }
  0x35   : > { %390 = vst.msk [vmem:[#allocation2 + $0x10a] sm:$0xff] %vm277_vm0, %v357_v24  ;;  %391 = vst.msk [vmem:[#allocation2 + $0x112] sm:$0xff] %vm277_vm0, %v358_v27  ;;  %v476_v33 = vld [vmem:[#allocation2 + $0x61] sm:$0xff]  ;;  %v477_v34 = vld [vmem:[#allocation2 + $0x69] sm:$0xff] }
  0x36   : > { %392 = vst.msk [vmem:[#allocation2 + $0x122] sm:$0xff] %vm277_vm0, %v359_v28  ;;  %393 = vst.msk [vmem:[#allocation2 + $0x12a] sm:$0xff] %vm277_vm0, %v360_v29  ;;  %v478_v40 = vld [vmem:[#allocation2 + $0x79] sm:$0xff]  ;;  %v479_v41 = vld [vmem:[#allocation2 + $0x81] sm:$0xff] }
  0x37   : > { %394 = vst.msk [vmem:[#allocation2 + $0x13a] sm:$0xff] %vm277_vm0, %v361_v30  ;;  %395 = vst.msk [vmem:[#allocation2 + $0x142] sm:$0xff] %vm277_vm0, %v362_v35  ;;  %v480_v42 = vld [vmem:[#allocation2 + $0x91] sm:$0xff]  ;;  %v481_v43 = vld [vmem:[#allocation2 + $0x99] sm:$0xff] }
  0x38   : > { %544 = vrot.lane.b32.xlu0 %v474_v31, %s9660_s9  ;;  %546 = vrot.lane.b32.xlu1 %v475_v32, %s9660_s9  ;;  %396 = vst.msk [vmem:[#allocation2 + $0x152] sm:$0xff] %vm277_vm0, %v363_v36  ;;  %397 = vst.msk [vmem:[#allocation2 + $0x15a] sm:$0xff] %vm277_vm0, %v364_v37  ;;  %v482_v44 = vld [vmem:[#allocation2 + $0xa9] sm:$0xff]  ;;  %v483_v45 = vld [vmem:[#allocation2 + $0xb1] sm:$0xff] }
  0x39   : > { %398 = vst.msk [vmem:[#allocation2 + $0x16a] sm:$0xff] %vm277_vm0, %v365_v38  ;;  %399 = vst.msk [vmem:[#allocation2 + $0x172] sm:$0xff] %vm277_vm0, %v366_v39  ;;  %v9962_v50 = vld [vmem:[#allocation2 + $0x30] sm:$0xff]  ;;  %v9964_v51 = vld [vmem:[#allocation2 + $0x38] sm:$0xff] }
  0x3a   : > { %436 = vst.msk [vmem:[#allocation3] sm:$0xff] %vm277_vm0, %v404_v46  ;;  %438 = vst.msk [vmem:[#allocation3 + $0x10] sm:$0xff] %vm277_vm0, %v9951_v47  ;;  %v484_v52 = vld [vmem:[#allocation2 + $0xc1] sm:$0xff]  ;;  %v485_v53 = vld [vmem:[#allocation2 + $0xc9] sm:$0xff] }
  0x3b   : > { %437 = vst.msk [vmem:[#allocation3 + $0x8] sm:$0xff] %vm277_vm0, %v405_v48  ;;  %439 = vst.msk [vmem:[#allocation3 + $0x18] sm:$0xff] %vm277_vm0, %v9955_v49  ;;  %v9970_v54 = vld [vmem:[#allocation2 + $0x48] sm:$0xff]  ;;  %v9974_v55 = vld [vmem:[#allocation2 + $0x50] sm:$0xff] }
  0x3c   : > { %548 = vrot.lane.b32.xlu0 %v476_v33, %s9660_s9  ;;  %550 = vrot.lane.b32.xlu1 %v477_v34, %s9660_s9  ;;  %440 = vst.msk [vmem:[#allocation3 + $0x20] sm:$0xff] %vm277_vm0, %v9962_v50  ;;  %441 = vst.msk [vmem:[#allocation3 + $0x28] sm:$0xff] %vm277_vm0, %v9964_v51  ;;  %v9978_v56 = vld [vmem:[#allocation2 + $0x60] sm:$0xff]  ;;  %v9980_v57 = vld [vmem:[#allocation2 + $0x68] sm:$0xff] }
  0x3d   : > { %442 = vst.msk [vmem:[#allocation3 + $0x30] sm:$0xff] %vm277_vm0, %v9970_v54  ;;  %443 = vst.msk [vmem:[#allocation3 + $0x38] sm:$0xff] %vm277_vm0, %v9974_v55  ;;  %v9988_v58 = vld [vmem:[#allocation2 + $0x78] sm:$0xff]  ;;  %v9990_v59 = vld [vmem:[#allocation2 + $0x80] sm:$0xff] }
  0x3e   : > { %444 = vst.msk [vmem:[#allocation3 + $0x40] sm:$0xff] %vm277_vm0, %v9978_v56  ;;  %445 = vst.msk [vmem:[#allocation3 + $0x48] sm:$0xff] %vm277_vm0, %v9980_v57  ;;  %v486_v60 = vld [vmem:[#allocation2 + $0xd9] sm:$0xff]  ;;  %v487_v61 = vld [vmem:[#allocation2 + $0xe1] sm:$0xff] }
  0x3f   : > { %446 = vst.msk [vmem:[#allocation3 + $0x50] sm:$0xff] %vm277_vm0, %v9988_v58  ;;  %447 = vst.msk [vmem:[#allocation3 + $0x58] sm:$0xff] %vm277_vm0, %v9990_v59  ;;  %v9996_v62 = vld [vmem:[#allocation2 + $0x90] sm:$0xff]  ;;  %v10000_v63 = vld [vmem:[#allocation2 + $0x98] sm:$0xff] }
  0x40   : > { %552 = vrot.lane.b32.xlu0 %v478_v40, %s9660_s9  ;;  %554 = vrot.lane.b32.xlu1 %v479_v41, %s9660_s9  ;;  %448 = vst.msk [vmem:[#allocation3 + $0x60] sm:$0xff] %vm277_vm0, %v9996_v62  ;;  %449 = vst.msk [vmem:[#allocation3 + $0x68] sm:$0xff] %vm277_vm0, %v10000_v63  ;;  %v10004_v0 = vld [vmem:[#allocation2 + $0xa8] sm:$0xff]  ;;  %v10006_v2 = vld [vmem:[#allocation2 + $0xb0] sm:$0xff] }
  0x41   : > { %450 = vst.msk [vmem:[#allocation3 + $0x70] sm:$0xff] %vm277_vm0, %v10004_v0  ;;  %451 = vst.msk [vmem:[#allocation3 + $0x78] sm:$0xff] %vm277_vm0, %v10006_v2  ;;  %v10014_v3 = vld [vmem:[#allocation2 + $0xc0] sm:$0xff]  ;;  %v10016_v4 = vld [vmem:[#allocation2 + $0xc8] sm:$0xff] }
  0x42   : > { %v488_v5 = vld [vmem:[#allocation2 + $0xf1] sm:$0xff]  ;;  %v489_v6 = vld [vmem:[#allocation2 + $0xf9] sm:$0xff]  ;;  %452 = vst.msk [vmem:[#allocation3 + $0x80] sm:$0xff] %vm277_vm0, %v10014_v3  ;;  %453 = vst.msk [vmem:[#allocation3 + $0x88] sm:$0xff] %vm277_vm0, %v10016_v4 }
  0x43   : > { %v10022_v7 = vld [vmem:[#allocation2 + $0xd8] sm:$0xff]  ;;  %v10026_v8 = vld [vmem:[#allocation2 + $0xe0] sm:$0xff]  ;;  %v10030_v9 = vld [vmem:[#allocation2 + $0xf0] sm:$0xff] }
  0x44   : > { %556 = vrot.lane.b32.xlu0 %v480_v42, %s9660_s9  ;;  %558 = vrot.lane.b32.xlu1 %v481_v43, %s9660_s9  ;;  %454 = vst.msk [vmem:[#allocation3 + $0x90] sm:$0xff] %vm277_vm0, %v10022_v7  ;;  %455 = vst.msk [vmem:[#allocation3 + $0x98] sm:$0xff] %vm277_vm0, %v10026_v8  ;;  %v10032_v10 = vld [vmem:[#allocation2 + $0xf8] sm:$0xff]  ;;  %v10040_v11 = vld [vmem:[#allocation2 + $0x108] sm:$0xff] }
  0x45   : > { %456 = vst.msk [vmem:[#allocation3 + $0xa0] sm:$0xff] %vm277_vm0, %v10030_v9  ;;  %457 = vst.msk [vmem:[#allocation3 + $0xa8] sm:$0xff] %vm277_vm0, %v10032_v10  ;;  %v10042_v12 = vld [vmem:[#allocation2 + $0x110] sm:$0xff]  ;;  %v10048_v15 = vld [vmem:[#allocation2 + $0x120] sm:$0xff] }
  0x46   : > { %v490_v13 = vld [vmem:[#allocation2 + $0x109] sm:$0xff]  ;;  %v491_v14 = vld [vmem:[#allocation2 + $0x111] sm:$0xff]  ;;  %458 = vst.msk [vmem:[#allocation3 + $0xb0] sm:$0xff] %vm277_vm0, %v10040_v11  ;;  %459 = vst.msk [vmem:[#allocation3 + $0xb8] sm:$0xff] %vm277_vm0, %v10042_v12 }
  0x47   : > { %460 = vst.msk [vmem:[#allocation3 + $0xc0] sm:$0xff] %vm277_vm0, %v10048_v15  ;;  %v10052_v16 = vld [vmem:[#allocation2 + $0x128] sm:$0xff]  ;;  %v10056_v17 = vld [vmem:[#allocation2 + $0x138] sm:$0xff]  ;;  %v10058_v18 = vld [vmem:[#allocation2 + $0x140] sm:$0xff] }
  0x48   : > { %560 = vrot.lane.b32.xlu0 %v482_v44, %s9660_s9  ;;  %562 = vrot.lane.b32.xlu1 %v483_v45, %s9660_s9  ;;  %461 = vst.msk [vmem:[#allocation3 + $0xc8] sm:$0xff] %vm277_vm0, %v10052_v16  ;;  %462 = vst.msk [vmem:[#allocation3 + $0xd0] sm:$0xff] %vm277_vm0, %v10056_v17  ;;  %v10066_v19 = vld [vmem:[#allocation2 + $0x150] sm:$0xff]  ;;  %v10068_v20 = vld [vmem:[#allocation2 + $0x158] sm:$0xff] }
  0x49   : > { %463 = vst.msk [vmem:[#allocation3 + $0xd8] sm:$0xff] %vm277_vm0, %v10058_v18  ;;  %v492_v21 = vld [vmem:[#allocation2 + $0x121] sm:$0xff]  ;;  %v493_v22 = vld [vmem:[#allocation2 + $0x129] sm:$0xff]  ;;  %464 = vst.msk [vmem:[#allocation3 + $0xe0] sm:$0xff] %vm277_vm0, %v10066_v19 }
  0x4a   : > { %465 = vst.msk [vmem:[#allocation3 + $0xe8] sm:$0xff] %vm277_vm0, %v10068_v20  ;;  %v10074_v23 = vld [vmem:[#allocation2 + $0x168] sm:$0xff]  ;;  %v10078_v24 = vld [vmem:[#allocation2 + $0x170] sm:$0xff]  ;;  %v494_v25 = vld [vmem:[#allocation2 + $0x139] sm:$0xff] }
  0x4b   : > { %466 = vst.msk [vmem:[#allocation3 + $0xf0] sm:$0xff] %vm277_vm0, %v10074_v23  ;;  %467 = vst.msk [vmem:[#allocation3 + $0xf8] sm:$0xff] %vm277_vm0, %v10078_v24  ;;  %v495_v26 = vld [vmem:[#allocation2 + $0x141] sm:$0xff]  ;;  %v496_v27 = vld [vmem:[#allocation2 + $0x151] sm:$0xff] }
  0x4c   : > { %564 = vrot.lane.b32.xlu0 %v484_v52, %s9660_s9  ;;  %566 = vrot.lane.b32.xlu1 %v485_v53, %s9660_s9  ;;  %v497_v28 = vld [vmem:[#allocation2 + $0x159] sm:$0xff]  ;;  %v498_v29 = vld [vmem:[#allocation2 + $0x169] sm:$0xff]  ;;  %v499_v30 = vld [vmem:[#allocation2 + $0x171] sm:$0xff] }
  0x4d   : > { %v661_v31 = vld [vmem:[#allocation2 + $0x2] sm:$0xff]  ;;  %v662_v32 = vld [vmem:[#allocation2 + $0xa] sm:$0xff]  ;;  %v663_v33 = vld [vmem:[#allocation2 + $0x1a] sm:$0xff] }
  0x4e   : > { %v664_v34 = vld [vmem:[#allocation2 + $0x22] sm:$0xff]  ;;  %v665_v35 = vld [vmem:[#allocation2 + $0x32] sm:$0xff]  ;;  %v666_v36 = vld [vmem:[#allocation2 + $0x3a] sm:$0xff] }
  0x4f   : > { %v667_v37 = vld [vmem:[#allocation2 + $0x4a] sm:$0xff]  ;;  %v668_v38 = vld [vmem:[#allocation2 + $0x52] sm:$0xff]  ;;  %v669_v39 = vld [vmem:[#allocation2 + $0x62] sm:$0xff] }
  0x50   : > { %568 = vrot.lane.b32.xlu0 %v486_v60, %s9660_s9  ;;  %570 = vrot.lane.b32.xlu1 %v487_v61, %s9660_s9  ;;  %v670_v40 = vld [vmem:[#allocation2 + $0x6a] sm:$0xff]  ;;  %v671_v41 = vld [vmem:[#allocation2 + $0x7a] sm:$0xff]  ;;  %v672_v42 = vld [vmem:[#allocation2 + $0x82] sm:$0xff] }
  0x51   : > { %v673_v43 = vld [vmem:[#allocation2 + $0x92] sm:$0xff]  ;;  %v674_v44 = vld [vmem:[#allocation2 + $0x9a] sm:$0xff]  ;;  %v675_v45 = vld [vmem:[#allocation2 + $0xaa] sm:$0xff] }
  0x52   : > { %v676_v46 = vld [vmem:[#allocation2 + $0xb2] sm:$0xff]  ;;  %v677_v48 = vld [vmem:[#allocation2 + $0xc2] sm:$0xff]  ;;  %v678_v52 = vld [vmem:[#allocation2 + $0xca] sm:$0xff] }
  0x53   : > { %v679_v53 = vld [vmem:[#allocation2 + $0xda] sm:$0xff]  ;;  %v680_v60 = vld [vmem:[#allocation2 + $0xe2] sm:$0xff]  ;;  %v681_v61 = vld [vmem:[#allocation2 + $0xf2] sm:$0xff] }
  0x54   : > { %572 = vrot.lane.b32.xlu0 %v488_v5, %s9660_s9  ;;  %574 = vrot.lane.b32.xlu1 %v489_v6, %s9660_s9  ;;  %v682_v5 = vld [vmem:[#allocation2 + $0xfa] sm:$0xff]  ;;  %v683_v6 = vld [vmem:[#allocation2 + $0x10a] sm:$0xff] }
  0x58   : > { %576 = vrot.lane.b32.xlu0 %v490_v13, %s9660_s9  ;;  %578 = vrot.lane.b32.xlu1 %v491_v14, %s9660_s9  ;;  %v684_v13 = vld [vmem:[#allocation2 + $0x112] sm:$0xff]  ;;  %v685_v14 = vld [vmem:[#allocation2 + $0x122] sm:$0xff] }
  0x5c   : > { %580 = vrot.lane.b32.xlu0 %v492_v21, %s9660_s9  ;;  %582 = vrot.lane.b32.xlu1 %v493_v22, %s9660_s9  ;;  %v686_v21 = vld [vmem:[#allocation2 + $0x12a] sm:$0xff]  ;;  %v687_v22 = vld [vmem:[#allocation2 + $0x13a] sm:$0xff] }
  0x60   : > { %584 = vrot.lane.b32.xlu0 %v494_v25, %s9660_s9  ;;  %586 = vrot.lane.b32.xlu1 %v495_v26, %s9660_s9  ;;  %v688_v25 = vld [vmem:[#allocation2 + $0x142] sm:$0xff] }
  0x64   : > { %588 = vrot.lane.b32.xlu0 %v496_v27, %s9660_s9  ;;  %590 = vrot.lane.b32.xlu1 %v497_v28, %s9660_s9  ;;  %v689_v28 = vld [vmem:[#allocation2 + $0x152] sm:$0xff] }
  0x68   : > { %592 = vrot.lane.b32.xlu0 %v498_v29, %s9660_s9  ;;  %594 = vrot.lane.b32.xlu1 %v499_v30, %s9660_s9  ;;  %v690_v29 = vld [vmem:[#allocation2 + $0x15a] sm:$0xff]  ;;  %s9680_s9 = smov 63  }
  0x6c   : > { %725 = vrot.lane.b32.xlu0 %v661_v31, %s9661_s10  ;;  %727 = vrot.lane.b32.xlu1 %v662_v32, %s9661_s10  ;;  %v691_v32 = vld [vmem:[#allocation2 + $0x16a] sm:$0xff] }
  0x70   : > { %729 = vrot.lane.b32.xlu0 %v663_v33, %s9661_s10  ;;  %731 = vrot.lane.b32.xlu1 %v664_v34, %s9661_s10  ;;  %v692_v33 = vld [vmem:[#allocation2 + $0x172] sm:$0xff] }
  0x74   : > { %733 = vrot.lane.b32.xlu0 %v665_v35, %s9661_s10  ;;  %735 = vrot.lane.b32.xlu1 %v666_v36, %s9661_s10  ;;  %v854_v36 = vld [vmem:[#allocation2 + $0x3] sm:$0xff] }
  0x78   : > { %737 = vrot.lane.b32.xlu0 %v667_v37, %s9661_s10  ;;  %739 = vrot.lane.b32.xlu1 %v668_v38, %s9661_s10  ;;  %v855_v37 = vld [vmem:[#allocation2 + $0xb] sm:$0xff] }
  0x7c   : > { %741 = vrot.lane.b32.xlu0 %v669_v39, %s9661_s10  ;;  %743 = vrot.lane.b32.xlu1 %v670_v40, %s9661_s10  ;;  %v856_v40 = vld [vmem:[#allocation2 + $0x1b] sm:$0xff] }
  0x80   : > { %745 = vrot.lane.b32.xlu0 %v671_v41, %s9661_s10  ;;  %747 = vrot.lane.b32.xlu1 %v672_v42, %s9661_s10  ;;  %v857_v41 = vld [vmem:[#allocation2 + $0x23] sm:$0xff] }
  0x84   : > { %749 = vrot.lane.b32.xlu0 %v673_v43, %s9661_s10  ;;  %751 = vrot.lane.b32.xlu1 %v674_v44, %s9661_s10  ;;  %v858_v44 = vld [vmem:[#allocation2 + $0x33] sm:$0xff] }
  0x88   : > { %753 = vrot.lane.b32.xlu0 %v675_v45, %s9661_s10  ;;  %755 = vrot.lane.b32.xlu1 %v676_v46, %s9661_s10  ;;  %v533_v26 = vpop.permute.xlu0 %532  ;;  %v859_v45 = vld [vmem:[#allocation2 + $0x3b] sm:$0xff] }
  0x89   : > { %v537_v27 = vpop.permute.xlu1 %536  ;;  %629 = vst.msk [vmem:[#allocation3] sm:$0xff] %vm628_vm2, %v533_v26 }
  0x8a   : > { %631 = vst.msk [vmem:[#allocation3 + $0x10] sm:$0xff] %vm628_vm2, %v537_v27  ;;  %v866_v27 = vld [vmem:[#allocation2 + $0x93] sm:$0xff] }
  0x8c   : > { %757 = vrot.lane.b32.xlu0 %v677_v48, %s9661_s10  ;;  %759 = vrot.lane.b32.xlu1 %v678_v52, %s9661_s10  ;;  %v860_v52 = vld [vmem:[#allocation2 + $0x4b] sm:$0xff] }
  0x90   : > { %761 = vrot.lane.b32.xlu0 %v679_v53, %s9661_s10  ;;  %763 = vrot.lane.b32.xlu1 %v680_v60, %s9661_s10  ;;  %v861_v53 = vld [vmem:[#allocation2 + $0x53] sm:$0xff] }
  0x94   : > { %765 = vrot.lane.b32.xlu0 %v681_v61, %s9661_s10  ;;  %767 = vrot.lane.b32.xlu1 %v682_v5, %s9661_s10  ;;  %v862_v5 = vld [vmem:[#allocation2 + $0x63] sm:$0xff] }
  0x98   : > { %769 = vrot.lane.b32.xlu0 %v683_v6, %s9661_s10  ;;  %771 = vrot.lane.b32.xlu1 %v684_v13, %s9661_s10  ;;  %v863_v6 = vld [vmem:[#allocation2 + $0x6b] sm:$0xff] }
  0x9c   : > { %773 = vrot.lane.b32.xlu0 %v685_v14, %s9661_s10  ;;  %775 = vrot.lane.b32.xlu1 %v686_v21, %s9661_s10  ;;  %v535_v30 = vpop.permute.xlu0 %534  ;;  %v539_v31 = vpop.permute.xlu1 %538  ;;  %v864_v21 = vld [vmem:[#allocation2 + $0x7b] sm:$0xff] }
  0x9d   : > { %630 = vst.msk [vmem:[#allocation3 + $0x8] sm:$0xff] %vm628_vm2, %v535_v30  ;;  %632 = vst.msk [vmem:[#allocation3 + $0x18] sm:$0xff] %vm628_vm2, %v539_v31  ;;  %v868_v31 = vld [vmem:[#allocation2 + $0xab] sm:$0xff] }
  0xa0   : > { %777 = vrot.lane.b32.xlu0 %v687_v22, %s9661_s10  ;;  %779 = vrot.lane.b32.xlu1 %v688_v25, %s9661_s10  ;;  %v865_v22 = vld [vmem:[#allocation2 + $0x83] sm:$0xff] }
  0xa4   : > { %781 = vrot.lane.b32.xlu0 %v689_v28, %s9661_s10  ;;  %783 = vrot.lane.b32.xlu1 %v690_v29, %s9661_s10  ;;  %v867_v28 = vld [vmem:[#allocation2 + $0x9b] sm:$0xff] }
  0xa6   : > { %v541_v34 = vpop.permute.xlu0 %540  ;;  %v543_v35 = vpop.permute.xlu1 %542 }
  0xa7   : > { %633 = vst.msk [vmem:[#allocation3 + $0x20] sm:$0xff] %vm628_vm2, %v541_v34  ;;  %634 = vst.msk [vmem:[#allocation3 + $0x28] sm:$0xff] %vm628_vm2, %v543_v35  ;;  %v870_v35 = vld [vmem:[#allocation2 + $0xc3] sm:$0xff] }
  0xa8   : > { %785 = vrot.lane.b32.xlu0 %v691_v32, %s9661_s10  ;;  %787 = vrot.lane.b32.xlu1 %v692_v33, %s9661_s10  ;;  %v869_v32 = vld [vmem:[#allocation2 + $0xb3] sm:$0xff] }
  0xaa   : > { %v545_v38 = vpop.permute.xlu0 %544  ;;  %v547_v39 = vpop.permute.xlu1 %546 }
  0xab   : > { %635 = vst.msk [vmem:[#allocation3 + $0x30] sm:$0xff] %vm628_vm2, %v545_v38  ;;  %636 = vst.msk [vmem:[#allocation3 + $0x38] sm:$0xff] %vm628_vm2, %v547_v39  ;;  %v872_v39 = vld [vmem:[#allocation2 + $0xdb] sm:$0xff] }
  0xac   : > { %918 = vrot.lane.b32.xlu0 %v854_v36, %s9662_s11  ;;  %920 = vrot.lane.b32.xlu1 %v855_v37, %s9662_s11  ;;  %v871_v36 = vld [vmem:[#allocation2 + $0xcb] sm:$0xff] }
  0xae   : > { %v549_v42 = vpop.permute.xlu0 %548  ;;  %v551_v43 = vpop.permute.xlu1 %550 }
  0xaf   : > { %637 = vst.msk [vmem:[#allocation3 + $0x40] sm:$0xff] %vm628_vm2, %v549_v42  ;;  %638 = vst.msk [vmem:[#allocation3 + $0x48] sm:$0xff] %vm628_vm2, %v551_v43  ;;  %v874_v43 = vld [vmem:[#allocation2 + $0xf3] sm:$0xff] }
  0xb0   : > { %922 = vrot.lane.b32.xlu0 %v856_v40, %s9662_s11  ;;  %924 = vrot.lane.b32.xlu1 %v857_v41, %s9662_s11  ;;  %v873_v40 = vld [vmem:[#allocation2 + $0xe3] sm:$0xff] }
  0xb2   : > { %v553_v46 = vpop.permute.xlu0 %552  ;;  %v555_v48 = vpop.permute.xlu1 %554 }
  0xb3   : > { %639 = vst.msk [vmem:[#allocation3 + $0x50] sm:$0xff] %vm628_vm2, %v553_v46  ;;  %640 = vst.msk [vmem:[#allocation3 + $0x58] sm:$0xff] %vm628_vm2, %v555_v48  ;;  %v876_v48 = vld [vmem:[#allocation2 + $0x10b] sm:$0xff] }
  0xb4   : > { %926 = vrot.lane.b32.xlu0 %v858_v44, %s9662_s11  ;;  %928 = vrot.lane.b32.xlu1 %v859_v45, %s9662_s11  ;;  %v875_v44 = vld [vmem:[#allocation2 + $0xfb] sm:$0xff] }
  0xb6   : > { %v557_v60 = vpop.permute.xlu0 %556  ;;  %v559_v61 = vpop.permute.xlu1 %558 }
  0xb7   : > { %641 = vst.msk [vmem:[#allocation3 + $0x60] sm:$0xff] %vm628_vm2, %v557_v60  ;;  %642 = vst.msk [vmem:[#allocation3 + $0x68] sm:$0xff] %vm628_vm2, %v559_v61  ;;  %v878_v61 = vld [vmem:[#allocation2 + $0x123] sm:$0xff] }
  0xb8   : > { %930 = vrot.lane.b32.xlu0 %v860_v52, %s9662_s11  ;;  %932 = vrot.lane.b32.xlu1 %v861_v53, %s9662_s11  ;;  %v877_v52 = vld [vmem:[#allocation2 + $0x113] sm:$0xff] }
  0xba   : > { %v561_v13 = vpop.permute.xlu0 %560  ;;  %v563_v14 = vpop.permute.xlu1 %562 }
  0xbb   : > { %643 = vst.msk [vmem:[#allocation3 + $0x70] sm:$0xff] %vm628_vm2, %v561_v13  ;;  %644 = vst.msk [vmem:[#allocation3 + $0x78] sm:$0xff] %vm628_vm2, %v563_v14  ;;  %v880_v14 = vld [vmem:[#allocation2 + $0x13b] sm:$0xff] }
  0xbc   : > { %934 = vrot.lane.b32.xlu0 %v862_v5, %s9662_s11  ;;  %936 = vrot.lane.b32.xlu1 %v863_v6, %s9662_s11  ;;  %v879_v5 = vld [vmem:[#allocation2 + $0x12b] sm:$0xff] }
  0xbe   : > { %v565_v25 = vpop.permute.xlu0 %564  ;;  %v567_v26 = vpop.permute.xlu1 %566 }
  0xbf   : > { %645 = vst.msk [vmem:[#allocation3 + $0x80] sm:$0xff] %vm628_vm2, %v565_v25  ;;  %646 = vst.msk [vmem:[#allocation3 + $0x88] sm:$0xff] %vm628_vm2, %v567_v26  ;;  %v367_v26 = vld [vmem:[%s9878_s8 + $0xe0] sm:$0xff] }
  0xc0   : > { %938 = vrot.lane.b32.xlu0 %v864_v21, %s9662_s11  ;;  %940 = vrot.lane.b32.xlu1 %v865_v22, %s9662_s11  ;;  %v881_v21 = vld [vmem:[#allocation2 + $0x143] sm:$0xff]  ;;  %400 = vst.msk [vmem:[#allocation2 + $0x182] sm:$0xff] %vm277_vm0, %v367_v26 }
  0xc2   : > { %v569_v29 = vpop.permute.xlu0 %568  ;;  %v571_v30 = vpop.permute.xlu1 %570 }
  0xc3   : > { %647 = vst.msk [vmem:[#allocation3 + $0x90] sm:$0xff] %vm628_vm2, %v569_v29  ;;  %648 = vst.msk [vmem:[#allocation3 + $0x98] sm:$0xff] %vm628_vm2, %v571_v30  ;;  %v883_v29 = vld [vmem:[#allocation2 + $0x15b] sm:$0xff] }
  0xc4   : > { %942 = vrot.lane.b32.xlu0 %v866_v27, %s9662_s11  ;;  %944 = vrot.lane.b32.xlu1 %v867_v28, %s9662_s11  ;;  %v368_v27 = vld [vmem:[%s9878_s8 + $0xe8] sm:$0xff]  ;;  %v882_v28 = vld [vmem:[#allocation2 + $0x153] sm:$0xff] }
  0xc5   : > { %401 = vst.msk [vmem:[#allocation2 + $0x18a] sm:$0xff] %vm277_vm0, %v368_v27  ;;  %v1059_v27 = vld [vmem:[#allocation2 + $0x94] sm:$0xff] }
  0xc6   : > { %v573_v33 = vpop.permute.xlu0 %572  ;;  %v575_v34 = vpop.permute.xlu1 %574 }
  0xc7   : > { %649 = vst.msk [vmem:[#allocation3 + $0xa0] sm:$0xff] %vm628_vm2, %v573_v33  ;;  %650 = vst.msk [vmem:[#allocation3 + $0xa8] sm:$0xff] %vm628_vm2, %v575_v34  ;;  %v885_v33 = vld [vmem:[#allocation2 + $0x173] sm:$0xff] }
  0xc8   : > { %946 = vrot.lane.b32.xlu0 %v868_v31, %s9662_s11  ;;  %948 = vrot.lane.b32.xlu1 %v869_v32, %s9662_s11  ;;  %v884_v32 = vld [vmem:[#allocation2 + $0x16b] sm:$0xff] }
  0xca   : > { %v577_v37 = vpop.permute.xlu0 %576  ;;  %v579_v38 = vpop.permute.xlu1 %578 }
  0xcb   : > { %651 = vst.msk [vmem:[#allocation3 + $0xb0] sm:$0xff] %vm628_vm2, %v577_v37  ;;  %652 = vst.msk [vmem:[#allocation3 + $0xb8] sm:$0xff] %vm628_vm2, %v579_v38  ;;  %v1048_v37 = vld [vmem:[#allocation2 + $0xc] sm:$0xff] }
  0xcc   : > { %950 = vrot.lane.b32.xlu0 %v870_v35, %s9662_s11  ;;  %952 = vrot.lane.b32.xlu1 %v871_v36, %s9662_s11  ;;  %v1047_v36 = vld [vmem:[#allocation2 + $0x4] sm:$0xff] }
  0xce   : > { %v581_v41 = vpop.permute.xlu0 %580  ;;  %v583_v42 = vpop.permute.xlu1 %582 }
  0xcf   : > { %653 = vst.msk [vmem:[#allocation3 + $0xc0] sm:$0xff] %vm628_vm2, %v581_v41  ;;  %654 = vst.msk [vmem:[#allocation3 + $0xc8] sm:$0xff] %vm628_vm2, %v583_v42  ;;  %v1050_v41 = vld [vmem:[#allocation2 + $0x24] sm:$0xff] }
  0xd0   : > { %954 = vrot.lane.b32.xlu0 %v872_v39, %s9662_s11  ;;  %956 = vrot.lane.b32.xlu1 %v873_v40, %s9662_s11  ;;  %v1049_v40 = vld [vmem:[#allocation2 + $0x1c] sm:$0xff] }
  0xd2   : > { %v585_v45 = vpop.permute.xlu0 %584  ;;  %v587_v46 = vpop.permute.xlu1 %586 }
  0xd3   : > { %655 = vst.msk [vmem:[#allocation3 + $0xd0] sm:$0xff] %vm628_vm2, %v585_v45  ;;  %656 = vst.msk [vmem:[#allocation3 + $0xd8] sm:$0xff] %vm628_vm2, %v587_v46  ;;  %v1052_v45 = vld [vmem:[#allocation2 + $0x3c] sm:$0xff] }
  0xd4   : > { %958 = vrot.lane.b32.xlu0 %v874_v43, %s9662_s11  ;;  %960 = vrot.lane.b32.xlu1 %v875_v44, %s9662_s11  ;;  %v1051_v44 = vld [vmem:[#allocation2 + $0x34] sm:$0xff] }
  0xd6   : > { %v589_v53 = vpop.permute.xlu0 %588  ;;  %v591_v60 = vpop.permute.xlu1 %590 }
  0xd7   : > { %657 = vst.msk [vmem:[#allocation3 + $0xe0] sm:$0xff] %vm628_vm2, %v589_v53  ;;  %658 = vst.msk [vmem:[#allocation3 + $0xe8] sm:$0xff] %vm628_vm2, %v591_v60  ;;  %v1054_v53 = vld [vmem:[#allocation2 + $0x54] sm:$0xff] }
  0xd8   : > { %962 = vrot.lane.b32.xlu0 %v876_v48, %s9662_s11  ;;  %964 = vrot.lane.b32.xlu1 %v877_v52, %s9662_s11  ;;  %v1053_v52 = vld [vmem:[#allocation2 + $0x4c] sm:$0xff] }
  0xda   : > { %v593_v6 = vpop.permute.xlu0 %592  ;;  %v595_v13 = vpop.permute.xlu1 %594 }
  0xdb   : > { %659 = vst.msk [vmem:[#allocation3 + $0xf0] sm:$0xff] %vm628_vm2, %v593_v6  ;;  %660 = vst.msk [vmem:[#allocation3 + $0xf8] sm:$0xff] %vm628_vm2, %v595_v13  ;;  %v1056_v6 = vld [vmem:[#allocation2 + $0x6c] sm:$0xff]  ;;  %vm3718_vm2 = vcmask 441752  }
  0xdc   : > { %966 = vrot.lane.b32.xlu0 %v878_v61, %s9662_s11  ;;  %968 = vrot.lane.b32.xlu1 %v879_v5, %s9662_s11  ;;  %v1055_v5 = vld [vmem:[#allocation2 + $0x64] sm:$0xff] }
  0xde   : > { %v726_v22 = vpop.permute.xlu0 %725  ;;  %v728_v25 = vpop.permute.xlu1 %727 }
  0xdf   : > { %822 = vst.msk [vmem:[#allocation3] sm:$0xff] %vm821_vm3, %v726_v22  ;;  %823 = vst.msk [vmem:[#allocation3 + $0x8] sm:$0xff] %vm821_vm3, %v728_v25  ;;  %v1058_v22 = vld [vmem:[#allocation2 + $0x84] sm:$0xff] }
  0xe0   : > { %970 = vrot.lane.b32.xlu0 %v880_v14, %s9662_s11  ;;  %972 = vrot.lane.b32.xlu1 %v881_v21, %s9662_s11  ;;  %v1057_v21 = vld [vmem:[#allocation2 + $0x7c] sm:$0xff] }
  0xe2   : > { %v730_v30 = vpop.permute.xlu0 %729  ;;  %v732_v31 = vpop.permute.xlu1 %731 }
  0xe3   : > { %824 = vst.msk [vmem:[#allocation3 + $0x10] sm:$0xff] %vm821_vm3, %v730_v30  ;;  %825 = vst.msk [vmem:[#allocation3 + $0x18] sm:$0xff] %vm821_vm3, %v732_v31  ;;  %v1061_v31 = vld [vmem:[#allocation2 + $0xac] sm:$0xff] }
  0xe4   : > { %974 = vrot.lane.b32.xlu0 %v882_v28, %s9662_s11  ;;  %976 = vrot.lane.b32.xlu1 %v883_v29, %s9662_s11  ;;  %v1060_v28 = vld [vmem:[#allocation2 + $0x9c] sm:$0xff] }
  0xe6   : > { %v734_v34 = vpop.permute.xlu0 %733  ;;  %v736_v35 = vpop.permute.xlu1 %735 }
  0xe7   : > { %826 = vst.msk [vmem:[#allocation3 + $0x20] sm:$0xff] %vm821_vm3, %v734_v34  ;;  %827 = vst.msk [vmem:[#allocation3 + $0x28] sm:$0xff] %vm821_vm3, %v736_v35  ;;  %v1063_v35 = vld [vmem:[#allocation2 + $0xc4] sm:$0xff] }
  0xe8   : > { %978 = vrot.lane.b32.xlu0 %v884_v32, %s9662_s11  ;;  %980 = vrot.lane.b32.xlu1 %v885_v33, %s9662_s11  ;;  %v1062_v32 = vld [vmem:[#allocation2 + $0xb4] sm:$0xff] }
  0xea   : > { %v738_v38 = vpop.permute.xlu0 %737  ;;  %v740_v39 = vpop.permute.xlu1 %739 }
  0xeb   : > { %828 = vst.msk [vmem:[#allocation3 + $0x30] sm:$0xff] %vm821_vm3, %v738_v38  ;;  %829 = vst.msk [vmem:[#allocation3 + $0x38] sm:$0xff] %vm821_vm3, %v740_v39  ;;  %v1065_v39 = vld [vmem:[#allocation2 + $0xdc] sm:$0xff] }
  0xec   : > { %1111 = vrot.lane.b32.xlu0 %v1047_v36, %s9663_s12  ;;  %1113 = vrot.lane.b32.xlu1 %v1048_v37, %s9663_s12  ;;  %v1064_v36 = vld [vmem:[#allocation2 + $0xcc] sm:$0xff] }
  0xee   : > { %v742_v42 = vpop.permute.xlu0 %741  ;;  %v744_v43 = vpop.permute.xlu1 %743 }
  0xef   : > { %830 = vst.msk [vmem:[#allocation3 + $0x40] sm:$0xff] %vm821_vm3, %v742_v42  ;;  %831 = vst.msk [vmem:[#allocation3 + $0x48] sm:$0xff] %vm821_vm3, %v744_v43  ;;  %v1067_v43 = vld [vmem:[#allocation2 + $0xf4] sm:$0xff] }
  0xf0   : > { %1115 = vrot.lane.b32.xlu0 %v1049_v40, %s9663_s12  ;;  %1117 = vrot.lane.b32.xlu1 %v1050_v41, %s9663_s12  ;;  %v1066_v40 = vld [vmem:[#allocation2 + $0xe4] sm:$0xff] }
  0xf2   : > { %v746_v46 = vpop.permute.xlu0 %745  ;;  %v748_v48 = vpop.permute.xlu1 %747 }
  0xf3   : > { %832 = vst.msk [vmem:[#allocation3 + $0x50] sm:$0xff] %vm821_vm3, %v746_v46  ;;  %833 = vst.msk [vmem:[#allocation3 + $0x58] sm:$0xff] %vm821_vm3, %v748_v48  ;;  %v1069_v48 = vld [vmem:[#allocation2 + $0x10c] sm:$0xff] }
  0xf4   : > { %1119 = vrot.lane.b32.xlu0 %v1051_v44, %s9663_s12  ;;  %1121 = vrot.lane.b32.xlu1 %v1052_v45, %s9663_s12  ;;  %v1068_v44 = vld [vmem:[#allocation2 + $0xfc] sm:$0xff] }
  0xf6   : > { %v750_v60 = vpop.permute.xlu0 %749  ;;  %v752_v61 = vpop.permute.xlu1 %751 }
  0xf7   : > { %834 = vst.msk [vmem:[#allocation3 + $0x60] sm:$0xff] %vm821_vm3, %v750_v60  ;;  %835 = vst.msk [vmem:[#allocation3 + $0x68] sm:$0xff] %vm821_vm3, %v752_v61  ;;  %v1071_v61 = vld [vmem:[#allocation2 + $0x124] sm:$0xff] }
  0xf8   : > { %1123 = vrot.lane.b32.xlu0 %v1053_v52, %s9663_s12  ;;  %1125 = vrot.lane.b32.xlu1 %v1054_v53, %s9663_s12  ;;  %v1070_v52 = vld [vmem:[#allocation2 + $0x114] sm:$0xff] }
  0xfa   : > { %v754_v13 = vpop.permute.xlu0 %753  ;;  %v756_v14 = vpop.permute.xlu1 %755 }
  0xfb   : > { %836 = vst.msk [vmem:[#allocation3 + $0x70] sm:$0xff] %vm821_vm3, %v754_v13  ;;  %837 = vst.msk [vmem:[#allocation3 + $0x78] sm:$0xff] %vm821_vm3, %v756_v14  ;;  %v1073_v14 = vld [vmem:[#allocation2 + $0x13c] sm:$0xff] }
  0xfc   : > { %1127 = vrot.lane.b32.xlu0 %v1055_v5, %s9663_s12  ;;  %1129 = vrot.lane.b32.xlu1 %v1056_v6, %s9663_s12  ;;  %v1072_v5 = vld [vmem:[#allocation2 + $0x12c] sm:$0xff] }
  0xfe   : > { %v758_v25 = vpop.permute.xlu0 %757  ;;  %v760_v26 = vpop.permute.xlu1 %759 }
  0xff   : > { %838 = vst.msk [vmem:[#allocation3 + $0x80] sm:$0xff] %vm821_vm3, %v758_v25  ;;  %839 = vst.msk [vmem:[#allocation3 + $0x88] sm:$0xff] %vm821_vm3, %v760_v26  ;;  %v1075_v26 = vld [vmem:[#allocation2 + $0x154] sm:$0xff] }
 0x100   : > { %1131 = vrot.lane.b32.xlu0 %v1057_v21, %s9663_s12  ;;  %1133 = vrot.lane.b32.xlu1 %v1058_v22, %s9663_s12  ;;  %v1074_v21 = vld [vmem:[#allocation2 + $0x144] sm:$0xff] }
 0x102   : > { %v762_v29 = vpop.permute.xlu0 %761  ;;  %v764_v30 = vpop.permute.xlu1 %763 }
 0x103   : > { %840 = vst.msk [vmem:[#allocation3 + $0x90] sm:$0xff] %vm821_vm3, %v762_v29  ;;  %841 = vst.msk [vmem:[#allocation3 + $0x98] sm:$0xff] %vm821_vm3, %v764_v30  ;;  %v1077_v30 = vld [vmem:[#allocation2 + $0x16c] sm:$0xff] }
 0x104   : > { %1135 = vrot.lane.b32.xlu0 %v1059_v27, %s9663_s12  ;;  %1137 = vrot.lane.b32.xlu1 %v1060_v28, %s9663_s12  ;;  %v1076_v27 = vld [vmem:[#allocation2 + $0x15c] sm:$0xff] }
 0x106   : > { %v766_v33 = vpop.permute.xlu0 %765  ;;  %v768_v34 = vpop.permute.xlu1 %767 }
 0x107   : > { %842 = vst.msk [vmem:[#allocation3 + $0xa0] sm:$0xff] %vm821_vm3, %v766_v33  ;;  %843 = vst.msk [vmem:[#allocation3 + $0xa8] sm:$0xff] %vm821_vm3, %v768_v34 }
 0x108   : > { %1139 = vrot.lane.b32.xlu0 %v1061_v31, %s9663_s12  ;;  %1141 = vrot.lane.b32.xlu1 %v1062_v32, %s9663_s12  ;;  %v1078_v31 = vld [vmem:[#allocation2 + $0x174] sm:$0xff] }
 0x10a   : > { %v770_v37 = vpop.permute.xlu0 %769  ;;  %v772_v38 = vpop.permute.xlu1 %771 }
 0x10b   : > { %844 = vst.msk [vmem:[#allocation3 + $0xb0] sm:$0xff] %vm821_vm3, %v770_v37  ;;  %845 = vst.msk [vmem:[#allocation3 + $0xb8] sm:$0xff] %vm821_vm3, %v772_v38 }
 0x10c   : > { %1143 = vrot.lane.b32.xlu0 %v1063_v35, %s9663_s12  ;;  %1145 = vrot.lane.b32.xlu1 %v1064_v36, %s9663_s12 }
 0x10e   : > { %v774_v41 = vpop.permute.xlu0 %773  ;;  %v776_v42 = vpop.permute.xlu1 %775 }
 0x10f   : > { %846 = vst.msk [vmem:[#allocation3 + $0xc0] sm:$0xff] %vm821_vm3, %v774_v41  ;;  %847 = vst.msk [vmem:[#allocation3 + $0xc8] sm:$0xff] %vm821_vm3, %v776_v42 }
 0x110   : > { %1147 = vrot.lane.b32.xlu0 %v1065_v39, %s9663_s12  ;;  %1149 = vrot.lane.b32.xlu1 %v1066_v40, %s9663_s12 }
 0x112   : > { %v778_v45 = vpop.permute.xlu0 %777  ;;  %v780_v46 = vpop.permute.xlu1 %779 }
 0x113   : > { %848 = vst.msk [vmem:[#allocation3 + $0xd0] sm:$0xff] %vm821_vm3, %v778_v45  ;;  %849 = vst.msk [vmem:[#allocation3 + $0xd8] sm:$0xff] %vm821_vm3, %v780_v46  ;;  %v1438_v46 = vld [vmem:[#allocation2 + $0x49] sm:$0xff] }
 0x114   : > { %1151 = vrot.lane.b32.xlu0 %v1067_v43, %s9663_s12  ;;  %1153 = vrot.lane.b32.xlu1 %v1068_v44, %s9663_s12 }
 0x116   : > { %v782_v53 = vpop.permute.xlu0 %781  ;;  %v784_v60 = vpop.permute.xlu1 %783 }
 0x117   : > { %850 = vst.msk [vmem:[#allocation3 + $0xe0] sm:$0xff] %vm821_vm3, %v782_v53  ;;  %851 = vst.msk [vmem:[#allocation3 + $0xe8] sm:$0xff] %vm821_vm3, %v784_v60  ;;  %v1440_v60 = vld [vmem:[#allocation2 + $0x61] sm:$0xff] }
 0x118   : > { %1155 = vrot.lane.b32.xlu0 %v1069_v48, %s9663_s12  ;;  %1157 = vrot.lane.b32.xlu1 %v1070_v52, %s9663_s12  ;;  %v1439_v48 = vld [vmem:[#allocation2 + $0x51] sm:$0xff] }
 0x11a   : > { %v786_v6 = vpop.permute.xlu0 %785  ;;  %v788_v13 = vpop.permute.xlu1 %787 }
 0x11b   : > { %852 = vst.msk [vmem:[#allocation3 + $0xf0] sm:$0xff] %vm821_vm3, %v786_v6  ;;  %853 = vst.msk [vmem:[#allocation3 + $0xf8] sm:$0xff] %vm821_vm3, %v788_v13  ;;  %v1442_v13 = vld [vmem:[#allocation2 + $0x79] sm:$0xff]  ;;  %vm5249_vm3 = vcmask 1042432  }
 0x11c   : > { %1159 = vrot.lane.b32.xlu0 %v1071_v61, %s9663_s12  ;;  %1161 = vrot.lane.b32.xlu1 %v1072_v5, %s9663_s12  ;;  %v1441_v61 = vld [vmem:[#allocation2 + $0x69] sm:$0xff] }
 0x11e   : > { %v919_v22 = vpop.permute.xlu0 %918  ;;  %v921_v25 = vpop.permute.xlu1 %920 }
 0x11f   : > { %1015 = vst.msk [vmem:[#allocation3] sm:$0xff] %vm1014_vm4, %v919_v22  ;;  %1016 = vst.msk [vmem:[#allocation3 + $0x8] sm:$0xff] %vm1014_vm4, %v921_v25  ;;  %v1444_v25 = vld [vmem:[#allocation2 + $0x91] sm:$0xff] }
 0x120   : > { %1163 = vrot.lane.b32.xlu0 %v1073_v14, %s9663_s12  ;;  %1165 = vrot.lane.b32.xlu1 %v1074_v21, %s9663_s12  ;;  %v1443_v14 = vld [vmem:[#allocation2 + $0x81] sm:$0xff] }
 0x122   : > { %v923_v28 = vpop.permute.xlu0 %922  ;;  %v925_v29 = vpop.permute.xlu1 %924 }
 0x123   : > { %1017 = vst.msk [vmem:[#allocation3 + $0x10] sm:$0xff] %vm1014_vm4, %v923_v28  ;;  %1018 = vst.msk [vmem:[#allocation3 + $0x18] sm:$0xff] %vm1014_vm4, %v925_v29  ;;  %v1446_v29 = vld [vmem:[#allocation2 + $0xa9] sm:$0xff] }
 0x124   : > { %1167 = vrot.lane.b32.xlu0 %v1075_v26, %s9663_s12  ;;  %1169 = vrot.lane.b32.xlu1 %v1076_v27, %s9663_s12  ;;  %v1445_v26 = vld [vmem:[#allocation2 + $0x99] sm:$0xff] }
 0x126   : > { %v927_v32 = vpop.permute.xlu0 %926  ;;  %v929_v33 = vpop.permute.xlu1 %928 }
 0x127   : > { %1019 = vst.msk [vmem:[#allocation3 + $0x20] sm:$0xff] %vm1014_vm4, %v927_v32  ;;  %1020 = vst.msk [vmem:[#allocation3 + $0x28] sm:$0xff] %vm1014_vm4, %v929_v33  ;;  %v1448_v33 = vld [vmem:[#allocation2 + $0xc1] sm:$0xff] }
 0x128   : > { %1171 = vrot.lane.b32.xlu0 %v1077_v30, %s9663_s12  ;;  %1173 = vrot.lane.b32.xlu1 %v1078_v31, %s9663_s12  ;;  %v1447_v30 = vld [vmem:[#allocation2 + $0xb1] sm:$0xff] }
 0x12a   : > { %v931_v34 = vpop.permute.xlu0 %930  ;;  %v933_v35 = vpop.permute.xlu1 %932 }
 0x12b   : > { %1021 = vst.msk [vmem:[#allocation3 + $0x30] sm:$0xff] %vm1014_vm4, %v931_v34  ;;  %1022 = vst.msk [vmem:[#allocation3 + $0x38] sm:$0xff] %vm1014_vm4, %v933_v35  ;;  %v1449_v34 = vld [vmem:[#allocation2 + $0xc9] sm:$0xff] }
 0x12c   : > { %1305 = vrot.lane.b32.xlu0 %v9951_v47, %s9664_s13  ;;  %1307 = vrot.lane.b32.xlu1 %v9955_v49, %s9664_s13 }
 0x12e   : > { %v935_v36 = vpop.permute.xlu0 %934  ;;  %v937_v37 = vpop.permute.xlu1 %936 }
 0x12f   : > { %1023 = vst.msk [vmem:[#allocation3 + $0x40] sm:$0xff] %vm1014_vm4, %v935_v36  ;;  %1024 = vst.msk [vmem:[#allocation3 + $0x48] sm:$0xff] %vm1014_vm4, %v937_v37  ;;  %v1450_v37 = vld [vmem:[#allocation2 + $0xd9] sm:$0xff] }
 0x130   : > { %1309 = vrot.lane.b32.xlu0 %v9962_v50, %s9664_s13  ;;  %1311 = vrot.lane.b32.xlu1 %v9964_v51, %s9664_s13 }
 0x132   : > { %v939_v38 = vpop.permute.xlu0 %938  ;;  %v941_v39 = vpop.permute.xlu1 %940 }
 0x133   : > { %1025 = vst.msk [vmem:[#allocation3 + $0x50] sm:$0xff] %vm1014_vm4, %v939_v38  ;;  %1026 = vst.msk [vmem:[#allocation3 + $0x58] sm:$0xff] %vm1014_vm4, %v941_v39  ;;  %v1451_v38 = vld [vmem:[#allocation2 + $0xe1] sm:$0xff] }
 0x134   : > { %1313 = vrot.lane.b32.xlu0 %v9970_v54, %s9664_s13  ;;  %1315 = vrot.lane.b32.xlu1 %v9974_v55, %s9664_s13 }
 0x136   : > { %v943_v47 = vpop.permute.xlu0 %942  ;;  %v945_v49 = vpop.permute.xlu1 %944 }
 0x137   : > { %1027 = vst.msk [vmem:[#allocation3 + $0x60] sm:$0xff] %vm1014_vm4, %v943_v47  ;;  %1028 = vst.msk [vmem:[#allocation3 + $0x68] sm:$0xff] %vm1014_vm4, %v945_v49  ;;  %v1452_v49 = vld [vmem:[#allocation2 + $0xf1] sm:$0xff] }
 0x138   : > { %1317 = vrot.lane.b32.xlu0 %v9978_v56, %s9664_s13  ;;  %1319 = vrot.lane.b32.xlu1 %v9980_v57, %s9664_s13 }
 0x13a   : > { %v947_v50 = vpop.permute.xlu0 %946  ;;  %v949_v51 = vpop.permute.xlu1 %948 }
 0x13b   : > { %1029 = vst.msk [vmem:[#allocation3 + $0x70] sm:$0xff] %vm1014_vm4, %v947_v50  ;;  %1030 = vst.msk [vmem:[#allocation3 + $0x78] sm:$0xff] %vm1014_vm4, %v949_v51  ;;  %v1453_v50 = vld [vmem:[#allocation2 + $0xf9] sm:$0xff] }
 0x13c   : > { %1321 = vrot.lane.b32.xlu0 %v9988_v58, %s9664_s13  ;;  %1323 = vrot.lane.b32.xlu1 %v9990_v59, %s9664_s13 }
 0x13e   : > { %v951_v54 = vpop.permute.xlu0 %950  ;;  %v953_v55 = vpop.permute.xlu1 %952 }
 0x13f   : > { %1031 = vst.msk [vmem:[#allocation3 + $0x80] sm:$0xff] %vm1014_vm4, %v951_v54  ;;  %1032 = vst.msk [vmem:[#allocation3 + $0x88] sm:$0xff] %vm1014_vm4, %v953_v55  ;;  %v1454_v55 = vld [vmem:[#allocation2 + $0x109] sm:$0xff] }
 0x140   : > { %1325 = vrot.lane.b32.xlu0 %v9996_v62, %s9664_s13  ;;  %1327 = vrot.lane.b32.xlu1 %v10000_v63, %s9664_s13 }
 0x142   : > { %v955_v56 = vpop.permute.xlu0 %954  ;;  %v957_v57 = vpop.permute.xlu1 %956 }
 0x143   : > { %1033 = vst.msk [vmem:[#allocation3 + $0x90] sm:$0xff] %vm1014_vm4, %v955_v56  ;;  %1034 = vst.msk [vmem:[#allocation3 + $0x98] sm:$0xff] %vm1014_vm4, %v957_v57  ;;  %v1455_v56 = vld [vmem:[#allocation2 + $0x111] sm:$0xff] }
 0x144   : > { %1329 = vrot.lane.b32.xlu0 %v10004_v0, %s9664_s13  ;;  %1331 = vrot.lane.b32.xlu1 %v10006_v2, %s9664_s13 }
 0x146   : > { %v959_v58 = vpop.permute.xlu0 %958  ;;  %v961_v59 = vpop.permute.xlu1 %960 }
 0x147   : > { %1035 = vst.msk [vmem:[#allocation3 + $0xa0] sm:$0xff] %vm1014_vm4, %v959_v58  ;;  %1036 = vst.msk [vmem:[#allocation3 + $0xa8] sm:$0xff] %vm1014_vm4, %v961_v59  ;;  %v1456_v59 = vld [vmem:[#allocation2 + $0x121] sm:$0xff] }
 0x148   : > { %1333 = vrot.lane.b32.xlu0 %v10014_v3, %s9664_s13  ;;  %1335 = vrot.lane.b32.xlu1 %v10016_v4, %s9664_s13 }
 0x14a   : > { %v963_v62 = vpop.permute.xlu0 %962  ;;  %v965_v63 = vpop.permute.xlu1 %964 }
 0x14b   : > { %1037 = vst.msk [vmem:[#allocation3 + $0xb0] sm:$0xff] %vm1014_vm4, %v963_v62  ;;  %1038 = vst.msk [vmem:[#allocation3 + $0xb8] sm:$0xff] %vm1014_vm4, %v965_v63  ;;  %v1457_v62 = vld [vmem:[#allocation2 + $0x129] sm:$0xff] }
 0x14c   : > { %1337 = vrot.lane.b32.xlu0 %v10022_v7, %s9664_s13  ;;  %1339 = vrot.lane.b32.xlu1 %v10026_v8, %s9664_s13 }
 0x14e   : > { %v967_v0 = vpop.permute.xlu0 %966  ;;  %v969_v2 = vpop.permute.xlu1 %968 }
 0x14f   : > { %1039 = vst.msk [vmem:[#allocation3 + $0xc0] sm:$0xff] %vm1014_vm4, %v967_v0  ;;  %1040 = vst.msk [vmem:[#allocation3 + $0xc8] sm:$0xff] %vm1014_vm4, %v969_v2  ;;  %v1458_v2 = vld [vmem:[#allocation2 + $0x139] sm:$0xff] }
 0x150   : > { %1341 = vrot.lane.b32.xlu0 %v10030_v9, %s9664_s13  ;;  %1343 = vrot.lane.b32.xlu1 %v10032_v10, %s9664_s13 }
 0x152   : > { %v971_v3 = vpop.permute.xlu0 %970  ;;  %v973_v4 = vpop.permute.xlu1 %972 }
 0x153   : > { %1041 = vst.msk [vmem:[#allocation3 + $0xd0] sm:$0xff] %vm1014_vm4, %v971_v3  ;;  %1042 = vst.msk [vmem:[#allocation3 + $0xd8] sm:$0xff] %vm1014_vm4, %v973_v4  ;;  %v1459_v3 = vld [vmem:[#allocation2 + $0x141] sm:$0xff] }
 0x154   : > { %1345 = vrot.lane.b32.xlu0 %v10040_v11, %s9664_s13  ;;  %1347 = vrot.lane.b32.xlu1 %v10042_v12, %s9664_s13 }
 0x156   : > { %v975_v7 = vpop.permute.xlu0 %974  ;;  %v977_v8 = vpop.permute.xlu1 %976 }
 0x157   : > { %1043 = vst.msk [vmem:[#allocation3 + $0xe0] sm:$0xff] %vm1014_vm4, %v975_v7  ;;  %1044 = vst.msk [vmem:[#allocation3 + $0xe8] sm:$0xff] %vm1014_vm4, %v977_v8  ;;  %v1460_v8 = vld [vmem:[#allocation2 + $0x151] sm:$0xff] }
 0x158   : > { %1349 = vrot.lane.b32.xlu0 %v10048_v15, %s9664_s13  ;;  %1351 = vrot.lane.b32.xlu1 %v10052_v16, %s9664_s13 }
 0x15a   : > { %v979_v9 = vpop.permute.xlu0 %978  ;;  %v981_v10 = vpop.permute.xlu1 %980 }
 0x15b   : > { %1045 = vst.msk [vmem:[#allocation3 + $0xf0] sm:$0xff] %vm1014_vm4, %v979_v9  ;;  %1046 = vst.msk [vmem:[#allocation3 + $0xf8] sm:$0xff] %vm1014_vm4, %v981_v10  ;;  %v1461_v9 = vld [vmem:[#allocation2 + $0x159] sm:$0xff]  ;;  %vm3911_vm4 = vcmask 466352  }
 0x15c   : > { %1353 = vrot.lane.b32.xlu0 %v10056_v17, %s9664_s13  ;;  %1355 = vrot.lane.b32.xlu1 %v10058_v18, %s9664_s13  ;;  %v1271_v17 = vld [vmem:[#allocation2 + $0x180] sm:$0xff]  ;;  %v1272_v18 = vld [vmem:[#allocation2 + $0x188] sm:$0xff] }
 0x15e   : > { %v1112_v11 = vpop.permute.xlu0 %1111  ;;  %v1114_v12 = vpop.permute.xlu1 %1113 }
 0x15f   : > { %1208 = vst.msk [vmem:[#allocation3] sm:$0xff] %vm1207_vm5, %v1112_v11  ;;  %1209 = vst.msk [vmem:[#allocation3 + $0x8] sm:$0xff] %vm1207_vm5, %v1114_v12  ;;  %v1462_v12 = vld [vmem:[#allocation2 + $0x169] sm:$0xff] }
 0x160   : > { %1357 = vrot.lane.b32.xlu0 %v10066_v19, %s9664_s13  ;;  %1359 = vrot.lane.b32.xlu1 %v10068_v20, %s9664_s13  ;;  %v1434_v19 = vld [vmem:[#allocation2 + $0x19] sm:$0xff]  ;;  %v1435_v20 = vld [vmem:[#allocation2 + $0x21] sm:$0xff] }
 0x162   : > { %v1116_v15 = vpop.permute.xlu0 %1115  ;;  %v1118_v16 = vpop.permute.xlu1 %1117 }
 0x163   : > { %1210 = vst.msk [vmem:[#allocation3 + $0x10] sm:$0xff] %vm1207_vm5, %v1116_v15  ;;  %1211 = vst.msk [vmem:[#allocation3 + $0x18] sm:$0xff] %vm1207_vm5, %v1118_v16  ;;  %v1463_v15 = vld [vmem:[#allocation2 + $0x171] sm:$0xff] }
 0x164   : > { %1361 = vrot.lane.b32.xlu0 %v10074_v23, %s9664_s13  ;;  %1363 = vrot.lane.b32.xlu1 %v10078_v24, %s9664_s13  ;;  %v1436_v23 = vld [vmem:[#allocation2 + $0x31] sm:$0xff]  ;;  %v1437_v24 = vld [vmem:[#allocation2 + $0x39] sm:$0xff] }
 0x166   : > { %v1120_v40 = vpop.permute.xlu0 %1119  ;;  %v1122_v41 = vpop.permute.xlu1 %1121 }
 0x167   : > { %1212 = vst.msk [vmem:[#allocation3 + $0x20] sm:$0xff] %vm1207_vm5, %v1120_v40  ;;  %1213 = vst.msk [vmem:[#allocation3 + $0x28] sm:$0xff] %vm1207_vm5, %v1122_v41  ;;  %v1465_v40 = vld [vmem:[#allocation2 + $0x189] sm:$0xff] }
 0x168   : > { %1365 = vrot.lane.b32.xlu0 %v1271_v17, %s9664_s13  ;;  %1367 = vrot.lane.b32.xlu1 %v1272_v18, %s9664_s13  ;;  %v1464_v18 = vld [vmem:[#allocation2 + $0x181] sm:$0xff] }
 0x16a   : > { %v1124_v42 = vpop.permute.xlu0 %1123  ;;  %v1126_v43 = vpop.permute.xlu1 %1125 }
 0x16b   : > { %1214 = vst.msk [vmem:[#allocation3 + $0x30] sm:$0xff] %vm1207_vm5, %v1124_v42  ;;  %1215 = vst.msk [vmem:[#allocation3 + $0x38] sm:$0xff] %vm1207_vm5, %v1126_v43  ;;  %v1628_v42 = vld [vmem:[#allocation2 + $0x22] sm:$0xff] }
 0x16c   : > { %1498 = vrot.lane.b32.xlu0 %v1434_v19, %s9665_s14  ;;  %1500 = vrot.lane.b32.xlu1 %v1435_v20, %s9665_s14  ;;  %v1627_v20 = vld [vmem:[#allocation2 + $0x1a] sm:$0xff] }
 0x16e   : > { %v1128_v44 = vpop.permute.xlu0 %1127  ;;  %v1130_v45 = vpop.permute.xlu1 %1129 }
 0x16f   : > { %1216 = vst.msk [vmem:[#allocation3 + $0x40] sm:$0xff] %vm1207_vm5, %v1128_v44  ;;  %1217 = vst.msk [vmem:[#allocation3 + $0x48] sm:$0xff] %vm1207_vm5, %v1130_v45  ;;  %v1630_v44 = vld [vmem:[#allocation2 + $0x3a] sm:$0xff] }
 0x170   : > { %1502 = vrot.lane.b32.xlu0 %v1436_v23, %s9665_s14  ;;  %1504 = vrot.lane.b32.xlu1 %v1437_v24, %s9665_s14  ;;  %v1629_v24 = vld [vmem:[#allocation2 + $0x32] sm:$0xff] }
 0x172   : > { %v1132_v52 = vpop.permute.xlu0 %1131  ;;  %v1134_v53 = vpop.permute.xlu1 %1133 }
 0x173   : > { %1218 = vst.msk [vmem:[#allocation3 + $0x50] sm:$0xff] %vm1207_vm5, %v1132_v52  ;;  %1219 = vst.msk [vmem:[#allocation3 + $0x58] sm:$0xff] %vm1207_vm5, %v1134_v53  ;;  %v1632_v52 = vld [vmem:[#allocation2 + $0x52] sm:$0xff] }
 0x174   : > { %1506 = vrot.lane.b32.xlu0 %v1438_v46, %s9665_s14  ;;  %1508 = vrot.lane.b32.xlu1 %v1439_v48, %s9665_s14  ;;  %v1631_v48 = vld [vmem:[#allocation2 + $0x4a] sm:$0xff] }
 0x176   : > { %v1136_v5 = vpop.permute.xlu0 %1135  ;;  %v1138_v6 = vpop.permute.xlu1 %1137 }
 0x177   : > { %1220 = vst.msk [vmem:[#allocation3 + $0x60] sm:$0xff] %vm1207_vm5, %v1136_v5  ;;  %1221 = vst.msk [vmem:[#allocation3 + $0x68] sm:$0xff] %vm1207_vm5, %v1138_v6  ;;  %v1634_v5 = vld [vmem:[#allocation2 + $0x6a] sm:$0xff] }
 0x178   : > { %1510 = vrot.lane.b32.xlu0 %v1440_v60, %s9665_s14  ;;  %1512 = vrot.lane.b32.xlu1 %v1441_v61, %s9665_s14  ;;  %v1633_v61 = vld [vmem:[#allocation2 + $0x62] sm:$0xff] }
 0x17a   : > { %v1140_v21 = vpop.permute.xlu0 %1139  ;;  %v1142_v22 = vpop.permute.xlu1 %1141 }
 0x17b   : > { %1222 = vst.msk [vmem:[#allocation3 + $0x70] sm:$0xff] %vm1207_vm5, %v1140_v21  ;;  %1223 = vst.msk [vmem:[#allocation3 + $0x78] sm:$0xff] %vm1207_vm5, %v1142_v22  ;;  %v1636_v21 = vld [vmem:[#allocation2 + $0x82] sm:$0xff] }
 0x17c   : > { %1514 = vrot.lane.b32.xlu0 %v1442_v13, %s9665_s14  ;;  %1516 = vrot.lane.b32.xlu1 %v1443_v14, %s9665_s14  ;;  %v1635_v14 = vld [vmem:[#allocation2 + $0x7a] sm:$0xff] }
 0x17e   : > { %v1144_v27 = vpop.permute.xlu0 %1143  ;;  %v1146_v28 = vpop.permute.xlu1 %1145 }
 0x17f   : > { %1224 = vst.msk [vmem:[#allocation3 + $0x80] sm:$0xff] %vm1207_vm5, %v1144_v27  ;;  %1225 = vst.msk [vmem:[#allocation3 + $0x88] sm:$0xff] %vm1207_vm5, %v1146_v28  ;;  %v1638_v27 = vld [vmem:[#allocation2 + $0x9a] sm:$0xff] }
 0x180   : > { %1518 = vrot.lane.b32.xlu0 %v1444_v25, %s9665_s14  ;;  %1520 = vrot.lane.b32.xlu1 %v1445_v26, %s9665_s14  ;;  %v1637_v26 = vld [vmem:[#allocation2 + $0x92] sm:$0xff] }
 0x182   : > { %v1148_v31 = vpop.permute.xlu0 %1147  ;;  %v1150_v32 = vpop.permute.xlu1 %1149 }
 0x183   : > { %1226 = vst.msk [vmem:[#allocation3 + $0x90] sm:$0xff] %vm1207_vm5, %v1148_v31  ;;  %1227 = vst.msk [vmem:[#allocation3 + $0x98] sm:$0xff] %vm1207_vm5, %v1150_v32  ;;  %v1640_v31 = vld [vmem:[#allocation2 + $0xb2] sm:$0xff] }
 0x184   : > { %1522 = vrot.lane.b32.xlu0 %v1446_v29, %s9665_s14  ;;  %1524 = vrot.lane.b32.xlu1 %v1447_v30, %s9665_s14  ;;  %v1639_v30 = vld [vmem:[#allocation2 + $0xaa] sm:$0xff] }
 0x186   : > { %v1152_v35 = vpop.permute.xlu0 %1151  ;;  %v1154_v36 = vpop.permute.xlu1 %1153 }
 0x187   : > { %1228 = vst.msk [vmem:[#allocation3 + $0xa0] sm:$0xff] %vm1207_vm5, %v1152_v35  ;;  %1229 = vst.msk [vmem:[#allocation3 + $0xa8] sm:$0xff] %vm1207_vm5, %v1154_v36  ;;  %v1642_v35 = vld [vmem:[#allocation2 + $0xca] sm:$0xff] }
 0x188   : > { %1526 = vrot.lane.b32.xlu0 %v1448_v33, %s9665_s14  ;;  %1528 = vrot.lane.b32.xlu1 %v1449_v34, %s9665_s14  ;;  %v1641_v34 = vld [vmem:[#allocation2 + $0xc2] sm:$0xff] }
 0x18a   : > { %v1156_v39 = vpop.permute.xlu0 %1155  ;;  %v1158_v47 = vpop.permute.xlu1 %1157 }
 0x18b   : > { %1230 = vst.msk [vmem:[#allocation3 + $0xb0] sm:$0xff] %vm1207_vm5, %v1156_v39  ;;  %1231 = vst.msk [vmem:[#allocation3 + $0xb8] sm:$0xff] %vm1207_vm5, %v1158_v47  ;;  %v1644_v39 = vld [vmem:[#allocation2 + $0xe2] sm:$0xff] }
 0x18c   : > { %1530 = vrot.lane.b32.xlu0 %v1450_v37, %s9665_s14  ;;  %1532 = vrot.lane.b32.xlu1 %v1451_v38, %s9665_s14  ;;  %v1643_v38 = vld [vmem:[#allocation2 + $0xda] sm:$0xff] }
 0x18e   : > { %v1160_v51 = vpop.permute.xlu0 %1159  ;;  %v1162_v54 = vpop.permute.xlu1 %1161 }
 0x18f   : > { %1232 = vst.msk [vmem:[#allocation3 + $0xc0] sm:$0xff] %vm1207_vm5, %v1160_v51  ;;  %1233 = vst.msk [vmem:[#allocation3 + $0xc8] sm:$0xff] %vm1207_vm5, %v1162_v54  ;;  %v1646_v51 = vld [vmem:[#allocation2 + $0xfa] sm:$0xff] }
 0x190   : > { %1534 = vrot.lane.b32.xlu0 %v1452_v49, %s9665_s14  ;;  %1536 = vrot.lane.b32.xlu1 %v1453_v50, %s9665_s14  ;;  %v1645_v50 = vld [vmem:[#allocation2 + $0xf2] sm:$0xff] }
 0x192   : > { %v1164_v57 = vpop.permute.xlu0 %1163  ;;  %v1166_v58 = vpop.permute.xlu1 %1165 }
 0x193   : > { %1234 = vst.msk [vmem:[#allocation3 + $0xd0] sm:$0xff] %vm1207_vm5, %v1164_v57  ;;  %1235 = vst.msk [vmem:[#allocation3 + $0xd8] sm:$0xff] %vm1207_vm5, %v1166_v58  ;;  %v1648_v57 = vld [vmem:[#allocation2 + $0x112] sm:$0xff] }
 0x194   : > { %1538 = vrot.lane.b32.xlu0 %v1454_v55, %s9665_s14  ;;  %1540 = vrot.lane.b32.xlu1 %v1455_v56, %s9665_s14  ;;  %v1647_v56 = vld [vmem:[#allocation2 + $0x10a] sm:$0xff] }
 0x196   : > { %v1168_v63 = vpop.permute.xlu0 %1167  ;;  %v1170_v0 = vpop.permute.xlu1 %1169 }
 0x197   : > { %1236 = vst.msk [vmem:[#allocation3 + $0xe0] sm:$0xff] %vm1207_vm5, %v1168_v63  ;;  %1237 = vst.msk [vmem:[#allocation3 + $0xe8] sm:$0xff] %vm1207_vm5, %v1170_v0  ;;  %v1650_v63 = vld [vmem:[#allocation2 + $0x12a] sm:$0xff] }
 0x198   : > { %1542 = vrot.lane.b32.xlu0 %v1456_v59, %s9665_s14  ;;  %1544 = vrot.lane.b32.xlu1 %v1457_v62, %s9665_s14  ;;  %v1649_v62 = vld [vmem:[#allocation2 + $0x122] sm:$0xff] }
 0x19a   : > { %v1172_v4 = vpop.permute.xlu0 %1171  ;;  %v1174_v7 = vpop.permute.xlu1 %1173 }
 0x19b   : > { %1238 = vst.msk [vmem:[#allocation3 + $0xf0] sm:$0xff] %vm1207_vm5, %v1172_v4  ;;  %1239 = vst.msk [vmem:[#allocation3 + $0xf8] sm:$0xff] %vm1207_vm5, %v1174_v7  ;;  %v1652_v4 = vld [vmem:[#allocation2 + $0x142] sm:$0xff]  ;;  %vm4104_vm5 = vcmask 490952  }
 0x19c   : > { %1546 = vrot.lane.b32.xlu0 %v1458_v2, %s9665_s14  ;;  %1548 = vrot.lane.b32.xlu1 %v1459_v3, %s9665_s14  ;;  %v1651_v3 = vld [vmem:[#allocation2 + $0x13a] sm:$0xff] }
 0x19e   : > { %v1306_v10 = vpop.permute.xlu0 %1305  ;;  %v1308_v11 = vpop.permute.xlu1 %1307 }
 0x19f   : > { %1402 = vst.msk [vmem:[#allocation3] sm:$0xff] %vm1401_vm6, %v1306_v10  ;;  %1403 = vst.msk [vmem:[#allocation3 + $0x8] sm:$0xff] %vm1401_vm6, %v1308_v11  ;;  %v1654_v10 = vld [vmem:[#allocation2 + $0x15a] sm:$0xff] }
 0x1a0   : > { %1550 = vrot.lane.b32.xlu0 %v1460_v8, %s9665_s14  ;;  %1552 = vrot.lane.b32.xlu1 %v1461_v9, %s9665_s14  ;;  %v1653_v9 = vld [vmem:[#allocation2 + $0x152] sm:$0xff] }
 0x1a2   : > { %v1310_v16 = vpop.permute.xlu0 %1309  ;;  %v1312_v17 = vpop.permute.xlu1 %1311 }
 0x1a3   : > { %1404 = vst.msk [vmem:[#allocation3 + $0x10] sm:$0xff] %vm1401_vm6, %v1310_v16  ;;  %1405 = vst.msk [vmem:[#allocation3 + $0x18] sm:$0xff] %vm1401_vm6, %v1312_v17  ;;  %v1656_v16 = vld [vmem:[#allocation2 + $0x172] sm:$0xff] }
 0x1a4   : > { %1554 = vrot.lane.b32.xlu0 %v1462_v12, %s9665_s14  ;;  %1556 = vrot.lane.b32.xlu1 %v1463_v15, %s9665_s14  ;;  %v1655_v15 = vld [vmem:[#allocation2 + $0x16a] sm:$0xff] }
 0x1a6   : > { %v1314_v41 = vpop.permute.xlu0 %1313  ;;  %v1316_v19 = vpop.permute.xlu1 %1315 }
 0x1a7   : > { %1406 = vst.msk [vmem:[#allocation3 + $0x20] sm:$0xff] %vm1401_vm6, %v1314_v41  ;;  %1407 = vst.msk [vmem:[#allocation3 + $0x28] sm:$0xff] %vm1401_vm6, %v1316_v19  ;;  %v1658_v41 = vld [vmem:[#allocation2 + $0x18a] sm:$0xff] }
 0x1a8   : > { %1558 = vrot.lane.b32.xlu0 %v1464_v18, %s9665_s14  ;;  %1560 = vrot.lane.b32.xlu1 %v1465_v40, %s9665_s14  ;;  %v1657_v40 = vld [vmem:[#allocation2 + $0x182] sm:$0xff]  ;;  %s9681_s14 = smov 66  }
 0x1aa   : > { %v1318_v43 = vpop.permute.xlu0 %1317  ;;  %v1320_v23 = vpop.permute.xlu1 %1319 }
 0x1ab   : > { %1408 = vst.msk [vmem:[#allocation3 + $0x30] sm:$0xff] %vm1401_vm6, %v1318_v43  ;;  %1409 = vst.msk [vmem:[#allocation3 + $0x38] sm:$0xff] %vm1401_vm6, %v1320_v23  ;;  %v1821_v43 = vld [vmem:[#allocation2 + $0x23] sm:$0xff] }
 0x1ac   : > { %1691 = vrot.lane.b32.xlu0 %v1627_v20, %s9666_s15  ;;  %1693 = vrot.lane.b32.xlu1 %v1628_v42, %s9666_s15  ;;  %v1820_v42 = vld [vmem:[#allocation2 + $0x1b] sm:$0xff] }
 0x1ae   : > { %v1322_v45 = vpop.permute.xlu0 %1321  ;;  %v1324_v46 = vpop.permute.xlu1 %1323 }
 0x1af   : > { %1410 = vst.msk [vmem:[#allocation3 + $0x40] sm:$0xff] %vm1401_vm6, %v1322_v45  ;;  %1411 = vst.msk [vmem:[#allocation3 + $0x48] sm:$0xff] %vm1401_vm6, %v1324_v46  ;;  %v1823_v45 = vld [vmem:[#allocation2 + $0x3b] sm:$0xff] }
 0x1b0   : > { %1695 = vrot.lane.b32.xlu0 %v1629_v24, %s9666_s15  ;;  %1697 = vrot.lane.b32.xlu1 %v1630_v44, %s9666_s15  ;;  %v1822_v44 = vld [vmem:[#allocation2 + $0x33] sm:$0xff] }
 0x1b2   : > { %v1326_v53 = vpop.permute.xlu0 %1325  ;;  %v1328_v60 = vpop.permute.xlu1 %1327 }
 0x1b3   : > { %1412 = vst.msk [vmem:[#allocation3 + $0x50] sm:$0xff] %vm1401_vm6, %v1326_v53  ;;  %1413 = vst.msk [vmem:[#allocation3 + $0x58] sm:$0xff] %vm1401_vm6, %v1328_v60  ;;  %v1825_v53 = vld [vmem:[#allocation2 + $0x53] sm:$0xff] }
 0x1b4   : > { %1699 = vrot.lane.b32.xlu0 %v1631_v48, %s9666_s15  ;;  %1701 = vrot.lane.b32.xlu1 %v1632_v52, %s9666_s15  ;;  %v1824_v52 = vld [vmem:[#allocation2 + $0x4b] sm:$0xff] }
 0x1b6   : > { %v1330_v6 = vpop.permute.xlu0 %1329  ;;  %v1332_v13 = vpop.permute.xlu1 %1331 }
 0x1b7   : > { %1414 = vst.msk [vmem:[#allocation3 + $0x60] sm:$0xff] %vm1401_vm6, %v1330_v6  ;;  %1415 = vst.msk [vmem:[#allocation3 + $0x68] sm:$0xff] %vm1401_vm6, %v1332_v13  ;;  %v1827_v6 = vld [vmem:[#allocation2 + $0x6b] sm:$0xff] }
 0x1b8   : > { %1703 = vrot.lane.b32.xlu0 %v1633_v61, %s9666_s15  ;;  %1705 = vrot.lane.b32.xlu1 %v1634_v5, %s9666_s15  ;;  %v1826_v5 = vld [vmem:[#allocation2 + $0x63] sm:$0xff] }
 0x1ba   : > { %v1334_v22 = vpop.permute.xlu0 %1333  ;;  %v1336_v25 = vpop.permute.xlu1 %1335 }
 0x1bb   : > { %1416 = vst.msk [vmem:[#allocation3 + $0x70] sm:$0xff] %vm1401_vm6, %v1334_v22  ;;  %1417 = vst.msk [vmem:[#allocation3 + $0x78] sm:$0xff] %vm1401_vm6, %v1336_v25  ;;  %v1829_v22 = vld [vmem:[#allocation2 + $0x83] sm:$0xff] }
 0x1bc   : > { %1707 = vrot.lane.b32.xlu0 %v1635_v14, %s9666_s15  ;;  %1709 = vrot.lane.b32.xlu1 %v1636_v21, %s9666_s15  ;;  %v1828_v21 = vld [vmem:[#allocation2 + $0x7b] sm:$0xff] }
 0x1be   : > { %v1338_v28 = vpop.permute.xlu0 %1337  ;;  %v1340_v29 = vpop.permute.xlu1 %1339 }
 0x1bf   : > { %1418 = vst.msk [vmem:[#allocation3 + $0x80] sm:$0xff] %vm1401_vm6, %v1338_v28  ;;  %1419 = vst.msk [vmem:[#allocation3 + $0x88] sm:$0xff] %vm1401_vm6, %v1340_v29  ;;  %v1831_v28 = vld [vmem:[#allocation2 + $0x9b] sm:$0xff] }
 0x1c0   : > { %1711 = vrot.lane.b32.xlu0 %v1637_v26, %s9666_s15  ;;  %1713 = vrot.lane.b32.xlu1 %v1638_v27, %s9666_s15  ;;  %v1830_v27 = vld [vmem:[#allocation2 + $0x93] sm:$0xff] }
 0x1c2   : > { %v1342_v32 = vpop.permute.xlu0 %1341  ;;  %v1344_v33 = vpop.permute.xlu1 %1343 }
 0x1c3   : > { %1420 = vst.msk [vmem:[#allocation3 + $0x90] sm:$0xff] %vm1401_vm6, %v1342_v32  ;;  %1421 = vst.msk [vmem:[#allocation3 + $0x98] sm:$0xff] %vm1401_vm6, %v1344_v33  ;;  %v1833_v32 = vld [vmem:[#allocation2 + $0xb3] sm:$0xff] }
 0x1c4   : > { %1715 = vrot.lane.b32.xlu0 %v1639_v30, %s9666_s15  ;;  %1717 = vrot.lane.b32.xlu1 %v1640_v31, %s9666_s15  ;;  %v1832_v31 = vld [vmem:[#allocation2 + $0xab] sm:$0xff] }
 0x1c6   : > { %v1346_v36 = vpop.permute.xlu0 %1345  ;;  %v1348_v37 = vpop.permute.xlu1 %1347 }
 0x1c7   : > { %1422 = vst.msk [vmem:[#allocation3 + $0xa0] sm:$0xff] %vm1401_vm6, %v1346_v36  ;;  %1423 = vst.msk [vmem:[#allocation3 + $0xa8] sm:$0xff] %vm1401_vm6, %v1348_v37  ;;  %v1835_v36 = vld [vmem:[#allocation2 + $0xcb] sm:$0xff] }
 0x1c8   : > { %1719 = vrot.lane.b32.xlu0 %v1641_v34, %s9666_s15  ;;  %1721 = vrot.lane.b32.xlu1 %v1642_v35, %s9666_s15  ;;  %v1834_v35 = vld [vmem:[#allocation2 + $0xc3] sm:$0xff] }
 0x1ca   : > { %v1350_v47 = vpop.permute.xlu0 %1349  ;;  %v1352_v49 = vpop.permute.xlu1 %1351 }
 0x1cb   : > { %1424 = vst.msk [vmem:[#allocation3 + $0xb0] sm:$0xff] %vm1401_vm6, %v1350_v47  ;;  %1425 = vst.msk [vmem:[#allocation3 + $0xb8] sm:$0xff] %vm1401_vm6, %v1352_v49  ;;  %v1837_v47 = vld [vmem:[#allocation2 + $0xe3] sm:$0xff] }
 0x1cc   : > { %1723 = vrot.lane.b32.xlu0 %v1643_v38, %s9666_s15  ;;  %1725 = vrot.lane.b32.xlu1 %v1644_v39, %s9666_s15  ;;  %v1836_v39 = vld [vmem:[#allocation2 + $0xdb] sm:$0xff] }
 0x1ce   : > { %v1354_v54 = vpop.permute.xlu0 %1353  ;;  %v1356_v55 = vpop.permute.xlu1 %1355 }
 0x1cf   : > { %1426 = vst.msk [vmem:[#allocation3 + $0xc0] sm:$0xff] %vm1401_vm6, %v1354_v54  ;;  %1427 = vst.msk [vmem:[#allocation3 + $0xc8] sm:$0xff] %vm1401_vm6, %v1356_v55  ;;  %v1839_v54 = vld [vmem:[#allocation2 + $0xfb] sm:$0xff] }
 0x1d0   : > { %1727 = vrot.lane.b32.xlu0 %v1645_v50, %s9666_s15  ;;  %1729 = vrot.lane.b32.xlu1 %v1646_v51, %s9666_s15  ;;  %v1838_v51 = vld [vmem:[#allocation2 + $0xf3] sm:$0xff] }
 0x1d2   : > { %v1358_v58 = vpop.permute.xlu0 %1357  ;;  %v1360_v59 = vpop.permute.xlu1 %1359 }
 0x1d3   : > { %1428 = vst.msk [vmem:[#allocation3 + $0xd0] sm:$0xff] %vm1401_vm6, %v1358_v58  ;;  %1429 = vst.msk [vmem:[#allocation3 + $0xd8] sm:$0xff] %vm1401_vm6, %v1360_v59  ;;  %v1841_v58 = vld [vmem:[#allocation2 + $0x113] sm:$0xff] }
 0x1d4   : > { %1731 = vrot.lane.b32.xlu0 %v1647_v56, %s9666_s15  ;;  %1733 = vrot.lane.b32.xlu1 %v1648_v57, %s9666_s15  ;;  %v1840_v57 = vld [vmem:[#allocation2 + $0x10b] sm:$0xff] }
 0x1d6   : > { %v1362_v0 = vpop.permute.xlu0 %1361  ;;  %v1364_v2 = vpop.permute.xlu1 %1363 }
 0x1d7   : > { %1430 = vst.msk [vmem:[#allocation3 + $0xe0] sm:$0xff] %vm1401_vm6, %v1362_v0  ;;  %1431 = vst.msk [vmem:[#allocation3 + $0xe8] sm:$0xff] %vm1401_vm6, %v1364_v2  ;;  %v1843_v0 = vld [vmem:[#allocation2 + $0x12b] sm:$0xff] }
 0x1d8   : > { %1735 = vrot.lane.b32.xlu0 %v1649_v62, %s9666_s15  ;;  %1737 = vrot.lane.b32.xlu1 %v1650_v63, %s9666_s15  ;;  %v1842_v63 = vld [vmem:[#allocation2 + $0x123] sm:$0xff] }
 0x1da   : > { %v1366_v7 = vpop.permute.xlu0 %1365  ;;  %v1368_v8 = vpop.permute.xlu1 %1367 }
 0x1db   : > { %1432 = vst.msk [vmem:[#allocation3 + $0xf0] sm:$0xff] %vm1401_vm6, %v1366_v7  ;;  %1433 = vst.msk [vmem:[#allocation3 + $0xf8] sm:$0xff] %vm1401_vm6, %v1368_v8  ;;  %v1845_v7 = vld [vmem:[#allocation2 + $0x143] sm:$0xff]  ;;  %vm4298_vm6 = vcmask 515552  }
 0x1dc   : > { %1739 = vrot.lane.b32.xlu0 %v1651_v3, %s9666_s15  ;;  %1741 = vrot.lane.b32.xlu1 %v1652_v4, %s9666_s15  ;;  %v1844_v4 = vld [vmem:[#allocation2 + $0x13b] sm:$0xff] }
 0x1de   : > { %v1499_v11 = vpop.permute.xlu0 %1498  ;;  %v1501_v12 = vpop.permute.xlu1 %1500 }
 0x1df   : > { %1595 = vst.msk [vmem:[#allocation3] sm:$0xff] %vm1594_vm7, %v1499_v11  ;;  %1596 = vst.msk [vmem:[#allocation3 + $0x8] sm:$0xff] %vm1594_vm7, %v1501_v12  ;;  %v1847_v11 = vld [vmem:[#allocation2 + $0x15b] sm:$0xff] }
 0x1e0   : > { %1743 = vrot.lane.b32.xlu0 %v1653_v9, %s9666_s15  ;;  %1745 = vrot.lane.b32.xlu1 %v1654_v10, %s9666_s15  ;;  %v1846_v10 = vld [vmem:[#allocation2 + $0x153] sm:$0xff] }
 0x1e2   : > { %v1503_v17 = vpop.permute.xlu0 %1502  ;;  %v1505_v18 = vpop.permute.xlu1 %1504 }
 0x1e3   : > { %1597 = vst.msk [vmem:[#allocation3 + $0x10] sm:$0xff] %vm1594_vm7, %v1503_v17  ;;  %1598 = vst.msk [vmem:[#allocation3 + $0x18] sm:$0xff] %vm1594_vm7, %v1505_v18  ;;  %v370_v17 = vld [vmem:[%s9878_s8 + $0xf8] sm:$0xff]  ;;  %v1848_v18 = vld [vmem:[#allocation2 + $0x16b] sm:$0xff] }
 0x1e4   : > { %1747 = vrot.lane.b32.xlu0 %v1655_v15, %s9666_s15  ;;  %1749 = vrot.lane.b32.xlu1 %v1656_v16, %s9666_s15  ;;  %v369_v16 = vld [vmem:[%s9878_s8 + $0xf0] sm:$0xff]  ;;  %403 = vst.msk [vmem:[#allocation2 + $0x1a2] sm:$0xff] %vm277_vm0, %v370_v17  ;;  %s9683_s8 = smov 72  }
 0x1e5   : > { %402 = vst.msk [vmem:[#allocation2 + $0x19a] sm:$0xff] %vm277_vm0, %v369_v16  ;;  %v2040_v16 = vld [vmem:[#allocation2 + $0x15c] sm:$0xff]  ;;  %vm3332_vm0 = vcmask 392552  }
 0x1e6   : > { %v1507_v19 = vpop.permute.xlu0 %1506  ;;  %v1509_v20 = vpop.permute.xlu1 %1508 }
 0x1e7   : > { %1599 = vst.msk [vmem:[#allocation3 + $0x20] sm:$0xff] %vm1594_vm7, %v1507_v19  ;;  %1600 = vst.msk [vmem:[#allocation3 + $0x28] sm:$0xff] %vm1594_vm7, %v1509_v20  ;;  %v1850_v20 = vld [vmem:[#allocation2 + $0x183] sm:$0xff] }
 0x1e8   : > { %1751 = vrot.lane.b32.xlu0 %v1657_v40, %s9666_s15  ;;  %1753 = vrot.lane.b32.xlu1 %v1658_v41, %s9666_s15  ;;  %v1849_v40 = vld [vmem:[#allocation2 + $0x173] sm:$0xff] }
 0x1ea   : > { %v1511_v23 = vpop.permute.xlu0 %1510  ;;  %v1513_v24 = vpop.permute.xlu1 %1512 }
 0x1eb   : > { %1601 = vst.msk [vmem:[#allocation3 + $0x30] sm:$0xff] %vm1594_vm7, %v1511_v23  ;;  %1602 = vst.msk [vmem:[#allocation3 + $0x38] sm:$0xff] %vm1594_vm7, %v1513_v24  ;;  %v2013_v24 = vld [vmem:[#allocation2 + $0x1c] sm:$0xff] }
 0x1ec   : > { %1884 = vrot.lane.b32.xlu0 %v1820_v42, %s9667_s16  ;;  %1886 = vrot.lane.b32.xlu1 %v1821_v43, %s9667_s16  ;;  %v1851_v42 = vld [vmem:[#allocation2 + $0x18b] sm:$0xff] }
 0x1ee   : > { %v1515_v46 = vpop.permute.xlu0 %1514  ;;  %v1517_v48 = vpop.permute.xlu1 %1516 }
 0x1ef   : > { %1603 = vst.msk [vmem:[#allocation3 + $0x40] sm:$0xff] %vm1594_vm7, %v1515_v46  ;;  %1604 = vst.msk [vmem:[#allocation3 + $0x48] sm:$0xff] %vm1594_vm7, %v1517_v48  ;;  %v2015_v48 = vld [vmem:[#allocation2 + $0x34] sm:$0xff] }
 0x1f0   : > { %1888 = vrot.lane.b32.xlu0 %v1822_v44, %s9667_s16  ;;  %1890 = vrot.lane.b32.xlu1 %v1823_v45, %s9667_s16  ;;  %v2014_v44 = vld [vmem:[#allocation2 + $0x24] sm:$0xff] }
 0x1f2   : > { %v1519_v60 = vpop.permute.xlu0 %1518  ;;  %v1521_v61 = vpop.permute.xlu1 %1520 }
 0x1f3   : > { %1605 = vst.msk [vmem:[#allocation3 + $0x50] sm:$0xff] %vm1594_vm7, %v1519_v60  ;;  %1606 = vst.msk [vmem:[#allocation3 + $0x58] sm:$0xff] %vm1594_vm7, %v1521_v61  ;;  %v2017_v61 = vld [vmem:[#allocation2 + $0x4c] sm:$0xff] }
 0x1f4   : > { %1892 = vrot.lane.b32.xlu0 %v1824_v52, %s9667_s16  ;;  %1894 = vrot.lane.b32.xlu1 %v1825_v53, %s9667_s16  ;;  %v2016_v52 = vld [vmem:[#allocation2 + $0x3c] sm:$0xff] }
 0x1f6   : > { %v1523_v13 = vpop.permute.xlu0 %1522  ;;  %v1525_v14 = vpop.permute.xlu1 %1524 }
 0x1f7   : > { %1607 = vst.msk [vmem:[#allocation3 + $0x60] sm:$0xff] %vm1594_vm7, %v1523_v13  ;;  %1608 = vst.msk [vmem:[#allocation3 + $0x68] sm:$0xff] %vm1594_vm7, %v1525_v14  ;;  %v2019_v14 = vld [vmem:[#allocation2 + $0x64] sm:$0xff] }
 0x1f8   : > { %1896 = vrot.lane.b32.xlu0 %v1826_v5, %s9667_s16  ;;  %1898 = vrot.lane.b32.xlu1 %v1827_v6, %s9667_s16  ;;  %v2018_v5 = vld [vmem:[#allocation2 + $0x54] sm:$0xff] }
 0x1fa   : > { %v1527_v25 = vpop.permute.xlu0 %1526  ;;  %v1529_v26 = vpop.permute.xlu1 %1528 }
 0x1fb   : > { %1609 = vst.msk [vmem:[#allocation3 + $0x70] sm:$0xff] %vm1594_vm7, %v1527_v25  ;;  %1610 = vst.msk [vmem:[#allocation3 + $0x78] sm:$0xff] %vm1594_vm7, %v1529_v26  ;;  %v2021_v26 = vld [vmem:[#allocation2 + $0x7c] sm:$0xff] }
 0x1fc   : > { %1900 = vrot.lane.b32.xlu0 %v1828_v21, %s9667_s16  ;;  %1902 = vrot.lane.b32.xlu1 %v1829_v22, %s9667_s16  ;;  %v2020_v21 = vld [vmem:[#allocation2 + $0x6c] sm:$0xff] }
 0x1fe   : > { %v1531_v29 = vpop.permute.xlu0 %1530  ;;  %v1533_v30 = vpop.permute.xlu1 %1532 }
 0x1ff   : > { %1611 = vst.msk [vmem:[#allocation3 + $0x80] sm:$0xff] %vm1594_vm7, %v1531_v29  ;;  %1612 = vst.msk [vmem:[#allocation3 + $0x88] sm:$0xff] %vm1594_vm7, %v1533_v30  ;;  %v2023_v30 = vld [vmem:[#allocation2 + $0x94] sm:$0xff] }
 0x200   : > { %1904 = vrot.lane.b32.xlu0 %v1830_v27, %s9667_s16  ;;  %1906 = vrot.lane.b32.xlu1 %v1831_v28, %s9667_s16  ;;  %v2022_v27 = vld [vmem:[#allocation2 + $0x84] sm:$0xff] }
 0x202   : > { %v1535_v33 = vpop.permute.xlu0 %1534  ;;  %v1537_v34 = vpop.permute.xlu1 %1536 }
 0x203   : > { %1613 = vst.msk [vmem:[#allocation3 + $0x90] sm:$0xff] %vm1594_vm7, %v1535_v33  ;;  %1614 = vst.msk [vmem:[#allocation3 + $0x98] sm:$0xff] %vm1594_vm7, %v1537_v34  ;;  %v2025_v34 = vld [vmem:[#allocation2 + $0xac] sm:$0xff] }
 0x204   : > { %1908 = vrot.lane.b32.xlu0 %v1832_v31, %s9667_s16  ;;  %1910 = vrot.lane.b32.xlu1 %v1833_v32, %s9667_s16  ;;  %v2024_v31 = vld [vmem:[#allocation2 + $0x9c] sm:$0xff] }
 0x206   : > { %v1539_v37 = vpop.permute.xlu0 %1538  ;;  %v1541_v38 = vpop.permute.xlu1 %1540 }
 0x207   : > { %1615 = vst.msk [vmem:[#allocation3 + $0xa0] sm:$0xff] %vm1594_vm7, %v1539_v37  ;;  %1616 = vst.msk [vmem:[#allocation3 + $0xa8] sm:$0xff] %vm1594_vm7, %v1541_v38  ;;  %v2027_v38 = vld [vmem:[#allocation2 + $0xc4] sm:$0xff] }
 0x208   : > { %1912 = vrot.lane.b32.xlu0 %v1834_v35, %s9667_s16  ;;  %1914 = vrot.lane.b32.xlu1 %v1835_v36, %s9667_s16  ;;  %v2026_v35 = vld [vmem:[#allocation2 + $0xb4] sm:$0xff] }
 0x20a   : > { %v1543_v49 = vpop.permute.xlu0 %1542  ;;  %v1545_v50 = vpop.permute.xlu1 %1544 }
 0x20b   : > { %1617 = vst.msk [vmem:[#allocation3 + $0xb0] sm:$0xff] %vm1594_vm7, %v1543_v49  ;;  %1618 = vst.msk [vmem:[#allocation3 + $0xb8] sm:$0xff] %vm1594_vm7, %v1545_v50  ;;  %v2029_v50 = vld [vmem:[#allocation2 + $0xdc] sm:$0xff] }
 0x20c   : > { %1916 = vrot.lane.b32.xlu0 %v1836_v39, %s9667_s16  ;;  %1918 = vrot.lane.b32.xlu1 %v1837_v47, %s9667_s16  ;;  %v2028_v39 = vld [vmem:[#allocation2 + $0xcc] sm:$0xff] }
 0x20e   : > { %v1547_v55 = vpop.permute.xlu0 %1546  ;;  %v1549_v56 = vpop.permute.xlu1 %1548 }
 0x20f   : > { %1619 = vst.msk [vmem:[#allocation3 + $0xc0] sm:$0xff] %vm1594_vm7, %v1547_v55  ;;  %1620 = vst.msk [vmem:[#allocation3 + $0xc8] sm:$0xff] %vm1594_vm7, %v1549_v56  ;;  %v2031_v56 = vld [vmem:[#allocation2 + $0xf4] sm:$0xff] }
 0x210   : > { %1920 = vrot.lane.b32.xlu0 %v1838_v51, %s9667_s16  ;;  %1922 = vrot.lane.b32.xlu1 %v1839_v54, %s9667_s16  ;;  %v2030_v51 = vld [vmem:[#allocation2 + $0xe4] sm:$0xff] }
 0x212   : > { %v1551_v59 = vpop.permute.xlu0 %1550  ;;  %v1553_v62 = vpop.permute.xlu1 %1552 }
 0x213   : > { %1621 = vst.msk [vmem:[#allocation3 + $0xd0] sm:$0xff] %vm1594_vm7, %v1551_v59  ;;  %1622 = vst.msk [vmem:[#allocation3 + $0xd8] sm:$0xff] %vm1594_vm7, %v1553_v62  ;;  %v2033_v62 = vld [vmem:[#allocation2 + $0x10c] sm:$0xff] }
 0x214   : > { %1924 = vrot.lane.b32.xlu0 %v1840_v57, %s9667_s16  ;;  %1926 = vrot.lane.b32.xlu1 %v1841_v58, %s9667_s16  ;;  %v2032_v57 = vld [vmem:[#allocation2 + $0xfc] sm:$0xff] }
 0x216   : > { %v1555_v2 = vpop.permute.xlu0 %1554  ;;  %v1557_v3 = vpop.permute.xlu1 %1556 }
 0x217   : > { %1623 = vst.msk [vmem:[#allocation3 + $0xe0] sm:$0xff] %vm1594_vm7, %v1555_v2  ;;  %1624 = vst.msk [vmem:[#allocation3 + $0xe8] sm:$0xff] %vm1594_vm7, %v1557_v3  ;;  %v2035_v3 = vld [vmem:[#allocation2 + $0x124] sm:$0xff] }
 0x218   : > { %1928 = vrot.lane.b32.xlu0 %v1842_v63, %s9667_s16  ;;  %1930 = vrot.lane.b32.xlu1 %v1843_v0, %s9667_s16  ;;  %v2034_v63 = vld [vmem:[#allocation2 + $0x114] sm:$0xff] }
 0x21a   : > { %v1559_v8 = vpop.permute.xlu0 %1558  ;;  %v1561_v9 = vpop.permute.xlu1 %1560 }
 0x21b   : > { %1625 = vst.msk [vmem:[#allocation3 + $0xf0] sm:$0xff] %vm1594_vm7, %v1559_v8  ;;  %1626 = vst.msk [vmem:[#allocation3 + $0xf8] sm:$0xff] %vm1594_vm7, %v1561_v9  ;;  %v2037_v9 = vld [vmem:[#allocation2 + $0x13c] sm:$0xff]  ;;  %vm4491_vm7 = vcmask 540152  }
 0x21c   : > { %1932 = vrot.lane.b32.xlu0 %v1844_v4, %s9667_s16  ;;  %1934 = vrot.lane.b32.xlu1 %v1845_v7, %s9667_s16  ;;  %v2036_v4 = vld [vmem:[#allocation2 + $0x12c] sm:$0xff] }
 0x21e   : > { %v1692_v12 = vpop.permute.xlu0 %1691  ;;  %v1694_v15 = vpop.permute.xlu1 %1693 }
 0x21f   : > { %1788 = vst.msk [vmem:[#allocation3] sm:$0xff] %vm1787_vm8, %v1692_v12  ;;  %1789 = vst.msk [vmem:[#allocation3 + $0x8] sm:$0xff] %vm1787_vm8, %v1694_v15  ;;  %v2039_v15 = vld [vmem:[#allocation2 + $0x154] sm:$0xff] }
 0x220   : > { %1936 = vrot.lane.b32.xlu0 %v1846_v10, %s9667_s16  ;;  %1938 = vrot.lane.b32.xlu1 %v1847_v11, %s9667_s16  ;;  %v2038_v10 = vld [vmem:[#allocation2 + $0x144] sm:$0xff] }
 0x222   : > { %v1696_v41 = vpop.permute.xlu0 %1695  ;;  %v1698_v19 = vpop.permute.xlu1 %1697 }
 0x223   : > { %1790 = vst.msk [vmem:[#allocation3 + $0x10] sm:$0xff] %vm1787_vm8, %v1696_v41  ;;  %1791 = vst.msk [vmem:[#allocation3 + $0x18] sm:$0xff] %vm1787_vm8, %v1698_v19  ;;  %v2042_v41 = vld [vmem:[#allocation2 + $0x174] sm:$0xff] }
 0x224   : > { %1940 = vrot.lane.b32.xlu0 %v1848_v18, %s9667_s16  ;;  %1942 = vrot.lane.b32.xlu1 %v1849_v40, %s9667_s16  ;;  %v2041_v40 = vld [vmem:[#allocation2 + $0x16c] sm:$0xff] }
 0x226   : > { %v1700_v43 = vpop.permute.xlu0 %1699  ;;  %v1702_v23 = vpop.permute.xlu1 %1701 }
 0x227   : > { %1792 = vst.msk [vmem:[#allocation3 + $0x20] sm:$0xff] %vm1787_vm8, %v1700_v43  ;;  %1793 = vst.msk [vmem:[#allocation3 + $0x28] sm:$0xff] %vm1787_vm8, %v1702_v23  ;;  %v2044_v43 = vld [vmem:[#allocation2 + $0x18c] sm:$0xff] }
 0x228   : > { %1944 = vrot.lane.b32.xlu0 %v1850_v20, %s9667_s16  ;;  %1946 = vrot.lane.b32.xlu1 %v1851_v42, %s9667_s16  ;;  %v2043_v42 = vld [vmem:[#allocation2 + $0x184] sm:$0xff] }
 0x22a   : > { %v1704_v45 = vpop.permute.xlu0 %1703  ;;  %v1706_v46 = vpop.permute.xlu1 %1705 }
 0x22b   : > { %1794 = vst.msk [vmem:[#allocation3 + $0x30] sm:$0xff] %vm1787_vm8, %v1704_v45  ;;  %1795 = vst.msk [vmem:[#allocation3 + $0x38] sm:$0xff] %vm1787_vm8, %v1706_v46  ;;  %v2207_v45 = vld [vmem:[#allocation2 + $0x38] sm:$0xff] }
 0x22c   : > { %2077 = vrot.lane.b32.xlu0 %v2013_v24, %s9668_s17  ;;  %2079 = vrot.lane.b32.xlu1 %v2014_v44, %s9668_s17  ;;  %v2206_v44 = vld [vmem:[#allocation2 + $0x30] sm:$0xff] }
 0x22e   : > { %v1708_v53 = vpop.permute.xlu0 %1707  ;;  %v1710_v60 = vpop.permute.xlu1 %1709 }
 0x22f   : > { %1796 = vst.msk [vmem:[#allocation3 + $0x40] sm:$0xff] %vm1787_vm8, %v1708_v53  ;;  %1797 = vst.msk [vmem:[#allocation3 + $0x48] sm:$0xff] %vm1787_vm8, %v1710_v60  ;;  %v2209_v53 = vld [vmem:[#allocation2 + $0x50] sm:$0xff] }
 0x230   : > { %2081 = vrot.lane.b32.xlu0 %v2015_v48, %s9668_s17  ;;  %2083 = vrot.lane.b32.xlu1 %v2016_v52, %s9668_s17  ;;  %v2208_v52 = vld [vmem:[#allocation2 + $0x48] sm:$0xff] }
 0x232   : > { %v1712_v6 = vpop.permute.xlu0 %1711  ;;  %v1714_v13 = vpop.permute.xlu1 %1713 }
 0x233   : > { %1798 = vst.msk [vmem:[#allocation3 + $0x50] sm:$0xff] %vm1787_vm8, %v1712_v6  ;;  %1799 = vst.msk [vmem:[#allocation3 + $0x58] sm:$0xff] %vm1787_vm8, %v1714_v13  ;;  %v2211_v6 = vld [vmem:[#allocation2 + $0x68] sm:$0xff] }
 0x234   : > { %2085 = vrot.lane.b32.xlu0 %v2017_v61, %s9668_s17  ;;  %2087 = vrot.lane.b32.xlu1 %v2018_v5, %s9668_s17  ;;  %v2210_v5 = vld [vmem:[#allocation2 + $0x60] sm:$0xff] }
 0x236   : > { %v1716_v22 = vpop.permute.xlu0 %1715  ;;  %v1718_v25 = vpop.permute.xlu1 %1717 }
 0x237   : > { %1800 = vst.msk [vmem:[#allocation3 + $0x60] sm:$0xff] %vm1787_vm8, %v1716_v22  ;;  %1801 = vst.msk [vmem:[#allocation3 + $0x68] sm:$0xff] %vm1787_vm8, %v1718_v25  ;;  %v2213_v22 = vld [vmem:[#allocation2 + $0x80] sm:$0xff] }
 0x238   : > { %2089 = vrot.lane.b32.xlu0 %v2019_v14, %s9668_s17  ;;  %2091 = vrot.lane.b32.xlu1 %v2020_v21, %s9668_s17  ;;  %v2212_v21 = vld [vmem:[#allocation2 + $0x78] sm:$0xff] }
 0x23a   : > { %v1720_v28 = vpop.permute.xlu0 %1719  ;;  %v1722_v29 = vpop.permute.xlu1 %1721 }
 0x23b   : > { %1802 = vst.msk [vmem:[#allocation3 + $0x70] sm:$0xff] %vm1787_vm8, %v1720_v28  ;;  %1803 = vst.msk [vmem:[#allocation3 + $0x78] sm:$0xff] %vm1787_vm8, %v1722_v29  ;;  %v2215_v28 = vld [vmem:[#allocation2 + $0x98] sm:$0xff] }
 0x23c   : > { %2093 = vrot.lane.b32.xlu0 %v2021_v26, %s9668_s17  ;;  %2095 = vrot.lane.b32.xlu1 %v2022_v27, %s9668_s17  ;;  %v2214_v27 = vld [vmem:[#allocation2 + $0x90] sm:$0xff] }
 0x23e   : > { %v1724_v32 = vpop.permute.xlu0 %1723  ;;  %v1726_v33 = vpop.permute.xlu1 %1725 }
 0x23f   : > { %1804 = vst.msk [vmem:[#allocation3 + $0x80] sm:$0xff] %vm1787_vm8, %v1724_v32  ;;  %1805 = vst.msk [vmem:[#allocation3 + $0x88] sm:$0xff] %vm1787_vm8, %v1726_v33  ;;  %v2217_v32 = vld [vmem:[#allocation2 + $0xb0] sm:$0xff] }
 0x240   : > { %2097 = vrot.lane.b32.xlu0 %v2023_v30, %s9668_s17  ;;  %2099 = vrot.lane.b32.xlu1 %v2024_v31, %s9668_s17  ;;  %v2216_v31 = vld [vmem:[#allocation2 + $0xa8] sm:$0xff] }
 0x242   : > { %v1728_v36 = vpop.permute.xlu0 %1727  ;;  %v1730_v37 = vpop.permute.xlu1 %1729 }
 0x243   : > { %1806 = vst.msk [vmem:[#allocation3 + $0x90] sm:$0xff] %vm1787_vm8, %v1728_v36  ;;  %1807 = vst.msk [vmem:[#allocation3 + $0x98] sm:$0xff] %vm1787_vm8, %v1730_v37  ;;  %v2219_v36 = vld [vmem:[#allocation2 + $0xc8] sm:$0xff] }
 0x244   : > { %2101 = vrot.lane.b32.xlu0 %v2025_v34, %s9668_s17  ;;  %2103 = vrot.lane.b32.xlu1 %v2026_v35, %s9668_s17  ;;  %v2218_v35 = vld [vmem:[#allocation2 + $0xc0] sm:$0xff] }
 0x246   : > { %v1732_v47 = vpop.permute.xlu0 %1731  ;;  %v1734_v49 = vpop.permute.xlu1 %1733 }
 0x247   : > { %1808 = vst.msk [vmem:[#allocation3 + $0xa0] sm:$0xff] %vm1787_vm8, %v1732_v47  ;;  %1809 = vst.msk [vmem:[#allocation3 + $0xa8] sm:$0xff] %vm1787_vm8, %v1734_v49  ;;  %v2221_v47 = vld [vmem:[#allocation2 + $0xe0] sm:$0xff] }
 0x248   : > { %2105 = vrot.lane.b32.xlu0 %v2027_v38, %s9668_s17  ;;  %2107 = vrot.lane.b32.xlu1 %v2028_v39, %s9668_s17  ;;  %v2220_v39 = vld [vmem:[#allocation2 + $0xd8] sm:$0xff] }
 0x24a   : > { %v1736_v54 = vpop.permute.xlu0 %1735  ;;  %v1738_v55 = vpop.permute.xlu1 %1737 }
 0x24b   : > { %1810 = vst.msk [vmem:[#allocation3 + $0xb0] sm:$0xff] %vm1787_vm8, %v1736_v54  ;;  %1811 = vst.msk [vmem:[#allocation3 + $0xb8] sm:$0xff] %vm1787_vm8, %v1738_v55  ;;  %v2223_v54 = vld [vmem:[#allocation2 + $0xf8] sm:$0xff] }
 0x24c   : > { %2109 = vrot.lane.b32.xlu0 %v2029_v50, %s9668_s17  ;;  %2111 = vrot.lane.b32.xlu1 %v2030_v51, %s9668_s17  ;;  %v2222_v51 = vld [vmem:[#allocation2 + $0xf0] sm:$0xff] }
 0x24e   : > { %v1740_v58 = vpop.permute.xlu0 %1739  ;;  %v1742_v59 = vpop.permute.xlu1 %1741 }
 0x24f   : > { %1812 = vst.msk [vmem:[#allocation3 + $0xc0] sm:$0xff] %vm1787_vm8, %v1740_v58  ;;  %1813 = vst.msk [vmem:[#allocation3 + $0xc8] sm:$0xff] %vm1787_vm8, %v1742_v59  ;;  %v2225_v58 = vld [vmem:[#allocation2 + $0x110] sm:$0xff] }
 0x250   : > { %2113 = vrot.lane.b32.xlu0 %v2031_v56, %s9668_s17  ;;  %2115 = vrot.lane.b32.xlu1 %v2032_v57, %s9668_s17  ;;  %v2224_v57 = vld [vmem:[#allocation2 + $0x108] sm:$0xff] }
 0x252   : > { %v1744_v0 = vpop.permute.xlu0 %1743  ;;  %v1746_v2 = vpop.permute.xlu1 %1745 }
 0x253   : > { %1814 = vst.msk [vmem:[#allocation3 + $0xd0] sm:$0xff] %vm1787_vm8, %v1744_v0  ;;  %1815 = vst.msk [vmem:[#allocation3 + $0xd8] sm:$0xff] %vm1787_vm8, %v1746_v2  ;;  %v2227_v0 = vld [vmem:[#allocation2 + $0x128] sm:$0xff] }
 0x254   : > { %2117 = vrot.lane.b32.xlu0 %v2033_v62, %s9668_s17  ;;  %2119 = vrot.lane.b32.xlu1 %v2034_v63, %s9668_s17  ;;  %v2226_v63 = vld [vmem:[#allocation2 + $0x120] sm:$0xff] }
 0x256   : > { %v1748_v7 = vpop.permute.xlu0 %1747  ;;  %v1750_v8 = vpop.permute.xlu1 %1749 }
 0x257   : > { %1816 = vst.msk [vmem:[#allocation3 + $0xe0] sm:$0xff] %vm1787_vm8, %v1748_v7  ;;  %1817 = vst.msk [vmem:[#allocation3 + $0xe8] sm:$0xff] %vm1787_vm8, %v1750_v8  ;;  %v2229_v7 = vld [vmem:[#allocation2 + $0x140] sm:$0xff] }
 0x258   : > { %2121 = vrot.lane.b32.xlu0 %v2035_v3, %s9668_s17  ;;  %2123 = vrot.lane.b32.xlu1 %v2036_v4, %s9668_s17  ;;  %v2228_v4 = vld [vmem:[#allocation2 + $0x138] sm:$0xff] }
 0x25a   : > { %v1752_v11 = vpop.permute.xlu0 %1751  ;;  %v1754_v12 = vpop.permute.xlu1 %1753 }
 0x25b   : > { %1818 = vst.msk [vmem:[#allocation3 + $0xf0] sm:$0xff] %vm1787_vm8, %v1752_v11  ;;  %1819 = vst.msk [vmem:[#allocation3 + $0xf8] sm:$0xff] %vm1787_vm8, %v1754_v12  ;;  %v2231_v11 = vld [vmem:[#allocation2 + $0x158] sm:$0xff]  ;;  %vm4684_vm8 = vcmask 564752  }
 0x25c   : > { %2125 = vrot.lane.b32.xlu0 %v2037_v9, %s9668_s17  ;;  %2127 = vrot.lane.b32.xlu1 %v2038_v10, %s9668_s17  ;;  %v2230_v10 = vld [vmem:[#allocation2 + $0x150] sm:$0xff] }
 0x25e   : > { %v1885_v17 = vpop.permute.xlu0 %1884  ;;  %v1887_v18 = vpop.permute.xlu1 %1886 }
 0x25f   : > { %1981 = vst.msk [vmem:[#allocation3] sm:$0xff] %vm1980_vm9, %v1885_v17  ;;  %1982 = vst.msk [vmem:[#allocation3 + $0x8] sm:$0xff] %vm1980_vm9, %v1887_v18  ;;  %v2233_v17 = vld [vmem:[#allocation2 + $0x170] sm:$0xff] }
 0x260   : > { %2129 = vrot.lane.b32.xlu0 %v2039_v15, %s9668_s17  ;;  %2131 = vrot.lane.b32.xlu1 %v2040_v16, %s9668_s17  ;;  %v2232_v16 = vld [vmem:[#allocation2 + $0x168] sm:$0xff] }
 0x262   : > { %v1889_v19 = vpop.permute.xlu0 %1888  ;;  %v1891_v20 = vpop.permute.xlu1 %1890 }
 0x263   : > { %1983 = vst.msk [vmem:[#allocation3 + $0x10] sm:$0xff] %vm1980_vm9, %v1889_v19  ;;  %1984 = vst.msk [vmem:[#allocation3 + $0x18] sm:$0xff] %vm1980_vm9, %v1891_v20  ;;  %v2235_v19 = vld [vmem:[#allocation2 + $0x188] sm:$0xff] }
 0x264   : > { %2133 = vrot.lane.b32.xlu0 %v2041_v40, %s9668_s17  ;;  %2135 = vrot.lane.b32.xlu1 %v2042_v41, %s9668_s17  ;;  %v2234_v41 = vld [vmem:[#allocation2 + $0x180] sm:$0xff] }
 0x266   : > { %v1893_v23 = vpop.permute.xlu0 %1892  ;;  %v1895_v24 = vpop.permute.xlu1 %1894 }
 0x267   : > { %1985 = vst.msk [vmem:[#allocation3 + $0x20] sm:$0xff] %vm1980_vm9, %v1893_v23  ;;  %1986 = vst.msk [vmem:[#allocation3 + $0x28] sm:$0xff] %vm1980_vm9, %v1895_v24  ;;  %v2237_v23 = vld [vmem:[#allocation2 + $0x1a0] sm:$0xff] }
 0x268   : > { %2137 = vrot.lane.b32.xlu0 %v2043_v42, %s9668_s17  ;;  %2139 = vrot.lane.b32.xlu1 %v2044_v43, %s9668_s17  ;;  %v2236_v43 = vld [vmem:[#allocation2 + $0x198] sm:$0xff]  ;;  %s9690_s17 = smov 112  }
 0x26a   : > { %v1897_v46 = vpop.permute.xlu0 %1896  ;;  %v1899_v48 = vpop.permute.xlu1 %1898 }
 0x26b   : > { %1987 = vst.msk [vmem:[#allocation3 + $0x30] sm:$0xff] %vm1980_vm9, %v1897_v46  ;;  %1988 = vst.msk [vmem:[#allocation3 + $0x38] sm:$0xff] %vm1980_vm9, %v1899_v48  ;;  %v2400_v46 = vld [vmem:[#allocation2 + $0x39] sm:$0xff] }
 0x26c   : > { %2270 = vrot.lane.b32.xlu0 %v2206_v44, %s9669_s18  ;;  %2272 = vrot.lane.b32.xlu1 %v2207_v45, %s9669_s18  ;;  %v2399_v45 = vld [vmem:[#allocation2 + $0x31] sm:$0xff] }
 0x26e   : > { %v1901_v60 = vpop.permute.xlu0 %1900  ;;  %v1903_v61 = vpop.permute.xlu1 %1902 }
 0x26f   : > { %1989 = vst.msk [vmem:[#allocation3 + $0x40] sm:$0xff] %vm1980_vm9, %v1901_v60  ;;  %1990 = vst.msk [vmem:[#allocation3 + $0x48] sm:$0xff] %vm1980_vm9, %v1903_v61  ;;  %v2402_v60 = vld [vmem:[#allocation2 + $0x51] sm:$0xff] }
 0x270   : > { %2274 = vrot.lane.b32.xlu0 %v2208_v52, %s9669_s18  ;;  %2276 = vrot.lane.b32.xlu1 %v2209_v53, %s9669_s18  ;;  %v2401_v53 = vld [vmem:[#allocation2 + $0x49] sm:$0xff] }
 0x272   : > { %v1905_v13 = vpop.permute.xlu0 %1904  ;;  %v1907_v14 = vpop.permute.xlu1 %1906 }
 0x273   : > { %1991 = vst.msk [vmem:[#allocation3 + $0x50] sm:$0xff] %vm1980_vm9, %v1905_v13  ;;  %1992 = vst.msk [vmem:[#allocation3 + $0x58] sm:$0xff] %vm1980_vm9, %v1907_v14  ;;  %v2404_v13 = vld [vmem:[#allocation2 + $0x69] sm:$0xff] }
 0x274   : > { %2278 = vrot.lane.b32.xlu0 %v2210_v5, %s9669_s18  ;;  %2280 = vrot.lane.b32.xlu1 %v2211_v6, %s9669_s18  ;;  %v2403_v6 = vld [vmem:[#allocation2 + $0x61] sm:$0xff] }
 0x276   : > { %v1909_v25 = vpop.permute.xlu0 %1908  ;;  %v1911_v26 = vpop.permute.xlu1 %1910 }
 0x277   : > { %1993 = vst.msk [vmem:[#allocation3 + $0x60] sm:$0xff] %vm1980_vm9, %v1909_v25  ;;  %1994 = vst.msk [vmem:[#allocation3 + $0x68] sm:$0xff] %vm1980_vm9, %v1911_v26  ;;  %v2406_v25 = vld [vmem:[#allocation2 + $0x81] sm:$0xff] }
 0x278   : > { %2282 = vrot.lane.b32.xlu0 %v2212_v21, %s9669_s18  ;;  %2284 = vrot.lane.b32.xlu1 %v2213_v22, %s9669_s18  ;;  %v2405_v22 = vld [vmem:[#allocation2 + $0x79] sm:$0xff] }
 0x27a   : > { %v1913_v29 = vpop.permute.xlu0 %1912  ;;  %v1915_v30 = vpop.permute.xlu1 %1914 }
 0x27b   : > { %1995 = vst.msk [vmem:[#allocation3 + $0x70] sm:$0xff] %vm1980_vm9, %v1913_v29  ;;  %1996 = vst.msk [vmem:[#allocation3 + $0x78] sm:$0xff] %vm1980_vm9, %v1915_v30  ;;  %v2408_v29 = vld [vmem:[#allocation2 + $0x99] sm:$0xff] }
 0x27c   : > { %2286 = vrot.lane.b32.xlu0 %v2214_v27, %s9669_s18  ;;  %2288 = vrot.lane.b32.xlu1 %v2215_v28, %s9669_s18  ;;  %v2407_v28 = vld [vmem:[#allocation2 + $0x91] sm:$0xff] }
 0x27e   : > { %v1917_v33 = vpop.permute.xlu0 %1916  ;;  %v1919_v34 = vpop.permute.xlu1 %1918 }
 0x27f   : > { %1997 = vst.msk [vmem:[#allocation3 + $0x80] sm:$0xff] %vm1980_vm9, %v1917_v33  ;;  %1998 = vst.msk [vmem:[#allocation3 + $0x88] sm:$0xff] %vm1980_vm9, %v1919_v34  ;;  %v2410_v33 = vld [vmem:[#allocation2 + $0xb1] sm:$0xff] }
 0x280   : > { %2290 = vrot.lane.b32.xlu0 %v2216_v31, %s9669_s18  ;;  %2292 = vrot.lane.b32.xlu1 %v2217_v32, %s9669_s18  ;;  %v2409_v32 = vld [vmem:[#allocation2 + $0xa9] sm:$0xff] }
 0x282   : > { %v1921_v37 = vpop.permute.xlu0 %1920  ;;  %v1923_v38 = vpop.permute.xlu1 %1922 }
 0x283   : > { %1999 = vst.msk [vmem:[#allocation3 + $0x90] sm:$0xff] %vm1980_vm9, %v1921_v37  ;;  %2000 = vst.msk [vmem:[#allocation3 + $0x98] sm:$0xff] %vm1980_vm9, %v1923_v38  ;;  %v2412_v37 = vld [vmem:[#allocation2 + $0xc9] sm:$0xff] }
 0x284   : > { %2294 = vrot.lane.b32.xlu0 %v2218_v35, %s9669_s18  ;;  %2296 = vrot.lane.b32.xlu1 %v2219_v36, %s9669_s18  ;;  %v2411_v36 = vld [vmem:[#allocation2 + $0xc1] sm:$0xff] }
 0x286   : > { %v1925_v49 = vpop.permute.xlu0 %1924  ;;  %v1927_v50 = vpop.permute.xlu1 %1926 }
 0x287   : > { %2001 = vst.msk [vmem:[#allocation3 + $0xa0] sm:$0xff] %vm1980_vm9, %v1925_v49  ;;  %2002 = vst.msk [vmem:[#allocation3 + $0xa8] sm:$0xff] %vm1980_vm9, %v1927_v50  ;;  %v2414_v49 = vld [vmem:[#allocation2 + $0xe1] sm:$0xff] }
 0x288   : > { %2298 = vrot.lane.b32.xlu0 %v2220_v39, %s9669_s18  ;;  %2300 = vrot.lane.b32.xlu1 %v2221_v47, %s9669_s18  ;;  %v2413_v47 = vld [vmem:[#allocation2 + $0xd9] sm:$0xff] }
 0x28a   : > { %v1929_v55 = vpop.permute.xlu0 %1928  ;;  %v1931_v56 = vpop.permute.xlu1 %1930 }
 0x28b   : > { %2003 = vst.msk [vmem:[#allocation3 + $0xb0] sm:$0xff] %vm1980_vm9, %v1929_v55  ;;  %2004 = vst.msk [vmem:[#allocation3 + $0xb8] sm:$0xff] %vm1980_vm9, %v1931_v56  ;;  %v2416_v55 = vld [vmem:[#allocation2 + $0xf9] sm:$0xff] }
 0x28c   : > { %2302 = vrot.lane.b32.xlu0 %v2222_v51, %s9669_s18  ;;  %2304 = vrot.lane.b32.xlu1 %v2223_v54, %s9669_s18  ;;  %v2415_v54 = vld [vmem:[#allocation2 + $0xf1] sm:$0xff] }
 0x28e   : > { %v1933_v59 = vpop.permute.xlu0 %1932  ;;  %v1935_v62 = vpop.permute.xlu1 %1934 }
 0x28f   : > { %2005 = vst.msk [vmem:[#allocation3 + $0xc0] sm:$0xff] %vm1980_vm9, %v1933_v59  ;;  %2006 = vst.msk [vmem:[#allocation3 + $0xc8] sm:$0xff] %vm1980_vm9, %v1935_v62  ;;  %v2418_v59 = vld [vmem:[#allocation2 + $0x111] sm:$0xff] }
 0x290   : > { %2306 = vrot.lane.b32.xlu0 %v2224_v57, %s9669_s18  ;;  %2308 = vrot.lane.b32.xlu1 %v2225_v58, %s9669_s18  ;;  %v2417_v58 = vld [vmem:[#allocation2 + $0x109] sm:$0xff] }
 0x292   : > { %v1937_v2 = vpop.permute.xlu0 %1936  ;;  %v1939_v3 = vpop.permute.xlu1 %1938 }
 0x293   : > { %2007 = vst.msk [vmem:[#allocation3 + $0xd0] sm:$0xff] %vm1980_vm9, %v1937_v2  ;;  %2008 = vst.msk [vmem:[#allocation3 + $0xd8] sm:$0xff] %vm1980_vm9, %v1939_v3  ;;  %v2420_v2 = vld [vmem:[#allocation2 + $0x129] sm:$0xff] }
 0x294   : > { %2310 = vrot.lane.b32.xlu0 %v2226_v63, %s9669_s18  ;;  %2312 = vrot.lane.b32.xlu1 %v2227_v0, %s9669_s18  ;;  %v2419_v0 = vld [vmem:[#allocation2 + $0x121] sm:$0xff] }
 0x296   : > { %v1941_v8 = vpop.permute.xlu0 %1940  ;;  %v1943_v9 = vpop.permute.xlu1 %1942 }
 0x297   : > { %2009 = vst.msk [vmem:[#allocation3 + $0xe0] sm:$0xff] %vm1980_vm9, %v1941_v8  ;;  %2010 = vst.msk [vmem:[#allocation3 + $0xe8] sm:$0xff] %vm1980_vm9, %v1943_v9  ;;  %v2422_v8 = vld [vmem:[#allocation2 + $0x141] sm:$0xff] }
 0x298   : > { %2314 = vrot.lane.b32.xlu0 %v2228_v4, %s9669_s18  ;;  %2316 = vrot.lane.b32.xlu1 %v2229_v7, %s9669_s18  ;;  %v2421_v7 = vld [vmem:[#allocation2 + $0x139] sm:$0xff] }
 0x29a   : > { %v1945_v12 = vpop.permute.xlu0 %1944  ;;  %v1947_v15 = vpop.permute.xlu1 %1946 }
 0x29b   : > { %2011 = vst.msk [vmem:[#allocation3 + $0xf0] sm:$0xff] %vm1980_vm9, %v1945_v12  ;;  %2012 = vst.msk [vmem:[#allocation3 + $0xf8] sm:$0xff] %vm1980_vm9, %v1947_v15  ;;  %v2424_v12 = vld [vmem:[#allocation2 + $0x159] sm:$0xff]  ;;  %vm4877_vm9 = vcmask 589352  }
 0x29c   : > { %2318 = vrot.lane.b32.xlu0 %v2230_v10, %s9669_s18  ;;  %2320 = vrot.lane.b32.xlu1 %v2231_v11, %s9669_s18  ;;  %v2423_v11 = vld [vmem:[#allocation2 + $0x151] sm:$0xff] }
 0x29e   : > { %v2078_v18 = vpop.permute.xlu0 %2077  ;;  %v2080_v40 = vpop.permute.xlu1 %2079 }
 0x29f   : > { %2174 = vst.msk [vmem:[#allocation3] sm:$0xff] %vm2173_vm10, %v2078_v18  ;;  %2175 = vst.msk [vmem:[#allocation3 + $0x8] sm:$0xff] %vm2173_vm10, %v2080_v40  ;;  %v2426_v18 = vld [vmem:[#allocation2 + $0x171] sm:$0xff] }
 0x2a0   : > { %2322 = vrot.lane.b32.xlu0 %v2232_v16, %s9669_s18  ;;  %2324 = vrot.lane.b32.xlu1 %v2233_v17, %s9669_s18  ;;  %v2425_v17 = vld [vmem:[#allocation2 + $0x169] sm:$0xff] }
 0x2a2   : > { %v2082_v20 = vpop.permute.xlu0 %2081  ;;  %v2084_v42 = vpop.permute.xlu1 %2083 }
 0x2a3   : > { %2176 = vst.msk [vmem:[#allocation3 + $0x10] sm:$0xff] %vm2173_vm10, %v2082_v20  ;;  %2177 = vst.msk [vmem:[#allocation3 + $0x18] sm:$0xff] %vm2173_vm10, %v2084_v42  ;;  %v2428_v20 = vld [vmem:[#allocation2 + $0x189] sm:$0xff] }
 0x2a4   : > { %2326 = vrot.lane.b32.xlu0 %v2234_v41, %s9669_s18  ;;  %2328 = vrot.lane.b32.xlu1 %v2235_v19, %s9669_s18  ;;  %v2427_v19 = vld [vmem:[#allocation2 + $0x181] sm:$0xff] }
 0x2a6   : > { %v2086_v24 = vpop.permute.xlu0 %2085  ;;  %v2088_v44 = vpop.permute.xlu1 %2087 }
 0x2a7   : > { %2178 = vst.msk [vmem:[#allocation3 + $0x20] sm:$0xff] %vm2173_vm10, %v2086_v24  ;;  %2179 = vst.msk [vmem:[#allocation3 + $0x28] sm:$0xff] %vm2173_vm10, %v2088_v44  ;;  %v2430_v24 = vld [vmem:[#allocation2 + $0x1a1] sm:$0xff] }
 0x2a8   : > { %2330 = vrot.lane.b32.xlu0 %v2236_v43, %s9669_s18  ;;  %2332 = vrot.lane.b32.xlu1 %v2237_v23, %s9669_s18  ;;  %v2429_v23 = vld [vmem:[#allocation2 + $0x199] sm:$0xff]  ;;  %s276_s18 = scalar_lea.vmem %s13327_s7, %s13330_s27 }
 0x2aa   : > { %v2090_v48 = vpop.permute.xlu0 %2089  ;;  %v2092_v52 = vpop.permute.xlu1 %2091 }
 0x2ab   : > { %2180 = vst.msk [vmem:[#allocation3 + $0x30] sm:$0xff] %vm2173_vm10, %v2090_v48  ;;  %2181 = vst.msk [vmem:[#allocation3 + $0x38] sm:$0xff] %vm2173_vm10, %v2092_v52  ;;  %v2593_v48 = vld [vmem:[#allocation2 + $0x3a] sm:$0xff] }
 0x2ac   : > { %2463 = vrot.lane.b32.xlu0 %v2399_v45, %s9670_s19  ;;  %2465 = vrot.lane.b32.xlu1 %v2400_v46, %s9670_s19  ;;  %v2592_v46 = vld [vmem:[#allocation2 + $0x32] sm:$0xff] }
 0x2ae   : > { %v2094_v61 = vpop.permute.xlu0 %2093  ;;  %v2096_v5 = vpop.permute.xlu1 %2095 }
 0x2af   : > { %2182 = vst.msk [vmem:[#allocation3 + $0x40] sm:$0xff] %vm2173_vm10, %v2094_v61  ;;  %2183 = vst.msk [vmem:[#allocation3 + $0x48] sm:$0xff] %vm2173_vm10, %v2096_v5  ;;  %v2595_v61 = vld [vmem:[#allocation2 + $0x52] sm:$0xff] }
 0x2b0   : > { %2467 = vrot.lane.b32.xlu0 %v2401_v53, %s9670_s19  ;;  %2469 = vrot.lane.b32.xlu1 %v2402_v60, %s9670_s19  ;;  %v2594_v60 = vld [vmem:[#allocation2 + $0x4a] sm:$0xff] }
 0x2b2   : > { %v2098_v14 = vpop.permute.xlu0 %2097  ;;  %v2100_v21 = vpop.permute.xlu1 %2099 }
 0x2b3   : > { %2184 = vst.msk [vmem:[#allocation3 + $0x50] sm:$0xff] %vm2173_vm10, %v2098_v14  ;;  %2185 = vst.msk [vmem:[#allocation3 + $0x58] sm:$0xff] %vm2173_vm10, %v2100_v21  ;;  %v2597_v14 = vld [vmem:[#allocation2 + $0x6a] sm:$0xff] }
 0x2b4   : > { %2471 = vrot.lane.b32.xlu0 %v2403_v6, %s9670_s19  ;;  %2473 = vrot.lane.b32.xlu1 %v2404_v13, %s9670_s19  ;;  %v2596_v13 = vld [vmem:[#allocation2 + $0x62] sm:$0xff] }
 0x2b6   : > { %v2102_v26 = vpop.permute.xlu0 %2101  ;;  %v2104_v27 = vpop.permute.xlu1 %2103 }
 0x2b7   : > { %2186 = vst.msk [vmem:[#allocation3 + $0x60] sm:$0xff] %vm2173_vm10, %v2102_v26  ;;  %2187 = vst.msk [vmem:[#allocation3 + $0x68] sm:$0xff] %vm2173_vm10, %v2104_v27  ;;  %v2599_v26 = vld [vmem:[#allocation2 + $0x82] sm:$0xff] }
 0x2b8   : > { %2475 = vrot.lane.b32.xlu0 %v2405_v22, %s9670_s19  ;;  %2477 = vrot.lane.b32.xlu1 %v2406_v25, %s9670_s19  ;;  %v2598_v25 = vld [vmem:[#allocation2 + $0x7a] sm:$0xff] }
 0x2ba   : > { %v2106_v30 = vpop.permute.xlu0 %2105  ;;  %v2108_v31 = vpop.permute.xlu1 %2107 }
 0x2bb   : > { %2188 = vst.msk [vmem:[#allocation3 + $0x70] sm:$0xff] %vm2173_vm10, %v2106_v30  ;;  %2189 = vst.msk [vmem:[#allocation3 + $0x78] sm:$0xff] %vm2173_vm10, %v2108_v31  ;;  %v2601_v30 = vld [vmem:[#allocation2 + $0x9a] sm:$0xff] }
 0x2bc   : > { %2479 = vrot.lane.b32.xlu0 %v2407_v28, %s9670_s19  ;;  %2481 = vrot.lane.b32.xlu1 %v2408_v29, %s9670_s19  ;;  %v2600_v29 = vld [vmem:[#allocation2 + $0x92] sm:$0xff] }
 0x2be   : > { %v2110_v34 = vpop.permute.xlu0 %2109  ;;  %v2112_v35 = vpop.permute.xlu1 %2111 }
 0x2bf   : > { %2190 = vst.msk [vmem:[#allocation3 + $0x80] sm:$0xff] %vm2173_vm10, %v2110_v34  ;;  %2191 = vst.msk [vmem:[#allocation3 + $0x88] sm:$0xff] %vm2173_vm10, %v2112_v35  ;;  %v2603_v34 = vld [vmem:[#allocation2 + $0xb2] sm:$0xff] }
 0x2c0   : > { %2483 = vrot.lane.b32.xlu0 %v2409_v32, %s9670_s19  ;;  %2485 = vrot.lane.b32.xlu1 %v2410_v33, %s9670_s19  ;;  %v2602_v33 = vld [vmem:[#allocation2 + $0xaa] sm:$0xff] }
 0x2c2   : > { %v2114_v38 = vpop.permute.xlu0 %2113  ;;  %v2116_v39 = vpop.permute.xlu1 %2115 }
 0x2c3   : > { %2192 = vst.msk [vmem:[#allocation3 + $0x90] sm:$0xff] %vm2173_vm10, %v2114_v38  ;;  %2193 = vst.msk [vmem:[#allocation3 + $0x98] sm:$0xff] %vm2173_vm10, %v2116_v39  ;;  %v2605_v38 = vld [vmem:[#allocation2 + $0xca] sm:$0xff] }
 0x2c4   : > { %2487 = vrot.lane.b32.xlu0 %v2411_v36, %s9670_s19  ;;  %2489 = vrot.lane.b32.xlu1 %v2412_v37, %s9670_s19  ;;  %v2604_v37 = vld [vmem:[#allocation2 + $0xc2] sm:$0xff] }
 0x2c6   : > { %v2118_v50 = vpop.permute.xlu0 %2117  ;;  %v2120_v51 = vpop.permute.xlu1 %2119 }
 0x2c7   : > { %2194 = vst.msk [vmem:[#allocation3 + $0xa0] sm:$0xff] %vm2173_vm10, %v2118_v50  ;;  %2195 = vst.msk [vmem:[#allocation3 + $0xa8] sm:$0xff] %vm2173_vm10, %v2120_v51  ;;  %v2607_v50 = vld [vmem:[#allocation2 + $0xe2] sm:$0xff] }
 0x2c8   : > { %2491 = vrot.lane.b32.xlu0 %v2413_v47, %s9670_s19  ;;  %2493 = vrot.lane.b32.xlu1 %v2414_v49, %s9670_s19  ;;  %v2606_v49 = vld [vmem:[#allocation2 + $0xda] sm:$0xff] }
 0x2ca   : > { %v2122_v56 = vpop.permute.xlu0 %2121  ;;  %v2124_v57 = vpop.permute.xlu1 %2123 }
 0x2cb   : > { %2196 = vst.msk [vmem:[#allocation3 + $0xb0] sm:$0xff] %vm2173_vm10, %v2122_v56  ;;  %2197 = vst.msk [vmem:[#allocation3 + $0xb8] sm:$0xff] %vm2173_vm10, %v2124_v57  ;;  %v2609_v56 = vld [vmem:[#allocation2 + $0xfa] sm:$0xff] }
 0x2cc   : > { %2495 = vrot.lane.b32.xlu0 %v2415_v54, %s9670_s19  ;;  %2497 = vrot.lane.b32.xlu1 %v2416_v55, %s9670_s19  ;;  %v2608_v55 = vld [vmem:[#allocation2 + $0xf2] sm:$0xff] }
 0x2ce   : > { %v2126_v62 = vpop.permute.xlu0 %2125  ;;  %v2128_v63 = vpop.permute.xlu1 %2127 }
 0x2cf   : > { %2198 = vst.msk [vmem:[#allocation3 + $0xc0] sm:$0xff] %vm2173_vm10, %v2126_v62  ;;  %2199 = vst.msk [vmem:[#allocation3 + $0xc8] sm:$0xff] %vm2173_vm10, %v2128_v63  ;;  %v2611_v62 = vld [vmem:[#allocation2 + $0x112] sm:$0xff] }
 0x2d0   : > { %2499 = vrot.lane.b32.xlu0 %v2417_v58, %s9670_s19  ;;  %2501 = vrot.lane.b32.xlu1 %v2418_v59, %s9670_s19  ;;  %v2610_v59 = vld [vmem:[#allocation2 + $0x10a] sm:$0xff] }
 0x2d2   : > { %v2130_v3 = vpop.permute.xlu0 %2129  ;;  %v2132_v4 = vpop.permute.xlu1 %2131 }
 0x2d3   : > { %2200 = vst.msk [vmem:[#allocation3 + $0xd0] sm:$0xff] %vm2173_vm10, %v2130_v3  ;;  %2201 = vst.msk [vmem:[#allocation3 + $0xd8] sm:$0xff] %vm2173_vm10, %v2132_v4  ;;  %v2613_v3 = vld [vmem:[#allocation2 + $0x12a] sm:$0xff] }
 0x2d4   : > { %2503 = vrot.lane.b32.xlu0 %v2419_v0, %s9670_s19  ;;  %2505 = vrot.lane.b32.xlu1 %v2420_v2, %s9670_s19  ;;  %v2612_v2 = vld [vmem:[#allocation2 + $0x122] sm:$0xff] }
 0x2d6   : > { %v2134_v9 = vpop.permute.xlu0 %2133  ;;  %v2136_v10 = vpop.permute.xlu1 %2135 }
 0x2d7   : > { %2202 = vst.msk [vmem:[#allocation3 + $0xe0] sm:$0xff] %vm2173_vm10, %v2134_v9  ;;  %2203 = vst.msk [vmem:[#allocation3 + $0xe8] sm:$0xff] %vm2173_vm10, %v2136_v10  ;;  %v2615_v9 = vld [vmem:[#allocation2 + $0x142] sm:$0xff] }
 0x2d8   : > { %2507 = vrot.lane.b32.xlu0 %v2421_v7, %s9670_s19  ;;  %2509 = vrot.lane.b32.xlu1 %v2422_v8, %s9670_s19  ;;  %v2614_v8 = vld [vmem:[#allocation2 + $0x13a] sm:$0xff] }
 0x2da   : > { %v2138_v15 = vpop.permute.xlu0 %2137  ;;  %v2140_v16 = vpop.permute.xlu1 %2139 }
 0x2db   : > { %2204 = vst.msk [vmem:[#allocation3 + $0xf0] sm:$0xff] %vm2173_vm10, %v2138_v15  ;;  %2205 = vst.msk [vmem:[#allocation3 + $0xf8] sm:$0xff] %vm2173_vm10, %v2140_v16  ;;  %v2617_v15 = vld [vmem:[#allocation2 + $0x15a] sm:$0xff]  ;;  %vm5070_vm10 = vcmask 613952  }
 0x2dc   : > { %2511 = vrot.lane.b32.xlu0 %v2423_v11, %s9670_s19  ;;  %2513 = vrot.lane.b32.xlu1 %v2424_v12, %s9670_s19  ;;  %v2616_v12 = vld [vmem:[#allocation2 + $0x152] sm:$0xff] }
 0x2de   : > { %v2271_v40 = vpop.permute.xlu0 %2270  ;;  %v2273_v41 = vpop.permute.xlu1 %2272 }
 0x2df   : > { %2367 = vst.msk [vmem:[#allocation3] sm:$0xff] %vm2366_vm11, %v2271_v40  ;;  %2368 = vst.msk [vmem:[#allocation3 + $0x8] sm:$0xff] %vm2366_vm11, %v2273_v41  ;;  %v2619_v40 = vld [vmem:[#allocation2 + $0x172] sm:$0xff] }
 0x2e0   : > { %2515 = vrot.lane.b32.xlu0 %v2425_v17, %s9670_s19  ;;  %2517 = vrot.lane.b32.xlu1 %v2426_v18, %s9670_s19  ;;  %v2618_v18 = vld [vmem:[#allocation2 + $0x16a] sm:$0xff] }
 0x2e2   : > { %v2275_v42 = vpop.permute.xlu0 %2274  ;;  %v2277_v43 = vpop.permute.xlu1 %2276 }
 0x2e3   : > { %2369 = vst.msk [vmem:[#allocation3 + $0x10] sm:$0xff] %vm2366_vm11, %v2275_v42  ;;  %2370 = vst.msk [vmem:[#allocation3 + $0x18] sm:$0xff] %vm2366_vm11, %v2277_v43  ;;  %v2621_v42 = vld [vmem:[#allocation2 + $0x18a] sm:$0xff] }
 0x2e4   : > { %2519 = vrot.lane.b32.xlu0 %v2427_v19, %s9670_s19  ;;  %2521 = vrot.lane.b32.xlu1 %v2428_v20, %s9670_s19  ;;  %v2620_v20 = vld [vmem:[#allocation2 + $0x182] sm:$0xff] }
 0x2e6   : > { %v2279_v44 = vpop.permute.xlu0 %2278  ;;  %v2281_v45 = vpop.permute.xlu1 %2280 }
 0x2e7   : > { %2371 = vst.msk [vmem:[#allocation3 + $0x20] sm:$0xff] %vm2366_vm11, %v2279_v44  ;;  %2372 = vst.msk [vmem:[#allocation3 + $0x28] sm:$0xff] %vm2366_vm11, %v2281_v45  ;;  %v2623_v44 = vld [vmem:[#allocation2 + $0x1a2] sm:$0xff] }
 0x2e8   : > { %2523 = vrot.lane.b32.xlu0 %v2429_v23, %s9670_s19  ;;  %2525 = vrot.lane.b32.xlu1 %v2430_v24, %s9670_s19  ;;  %v2622_v24 = vld [vmem:[#allocation2 + $0x19a] sm:$0xff]  ;;  %s9682_s19 = smov 69  }
 0x2ea   : > { %v2283_v52 = vpop.permute.xlu0 %2282  ;;  %v2285_v53 = vpop.permute.xlu1 %2284 }
 0x2eb   : > { %2373 = vst.msk [vmem:[#allocation3 + $0x30] sm:$0xff] %vm2366_vm11, %v2283_v52  ;;  %2374 = vst.msk [vmem:[#allocation3 + $0x38] sm:$0xff] %vm2366_vm11, %v2285_v53  ;;  %v2786_v52 = vld [vmem:[#allocation2 + $0x3b] sm:$0xff] }
 0x2ec   : > { %2656 = vrot.lane.b32.xlu0 %v2592_v46, %s9671_s20  ;;  %2658 = vrot.lane.b32.xlu1 %v2593_v48, %s9671_s20  ;;  %v2785_v48 = vld [vmem:[#allocation2 + $0x33] sm:$0xff] }
 0x2ee   : > { %v2287_v5 = vpop.permute.xlu0 %2286  ;;  %v2289_v6 = vpop.permute.xlu1 %2288 }
 0x2ef   : > { %2375 = vst.msk [vmem:[#allocation3 + $0x40] sm:$0xff] %vm2366_vm11, %v2287_v5  ;;  %2376 = vst.msk [vmem:[#allocation3 + $0x48] sm:$0xff] %vm2366_vm11, %v2289_v6  ;;  %v2788_v5 = vld [vmem:[#allocation2 + $0x53] sm:$0xff] }
 0x2f0   : > { %2660 = vrot.lane.b32.xlu0 %v2594_v60, %s9671_s20  ;;  %2662 = vrot.lane.b32.xlu1 %v2595_v61, %s9671_s20  ;;  %v2787_v61 = vld [vmem:[#allocation2 + $0x4b] sm:$0xff] }
 0x2f2   : > { %v2291_v21 = vpop.permute.xlu0 %2290  ;;  %v2293_v22 = vpop.permute.xlu1 %2292 }
 0x2f3   : > { %2377 = vst.msk [vmem:[#allocation3 + $0x50] sm:$0xff] %vm2366_vm11, %v2291_v21  ;;  %2378 = vst.msk [vmem:[#allocation3 + $0x58] sm:$0xff] %vm2366_vm11, %v2293_v22  ;;  %v2790_v21 = vld [vmem:[#allocation2 + $0x6b] sm:$0xff] }
 0x2f4   : > { %2664 = vrot.lane.b32.xlu0 %v2596_v13, %s9671_s20  ;;  %2666 = vrot.lane.b32.xlu1 %v2597_v14, %s9671_s20  ;;  %v2789_v14 = vld [vmem:[#allocation2 + $0x63] sm:$0xff] }
 0x2f6   : > { %v2295_v27 = vpop.permute.xlu0 %2294  ;;  %v2297_v28 = vpop.permute.xlu1 %2296 }
 0x2f7   : > { %2379 = vst.msk [vmem:[#allocation3 + $0x60] sm:$0xff] %vm2366_vm11, %v2295_v27  ;;  %2380 = vst.msk [vmem:[#allocation3 + $0x68] sm:$0xff] %vm2366_vm11, %v2297_v28  ;;  %v2792_v27 = vld [vmem:[#allocation2 + $0x83] sm:$0xff] }
 0x2f8   : > { %2668 = vrot.lane.b32.xlu0 %v2598_v25, %s9671_s20  ;;  %2670 = vrot.lane.b32.xlu1 %v2599_v26, %s9671_s20  ;;  %v2791_v26 = vld [vmem:[#allocation2 + $0x7b] sm:$0xff] }
 0x2fa   : > { %v2299_v31 = vpop.permute.xlu0 %2298  ;;  %v2301_v32 = vpop.permute.xlu1 %2300 }
 0x2fb   : > { %2381 = vst.msk [vmem:[#allocation3 + $0x70] sm:$0xff] %vm2366_vm11, %v2299_v31  ;;  %2382 = vst.msk [vmem:[#allocation3 + $0x78] sm:$0xff] %vm2366_vm11, %v2301_v32  ;;  %v2794_v31 = vld [vmem:[#allocation2 + $0x9b] sm:$0xff] }
 0x2fc   : > { %2672 = vrot.lane.b32.xlu0 %v2600_v29, %s9671_s20  ;;  %2674 = vrot.lane.b32.xlu1 %v2601_v30, %s9671_s20  ;;  %v2793_v30 = vld [vmem:[#allocation2 + $0x93] sm:$0xff] }
 0x2fe   : > { %v2303_v35 = vpop.permute.xlu0 %2302  ;;  %v2305_v36 = vpop.permute.xlu1 %2304 }
 0x2ff   : > { %2383 = vst.msk [vmem:[#allocation3 + $0x80] sm:$0xff] %vm2366_vm11, %v2303_v35  ;;  %2384 = vst.msk [vmem:[#allocation3 + $0x88] sm:$0xff] %vm2366_vm11, %v2305_v36  ;;  %v2796_v35 = vld [vmem:[#allocation2 + $0xb3] sm:$0xff] }
 0x300   : > { %2676 = vrot.lane.b32.xlu0 %v2602_v33, %s9671_s20  ;;  %2678 = vrot.lane.b32.xlu1 %v2603_v34, %s9671_s20  ;;  %v2795_v34 = vld [vmem:[#allocation2 + $0xab] sm:$0xff] }
 0x302   : > { %v2307_v39 = vpop.permute.xlu0 %2306  ;;  %v2309_v47 = vpop.permute.xlu1 %2308 }
 0x303   : > { %2385 = vst.msk [vmem:[#allocation3 + $0x90] sm:$0xff] %vm2366_vm11, %v2307_v39  ;;  %2386 = vst.msk [vmem:[#allocation3 + $0x98] sm:$0xff] %vm2366_vm11, %v2309_v47  ;;  %v2798_v39 = vld [vmem:[#allocation2 + $0xcb] sm:$0xff] }
 0x304   : > { %2680 = vrot.lane.b32.xlu0 %v2604_v37, %s9671_s20  ;;  %2682 = vrot.lane.b32.xlu1 %v2605_v38, %s9671_s20  ;;  %v2797_v38 = vld [vmem:[#allocation2 + $0xc3] sm:$0xff] }
 0x306   : > { %v2311_v51 = vpop.permute.xlu0 %2310  ;;  %v2313_v54 = vpop.permute.xlu1 %2312 }
 0x307   : > { %2387 = vst.msk [vmem:[#allocation3 + $0xa0] sm:$0xff] %vm2366_vm11, %v2311_v51  ;;  %2388 = vst.msk [vmem:[#allocation3 + $0xa8] sm:$0xff] %vm2366_vm11, %v2313_v54  ;;  %v2800_v51 = vld [vmem:[#allocation2 + $0xe3] sm:$0xff] }
 0x308   : > { %2684 = vrot.lane.b32.xlu0 %v2606_v49, %s9671_s20  ;;  %2686 = vrot.lane.b32.xlu1 %v2607_v50, %s9671_s20  ;;  %v2799_v50 = vld [vmem:[#allocation2 + $0xdb] sm:$0xff] }
 0x30a   : > { %v2315_v57 = vpop.permute.xlu0 %2314  ;;  %v2317_v58 = vpop.permute.xlu1 %2316 }
 0x30b   : > { %2389 = vst.msk [vmem:[#allocation3 + $0xb0] sm:$0xff] %vm2366_vm11, %v2315_v57  ;;  %2390 = vst.msk [vmem:[#allocation3 + $0xb8] sm:$0xff] %vm2366_vm11, %v2317_v58  ;;  %v2802_v57 = vld [vmem:[#allocation2 + $0xfb] sm:$0xff] }
 0x30c   : > { %2688 = vrot.lane.b32.xlu0 %v2608_v55, %s9671_s20  ;;  %2690 = vrot.lane.b32.xlu1 %v2609_v56, %s9671_s20  ;;  %v2801_v56 = vld [vmem:[#allocation2 + $0xf3] sm:$0xff] }
 0x30e   : > { %v2319_v63 = vpop.permute.xlu0 %2318  ;;  %v2321_v0 = vpop.permute.xlu1 %2320 }
 0x30f   : > { %2391 = vst.msk [vmem:[#allocation3 + $0xc0] sm:$0xff] %vm2366_vm11, %v2319_v63  ;;  %2392 = vst.msk [vmem:[#allocation3 + $0xc8] sm:$0xff] %vm2366_vm11, %v2321_v0  ;;  %v2804_v63 = vld [vmem:[#allocation2 + $0x113] sm:$0xff] }
 0x310   : > { %2692 = vrot.lane.b32.xlu0 %v2610_v59, %s9671_s20  ;;  %2694 = vrot.lane.b32.xlu1 %v2611_v62, %s9671_s20  ;;  %v2803_v62 = vld [vmem:[#allocation2 + $0x10b] sm:$0xff] }
 0x312   : > { %v2323_v4 = vpop.permute.xlu0 %2322  ;;  %v2325_v7 = vpop.permute.xlu1 %2324 }
 0x313   : > { %2393 = vst.msk [vmem:[#allocation3 + $0xd0] sm:$0xff] %vm2366_vm11, %v2323_v4  ;;  %2394 = vst.msk [vmem:[#allocation3 + $0xd8] sm:$0xff] %vm2366_vm11, %v2325_v7  ;;  %v2806_v4 = vld [vmem:[#allocation2 + $0x12b] sm:$0xff] }
 0x314   : > { %2696 = vrot.lane.b32.xlu0 %v2612_v2, %s9671_s20  ;;  %2698 = vrot.lane.b32.xlu1 %v2613_v3, %s9671_s20  ;;  %v2805_v3 = vld [vmem:[#allocation2 + $0x123] sm:$0xff] }
 0x316   : > { %v2327_v10 = vpop.permute.xlu0 %2326  ;;  %v2329_v11 = vpop.permute.xlu1 %2328 }
 0x317   : > { %2395 = vst.msk [vmem:[#allocation3 + $0xe0] sm:$0xff] %vm2366_vm11, %v2327_v10  ;;  %2396 = vst.msk [vmem:[#allocation3 + $0xe8] sm:$0xff] %vm2366_vm11, %v2329_v11  ;;  %v2808_v10 = vld [vmem:[#allocation2 + $0x143] sm:$0xff] }
 0x318   : > { %2700 = vrot.lane.b32.xlu0 %v2614_v8, %s9671_s20  ;;  %2702 = vrot.lane.b32.xlu1 %v2615_v9, %s9671_s20  ;;  %v2807_v9 = vld [vmem:[#allocation2 + $0x13b] sm:$0xff] }
 0x31a   : > { %v2331_v16 = vpop.permute.xlu0 %2330  ;;  %v2333_v17 = vpop.permute.xlu1 %2332 }
 0x31b   : > { %2397 = vst.msk [vmem:[#allocation3 + $0xf0] sm:$0xff] %vm2366_vm11, %v2331_v16  ;;  %2398 = vst.msk [vmem:[#allocation3 + $0xf8] sm:$0xff] %vm2366_vm11, %v2333_v17  ;;  %v2810_v16 = vld [vmem:[#allocation2 + $0x15b] sm:$0xff]  ;;  %vm5152_vm11 = vcmask 613376  }
 0x31c   : > { %2704 = vrot.lane.b32.xlu0 %v2616_v12, %s9671_s20  ;;  %2706 = vrot.lane.b32.xlu1 %v2617_v15, %s9671_s20  ;;  %v2809_v15 = vld [vmem:[#allocation2 + $0x153] sm:$0xff] }
 0x31e   : > { %v2464_v41 = vpop.permute.xlu0 %2463  ;;  %v2466_v19 = vpop.permute.xlu1 %2465 }
 0x31f   : > { %2560 = vst.msk [vmem:[#allocation3] sm:$0xff] %vm2559_vm12, %v2464_v41  ;;  %2561 = vst.msk [vmem:[#allocation3 + $0x8] sm:$0xff] %vm2559_vm12, %v2466_v19  ;;  %v2812_v41 = vld [vmem:[#allocation2 + $0x173] sm:$0xff] }
 0x320   : > { %2708 = vrot.lane.b32.xlu0 %v2618_v18, %s9671_s20  ;;  %2710 = vrot.lane.b32.xlu1 %v2619_v40, %s9671_s20  ;;  %v2811_v40 = vld [vmem:[#allocation2 + $0x16b] sm:$0xff] }
 0x322   : > { %v2468_v43 = vpop.permute.xlu0 %2467  ;;  %v2470_v23 = vpop.permute.xlu1 %2469 }
 0x323   : > { %2562 = vst.msk [vmem:[#allocation3 + $0x10] sm:$0xff] %vm2559_vm12, %v2468_v43  ;;  %2563 = vst.msk [vmem:[#allocation3 + $0x18] sm:$0xff] %vm2559_vm12, %v2470_v23  ;;  %v2814_v43 = vld [vmem:[#allocation2 + $0x18b] sm:$0xff] }
 0x324   : > { %2712 = vrot.lane.b32.xlu0 %v2620_v20, %s9671_s20  ;;  %2714 = vrot.lane.b32.xlu1 %v2621_v42, %s9671_s20  ;;  %v2813_v42 = vld [vmem:[#allocation2 + $0x183] sm:$0xff] }
 0x326   : > { %v2472_v45 = vpop.permute.xlu0 %2471  ;;  %v2474_v46 = vpop.permute.xlu1 %2473 }
 0x327   : > { %2564 = vst.msk [vmem:[#allocation3 + $0x20] sm:$0xff] %vm2559_vm12, %v2472_v45  ;;  %2565 = vst.msk [vmem:[#allocation3 + $0x28] sm:$0xff] %vm2559_vm12, %v2474_v46  ;;  %v2816_v45 = vld [vmem:[#allocation2 + $0x1a3] sm:$0xff] }
 0x328   : > { %2716 = vrot.lane.b32.xlu0 %v2622_v24, %s9671_s20  ;;  %2718 = vrot.lane.b32.xlu1 %v2623_v44, %s9671_s20  ;;  %v2815_v44 = vld [vmem:[#allocation2 + $0x19b] sm:$0xff] }
 0x32a   : > { %v2476_v53 = vpop.permute.xlu0 %2475  ;;  %v2478_v60 = vpop.permute.xlu1 %2477 }
 0x32b   : > { %2566 = vst.msk [vmem:[#allocation3 + $0x30] sm:$0xff] %vm2559_vm12, %v2476_v53  ;;  %2567 = vst.msk [vmem:[#allocation3 + $0x38] sm:$0xff] %vm2559_vm12, %v2478_v60  ;;  %v2979_v53 = vld [vmem:[#allocation2 + $0x3c] sm:$0xff] }
 0x32c   : > { %2849 = vrot.lane.b32.xlu0 %v2785_v48, %s9672_s21  ;;  %2851 = vrot.lane.b32.xlu1 %v2786_v52, %s9672_s21  ;;  %v2978_v52 = vld [vmem:[#allocation2 + $0x34] sm:$0xff] }
 0x32e   : > { %v2480_v6 = vpop.permute.xlu0 %2479  ;;  %v2482_v13 = vpop.permute.xlu1 %2481 }
 0x32f   : > { %2568 = vst.msk [vmem:[#allocation3 + $0x40] sm:$0xff] %vm2559_vm12, %v2480_v6  ;;  %2569 = vst.msk [vmem:[#allocation3 + $0x48] sm:$0xff] %vm2559_vm12, %v2482_v13  ;;  %v2981_v6 = vld [vmem:[#allocation2 + $0x54] sm:$0xff] }
 0x330   : > { %2853 = vrot.lane.b32.xlu0 %v2787_v61, %s9672_s21  ;;  %2855 = vrot.lane.b32.xlu1 %v2788_v5, %s9672_s21  ;;  %v2980_v5 = vld [vmem:[#allocation2 + $0x4c] sm:$0xff] }
 0x332   : > { %v2484_v22 = vpop.permute.xlu0 %2483  ;;  %v2486_v25 = vpop.permute.xlu1 %2485 }
 0x333   : > { %2570 = vst.msk [vmem:[#allocation3 + $0x50] sm:$0xff] %vm2559_vm12, %v2484_v22  ;;  %2571 = vst.msk [vmem:[#allocation3 + $0x58] sm:$0xff] %vm2559_vm12, %v2486_v25  ;;  %v2983_v22 = vld [vmem:[#allocation2 + $0x6c] sm:$0xff] }
 0x334   : > { %2857 = vrot.lane.b32.xlu0 %v2789_v14, %s9672_s21  ;;  %2859 = vrot.lane.b32.xlu1 %v2790_v21, %s9672_s21  ;;  %v2982_v21 = vld [vmem:[#allocation2 + $0x64] sm:$0xff] }
 0x336   : > { %v2488_v28 = vpop.permute.xlu0 %2487  ;;  %v2490_v29 = vpop.permute.xlu1 %2489 }
 0x337   : > { %2572 = vst.msk [vmem:[#allocation3 + $0x60] sm:$0xff] %vm2559_vm12, %v2488_v28  ;;  %2573 = vst.msk [vmem:[#allocation3 + $0x68] sm:$0xff] %vm2559_vm12, %v2490_v29  ;;  %v2985_v28 = vld [vmem:[#allocation2 + $0x84] sm:$0xff] }
 0x338   : > { %2861 = vrot.lane.b32.xlu0 %v2791_v26, %s9672_s21  ;;  %2863 = vrot.lane.b32.xlu1 %v2792_v27, %s9672_s21  ;;  %v2984_v27 = vld [vmem:[#allocation2 + $0x7c] sm:$0xff] }
 0x33a   : > { %v2492_v32 = vpop.permute.xlu0 %2491  ;;  %v2494_v33 = vpop.permute.xlu1 %2493 }
 0x33b   : > { %2574 = vst.msk [vmem:[#allocation3 + $0x70] sm:$0xff] %vm2559_vm12, %v2492_v32  ;;  %2575 = vst.msk [vmem:[#allocation3 + $0x78] sm:$0xff] %vm2559_vm12, %v2494_v33  ;;  %v2987_v32 = vld [vmem:[#allocation2 + $0x9c] sm:$0xff] }
 0x33c   : > { %2865 = vrot.lane.b32.xlu0 %v2793_v30, %s9672_s21  ;;  %2867 = vrot.lane.b32.xlu1 %v2794_v31, %s9672_s21  ;;  %v2986_v31 = vld [vmem:[#allocation2 + $0x94] sm:$0xff] }
 0x33e   : > { %v2496_v36 = vpop.permute.xlu0 %2495  ;;  %v2498_v37 = vpop.permute.xlu1 %2497 }
 0x33f   : > { %2576 = vst.msk [vmem:[#allocation3 + $0x80] sm:$0xff] %vm2559_vm12, %v2496_v36  ;;  %2577 = vst.msk [vmem:[#allocation3 + $0x88] sm:$0xff] %vm2559_vm12, %v2498_v37  ;;  %v2989_v36 = vld [vmem:[#allocation2 + $0xb4] sm:$0xff] }
 0x340   : > { %2869 = vrot.lane.b32.xlu0 %v2795_v34, %s9672_s21  ;;  %2871 = vrot.lane.b32.xlu1 %v2796_v35, %s9672_s21  ;;  %v2988_v35 = vld [vmem:[#allocation2 + $0xac] sm:$0xff] }
 0x342   : > { %v2500_v47 = vpop.permute.xlu0 %2499  ;;  %v2502_v49 = vpop.permute.xlu1 %2501 }
 0x343   : > { %2578 = vst.msk [vmem:[#allocation3 + $0x90] sm:$0xff] %vm2559_vm12, %v2500_v47  ;;  %2579 = vst.msk [vmem:[#allocation3 + $0x98] sm:$0xff] %vm2559_vm12, %v2502_v49  ;;  %v2991_v47 = vld [vmem:[#allocation2 + $0xcc] sm:$0xff] }
 0x344   : > { %2873 = vrot.lane.b32.xlu0 %v2797_v38, %s9672_s21  ;;  %2875 = vrot.lane.b32.xlu1 %v2798_v39, %s9672_s21  ;;  %v2990_v39 = vld [vmem:[#allocation2 + $0xc4] sm:$0xff] }
 0x346   : > { %v2504_v54 = vpop.permute.xlu0 %2503  ;;  %v2506_v55 = vpop.permute.xlu1 %2505 }
 0x347   : > { %2580 = vst.msk [vmem:[#allocation3 + $0xa0] sm:$0xff] %vm2559_vm12, %v2504_v54  ;;  %2581 = vst.msk [vmem:[#allocation3 + $0xa8] sm:$0xff] %vm2559_vm12, %v2506_v55  ;;  %v2993_v54 = vld [vmem:[#allocation2 + $0xe4] sm:$0xff] }
 0x348   : > { %2877 = vrot.lane.b32.xlu0 %v2799_v50, %s9672_s21  ;;  %2879 = vrot.lane.b32.xlu1 %v2800_v51, %s9672_s21  ;;  %v2992_v51 = vld [vmem:[#allocation2 + $0xdc] sm:$0xff] }
 0x34a   : > { %v2508_v58 = vpop.permute.xlu0 %2507  ;;  %v2510_v59 = vpop.permute.xlu1 %2509 }
 0x34b   : > { %2582 = vst.msk [vmem:[#allocation3 + $0xb0] sm:$0xff] %vm2559_vm12, %v2508_v58  ;;  %2583 = vst.msk [vmem:[#allocation3 + $0xb8] sm:$0xff] %vm2559_vm12, %v2510_v59  ;;  %v2995_v58 = vld [vmem:[#allocation2 + $0xfc] sm:$0xff] }
 0x34c   : > { %2881 = vrot.lane.b32.xlu0 %v2801_v56, %s9672_s21  ;;  %2883 = vrot.lane.b32.xlu1 %v2802_v57, %s9672_s21  ;;  %v2994_v57 = vld [vmem:[#allocation2 + $0xf4] sm:$0xff] }
 0x34e   : > { %v2512_v0 = vpop.permute.xlu0 %2511  ;;  %v2514_v2 = vpop.permute.xlu1 %2513 }
 0x34f   : > { %2584 = vst.msk [vmem:[#allocation3 + $0xc0] sm:$0xff] %vm2559_vm12, %v2512_v0  ;;  %2585 = vst.msk [vmem:[#allocation3 + $0xc8] sm:$0xff] %vm2559_vm12, %v2514_v2  ;;  %v2997_v0 = vld [vmem:[#allocation2 + $0x114] sm:$0xff] }
 0x350   : > { %2885 = vrot.lane.b32.xlu0 %v2803_v62, %s9672_s21  ;;  %2887 = vrot.lane.b32.xlu1 %v2804_v63, %s9672_s21  ;;  %v2996_v63 = vld [vmem:[#allocation2 + $0x10c] sm:$0xff] }
 0x352   : > { %v2516_v7 = vpop.permute.xlu0 %2515  ;;  %v2518_v8 = vpop.permute.xlu1 %2517 }
 0x353   : > { %2586 = vst.msk [vmem:[#allocation3 + $0xd0] sm:$0xff] %vm2559_vm12, %v2516_v7  ;;  %2587 = vst.msk [vmem:[#allocation3 + $0xd8] sm:$0xff] %vm2559_vm12, %v2518_v8  ;;  %v2999_v7 = vld [vmem:[#allocation2 + $0x12c] sm:$0xff] }
 0x354   : > { %2889 = vrot.lane.b32.xlu0 %v2805_v3, %s9672_s21  ;;  %2891 = vrot.lane.b32.xlu1 %v2806_v4, %s9672_s21  ;;  %v2998_v4 = vld [vmem:[#allocation2 + $0x124] sm:$0xff] }
 0x356   : > { %v2520_v11 = vpop.permute.xlu0 %2519  ;;  %v2522_v12 = vpop.permute.xlu1 %2521 }
 0x357   : > { %2588 = vst.msk [vmem:[#allocation3 + $0xe0] sm:$0xff] %vm2559_vm12, %v2520_v11  ;;  %2589 = vst.msk [vmem:[#allocation3 + $0xe8] sm:$0xff] %vm2559_vm12, %v2522_v12  ;;  %v3001_v11 = vld [vmem:[#allocation2 + $0x144] sm:$0xff] }
 0x358   : > { %2893 = vrot.lane.b32.xlu0 %v2807_v9, %s9672_s21  ;;  %2895 = vrot.lane.b32.xlu1 %v2808_v10, %s9672_s21  ;;  %v3000_v10 = vld [vmem:[#allocation2 + $0x13c] sm:$0xff] }
 0x35a   : > { %v2524_v17 = vpop.permute.xlu0 %2523  ;;  %v2526_v18 = vpop.permute.xlu1 %2525 }
 0x35b   : > { %2590 = vst.msk [vmem:[#allocation3 + $0xf0] sm:$0xff] %vm2559_vm12, %v2524_v17  ;;  %2591 = vst.msk [vmem:[#allocation3 + $0xf8] sm:$0xff] %vm2559_vm12, %v2526_v18  ;;  %v3003_v17 = vld [vmem:[#allocation2 + $0x15c] sm:$0xff]  ;;  %vm6790_vm12 = vcmask 130048  }
 0x35c   : > { %2897 = vrot.lane.b32.xlu0 %v2809_v15, %s9672_s21  ;;  %2899 = vrot.lane.b32.xlu1 %v2810_v16, %s9672_s21  ;;  %v3002_v16 = vld [vmem:[#allocation2 + $0x154] sm:$0xff]  ;;  %6796 = vst.msk [vmem:[#allocation4 + $0x20] sm:$0xff] %vm6790_vm12, %v9659_v1  ;;  %6791 = vst.msk [vmem:[#allocation4] sm:$0xff] %vm6790_vm12, %v9659_v1 }
 0x35d   : > { %6794 = vst.msk [vmem:[#allocation4 + $0x10] sm:$0xff] %vm6790_vm12, %v9659_v1  ;;  %6798 = vst.msk [vmem:[#allocation4 + $0x30] sm:$0xff] %vm6790_vm12, %v9659_v1 }
 0x35e   : > { %v2657_v19 = vpop.permute.xlu0 %2656  ;;  %v2659_v20 = vpop.permute.xlu1 %2658  ;;  %6800 = vst.msk [vmem:[#allocation4 + $0x40] sm:$0xff] %vm6790_vm12, %v9659_v1  ;;  %6802 = vst.msk [vmem:[#allocation4 + $0x50] sm:$0xff] %vm6790_vm12, %v9659_v1 }
 0x35f   : > { %2753 = vst.msk [vmem:[#allocation3] sm:$0xff] %vm2752_vm13, %v2657_v19  ;;  %2754 = vst.msk [vmem:[#allocation3 + $0x8] sm:$0xff] %vm2752_vm13, %v2659_v20  ;;  %v3005_v19 = vld [vmem:[#allocation2 + $0x174] sm:$0xff] }
 0x360   : > { %2901 = vrot.lane.b32.xlu0 %v2811_v40, %s9672_s21  ;;  %2903 = vrot.lane.b32.xlu1 %v2812_v41, %s9672_s21  ;;  %v3004_v41 = vld [vmem:[#allocation2 + $0x16c] sm:$0xff]  ;;  %6804 = vst.msk [vmem:[#allocation4 + $0x60] sm:$0xff] %vm6790_vm12, %v9659_v1  ;;  %6806 = vst.msk [vmem:[#allocation4 + $0x70] sm:$0xff] %vm6790_vm12, %v9659_v1 }
 0x361   : > { %6808 = vst.msk [vmem:[#allocation4 + $0x80] sm:$0xff] %vm6790_vm12, %v9659_v1  ;;  %6810 = vst.msk [vmem:[#allocation4 + $0x90] sm:$0xff] %vm6790_vm12, %v9659_v1 }
 0x362   : > { %v2661_v23 = vpop.permute.xlu0 %2660  ;;  %v2663_v24 = vpop.permute.xlu1 %2662  ;;  %6812 = vst.msk [vmem:[#allocation4 + $0xa0] sm:$0xff] %vm6790_vm12, %v9659_v1  ;;  %6814 = vst.msk [vmem:[#allocation4 + $0xb0] sm:$0xff] %vm6790_vm12, %v9659_v1 }
 0x363   : > { %2755 = vst.msk [vmem:[#allocation3 + $0x10] sm:$0xff] %vm2752_vm13, %v2661_v23  ;;  %2756 = vst.msk [vmem:[#allocation3 + $0x18] sm:$0xff] %vm2752_vm13, %v2663_v24  ;;  %v3007_v23 = vld [vmem:[#allocation2 + $0x18c] sm:$0xff] }
 0x364   : > { %2905 = vrot.lane.b32.xlu0 %v2813_v42, %s9672_s21  ;;  %2907 = vrot.lane.b32.xlu1 %v2814_v43, %s9672_s21  ;;  %v3006_v43 = vld [vmem:[#allocation2 + $0x184] sm:$0xff] }
 0x366   : > { %v2665_v46 = vpop.permute.xlu0 %2664  ;;  %v2667_v48 = vpop.permute.xlu1 %2666 }
 0x367   : > { %2757 = vst.msk [vmem:[#allocation3 + $0x20] sm:$0xff] %vm2752_vm13, %v2665_v46  ;;  %2758 = vst.msk [vmem:[#allocation3 + $0x28] sm:$0xff] %vm2752_vm13, %v2667_v48  ;;  %v3009_v46 = vld [vmem:[#allocation2 + $0x1a4] sm:$0xff] }
 0x368   : > { %2909 = vrot.lane.b32.xlu0 %v2815_v44, %s9672_s21  ;;  %2911 = vrot.lane.b32.xlu1 %v2816_v45, %s9672_s21  ;;  %v3008_v45 = vld [vmem:[#allocation2 + $0x19c] sm:$0xff] }
 0x36a   : > { %v2669_v60 = vpop.permute.xlu0 %2668  ;;  %v2671_v61 = vpop.permute.xlu1 %2670 }
 0x36b   : > { %2759 = vst.msk [vmem:[#allocation3 + $0x30] sm:$0xff] %vm2752_vm13, %v2669_v60  ;;  %2760 = vst.msk [vmem:[#allocation3 + $0x38] sm:$0xff] %vm2752_vm13, %v2671_v61  ;;  %v3173_v60 = vld [vmem:[#allocation2 + $0x50] sm:$0xff] }
 0x36c   : > { %3042 = vrot.lane.b32.xlu0 %v2978_v52, %s9673_s22  ;;  %3044 = vrot.lane.b32.xlu1 %v2979_v53, %s9673_s22  ;;  %v3172_v53 = vld [vmem:[#allocation2 + $0x48] sm:$0xff] }
 0x36e   : > { %v2673_v13 = vpop.permute.xlu0 %2672  ;;  %v2675_v14 = vpop.permute.xlu1 %2674 }
 0x36f   : > { %2761 = vst.msk [vmem:[#allocation3 + $0x40] sm:$0xff] %vm2752_vm13, %v2673_v13  ;;  %2762 = vst.msk [vmem:[#allocation3 + $0x48] sm:$0xff] %vm2752_vm13, %v2675_v14  ;;  %v10940_v13 = vld [vmem:[#allocation2 + $0x68] sm:$0xff] }
 0x370   : > { %3046 = vrot.lane.b32.xlu0 %v2980_v5, %s9673_s22  ;;  %3048 = vrot.lane.b32.xlu1 %v2981_v6, %s9673_s22  ;;  %v10938_v6 = vld [vmem:[#allocation2 + $0x60] sm:$0xff] }
 0x372   : > { %v2677_v25 = vpop.permute.xlu0 %2676  ;;  %v2679_v26 = vpop.permute.xlu1 %2678 }
 0x373   : > { %2763 = vst.msk [vmem:[#allocation3 + $0x50] sm:$0xff] %vm2752_vm13, %v2677_v25  ;;  %2764 = vst.msk [vmem:[#allocation3 + $0x58] sm:$0xff] %vm2752_vm13, %v2679_v26  ;;  %v3177_v25 = vld [vmem:[#allocation2 + $0x80] sm:$0xff] }
 0x374   : > { %3050 = vrot.lane.b32.xlu0 %v2982_v21, %s9673_s22  ;;  %3052 = vrot.lane.b32.xlu1 %v2983_v22, %s9673_s22  ;;  %v3176_v22 = vld [vmem:[#allocation2 + $0x78] sm:$0xff] }
 0x376   : > { %v2681_v29 = vpop.permute.xlu0 %2680  ;;  %v2683_v30 = vpop.permute.xlu1 %2682 }
 0x377   : > { %2765 = vst.msk [vmem:[#allocation3 + $0x60] sm:$0xff] %vm2752_vm13, %v2681_v29  ;;  %2766 = vst.msk [vmem:[#allocation3 + $0x68] sm:$0xff] %vm2752_vm13, %v2683_v30  ;;  %v3179_v29 = vld [vmem:[#allocation2 + $0x98] sm:$0xff] }
 0x378   : > { %3054 = vrot.lane.b32.xlu0 %v2984_v27, %s9673_s22  ;;  %3056 = vrot.lane.b32.xlu1 %v2985_v28, %s9673_s22  ;;  %v3178_v28 = vld [vmem:[#allocation2 + $0x90] sm:$0xff] }
 0x37a   : > { %v2685_v33 = vpop.permute.xlu0 %2684  ;;  %v2687_v34 = vpop.permute.xlu1 %2686 }
 0x37b   : > { %2767 = vst.msk [vmem:[#allocation3 + $0x70] sm:$0xff] %vm2752_vm13, %v2685_v33  ;;  %2768 = vst.msk [vmem:[#allocation3 + $0x78] sm:$0xff] %vm2752_vm13, %v2687_v34  ;;  %v3181_v33 = vld [vmem:[#allocation2 + $0xb0] sm:$0xff] }
 0x37c   : > { %3058 = vrot.lane.b32.xlu0 %v2986_v31, %s9673_s22  ;;  %3060 = vrot.lane.b32.xlu1 %v2987_v32, %s9673_s22  ;;  %v3180_v32 = vld [vmem:[#allocation2 + $0xa8] sm:$0xff] }
 0x37e   : > { %v2689_v37 = vpop.permute.xlu0 %2688  ;;  %v2691_v38 = vpop.permute.xlu1 %2690 }
 0x37f   : > { %2769 = vst.msk [vmem:[#allocation3 + $0x80] sm:$0xff] %vm2752_vm13, %v2689_v37  ;;  %2770 = vst.msk [vmem:[#allocation3 + $0x88] sm:$0xff] %vm2752_vm13, %v2691_v38  ;;  %v3183_v37 = vld [vmem:[#allocation2 + $0xc8] sm:$0xff] }
 0x380   : > { %3062 = vrot.lane.b32.xlu0 %v2988_v35, %s9673_s22  ;;  %3064 = vrot.lane.b32.xlu1 %v2989_v36, %s9673_s22  ;;  %v3182_v36 = vld [vmem:[#allocation2 + $0xc0] sm:$0xff] }
 0x382   : > { %v2693_v49 = vpop.permute.xlu0 %2692  ;;  %v2695_v50 = vpop.permute.xlu1 %2694 }
 0x383   : > { %2771 = vst.msk [vmem:[#allocation3 + $0x90] sm:$0xff] %vm2752_vm13, %v2693_v49  ;;  %2772 = vst.msk [vmem:[#allocation3 + $0x98] sm:$0xff] %vm2752_vm13, %v2695_v50  ;;  %v3185_v49 = vld [vmem:[#allocation2 + $0xe0] sm:$0xff] }
 0x384   : > { %3066 = vrot.lane.b32.xlu0 %v2990_v39, %s9673_s22  ;;  %3068 = vrot.lane.b32.xlu1 %v2991_v47, %s9673_s22  ;;  %v3184_v47 = vld [vmem:[#allocation2 + $0xd8] sm:$0xff] }
 0x386   : > { %v2697_v55 = vpop.permute.xlu0 %2696  ;;  %v2699_v56 = vpop.permute.xlu1 %2698 }
 0x387   : > { %2773 = vst.msk [vmem:[#allocation3 + $0xa0] sm:$0xff] %vm2752_vm13, %v2697_v55  ;;  %2774 = vst.msk [vmem:[#allocation3 + $0xa8] sm:$0xff] %vm2752_vm13, %v2699_v56  ;;  %v3187_v55 = vld [vmem:[#allocation2 + $0xf8] sm:$0xff] }
 0x388   : > { %3070 = vrot.lane.b32.xlu0 %v2992_v51, %s9673_s22  ;;  %3072 = vrot.lane.b32.xlu1 %v2993_v54, %s9673_s22  ;;  %v3186_v54 = vld [vmem:[#allocation2 + $0xf0] sm:$0xff] }
 0x38a   : > { %v2701_v59 = vpop.permute.xlu0 %2700  ;;  %v2703_v62 = vpop.permute.xlu1 %2702 }
 0x38b   : > { %2775 = vst.msk [vmem:[#allocation3 + $0xb0] sm:$0xff] %vm2752_vm13, %v2701_v59  ;;  %2776 = vst.msk [vmem:[#allocation3 + $0xb8] sm:$0xff] %vm2752_vm13, %v2703_v62  ;;  %v3189_v59 = vld [vmem:[#allocation2 + $0x110] sm:$0xff] }
 0x38c   : > { %3074 = vrot.lane.b32.xlu0 %v2994_v57, %s9673_s22  ;;  %3076 = vrot.lane.b32.xlu1 %v2995_v58, %s9673_s22  ;;  %v3188_v58 = vld [vmem:[#allocation2 + $0x108] sm:$0xff] }
 0x38e   : > { %v2705_v2 = vpop.permute.xlu0 %2704  ;;  %v2707_v3 = vpop.permute.xlu1 %2706 }
 0x38f   : > { %2777 = vst.msk [vmem:[#allocation3 + $0xc0] sm:$0xff] %vm2752_vm13, %v2705_v2  ;;  %2778 = vst.msk [vmem:[#allocation3 + $0xc8] sm:$0xff] %vm2752_vm13, %v2707_v3  ;;  %v3191_v2 = vld [vmem:[#allocation2 + $0x128] sm:$0xff] }
 0x390   : > { %3078 = vrot.lane.b32.xlu0 %v2996_v63, %s9673_s22  ;;  %3080 = vrot.lane.b32.xlu1 %v2997_v0, %s9673_s22  ;;  %v3190_v0 = vld [vmem:[#allocation2 + $0x120] sm:$0xff] }
 0x392   : > { %v2709_v8 = vpop.permute.xlu0 %2708  ;;  %v2711_v9 = vpop.permute.xlu1 %2710 }
 0x393   : > { %2779 = vst.msk [vmem:[#allocation3 + $0xd0] sm:$0xff] %vm2752_vm13, %v2709_v8  ;;  %2780 = vst.msk [vmem:[#allocation3 + $0xd8] sm:$0xff] %vm2752_vm13, %v2711_v9  ;;  %v3193_v8 = vld [vmem:[#allocation2 + $0x140] sm:$0xff] }
 0x394   : > { %3082 = vrot.lane.b32.xlu0 %v2998_v4, %s9673_s22  ;;  %3084 = vrot.lane.b32.xlu1 %v2999_v7, %s9673_s22  ;;  %v3192_v7 = vld [vmem:[#allocation2 + $0x138] sm:$0xff] }
 0x396   : > { %v2713_v12 = vpop.permute.xlu0 %2712  ;;  %v2715_v15 = vpop.permute.xlu1 %2714 }
 0x397   : > { %2781 = vst.msk [vmem:[#allocation3 + $0xe0] sm:$0xff] %vm2752_vm13, %v2713_v12  ;;  %2782 = vst.msk [vmem:[#allocation3 + $0xe8] sm:$0xff] %vm2752_vm13, %v2715_v15  ;;  %v3195_v12 = vld [vmem:[#allocation2 + $0x158] sm:$0xff] }
 0x398   : > { %3086 = vrot.lane.b32.xlu0 %v3000_v10, %s9673_s22  ;;  %3088 = vrot.lane.b32.xlu1 %v3001_v11, %s9673_s22  ;;  %v3194_v11 = vld [vmem:[#allocation2 + $0x150] sm:$0xff] }
 0x39a   : > { %v2717_v18 = vpop.permute.xlu0 %2716  ;;  %v2719_v40 = vpop.permute.xlu1 %2718 }
 0x39b   : > { %2783 = vst.msk [vmem:[#allocation3 + $0xf0] sm:$0xff] %vm2752_vm13, %v2717_v18  ;;  %2784 = vst.msk [vmem:[#allocation3 + $0xf8] sm:$0xff] %vm2752_vm13, %v2719_v40  ;;  %v3197_v18 = vld [vmem:[#allocation2 + $0x170] sm:$0xff]  ;;  %vm6792_vm13 = vcmask 125952  }
 0x39c   : > { %3090 = vrot.lane.b32.xlu0 %v3002_v16, %s9673_s22  ;;  %3092 = vrot.lane.b32.xlu1 %v3003_v17, %s9673_s22  ;;  %v3196_v17 = vld [vmem:[#allocation2 + $0x168] sm:$0xff]  ;;  %6797 = vst.msk [vmem:[#allocation4 + $0x28] sm:$0xf] %vm6792_vm13, %v9659_v1  ;;  %6793 = vst.msk [vmem:[#allocation4 + $0x8] sm:$0xf] %vm6792_vm13, %v9659_v1 }
 0x39d   : > { %6795 = vst.msk [vmem:[#allocation4 + $0x18] sm:$0xf] %vm6792_vm13, %v9659_v1  ;;  %6799 = vst.msk [vmem:[#allocation4 + $0x38] sm:$0xf] %vm6792_vm13, %v9659_v1 }
 0x39e   : > { %v2850_v20 = vpop.permute.xlu0 %2849  ;;  %v2852_v42 = vpop.permute.xlu1 %2851  ;;  %6801 = vst.msk [vmem:[#allocation4 + $0x48] sm:$0xf] %vm6792_vm13, %v9659_v1  ;;  %6803 = vst.msk [vmem:[#allocation4 + $0x58] sm:$0xf] %vm6792_vm13, %v9659_v1 }
 0x39f   : > { %2946 = vst.msk [vmem:[#allocation3] sm:$0xff] %vm2945_vm14, %v2850_v20  ;;  %2947 = vst.msk [vmem:[#allocation3 + $0x8] sm:$0xff] %vm2945_vm14, %v2852_v42  ;;  %v3199_v20 = vld [vmem:[#allocation2 + $0x188] sm:$0xff] }
 0x3a0   : > { %3094 = vrot.lane.b32.xlu0 %v3004_v41, %s9673_s22  ;;  %3096 = vrot.lane.b32.xlu1 %v3005_v19, %s9673_s22  ;;  %v3198_v19 = vld [vmem:[#allocation2 + $0x180] sm:$0xff]  ;;  %6805 = vst.msk [vmem:[#allocation4 + $0x68] sm:$0xf] %vm6792_vm13, %v9659_v1  ;;  %6807 = vst.msk [vmem:[#allocation4 + $0x78] sm:$0xf] %vm6792_vm13, %v9659_v1 }
 0x3a1   : > { %6809 = vst.msk [vmem:[#allocation4 + $0x88] sm:$0xf] %vm6792_vm13, %v9659_v1  ;;  %6811 = vst.msk [vmem:[#allocation4 + $0x98] sm:$0xf] %vm6792_vm13, %v9659_v1 }
 0x3a2   : > { %v2854_v24 = vpop.permute.xlu0 %2853  ;;  %v2856_v44 = vpop.permute.xlu1 %2855  ;;  %6813 = vst.msk [vmem:[#allocation4 + $0xa8] sm:$0xf] %vm6792_vm13, %v9659_v1  ;;  %6815 = vst.msk [vmem:[#allocation4 + $0xb8] sm:$0xf] %vm6792_vm13, %v9659_v1  ;;  %vm7148_vm13 = vcmask 1047559  }
 0x3a3   : > { %2948 = vst.msk [vmem:[#allocation3 + $0x10] sm:$0xff] %vm2945_vm14, %v2854_v24  ;;  %2949 = vst.msk [vmem:[#allocation3 + $0x18] sm:$0xff] %vm2945_vm14, %v2856_v44  ;;  %v3201_v24 = vld [vmem:[#allocation2 + $0x1a0] sm:$0xff] }
 0x3a4   : > { %3098 = vrot.lane.b32.xlu0 %v3006_v43, %s9673_s22  ;;  %3100 = vrot.lane.b32.xlu1 %v3007_v23, %s9673_s22  ;;  %v3200_v23 = vld [vmem:[#allocation2 + $0x198] sm:$0xff] }
 0x3a6   : > { %v2858_v48 = vpop.permute.xlu0 %2857  ;;  %v2860_v52 = vpop.permute.xlu1 %2859 }
 0x3a7   : > { %2950 = vst.msk [vmem:[#allocation3 + $0x20] sm:$0xff] %vm2945_vm14, %v2858_v48  ;;  %2951 = vst.msk [vmem:[#allocation3 + $0x28] sm:$0xff] %vm2945_vm14, %v2860_v52  ;;  %v3203_v48 = vld [vmem:[#allocation2 + $0x1b8] sm:$0xff] }
 0x3a8   : > { %3102 = vrot.lane.b32.xlu0 %v3008_v45, %s9673_s22  ;;  %3104 = vrot.lane.b32.xlu1 %v3009_v46, %s9673_s22  ;;  %v3202_v46 = vld [vmem:[#allocation2 + $0x1b0] sm:$0xff] }
 0x3aa   : > { %v2862_v61 = vpop.permute.xlu0 %2861  ;;  %v2864_v5 = vpop.permute.xlu1 %2863 }
 0x3ab   : > { %2952 = vst.msk [vmem:[#allocation3 + $0x30] sm:$0xff] %vm2945_vm14, %v2862_v61  ;;  %2953 = vst.msk [vmem:[#allocation3 + $0x38] sm:$0xff] %vm2945_vm14, %v2864_v5  ;;  %v3366_v61 = vld [vmem:[#allocation2 + $0x51] sm:$0xff] }
 0x3ac   : > { %3236 = vrot.lane.b32.xlu0 %v3172_v53, %s9674_s23  ;;  %3238 = vrot.lane.b32.xlu1 %v3173_v60, %s9674_s23  ;;  %v3365_v60 = vld [vmem:[#allocation2 + $0x49] sm:$0xff] }
 0x3ae   : > { %v2866_v14 = vpop.permute.xlu0 %2865  ;;  %v2868_v21 = vpop.permute.xlu1 %2867 }
 0x3af   : > { %2954 = vst.msk [vmem:[#allocation3 + $0x40] sm:$0xff] %vm2945_vm14, %v2866_v14  ;;  %2955 = vst.msk [vmem:[#allocation3 + $0x48] sm:$0xff] %vm2945_vm14, %v2868_v21  ;;  %v11008_v21 = vld [vmem:[#allocation2 + $0x61] sm:$0xff] }
 0x3b0   : > { %3240 = vrot.lane.b32.xlu0 %v10938_v6, %s9674_s23  ;;  %3242 = vrot.lane.b32.xlu1 %v10940_v13, %s9674_s23 }
 0x3b2   : > { %v2870_v26 = vpop.permute.xlu0 %2869  ;;  %v2872_v27 = vpop.permute.xlu1 %2871 }
 0x3b3   : > { %2956 = vst.msk [vmem:[#allocation3 + $0x50] sm:$0xff] %vm2945_vm14, %v2870_v26  ;;  %2957 = vst.msk [vmem:[#allocation3 + $0x58] sm:$0xff] %vm2945_vm14, %v2872_v27  ;;  %v11018_v27 = vld [vmem:[#allocation2 + $0x79] sm:$0xff] }
 0x3b4   : > { %3244 = vrot.lane.b32.xlu0 %v3176_v22, %s9674_s23  ;;  %3246 = vrot.lane.b32.xlu1 %v3177_v25, %s9674_s23  ;;  %v11010_v22 = vld [vmem:[#allocation2 + $0x69] sm:$0xff] }
 0x3b6   : > { %v2874_v30 = vpop.permute.xlu0 %2873  ;;  %v2876_v31 = vpop.permute.xlu1 %2875 }
 0x3b7   : > { %2958 = vst.msk [vmem:[#allocation3 + $0x60] sm:$0xff] %vm2945_vm14, %v2874_v30  ;;  %2959 = vst.msk [vmem:[#allocation3 + $0x68] sm:$0xff] %vm2945_vm14, %v2876_v31  ;;  %v11028_v31 = vld [vmem:[#allocation2 + $0x91] sm:$0xff] }
 0x3b8   : > { %3248 = vrot.lane.b32.xlu0 %v3178_v28, %s9674_s23  ;;  %3250 = vrot.lane.b32.xlu1 %v3179_v29, %s9674_s23  ;;  %v11020_v28 = vld [vmem:[#allocation2 + $0x81] sm:$0xff] }
 0x3ba   : > { %v2878_v34 = vpop.permute.xlu0 %2877  ;;  %v2880_v35 = vpop.permute.xlu1 %2879 }
 0x3bb   : > { %2960 = vst.msk [vmem:[#allocation3 + $0x70] sm:$0xff] %vm2945_vm14, %v2878_v34  ;;  %2961 = vst.msk [vmem:[#allocation3 + $0x78] sm:$0xff] %vm2945_vm14, %v2880_v35  ;;  %v11038_v35 = vld [vmem:[#allocation2 + $0xa9] sm:$0xff] }
 0x3bc   : > { %3252 = vrot.lane.b32.xlu0 %v3180_v32, %s9674_s23  ;;  %3254 = vrot.lane.b32.xlu1 %v3181_v33, %s9674_s23  ;;  %v11030_v32 = vld [vmem:[#allocation2 + $0x99] sm:$0xff] }
 0x3be   : > { %v2882_v38 = vpop.permute.xlu0 %2881  ;;  %v2884_v39 = vpop.permute.xlu1 %2883 }
 0x3bf   : > { %2962 = vst.msk [vmem:[#allocation3 + $0x80] sm:$0xff] %vm2945_vm14, %v2882_v38  ;;  %2963 = vst.msk [vmem:[#allocation3 + $0x88] sm:$0xff] %vm2945_vm14, %v2884_v39  ;;  %v3375_v39 = vld [vmem:[#allocation2 + $0xc1] sm:$0xff] }
 0x3c0   : > { %3256 = vrot.lane.b32.xlu0 %v3182_v36, %s9674_s23  ;;  %3258 = vrot.lane.b32.xlu1 %v3183_v37, %s9674_s23  ;;  %v11040_v36 = vld [vmem:[#allocation2 + $0xb1] sm:$0xff] }
 0x3c2   : > { %v2886_v50 = vpop.permute.xlu0 %2885  ;;  %v2888_v51 = vpop.permute.xlu1 %2887 }
 0x3c3   : > { %2964 = vst.msk [vmem:[#allocation3 + $0x90] sm:$0xff] %vm2945_vm14, %v2886_v50  ;;  %2965 = vst.msk [vmem:[#allocation3 + $0x98] sm:$0xff] %vm2945_vm14, %v2888_v51  ;;  %v3377_v51 = vld [vmem:[#allocation2 + $0xd9] sm:$0xff] }
 0x3c4   : > { %3260 = vrot.lane.b32.xlu0 %v3184_v47, %s9674_s23  ;;  %3262 = vrot.lane.b32.xlu1 %v3185_v49, %s9674_s23  ;;  %v3376_v47 = vld [vmem:[#allocation2 + $0xc9] sm:$0xff] }
 0x3c6   : > { %v2890_v56 = vpop.permute.xlu0 %2889  ;;  %v2892_v57 = vpop.permute.xlu1 %2891 }
 0x3c7   : > { %2966 = vst.msk [vmem:[#allocation3 + $0xa0] sm:$0xff] %vm2945_vm14, %v2890_v56  ;;  %2967 = vst.msk [vmem:[#allocation3 + $0xa8] sm:$0xff] %vm2945_vm14, %v2892_v57  ;;  %v3379_v57 = vld [vmem:[#allocation2 + $0xf1] sm:$0xff] }
 0x3c8   : > { %3264 = vrot.lane.b32.xlu0 %v3186_v54, %s9674_s23  ;;  %3266 = vrot.lane.b32.xlu1 %v3187_v55, %s9674_s23  ;;  %v3378_v54 = vld [vmem:[#allocation2 + $0xe1] sm:$0xff] }
 0x3ca   : > { %v2894_v62 = vpop.permute.xlu0 %2893  ;;  %v2896_v63 = vpop.permute.xlu1 %2895 }
 0x3cb   : > { %2968 = vst.msk [vmem:[#allocation3 + $0xb0] sm:$0xff] %vm2945_vm14, %v2894_v62  ;;  %2969 = vst.msk [vmem:[#allocation3 + $0xb8] sm:$0xff] %vm2945_vm14, %v2896_v63  ;;  %v3381_v63 = vld [vmem:[#allocation2 + $0x109] sm:$0xff] }
 0x3cc   : > { %3268 = vrot.lane.b32.xlu0 %v3188_v58, %s9674_s23  ;;  %3270 = vrot.lane.b32.xlu1 %v3189_v59, %s9674_s23  ;;  %v3380_v58 = vld [vmem:[#allocation2 + $0xf9] sm:$0xff] }
 0x3ce   : > { %v2898_v3 = vpop.permute.xlu0 %2897  ;;  %v2900_v4 = vpop.permute.xlu1 %2899 }
 0x3cf   : > { %2970 = vst.msk [vmem:[#allocation3 + $0xc0] sm:$0xff] %vm2945_vm14, %v2898_v3  ;;  %2971 = vst.msk [vmem:[#allocation3 + $0xc8] sm:$0xff] %vm2945_vm14, %v2900_v4  ;;  %v3383_v4 = vld [vmem:[#allocation2 + $0x121] sm:$0xff] }
 0x3d0   : > { %3272 = vrot.lane.b32.xlu0 %v3190_v0, %s9674_s23  ;;  %3274 = vrot.lane.b32.xlu1 %v3191_v2, %s9674_s23  ;;  %v3382_v0 = vld [vmem:[#allocation2 + $0x111] sm:$0xff] }
 0x3d2   : > { %v2902_v9 = vpop.permute.xlu0 %2901  ;;  %v2904_v10 = vpop.permute.xlu1 %2903 }
 0x3d3   : > { %2972 = vst.msk [vmem:[#allocation3 + $0xd0] sm:$0xff] %vm2945_vm14, %v2902_v9  ;;  %2973 = vst.msk [vmem:[#allocation3 + $0xd8] sm:$0xff] %vm2945_vm14, %v2904_v10  ;;  %v3385_v10 = vld [vmem:[#allocation2 + $0x139] sm:$0xff] }
 0x3d4   : > { %3276 = vrot.lane.b32.xlu0 %v3192_v7, %s9674_s23  ;;  %3278 = vrot.lane.b32.xlu1 %v3193_v8, %s9674_s23  ;;  %v3384_v7 = vld [vmem:[#allocation2 + $0x129] sm:$0xff] }
 0x3d6   : > { %v2906_v15 = vpop.permute.xlu0 %2905  ;;  %v2908_v16 = vpop.permute.xlu1 %2907 }
 0x3d7   : > { %2974 = vst.msk [vmem:[#allocation3 + $0xe0] sm:$0xff] %vm2945_vm14, %v2906_v15  ;;  %2975 = vst.msk [vmem:[#allocation3 + $0xe8] sm:$0xff] %vm2945_vm14, %v2908_v16  ;;  %v3387_v16 = vld [vmem:[#allocation2 + $0x151] sm:$0xff] }
 0x3d8   : > { %3280 = vrot.lane.b32.xlu0 %v3194_v11, %s9674_s23  ;;  %3282 = vrot.lane.b32.xlu1 %v3195_v12, %s9674_s23  ;;  %v3386_v11 = vld [vmem:[#allocation2 + $0x141] sm:$0xff] }
 0x3da   : > { %v2910_v40 = vpop.permute.xlu0 %2909  ;;  %v2912_v41 = vpop.permute.xlu1 %2911 }
 0x3db   : > { %2976 = vst.msk [vmem:[#allocation3 + $0xf0] sm:$0xff] %vm2945_vm14, %v2910_v40  ;;  %2977 = vst.msk [vmem:[#allocation3 + $0xf8] sm:$0xff] %vm2945_vm14, %v2912_v41  ;;  %v3389_v41 = vld [vmem:[#allocation2 + $0x169] sm:$0xff]  ;;  %vm7136_vm14 = vcmask 1041409  }
 0x3dc   : > { %3284 = vrot.lane.b32.xlu0 %v3196_v17, %s9674_s23  ;;  %3286 = vrot.lane.b32.xlu1 %v3197_v18, %s9674_s23  ;;  %v3388_v17 = vld [vmem:[#allocation2 + $0x159] sm:$0xff] }
 0x3de   : > { %v3043_v42 = vpop.permute.xlu0 %3042  ;;  %v3045_v43 = vpop.permute.xlu1 %3044 }
 0x3df   : > { %3139 = vst.msk [vmem:[#allocation3] sm:$0xff] %vm3138_vm15, %v3043_v42  ;;  %3140 = vst.msk [vmem:[#allocation3 + $0x8] sm:$0xff] %vm3138_vm15, %v3045_v43  ;;  %v3391_v43 = vld [vmem:[#allocation2 + $0x181] sm:$0xff] }
 0x3e0   : > { %3288 = vrot.lane.b32.xlu0 %v3198_v19, %s9674_s23  ;;  %3290 = vrot.lane.b32.xlu1 %v3199_v20, %s9674_s23  ;;  %v3390_v19 = vld [vmem:[#allocation2 + $0x171] sm:$0xff] }
 0x3e2   : > { %v3047_v44 = vpop.permute.xlu0 %3046  ;;  %v3049_v45 = vpop.permute.xlu1 %3048 }
 0x3e3   : > { %3141 = vst.msk [vmem:[#allocation3 + $0x10] sm:$0xff] %vm3138_vm15, %v3047_v44  ;;  %3142 = vst.msk [vmem:[#allocation3 + $0x18] sm:$0xff] %vm3138_vm15, %v3049_v45  ;;  %v3393_v45 = vld [vmem:[#allocation2 + $0x199] sm:$0xff] }
 0x3e4   : > { %3292 = vrot.lane.b32.xlu0 %v3200_v23, %s9674_s23  ;;  %3294 = vrot.lane.b32.xlu1 %v3201_v24, %s9674_s23  ;;  %v3392_v23 = vld [vmem:[#allocation2 + $0x189] sm:$0xff] }
 0x3e6   : > { %v3051_v52 = vpop.permute.xlu0 %3050  ;;  %v3053_v53 = vpop.permute.xlu1 %3052 }
 0x3e7   : > { %3143 = vst.msk [vmem:[#allocation3 + $0x20] sm:$0xff] %vm3138_vm15, %v3051_v52  ;;  %3144 = vst.msk [vmem:[#allocation3 + $0x28] sm:$0xff] %vm3138_vm15, %v3053_v53  ;;  %v3395_v53 = vld [vmem:[#allocation2 + $0x1b1] sm:$0xff] }
 0x3e8   : > { %3296 = vrot.lane.b32.xlu0 %v3202_v46, %s9674_s23  ;;  %3298 = vrot.lane.b32.xlu1 %v3203_v48, %s9674_s23  ;;  %v3394_v46 = vld [vmem:[#allocation2 + $0x1a1] sm:$0xff] }
 0x3ea   : > { %v3055_v5 = vpop.permute.xlu0 %3054  ;;  %v3057_v14 = vpop.permute.xlu1 %3056 }
 0x3eb   : > { %3145 = vst.msk [vmem:[#allocation3 + $0x30] sm:$0xff] %vm3138_vm15, %v3055_v5  ;;  %3146 = vst.msk [vmem:[#allocation3 + $0x38] sm:$0xff] %vm3138_vm15, %v3057_v14  ;;  %v3558_v14 = vld [vmem:[#allocation2 + $0x4a] sm:$0xff] }
 0x3ec   : > { %3429 = vrot.lane.b32.xlu0 %v3365_v60, %s9675_s24  ;;  %3431 = vrot.lane.b32.xlu1 %v3366_v61, %s9675_s24  ;;  %v3396_v60 = vld [vmem:[#allocation2 + $0x1b9] sm:$0xff] }
 0x3ee   : > { %v3059_v25 = vpop.permute.xlu0 %3058  ;;  %v3061_v26 = vpop.permute.xlu1 %3060 }
 0x3ef   : > { %3147 = vst.msk [vmem:[#allocation3 + $0x40] sm:$0xff] %vm3138_vm15, %v3059_v25  ;;  %3148 = vst.msk [vmem:[#allocation3 + $0x48] sm:$0xff] %vm3138_vm15, %v3061_v26  ;;  %v3559_v25 = vld [vmem:[#allocation2 + $0x52] sm:$0xff] }
 0x3f0   : > { %3433 = vrot.lane.b32.xlu0 %v11008_v21, %s9675_s24  ;;  %3435 = vrot.lane.b32.xlu1 %v11010_v22, %s9675_s24 }
 0x3f2   : > { %v3063_v29 = vpop.permute.xlu0 %3062  ;;  %v3065_v30 = vpop.permute.xlu1 %3064 }
 0x3f3   : > { %3149 = vst.msk [vmem:[#allocation3 + $0x50] sm:$0xff] %vm3138_vm15, %v3063_v29  ;;  %3150 = vst.msk [vmem:[#allocation3 + $0x58] sm:$0xff] %vm3138_vm15, %v3065_v30  ;;  %v11096_v30 = vld [vmem:[#allocation2 + $0x62] sm:$0xff] }
 0x3f4   : > { %3437 = vrot.lane.b32.xlu0 %v11018_v27, %s9675_s24  ;;  %3439 = vrot.lane.b32.xlu1 %v11020_v28, %s9675_s24 }
 0x3f6   : > { %v3067_v33 = vpop.permute.xlu0 %3066  ;;  %v3069_v34 = vpop.permute.xlu1 %3068 }
 0x3f7   : > { %3151 = vst.msk [vmem:[#allocation3 + $0x60] sm:$0xff] %vm3138_vm15, %v3067_v33  ;;  %3152 = vst.msk [vmem:[#allocation3 + $0x68] sm:$0xff] %vm3138_vm15, %v3069_v34  ;;  %v11098_v33 = vld [vmem:[#allocation2 + $0x6a] sm:$0xff] }
 0x3f8   : > { %3441 = vrot.lane.b32.xlu0 %v11028_v31, %s9675_s24  ;;  %3443 = vrot.lane.b32.xlu1 %v11030_v32, %s9675_s24 }
 0x3fa   : > { %v3071_v37 = vpop.permute.xlu0 %3070  ;;  %v3073_v38 = vpop.permute.xlu1 %3072 }
 0x3fb   : > { %3153 = vst.msk [vmem:[#allocation3 + $0x70] sm:$0xff] %vm3138_vm15, %v3071_v37  ;;  %3154 = vst.msk [vmem:[#allocation3 + $0x78] sm:$0xff] %vm3138_vm15, %v3073_v38  ;;  %v11106_v38 = vld [vmem:[#allocation2 + $0x7a] sm:$0xff] }
 0x3fc   : > { %3445 = vrot.lane.b32.xlu0 %v11038_v35, %s9675_s24  ;;  %3447 = vrot.lane.b32.xlu1 %v11040_v36, %s9675_s24 }
 0x3fe   : > { %v3075_v49 = vpop.permute.xlu0 %3074  ;;  %v3077_v50 = vpop.permute.xlu1 %3076 }
 0x3ff   : > { %3155 = vst.msk [vmem:[#allocation3 + $0x80] sm:$0xff] %vm3138_vm15, %v3075_v49  ;;  %3156 = vst.msk [vmem:[#allocation3 + $0x88] sm:$0xff] %vm3138_vm15, %v3077_v50  ;;  %v11116_v50 = vld [vmem:[#allocation2 + $0x92] sm:$0xff] }
 0x400   : > { %3449 = vrot.lane.b32.xlu0 %v3375_v39, %s9675_s24  ;;  %3451 = vrot.lane.b32.xlu1 %v3376_v47, %s9675_s24  ;;  %v11108_v39 = vld [vmem:[#allocation2 + $0x82] sm:$0xff] }
 0x402   : > { %v3079_v55 = vpop.permute.xlu0 %3078  ;;  %v3081_v56 = vpop.permute.xlu1 %3080 }
 0x403   : > { %3157 = vst.msk [vmem:[#allocation3 + $0x90] sm:$0xff] %vm3138_vm15, %v3079_v55  ;;  %3158 = vst.msk [vmem:[#allocation3 + $0x98] sm:$0xff] %vm3138_vm15, %v3081_v56  ;;  %v11126_v56 = vld [vmem:[#allocation2 + $0xaa] sm:$0xff] }
 0x404   : > { %3453 = vrot.lane.b32.xlu0 %v3377_v51, %s9675_s24  ;;  %3455 = vrot.lane.b32.xlu1 %v3378_v54, %s9675_s24  ;;  %v11118_v51 = vld [vmem:[#allocation2 + $0x9a] sm:$0xff] }
 0x406   : > { %v3083_v59 = vpop.permute.xlu0 %3082  ;;  %v3085_v62 = vpop.permute.xlu1 %3084 }
 0x407   : > { %3159 = vst.msk [vmem:[#allocation3 + $0xa0] sm:$0xff] %vm3138_vm15, %v3083_v59  ;;  %3160 = vst.msk [vmem:[#allocation3 + $0xa8] sm:$0xff] %vm3138_vm15, %v3085_v62  ;;  %v11136_v62 = vld [vmem:[#allocation2 + $0xc2] sm:$0xff] }
 0x408   : > { %3457 = vrot.lane.b32.xlu0 %v3379_v57, %s9675_s24  ;;  %3459 = vrot.lane.b32.xlu1 %v3380_v58, %s9675_s24  ;;  %v11128_v57 = vld [vmem:[#allocation2 + $0xb2] sm:$0xff] }
 0x40a   : > { %v3087_v2 = vpop.permute.xlu0 %3086  ;;  %v3089_v3 = vpop.permute.xlu1 %3088 }
 0x40b   : > { %3161 = vst.msk [vmem:[#allocation3 + $0xb0] sm:$0xff] %vm3138_vm15, %v3087_v2  ;;  %3162 = vst.msk [vmem:[#allocation3 + $0xb8] sm:$0xff] %vm3138_vm15, %v3089_v3  ;;  %v11146_v3 = vld [vmem:[#allocation2 + $0xda] sm:$0xff] }
 0x40c   : > { %3461 = vrot.lane.b32.xlu0 %v3381_v63, %s9675_s24  ;;  %3463 = vrot.lane.b32.xlu1 %v3382_v0, %s9675_s24  ;;  %v11138_v63 = vld [vmem:[#allocation2 + $0xca] sm:$0xff] }
 0x40e   : > { %v3091_v8 = vpop.permute.xlu0 %3090  ;;  %v3093_v9 = vpop.permute.xlu1 %3092 }
 0x40f   : > { %3163 = vst.msk [vmem:[#allocation3 + $0xc0] sm:$0xff] %vm3138_vm15, %v3091_v8  ;;  %3164 = vst.msk [vmem:[#allocation3 + $0xc8] sm:$0xff] %vm3138_vm15, %v3093_v9  ;;  %v3572_v9 = vld [vmem:[#allocation2 + $0xf2] sm:$0xff] }
 0x410   : > { %3465 = vrot.lane.b32.xlu0 %v3383_v4, %s9675_s24  ;;  %3467 = vrot.lane.b32.xlu1 %v3384_v7, %s9675_s24  ;;  %v11148_v4 = vld [vmem:[#allocation2 + $0xe2] sm:$0xff] }
 0x412   : > { %v3095_v12 = vpop.permute.xlu0 %3094  ;;  %v3097_v15 = vpop.permute.xlu1 %3096 }
 0x413   : > { %3165 = vst.msk [vmem:[#allocation3 + $0xd0] sm:$0xff] %vm3138_vm15, %v3095_v12  ;;  %3166 = vst.msk [vmem:[#allocation3 + $0xd8] sm:$0xff] %vm3138_vm15, %v3097_v15  ;;  %v3574_v15 = vld [vmem:[#allocation2 + $0x10a] sm:$0xff] }
 0x414   : > { %3469 = vrot.lane.b32.xlu0 %v3385_v10, %s9675_s24  ;;  %3471 = vrot.lane.b32.xlu1 %v3386_v11, %s9675_s24  ;;  %v3573_v10 = vld [vmem:[#allocation2 + $0xfa] sm:$0xff] }
 0x416   : > { %v3099_v18 = vpop.permute.xlu0 %3098  ;;  %v3101_v40 = vpop.permute.xlu1 %3100 }
 0x417   : > { %3167 = vst.msk [vmem:[#allocation3 + $0xe0] sm:$0xff] %vm3138_vm15, %v3099_v18  ;;  %3168 = vst.msk [vmem:[#allocation3 + $0xe8] sm:$0xff] %vm3138_vm15, %v3101_v40  ;;  %v3576_v40 = vld [vmem:[#allocation2 + $0x122] sm:$0xff] }
 0x418   : > { %3473 = vrot.lane.b32.xlu0 %v3387_v16, %s9675_s24  ;;  %3475 = vrot.lane.b32.xlu1 %v3388_v17, %s9675_s24  ;;  %v3575_v16 = vld [vmem:[#allocation2 + $0x112] sm:$0xff] }
 0x41a   : > { %v3103_v20 = vpop.permute.xlu0 %3102  ;;  %v3105_v42 = vpop.permute.xlu1 %3104 }
 0x41b   : > { %3169 = vst.msk [vmem:[#allocation3 + $0xf0] sm:$0xff] %vm3138_vm15, %v3103_v20  ;;  %3170 = vst.msk [vmem:[#allocation3 + $0xf8] sm:$0xff] %vm3138_vm15, %v3105_v42  ;;  %v3578_v42 = vld [vmem:[#allocation2 + $0x13a] sm:$0xff]  ;;  %vm7138_vm15 = vcmask 1042434  }
 0x41c   : > { %3477 = vrot.lane.b32.xlu0 %v3389_v41, %s9675_s24  ;;  %3479 = vrot.lane.b32.xlu1 %v3390_v19, %s9675_s24  ;;  %v3577_v41 = vld [vmem:[#allocation2 + $0x12a] sm:$0xff] }
 0x41e   : > { %v3237_v24 = vpop.permute.xlu0 %3236  ;;  %v3239_v44 = vpop.permute.xlu1 %3238 }
 0x41f   : > { %3333 = vst.msk [vmem:[#allocation3] sm:$0xff] %vm3332_vm0, %v3237_v24  ;;  %3334 = vst.msk [vmem:[#allocation3 + $0x8] sm:$0xff] %vm3332_vm0, %v3239_v44  ;;  %v3580_v44 = vld [vmem:[#allocation2 + $0x152] sm:$0xff] }
 0x420   : > { %3481 = vrot.lane.b32.xlu0 %v3391_v43, %s9675_s24  ;;  %3483 = vrot.lane.b32.xlu1 %v3392_v23, %s9675_s24  ;;  %v3579_v43 = vld [vmem:[#allocation2 + $0x142] sm:$0xff] }
 0x422   : > { %v3241_v48 = vpop.permute.xlu0 %3240  ;;  %v3243_v52 = vpop.permute.xlu1 %3242 }
 0x423   : > { %3335 = vst.msk [vmem:[#allocation3 + $0x10] sm:$0xff] %vm3332_vm0, %v3241_v48  ;;  %3336 = vst.msk [vmem:[#allocation3 + $0x18] sm:$0xff] %vm3332_vm0, %v3243_v52  ;;  %v3582_v52 = vld [vmem:[#allocation2 + $0x16a] sm:$0xff] }
 0x424   : > { %3485 = vrot.lane.b32.xlu0 %v3393_v45, %s9675_s24  ;;  %3487 = vrot.lane.b32.xlu1 %v3394_v46, %s9675_s24  ;;  %v3581_v45 = vld [vmem:[#allocation2 + $0x15a] sm:$0xff] }
 0x426   : > { %v3245_v61 = vpop.permute.xlu0 %3244  ;;  %v3247_v5 = vpop.permute.xlu1 %3246 }
 0x427   : > { %3337 = vst.msk [vmem:[#allocation3 + $0x20] sm:$0xff] %vm3332_vm0, %v3245_v61  ;;  %3338 = vst.msk [vmem:[#allocation3 + $0x28] sm:$0xff] %vm3332_vm0, %v3247_v5  ;;  %v3584_v5 = vld [vmem:[#allocation2 + $0x182] sm:$0xff] }
 0x428   : > { %3489 = vrot.lane.b32.xlu0 %v3395_v53, %s9675_s24  ;;  %3491 = vrot.lane.b32.xlu1 %v3396_v60, %s9675_s24  ;;  %v3583_v53 = vld [vmem:[#allocation2 + $0x172] sm:$0xff] }
 0x42a   : > { %v3249_v26 = vpop.permute.xlu0 %3248  ;;  %v3251_v29 = vpop.permute.xlu1 %3250 }
 0x42b   : > { %3339 = vst.msk [vmem:[#allocation3 + $0x30] sm:$0xff] %vm3332_vm0, %v3249_v26  ;;  %3340 = vst.msk [vmem:[#allocation3 + $0x38] sm:$0xff] %vm3332_vm0, %v3251_v29  ;;  %v3586_v29 = vld [vmem:[#allocation2 + $0x19a] sm:$0xff] }
 0x42c   : > { %3622 = vrot.lane.b32.xlu0 %v3558_v14, %s9676_s25  ;;  %3624 = vrot.lane.b32.xlu1 %v3559_v25, %s9676_s25  ;;  %v3585_v14 = vld [vmem:[#allocation2 + $0x18a] sm:$0xff] }
 0x42e   : > { %v3253_v34 = vpop.permute.xlu0 %3252  ;;  %v3255_v37 = vpop.permute.xlu1 %3254 }
 0x42f   : > { %3341 = vst.msk [vmem:[#allocation3 + $0x40] sm:$0xff] %vm3332_vm0, %v3253_v34  ;;  %3342 = vst.msk [vmem:[#allocation3 + $0x48] sm:$0xff] %vm3332_vm0, %v3255_v37  ;;  %v3587_v34 = vld [vmem:[#allocation2 + $0x1a2] sm:$0xff] }
 0x430   : > { %3626 = vrot.lane.b32.xlu0 %v11096_v30, %s9676_s25  ;;  %3628 = vrot.lane.b32.xlu1 %v11098_v33, %s9676_s25 }
 0x432   : > { %v3257_v47 = vpop.permute.xlu0 %3256  ;;  %v3259_v49 = vpop.permute.xlu1 %3258 }
 0x433   : > { %3343 = vst.msk [vmem:[#allocation3 + $0x50] sm:$0xff] %vm3332_vm0, %v3257_v47  ;;  %3344 = vst.msk [vmem:[#allocation3 + $0x58] sm:$0xff] %vm3332_vm0, %v3259_v49  ;;  %v3588_v49 = vld [vmem:[#allocation2 + $0x1b2] sm:$0xff] }
 0x434   : > { %3630 = vrot.lane.b32.xlu0 %v11106_v38, %s9676_s25  ;;  %3632 = vrot.lane.b32.xlu1 %v11108_v39, %s9676_s25 }
 0x436   : > { %v3261_v54 = vpop.permute.xlu0 %3260  ;;  %v3263_v55 = vpop.permute.xlu1 %3262 }
 0x437   : > { %3345 = vst.msk [vmem:[#allocation3 + $0x60] sm:$0xff] %vm3332_vm0, %v3261_v54  ;;  %3346 = vst.msk [vmem:[#allocation3 + $0x68] sm:$0xff] %vm3332_vm0, %v3263_v55  ;;  %v3589_v54 = vld [vmem:[#allocation2 + $0x1ba] sm:$0xff] }
 0x438   : > { %3634 = vrot.lane.b32.xlu0 %v11116_v50, %s9676_s25  ;;  %3636 = vrot.lane.b32.xlu1 %v11118_v51, %s9676_s25 }
 0x43a   : > { %v3265_v58 = vpop.permute.xlu0 %3264  ;;  %v3267_v59 = vpop.permute.xlu1 %3266 }
 0x43b   : > { %3347 = vst.msk [vmem:[#allocation3 + $0x70] sm:$0xff] %vm3332_vm0, %v3265_v58  ;;  %3348 = vst.msk [vmem:[#allocation3 + $0x78] sm:$0xff] %vm3332_vm0, %v3267_v59  ;;  %v3751_v59 = vld [vmem:[#allocation2 + $0x4b] sm:$0xff] }
 0x43c   : > { %3638 = vrot.lane.b32.xlu0 %v11126_v56, %s9676_s25  ;;  %3640 = vrot.lane.b32.xlu1 %v11128_v57, %s9676_s25 }
 0x43e   : > { %v3269_v0 = vpop.permute.xlu0 %3268  ;;  %v3271_v2 = vpop.permute.xlu1 %3270 }
 0x43f   : > { %3349 = vst.msk [vmem:[#allocation3 + $0x80] sm:$0xff] %vm3332_vm0, %v3269_v0  ;;  %3350 = vst.msk [vmem:[#allocation3 + $0x88] sm:$0xff] %vm3332_vm0, %v3271_v2  ;;  %v3752_v0 = vld [vmem:[#allocation2 + $0x53] sm:$0xff] }
 0x440   : > { %3642 = vrot.lane.b32.xlu0 %v11136_v62, %s9676_s25  ;;  %3644 = vrot.lane.b32.xlu1 %v11138_v63, %s9676_s25 }
 0x442   : > { %v3273_v7 = vpop.permute.xlu0 %3272  ;;  %v3275_v8 = vpop.permute.xlu1 %3274 }
 0x443   : > { %3351 = vst.msk [vmem:[#allocation3 + $0x90] sm:$0xff] %vm3332_vm0, %v3273_v7  ;;  %3352 = vst.msk [vmem:[#allocation3 + $0x98] sm:$0xff] %vm3332_vm0, %v3275_v8  ;;  %v11196_v8 = vld [vmem:[#allocation2 + $0x63] sm:$0xff] }
 0x444   : > { %3646 = vrot.lane.b32.xlu0 %v11146_v3, %s9676_s25  ;;  %3648 = vrot.lane.b32.xlu1 %v11148_v4, %s9676_s25 }
 0x446   : > { %v3277_v11 = vpop.permute.xlu0 %3276  ;;  %v3279_v12 = vpop.permute.xlu1 %3278 }
 0x447   : > { %3353 = vst.msk [vmem:[#allocation3 + $0xa0] sm:$0xff] %vm3332_vm0, %v3277_v11  ;;  %3354 = vst.msk [vmem:[#allocation3 + $0xa8] sm:$0xff] %vm3332_vm0, %v3279_v12  ;;  %v11206_v12 = vld [vmem:[#allocation2 + $0x7b] sm:$0xff] }
 0x448   : > { %3650 = vrot.lane.b32.xlu0 %v3572_v9, %s9676_s25  ;;  %3652 = vrot.lane.b32.xlu1 %v3573_v10, %s9676_s25  ;;  %v11198_v9 = vld [vmem:[#allocation2 + $0x6b] sm:$0xff] }
 0x44a   : > { %v3281_v17 = vpop.permute.xlu0 %3280  ;;  %v3283_v18 = vpop.permute.xlu1 %3282 }
 0x44b   : > { %3355 = vst.msk [vmem:[#allocation3 + $0xb0] sm:$0xff] %vm3332_vm0, %v3281_v17  ;;  %3356 = vst.msk [vmem:[#allocation3 + $0xb8] sm:$0xff] %vm3332_vm0, %v3283_v18  ;;  %v11216_v18 = vld [vmem:[#allocation2 + $0x93] sm:$0xff] }
 0x44c   : > { %3654 = vrot.lane.b32.xlu0 %v3574_v15, %s9676_s25  ;;  %3656 = vrot.lane.b32.xlu1 %v3575_v16, %s9676_s25  ;;  %v11208_v15 = vld [vmem:[#allocation2 + $0x83] sm:$0xff] }
 0x44e   : > { %v3285_v19 = vpop.permute.xlu0 %3284  ;;  %v3287_v20 = vpop.permute.xlu1 %3286 }
 0x44f   : > { %3357 = vst.msk [vmem:[#allocation3 + $0xc0] sm:$0xff] %vm3332_vm0, %v3285_v19  ;;  %3358 = vst.msk [vmem:[#allocation3 + $0xc8] sm:$0xff] %vm3332_vm0, %v3287_v20  ;;  %v11226_v20 = vld [vmem:[#allocation2 + $0xab] sm:$0xff] }
 0x450   : > { %3658 = vrot.lane.b32.xlu0 %v3576_v40, %s9676_s25  ;;  %3660 = vrot.lane.b32.xlu1 %v3577_v41, %s9676_s25  ;;  %v11218_v40 = vld [vmem:[#allocation2 + $0x9b] sm:$0xff] }
 0x452   : > { %v3289_v23 = vpop.permute.xlu0 %3288  ;;  %v3291_v24 = vpop.permute.xlu1 %3290 }
 0x453   : > { %3359 = vst.msk [vmem:[#allocation3 + $0xd0] sm:$0xff] %vm3332_vm0, %v3289_v23  ;;  %3360 = vst.msk [vmem:[#allocation3 + $0xd8] sm:$0xff] %vm3332_vm0, %v3291_v24  ;;  %v11236_v24 = vld [vmem:[#allocation2 + $0xc3] sm:$0xff] }
 0x454   : > { %3662 = vrot.lane.b32.xlu0 %v3578_v42, %s9676_s25  ;;  %3664 = vrot.lane.b32.xlu1 %v3579_v43, %s9676_s25  ;;  %v11228_v42 = vld [vmem:[#allocation2 + $0xb3] sm:$0xff] }
 0x456   : > { %v3293_v46 = vpop.permute.xlu0 %3292  ;;  %v3295_v48 = vpop.permute.xlu1 %3294 }
 0x457   : > { %3361 = vst.msk [vmem:[#allocation3 + $0xe0] sm:$0xff] %vm3332_vm0, %v3293_v46  ;;  %3362 = vst.msk [vmem:[#allocation3 + $0xe8] sm:$0xff] %vm3332_vm0, %v3295_v48  ;;  %v11246_v48 = vld [vmem:[#allocation2 + $0xdb] sm:$0xff] }
 0x458   : > { %3666 = vrot.lane.b32.xlu0 %v3580_v44, %s9676_s25  ;;  %3668 = vrot.lane.b32.xlu1 %v3581_v45, %s9676_s25  ;;  %v11238_v44 = vld [vmem:[#allocation2 + $0xcb] sm:$0xff] }
 0x45a   : > { %v3297_v60 = vpop.permute.xlu0 %3296  ;;  %v3299_v61 = vpop.permute.xlu1 %3298 }
 0x45b   : > { %3363 = vst.msk [vmem:[#allocation3 + $0xf0] sm:$0xff] %vm3332_vm0, %v3297_v60  ;;  %3364 = vst.msk [vmem:[#allocation3 + $0xf8] sm:$0xff] %vm3332_vm0, %v3299_v61  ;;  %v11256_v61 = vld [vmem:[#allocation2 + $0xf3] sm:$0xff]  ;;  %vm7140_vm0 = vcmask 1043459  }
 0x45c   : > { %3670 = vrot.lane.b32.xlu0 %v3582_v52, %s9676_s25  ;;  %3672 = vrot.lane.b32.xlu1 %v3583_v53, %s9676_s25  ;;  %v11248_v52 = vld [vmem:[#allocation2 + $0xe3] sm:$0xff] }
 0x45e   : > { %v3430_v25 = vpop.permute.xlu0 %3429  ;;  %v3432_v26 = vpop.permute.xlu1 %3431 }
 0x45f   : > { %3526 = vst.msk [vmem:[#allocation3] sm:$0xff] %vm3525_vm1, %v3430_v25  ;;  %3527 = vst.msk [vmem:[#allocation3 + $0x8] sm:$0xff] %vm3525_vm1, %v3432_v26  ;;  %v11266_v26 = vld [vmem:[#allocation2 + $0x10b] sm:$0xff] }
 0x460   : > { %3674 = vrot.lane.b32.xlu0 %v3584_v5, %s9676_s25  ;;  %3676 = vrot.lane.b32.xlu1 %v3585_v14, %s9676_s25  ;;  %v11258_v5 = vld [vmem:[#allocation2 + $0xfb] sm:$0xff] }
 0x462   : > { %v3434_v37 = vpop.permute.xlu0 %3433  ;;  %v3436_v47 = vpop.permute.xlu1 %3435 }
 0x463   : > { %3528 = vst.msk [vmem:[#allocation3 + $0x10] sm:$0xff] %vm3525_vm1, %v3434_v37  ;;  %3529 = vst.msk [vmem:[#allocation3 + $0x18] sm:$0xff] %vm3525_vm1, %v3436_v47  ;;  %v11276_v47 = vld [vmem:[#allocation2 + $0x123] sm:$0xff] }
 0x464   : > { %3678 = vrot.lane.b32.xlu0 %v3586_v29, %s9676_s25  ;;  %3680 = vrot.lane.b32.xlu1 %v3587_v34, %s9676_s25  ;;  %v11268_v29 = vld [vmem:[#allocation2 + $0x113] sm:$0xff] }
 0x466   : > { %v3438_v55 = vpop.permute.xlu0 %3437  ;;  %v3440_v58 = vpop.permute.xlu1 %3439 }
 0x467   : > { %3530 = vst.msk [vmem:[#allocation3 + $0x20] sm:$0xff] %vm3525_vm1, %v3438_v55  ;;  %3531 = vst.msk [vmem:[#allocation3 + $0x28] sm:$0xff] %vm3525_vm1, %v3440_v58  ;;  %v3771_v58 = vld [vmem:[#allocation2 + $0x13b] sm:$0xff] }
 0x468   : > { %3682 = vrot.lane.b32.xlu0 %v3588_v49, %s9676_s25  ;;  %3684 = vrot.lane.b32.xlu1 %v3589_v54, %s9676_s25  ;;  %v11278_v49 = vld [vmem:[#allocation2 + $0x12b] sm:$0xff] }
 0x46a   : > { %v3442_v2 = vpop.permute.xlu0 %3441  ;;  %v3444_v7 = vpop.permute.xlu1 %3443 }
 0x46b   : > { %3532 = vst.msk [vmem:[#allocation3 + $0x30] sm:$0xff] %vm3525_vm1, %v3442_v2  ;;  %3533 = vst.msk [vmem:[#allocation3 + $0x38] sm:$0xff] %vm3525_vm1, %v3444_v7  ;;  %v3944_v7 = vld [vmem:[#allocation2 + $0x4c] sm:$0xff] }
 0x46c   : > { %3815 = vrot.lane.b32.xlu0 %v3751_v59, %s9677_s6  ;;  %3817 = vrot.lane.b32.xlu1 %v3752_v0, %s9677_s6  ;;  %v3772_v59 = vld [vmem:[#allocation2 + $0x143] sm:$0xff] }
 0x46e   : > { %v3446_v10 = vpop.permute.xlu0 %3445  ;;  %v3448_v11 = vpop.permute.xlu1 %3447 }
 0x46f   : > { %3534 = vst.msk [vmem:[#allocation3 + $0x40] sm:$0xff] %vm3525_vm1, %v3446_v10  ;;  %3535 = vst.msk [vmem:[#allocation3 + $0x48] sm:$0xff] %vm3525_vm1, %v3448_v11  ;;  %v3945_v10 = vld [vmem:[#allocation2 + $0x54] sm:$0xff] }
 0x470   : > { %3819 = vrot.lane.b32.xlu0 %v11196_v8, %s9677_s6  ;;  %3821 = vrot.lane.b32.xlu1 %v11198_v9, %s9677_s6 }
 0x472   : > { %v3450_v16 = vpop.permute.xlu0 %3449  ;;  %v3452_v17 = vpop.permute.xlu1 %3451 }
 0x473   : > { %3536 = vst.msk [vmem:[#allocation3 + $0x50] sm:$0xff] %vm3525_vm1, %v3450_v16  ;;  %3537 = vst.msk [vmem:[#allocation3 + $0x58] sm:$0xff] %vm3525_vm1, %v3452_v17 }
 0x474   : > { %3823 = vrot.lane.b32.xlu0 %v11206_v12, %s9677_s6  ;;  %3825 = vrot.lane.b32.xlu1 %v11208_v15, %s9677_s6 }
 0x476   : > { %v3454_v41 = vpop.permute.xlu0 %3453  ;;  %v3456_v19 = vpop.permute.xlu1 %3455 }
 0x477   : > { %3538 = vst.msk [vmem:[#allocation3 + $0x60] sm:$0xff] %vm3525_vm1, %v3454_v41  ;;  %3539 = vst.msk [vmem:[#allocation3 + $0x68] sm:$0xff] %vm3525_vm1, %v3456_v19 }
 0x478   : > { %3827 = vrot.lane.b32.xlu0 %v11216_v18, %s9677_s6  ;;  %3829 = vrot.lane.b32.xlu1 %v11218_v40, %s9677_s6 }
 0x47a   : > { %v3458_v43 = vpop.permute.xlu0 %3457  ;;  %v3460_v23 = vpop.permute.xlu1 %3459 }
 0x47b   : > { %3540 = vst.msk [vmem:[#allocation3 + $0x70] sm:$0xff] %vm3525_vm1, %v3458_v43  ;;  %3541 = vst.msk [vmem:[#allocation3 + $0x78] sm:$0xff] %vm3525_vm1, %v3460_v23  ;;  %v5144_v23 = vld [vmem:[%s13321_s1 + $0x48] sm:$0x7] }
 0x47c   : > { %3831 = vrot.lane.b32.xlu0 %v11226_v20, %s9677_s6  ;;  %3833 = vrot.lane.b32.xlu1 %v11228_v42, %s9677_s6 }
 0x47d   : > { %9499 = vmatprep.subr.msk.mxu0 %vm5249_vm3, %v5144_v23 }
 0x47e   : > { %v3462_v45 = vpop.permute.xlu0 %3461  ;;  %v3464_v46 = vpop.permute.xlu1 %3463  ;;  %9500 = vmatpush3.msk.msra.mxu0 %vm5249_vm3, %v5144_v23  ;;  %vm7146_vm3 = vcmask 1046534  }
 0x47f   : > { %3542 = vst.msk [vmem:[#allocation3 + $0x80] sm:$0xff] %vm3525_vm1, %v3462_v45  ;;  %3543 = vst.msk [vmem:[#allocation3 + $0x88] sm:$0xff] %vm3525_vm1, %v3464_v46 }
 0x480   : > { %3835 = vrot.lane.b32.xlu0 %v11236_v24, %s9677_s6  ;;  %3837 = vrot.lane.b32.xlu1 %v11238_v44, %s9677_s6 }
 0x482   : > { %v3466_v53 = vpop.permute.xlu0 %3465  ;;  %v3468_v60 = vpop.permute.xlu1 %3467 }
 0x483   : > { %3544 = vst.msk [vmem:[#allocation3 + $0x90] sm:$0xff] %vm3525_vm1, %v3466_v53  ;;  %3545 = vst.msk [vmem:[#allocation3 + $0x98] sm:$0xff] %vm3525_vm1, %v3468_v60  ;;  %v5142_v53 = vld [vmem:[%s13321_s1 + $0x38] sm:$0xff] }
 0x484   : > { %3839 = vrot.lane.b32.xlu0 %v11246_v48, %s9677_s6  ;;  %3841 = vrot.lane.b32.xlu1 %v11248_v52, %s9677_s6 }
 0x486   : > { %v3470_v14 = vpop.permute.xlu0 %3469  ;;  %v3472_v25 = vpop.permute.xlu1 %3471 }
 0x487   : > { %3546 = vst.msk [vmem:[#allocation3 + $0xa0] sm:$0xff] %vm3525_vm1, %v3470_v14  ;;  %3547 = vst.msk [vmem:[#allocation3 + $0xa8] sm:$0xff] %vm3525_vm1, %v3472_v25  ;;  %v5140_v14 = vld [vmem:[%s13321_s1 + $0x28] sm:$0xff] }
 0x488   : > { %3843 = vrot.lane.b32.xlu0 %v11256_v61, %s9677_s6  ;;  %3845 = vrot.lane.b32.xlu1 %v11258_v5, %s9677_s6 }
 0x48a   : > { %v3474_v34 = vpop.permute.xlu0 %3473  ;;  %v3476_v37 = vpop.permute.xlu1 %3475 }
 0x48b   : > { %3548 = vst.msk [vmem:[#allocation3 + $0xb0] sm:$0xff] %vm3525_vm1, %v3474_v34  ;;  %3549 = vst.msk [vmem:[#allocation3 + $0xb8] sm:$0xff] %vm3525_vm1, %v3476_v37  ;;  %v5139_v37 = vld [vmem:[%s13321_s1 + $0x20] sm:$0xff] }
 0x48c   : > { %3847 = vrot.lane.b32.xlu0 %v11266_v26, %s9677_s6  ;;  %3849 = vrot.lane.b32.xlu1 %v11268_v29, %s9677_s6 }
 0x48e   : > { %v3478_v54 = vpop.permute.xlu0 %3477  ;;  %v3480_v55 = vpop.permute.xlu1 %3479 }
 0x48f   : > { %3550 = vst.msk [vmem:[#allocation3 + $0xc0] sm:$0xff] %vm3525_vm1, %v3478_v54  ;;  %3551 = vst.msk [vmem:[#allocation3 + $0xc8] sm:$0xff] %vm3525_vm1, %v3480_v55 }
 0x490   : > { %3851 = vrot.lane.b32.xlu0 %v11276_v47, %s9677_s6  ;;  %3853 = vrot.lane.b32.xlu1 %v11278_v49, %s9677_s6 }
 0x492   : > { %v3482_v0 = vpop.permute.xlu0 %3481  ;;  %v3484_v2 = vpop.permute.xlu1 %3483 }
 0x493   : > { %3552 = vst.msk [vmem:[#allocation3 + $0xd0] sm:$0xff] %vm3525_vm1, %v3482_v0  ;;  %3553 = vst.msk [vmem:[#allocation3 + $0xd8] sm:$0xff] %vm3525_vm1, %v3484_v2 }
 0x494   : > { %3855 = vrot.lane.b32.xlu0 %v3771_v58, %s9677_s6  ;;  %3857 = vrot.lane.b32.xlu1 %v3772_v59, %s9677_s6  ;;  %v5137_v58 = vld [vmem:[%s13321_s1 + $0x10] sm:$0xff]  ;;  %v4141_v59 = vld [vmem:[#allocation2 + $0x80] sm:$0xff] }
 0x496   : > { %v3486_v11 = vpop.permute.xlu0 %3485  ;;  %v3488_v16 = vpop.permute.xlu1 %3487 }
 0x497   : > { %3554 = vst.msk [vmem:[#allocation3 + $0xe0] sm:$0xff] %vm3525_vm1, %v3486_v11  ;;  %3555 = vst.msk [vmem:[#allocation3 + $0xe8] sm:$0xff] %vm3525_vm1, %v3488_v16  ;;  %v3948_v16 = vld [vmem:[#allocation2 + $0x7c] sm:$0xff] }
 0x498   : > { %4008 = vrot.lane.b32.xlu0 %v3944_v7, %s9678_s28  ;;  %4010 = vrot.lane.b32.xlu1 %v3945_v10, %s9678_s28  ;;  %v5136_v7 = vld [vmem:[%s13321_s1 + $0x8] sm:$0xff] }
 0x49a   : > { %v3490_v17 = vpop.permute.xlu0 %3489  ;;  %v3492_v41 = vpop.permute.xlu1 %3491 }
 0x49b   : > { %3556 = vst.msk [vmem:[#allocation3 + $0xf0] sm:$0xff] %vm3525_vm1, %v3490_v17  ;;  %3557 = vst.msk [vmem:[#allocation3 + $0xf8] sm:$0xff] %vm3525_vm1, %v3492_v41  ;;  %vm7142_vm1 = vcmask 1044484  }
 0x49c   : > { %4202 = vrot.lane.b32.xlu0 %v10938_v6, %s9679_s29  ;;  %4204 = vrot.lane.b32.xlu1 %v10940_v13, %s9679_s29  ;;  %v5143_v6 = vld [vmem:[%s13321_s1 + $0x40] sm:$0xff] }
 0x49d   : > { %v3946_v13 = vld [vmem:[#allocation2 + $0x64] sm:$0xff]  ;;  %9501 = vmatprep.subr.mxu0 %v5143_v6 }
 0x49e   : > { %v3623_v19 = vpop.permute.xlu0 %3622  ;;  %v3625_v43 = vpop.permute.xlu1 %3624  ;;  %9502 = vmatpush3.msra.mxu0 %v5143_v6 }
 0x49f   : > { %3719 = vst.msk [vmem:[#allocation3] sm:$0xff] %vm3718_vm2, %v3623_v19  ;;  %3720 = vst.msk [vmem:[#allocation3 + $0x8] sm:$0xff] %vm3718_vm2, %v3625_v43  ;;  %9503 = vmatprep.subr.mxu0 %v5142_v53  ;;  %v4142_v43 = vld [vmem:[#allocation2 + $0x90] sm:$0xff] }
 0x4a0   : > { %4395 = vrot.lane.b32.xlu0 %v11008_v21, %s9680_s9  ;;  %4397 = vrot.lane.b32.xlu1 %v11010_v22, %s9680_s9  ;;  %v5141_v21 = vld [vmem:[%s13321_s1 + $0x30] sm:$0xff] }
 0x4a1   : > { %9504 = vmatpush3.msra.mxu0 %v5142_v53 }
 0x4a2   : > { %v3627_v45 = vpop.permute.xlu0 %3626  ;;  %v3629_v46 = vpop.permute.xlu1 %3628  ;;  %9505 = vmatprep.subr.mxu0 %v5141_v21 }
 0x4a3   : > { %3721 = vst.msk [vmem:[#allocation3 + $0x10] sm:$0xff] %vm3718_vm2, %v3627_v45  ;;  %3722 = vst.msk [vmem:[#allocation3 + $0x18] sm:$0xff] %vm3718_vm2, %v3629_v46  ;;  %9506 = vmatpush3.msra.mxu0 %v5141_v21 }
 0x4a4   : > { %4588 = vrot.lane.b32.xlu0 %v11096_v30, %s9681_s14  ;;  %4012 = vrot.lane.b32.xlu1 %v3946_v13, %s9678_s28  ;;  %v3947_v30 = vld [vmem:[#allocation2 + $0x6c] sm:$0xff] }
 0x4a5   : > { %9507 = vmatprep.subr.mxu0 %v5140_v14 }
 0x4a6   : > { %v3631_v22 = vpop.permute.xlu0 %3630  ;;  %v3633_v60 = vpop.permute.xlu1 %3632  ;;  %9508 = vmatpush3.msra.mxu0 %v5140_v14  ;;  %v4144_v14 = vld [vmem:[#allocation2 + $0xa8] sm:$0xff] }
 0x4a7   : > { %3723 = vst.msk [vmem:[#allocation3 + $0x20] sm:$0xff] %vm3718_vm2, %v3631_v22  ;;  %3724 = vst.msk [vmem:[#allocation3 + $0x28] sm:$0xff] %vm3718_vm2, %v3633_v60  ;;  %9509 = vmatprep.subr.mxu0 %v5139_v37 }
 0x4a8   : > { %4590 = vrot.lane.b32.xlu0 %v11098_v33, %s9681_s14  ;;  %4781 = vrot.lane.b32.xlu1 %v11196_v8, %s9682_s19  ;;  %v9645_v33 = vld [vmem:[#allocation2 + $0x78] sm:$0xff] }
 0x4a9   : > { %v5138_v8 = vld [vmem:[%s13321_s1 + $0x18] sm:$0xff]  ;;  %9510 = vmatpush3.msra.mxu0 %v5139_v37 }
 0x4aa   : > { %v3635_v25 = vpop.permute.xlu0 %3634  ;;  %v3637_v34 = vpop.permute.xlu1 %3636  ;;  %9511 = vmatprep.subr.mxu0 %v5138_v8 }
 0x4ab   : > { %3725 = vst.msk [vmem:[#allocation3 + $0x30] sm:$0xff] %vm3718_vm2, %v3635_v25  ;;  %3726 = vst.msk [vmem:[#allocation3 + $0x38] sm:$0xff] %vm3718_vm2, %v3637_v34  ;;  %9512 = vmatpush3.msra.mxu0 %v5138_v8 }
 0x4ac   : > { %4014 = vrot.lane.b32.xlu0 %v3947_v30, %s9678_s28  ;;  %4206 = vrot.lane.b32.xlu1 %v9645_v33, %s9679_s29 }
 0x4ad   : > { %9513 = vmatprep.subr.mxu0 %v5137_v58 }
 0x4ae   : > { %v3639_v54 = vpop.permute.xlu0 %3638  ;;  %v3641_v55 = vpop.permute.xlu1 %3640  ;;  %9514 = vmatpush3.msra.mxu0 %v5137_v58 }
 0x4af   : > { %3727 = vst.msk [vmem:[#allocation3 + $0x40] sm:$0xff] %vm3718_vm2, %v3639_v54  ;;  %3728 = vst.msk [vmem:[#allocation3 + $0x48] sm:$0xff] %vm3718_vm2, %v3641_v55  ;;  %9515 = vmatprep.subr.mxu0 %v5136_v7 }
 0x4b0   : > { %4783 = vrot.lane.b32.xlu0 %v11198_v9, %s9682_s19  ;;  %4974 = vrot.lane.b32.xlu1 %v3946_v13, %s9683_s8  ;;  %v5135_v9 = vld [vmem:[%s13321_s1] sm:$0xff] }
 0x4b1   : > { %9516 = vmatpush3.msra.mxu0 %v5136_v7 }
 0x4b2   : > { %v3643_v0 = vpop.permute.xlu0 %3642  ;;  %v3645_v2 = vpop.permute.xlu1 %3644  ;;  %9517 = vmatprep.subr.mxu0 %v5135_v9 }
 0x4b3   : > { %3729 = vst.msk [vmem:[#allocation3 + $0x50] sm:$0xff] %vm3718_vm2, %v3643_v0  ;;  %3730 = vst.msk [vmem:[#allocation3 + $0x58] sm:$0xff] %vm3718_vm2, %v3645_v2  ;;  %9518 = vmatpush3.msra.mxu0 %v5135_v9 }
 0x4b4   : > { %4208 = vrot.lane.b32.xlu0 %v4141_v59, %s9679_s29  ;;  %4399 = vrot.lane.b32.xlu1 %v11018_v27, %s9680_s9  ;;  %v4146_v59 = vld [vmem:[#allocation2 + $0xc0] sm:$0xff] }
 0x4b5   : > { %8516 = vmatprep.subr.mxu0 %v9659_v1 }
 0x4b6   : > { %v3647_v10 = vpop.permute.xlu0 %3646  ;;  %v3649_v11 = vpop.permute.xlu1 %3648 }
 0x4b7   : > { %3731 = vst.msk [vmem:[#allocation3 + $0x60] sm:$0xff] %vm3718_vm2, %v3647_v10  ;;  %3732 = vst.msk [vmem:[#allocation3 + $0x68] sm:$0xff] %vm3718_vm2, %v3649_v11  ;;  %v4340_v11 = vld [vmem:[#allocation2 + $0xc9] sm:$0xff] }
 0x4b8   : > { %4976 = vrot.lane.b32.xlu0 %v3947_v30, %s9683_s8  ;;  %4401 = vrot.lane.b32.xlu1 %v11020_v28, %s9680_s9  ;;  %v3949_v28 = vld [vmem:[#allocation2 + $0x84] sm:$0xff] }
 0x4ba   : > { %v3651_v27 = vpop.permute.xlu0 %3650  ;;  %v3653_v17 = vpop.permute.xlu1 %3652 }
 0x4bb   : > { %3733 = vst.msk [vmem:[#allocation3 + $0x70] sm:$0xff] %vm3718_vm2, %v3651_v27  ;;  %3734 = vst.msk [vmem:[#allocation3 + $0x78] sm:$0xff] %vm3718_vm2, %v3653_v17 }
 0x4bc   : > { %4592 = vrot.lane.b32.xlu0 %v11106_v38, %s9681_s14  ;;  %4016 = vrot.lane.b32.xlu1 %v3948_v16, %s9678_s28 }
 0x4be   : > { %v3655_v41 = vpop.permute.xlu0 %3654  ;;  %v3657_v19 = vpop.permute.xlu1 %3656 }
 0x4bf   : > { %3735 = vst.msk [vmem:[#allocation3 + $0x80] sm:$0xff] %vm3718_vm2, %v3655_v41  ;;  %3736 = vst.msk [vmem:[#allocation3 + $0x88] sm:$0xff] %vm3718_vm2, %v3657_v19 }
 0x4c0   : > { %4594 = vrot.lane.b32.xlu0 %v11108_v39, %s9681_s14  ;;  %4785 = vrot.lane.b32.xlu1 %v11206_v12, %s9682_s19  ;;  %v4143_v39 = vld [vmem:[#allocation2 + $0x98] sm:$0xff] }
 0x4c2   : > { %v3659_v23 = vpop.permute.xlu0 %3658  ;;  %v3661_v6 = vpop.permute.xlu1 %3660 }
 0x4c3   : > { %3737 = vst.msk [vmem:[#allocation3 + $0x90] sm:$0xff] %vm3718_vm2, %v3659_v23  ;;  %3738 = vst.msk [vmem:[#allocation3 + $0x98] sm:$0xff] %vm3718_vm2, %v3661_v6  ;;  %v4148_v23 = vld [vmem:[#allocation2 + $0xd8] sm:$0xff] }
 0x4c4   : > { %4018 = vrot.lane.b32.xlu0 %v3949_v28, %s9678_s28  ;;  %4210 = vrot.lane.b32.xlu1 %v4142_v43, %s9679_s29  ;;  %v3955_v43 = vld [vmem:[#allocation2 + $0xcc] sm:$0xff] }
 0x4c6   : > { %v3663_v38 = vpop.permute.xlu0 %3662  ;;  %v3665_v13 = vpop.permute.xlu1 %3664 }
 0x4c7   : > { %3739 = vst.msk [vmem:[#allocation3 + $0xa0] sm:$0xff] %vm3718_vm2, %v3663_v38  ;;  %3740 = vst.msk [vmem:[#allocation3 + $0xa8] sm:$0xff] %vm3718_vm2, %v3665_v13 }
 0x4c8   : > { %4787 = vrot.lane.b32.xlu0 %v11208_v15, %s9682_s19  ;;  %4978 = vrot.lane.b32.xlu1 %v3948_v16, %s9683_s8  ;;  %v3950_v15 = vld [vmem:[#allocation2 + $0x94] sm:$0xff] }
 0x4ca   : > { %v3667_v12 = vpop.permute.xlu0 %3666  ;;  %v3669_v45 = vpop.permute.xlu1 %3668 }
 0x4cb   : > { %3741 = vst.msk [vmem:[#allocation3 + $0xb0] sm:$0xff] %vm3718_vm2, %v3667_v12  ;;  %3742 = vst.msk [vmem:[#allocation3 + $0xb8] sm:$0xff] %vm3718_vm2, %v3669_v45  ;;  %v4342_v45 = vld [vmem:[#allocation2 + $0xe1] sm:$0xff] }
 0x4cc   : > { %4212 = vrot.lane.b32.xlu0 %v4143_v39, %s9679_s29  ;;  %4403 = vrot.lane.b32.xlu1 %v11028_v31, %s9680_s9 }
 0x4ce   : > { %v3671_v46 = vpop.permute.xlu0 %3670  ;;  %v3673_v53 = vpop.permute.xlu1 %3672 }
 0x4cf   : > { %3743 = vst.msk [vmem:[#allocation3 + $0xc0] sm:$0xff] %vm3718_vm2, %v3671_v46  ;;  %3744 = vst.msk [vmem:[#allocation3 + $0xc8] sm:$0xff] %vm3718_vm2, %v3673_v53 }
 0x4d0   : > { %4980 = vrot.lane.b32.xlu0 %v3949_v28, %s9683_s8  ;;  %4405 = vrot.lane.b32.xlu1 %v11030_v32, %s9680_s9  ;;  %v3951_v32 = vld [vmem:[#allocation2 + $0x9c] sm:$0xff] }
 0x4d2   : > { %v3675_v21 = vpop.permute.xlu0 %3674  ;;  %v3677_v22 = vpop.permute.xlu1 %3676 }
 0x4d3   : > { %3745 = vst.msk [vmem:[#allocation3 + $0xd0] sm:$0xff] %vm3718_vm2, %v3675_v21  ;;  %3746 = vst.msk [vmem:[#allocation3 + $0xd8] sm:$0xff] %vm3718_vm2, %v3677_v22 }
 0x4d4   : > { %4596 = vrot.lane.b32.xlu0 %v11116_v50, %s9681_s14  ;;  %4020 = vrot.lane.b32.xlu1 %v3950_v15, %s9678_s28 }
 0x4d6   : > { %v3679_v31 = vpop.permute.xlu0 %3678  ;;  %v3681_v60 = vpop.permute.xlu1 %3680 }
 0x4d7   : > { %3747 = vst.msk [vmem:[#allocation3 + $0xe0] sm:$0xff] %vm3718_vm2, %v3679_v31  ;;  %3748 = vst.msk [vmem:[#allocation3 + $0xe8] sm:$0xff] %vm3718_vm2, %v3681_v60  ;;  %v3957_v60 = vld [vmem:[#allocation2 + $0xe4] sm:$0xff] }
 0x4d8   : > { %4598 = vrot.lane.b32.xlu0 %v11118_v51, %s9681_s14  ;;  %4789 = vrot.lane.b32.xlu1 %v11216_v18, %s9682_s19  ;;  %v4145_v51 = vld [vmem:[#allocation2 + $0xb0] sm:$0xff] }
 0x4da   : > { %v3683_v30 = vpop.permute.xlu0 %3682  ;;  %v3685_v25 = vpop.permute.xlu1 %3684 }
 0x4db   : > { %3749 = vst.msk [vmem:[#allocation3 + $0xf0] sm:$0xff] %vm3718_vm2, %v3683_v30  ;;  %3750 = vst.msk [vmem:[#allocation3 + $0xf8] sm:$0xff] %vm3718_vm2, %v3685_v25  ;;  %vm7144_vm2 = vcmask 1045509  }
 0x4dc   : > { %4022 = vrot.lane.b32.xlu0 %v3951_v32, %s9678_s28  ;;  %4214 = vrot.lane.b32.xlu1 %v4144_v14, %s9679_s29 }
 0x4de   : > { %v3816_v50 = vpop.permute.xlu0 %3815  ;;  %v3818_v34 = vpop.permute.xlu1 %3817 }
 0x4df   : > { %3912 = vst.msk [vmem:[#allocation3] sm:$0xff] %vm3911_vm4, %v3816_v50  ;;  %3913 = vst.msk [vmem:[#allocation3 + $0x8] sm:$0xff] %vm3911_vm4, %v3818_v34 }
 0x4e0   : > { %4791 = vrot.lane.b32.xlu0 %v11218_v40, %s9682_s19  ;;  %4982 = vrot.lane.b32.xlu1 %v3950_v15, %s9683_s8  ;;  %v3952_v40 = vld [vmem:[#allocation2 + $0xac] sm:$0xff] }
 0x4e2   : > { %v3820_v18 = vpop.permute.xlu0 %3819  ;;  %v3822_v37 = vpop.permute.xlu1 %3821 }
 0x4e3   : > { %3914 = vst.msk [vmem:[#allocation3 + $0x10] sm:$0xff] %vm3911_vm4, %v3820_v18  ;;  %3915 = vst.msk [vmem:[#allocation3 + $0x18] sm:$0xff] %vm3911_vm4, %v3822_v37  ;;  %v4344_v18 = vld [vmem:[#allocation2 + $0xf9] sm:$0xff] }
 0x4e4   : > { %4216 = vrot.lane.b32.xlu0 %v4145_v51, %s9679_s29  ;;  %4407 = vrot.lane.b32.xlu1 %v11038_v35, %s9680_s9 }
 0x4e6   : > { %v3824_v33 = vpop.permute.xlu0 %3823  ;;  %v3826_v8 = vpop.permute.xlu1 %3825 }
 0x4e7   : > { %3916 = vst.msk [vmem:[#allocation3 + $0x20] sm:$0xff] %vm3911_vm4, %v3824_v33  ;;  %3917 = vst.msk [vmem:[#allocation3 + $0x28] sm:$0xff] %vm3911_vm4, %v3826_v8  ;;  %v4536_v33 = vld [vmem:[#allocation2 + $0xf2] sm:$0xff] }
 0x4e8   : > { %4984 = vrot.lane.b32.xlu0 %v3951_v32, %s9683_s8  ;;  %4409 = vrot.lane.b32.xlu1 %v11040_v36, %s9680_s9  ;;  %v3953_v36 = vld [vmem:[#allocation2 + $0xb4] sm:$0xff] }
 0x4e9   : > { %v4150_v32 = vld [vmem:[#allocation2 + $0xf0] sm:$0xff] }
 0x4ea   : > { %v3828_v54 = vpop.permute.xlu0 %3827  ;;  %v3830_v55 = vpop.permute.xlu1 %3829  ;;  %v3958_v8 = vld [vmem:[#allocation2 + $0xf4] sm:$0xff] }
 0x4eb   : > { %3918 = vst.msk [vmem:[#allocation3 + $0x30] sm:$0xff] %vm3911_vm4, %v3828_v54  ;;  %3919 = vst.msk [vmem:[#allocation3 + $0x38] sm:$0xff] %vm3911_vm4, %v3830_v55 }
 0x4ec   : > { %4600 = vrot.lane.b32.xlu0 %v11126_v56, %s9681_s14  ;;  %4024 = vrot.lane.b32.xlu1 %v3952_v40, %s9678_s28 }
 0x4ee   : > { %v3832_v35 = vpop.permute.xlu0 %3831  ;;  %v3834_v58 = vpop.permute.xlu1 %3833 }
 0x4ef   : > { %3920 = vst.msk [vmem:[#allocation3 + $0x40] sm:$0xff] %vm3911_vm4, %v3832_v35  ;;  %3921 = vst.msk [vmem:[#allocation3 + $0x48] sm:$0xff] %vm3911_vm4, %v3834_v58  ;;  %v4537_v35 = vld [vmem:[#allocation2 + $0xfa] sm:$0xff] }
 0x4f0   : > { %4602 = vrot.lane.b32.xlu0 %v11128_v57, %s9681_s14  ;;  %4793 = vrot.lane.b32.xlu1 %v11226_v20, %s9682_s19  ;;  %v4147_v57 = vld [vmem:[#allocation2 + $0xc8] sm:$0xff] }
 0x4f1   : > { %v4339_v20 = vld [vmem:[#allocation2 + $0xc1] sm:$0xff] }
 0x4f2   : > { %v3836_v0 = vpop.permute.xlu0 %3835  ;;  %v3838_v2 = vpop.permute.xlu1 %3837 }
 0x4f3   : > { %3922 = vst.msk [vmem:[#allocation3 + $0x50] sm:$0xff] %vm3911_vm4, %v3836_v0  ;;  %3923 = vst.msk [vmem:[#allocation3 + $0x58] sm:$0xff] %vm3911_vm4, %v3838_v2  ;;  %v4152_v0 = vld [vmem:[#allocation2 + $0x108] sm:$0xff] }
 0x4f4   : > { %4026 = vrot.lane.b32.xlu0 %v3953_v36, %s9678_s28  ;;  %4218 = vrot.lane.b32.xlu1 %v4146_v59, %s9679_s29  ;;  %v3959_v59 = vld [vmem:[#allocation2 + $0xfc] sm:$0xff] }
 0x4f6   : > { %v3840_v56 = vpop.permute.xlu0 %3839  ;;  %v3842_v7 = vpop.permute.xlu1 %3841 }
 0x4f7   : > { %3924 = vst.msk [vmem:[#allocation3 + $0x60] sm:$0xff] %vm3911_vm4, %v3840_v56  ;;  %3925 = vst.msk [vmem:[#allocation3 + $0x68] sm:$0xff] %vm3911_vm4, %v3842_v7 }
 0x4f8   : > { %4795 = vrot.lane.b32.xlu0 %v11228_v42, %s9682_s19  ;;  %4986 = vrot.lane.b32.xlu1 %v3952_v40, %s9683_s8  ;;  %v3954_v42 = vld [vmem:[#allocation2 + $0xc4] sm:$0xff] }
 0x4fa   : > { %v3844_v9 = vpop.permute.xlu0 %3843  ;;  %v3846_v10 = vpop.permute.xlu1 %3845 }
 0x4fb   : > { %3926 = vst.msk [vmem:[#allocation3 + $0x70] sm:$0xff] %vm3911_vm4, %v3844_v9  ;;  %3927 = vst.msk [vmem:[#allocation3 + $0x78] sm:$0xff] %vm3911_vm4, %v3846_v10 }
 0x4fc   : > { %4220 = vrot.lane.b32.xlu0 %v4147_v57, %s9679_s29  ;;  %4411 = vrot.lane.b32.xlu1 %v4339_v20, %s9680_s9  ;;  %v4345_v20 = vld [vmem:[#allocation2 + $0x109] sm:$0xff] }
 0x4fe   : > { %v3848_v16 = vpop.permute.xlu0 %3847  ;;  %v3850_v27 = vpop.permute.xlu1 %3849 }
 0x4ff   : > { %3928 = vst.msk [vmem:[#allocation3 + $0x80] sm:$0xff] %vm3911_vm4, %v3848_v16  ;;  %3929 = vst.msk [vmem:[#allocation3 + $0x88] sm:$0xff] %vm3911_vm4, %v3850_v27  ;;  %v4346_v16 = vld [vmem:[#allocation2 + $0x111] sm:$0xff] }
 0x500   : > { %4988 = vrot.lane.b32.xlu0 %v3953_v36, %s9683_s8  ;;  %4413 = vrot.lane.b32.xlu1 %v4340_v11, %s9680_s9 }
 0x502   : > { %v3852_v17 = vpop.permute.xlu0 %3851  ;;  %v3854_v41 = vpop.permute.xlu1 %3853 }
 0x503   : > { %3930 = vst.msk [vmem:[#allocation3 + $0x90] sm:$0xff] %vm3911_vm4, %v3852_v17  ;;  %3931 = vst.msk [vmem:[#allocation3 + $0x98] sm:$0xff] %vm3911_vm4, %v3854_v41  ;;  %v3960_v17 = vld [vmem:[#allocation2 + $0x10c] sm:$0xff] }
 0x504   : > { %4604 = vrot.lane.b32.xlu0 %v11136_v62, %s9681_s14  ;;  %4028 = vrot.lane.b32.xlu1 %v3954_v42, %s9678_s28 }
 0x506   : > { %v3856_v19 = vpop.permute.xlu0 %3855  ;;  %v3858_v28 = vpop.permute.xlu1 %3857 }
 0x507   : > { %3932 = vst.msk [vmem:[#allocation3 + $0xa0] sm:$0xff] %vm3911_vm4, %v3856_v19  ;;  %3933 = vst.msk [vmem:[#allocation3 + $0xa8] sm:$0xff] %vm3911_vm4, %v3858_v28 }
 0x508   : > { %4606 = vrot.lane.b32.xlu0 %v11138_v63, %s9681_s14  ;;  %4797 = vrot.lane.b32.xlu1 %v11236_v24, %s9682_s19  ;;  %v4149_v63 = vld [vmem:[#allocation2 + $0xe0] sm:$0xff] }
 0x509   : > { %v4341_v24 = vld [vmem:[#allocation2 + $0xd9] sm:$0xff] }
 0x50a   : > { %v4009_v6 = vpop.permute.xlu0 %4008  ;;  %v4011_v38 = vpop.permute.xlu1 %4010 }
 0x50b   : > { %4105 = vst.msk [vmem:[#allocation3] sm:$0xff] %vm4104_vm5, %v4009_v6  ;;  %4106 = vst.msk [vmem:[#allocation3 + $0x8] sm:$0xff] %vm4104_vm5, %v4011_v38  ;;  %v3961_v38 = vld [vmem:[#allocation2 + $0x114] sm:$0xff] }
 0x50c   : > { %4030 = vrot.lane.b32.xlu0 %v3955_v43, %s9678_s28  ;;  %4222 = vrot.lane.b32.xlu1 %v4148_v23, %s9679_s29 }
 0x50e   : > { %v4203_v62 = vpop.permute.xlu0 %4202  ;;  %v4205_v13 = vpop.permute.xlu1 %4204 }
 0x50f   : > { %4299 = vst.msk [vmem:[#allocation3] sm:$0xff] %vm4298_vm6, %v4203_v62  ;;  %4300 = vst.msk [vmem:[#allocation3 + $0x8] sm:$0xff] %vm4298_vm6, %v4205_v13  ;;  %v4154_v62 = vld [vmem:[#allocation2 + $0x120] sm:$0xff] }
 0x510   : > { %4799 = vrot.lane.b32.xlu0 %v11238_v44, %s9682_s19  ;;  %4990 = vrot.lane.b32.xlu1 %v3954_v42, %s9683_s8  ;;  %v3956_v44 = vld [vmem:[#allocation2 + $0xdc] sm:$0xff]  ;;  %v4538_v42 = vld [vmem:[#allocation2 + $0x10a] sm:$0xff] }
 0x512   : > { %v4396_v39 = vpop.permute.xlu0 %4395  ;;  %v4398_v12 = vpop.permute.xlu1 %4397 }
 0x513   : > { %4492 = vst.msk [vmem:[#allocation3] sm:$0xff] %vm4491_vm7, %v4396_v39  ;;  %4493 = vst.msk [vmem:[#allocation3 + $0x8] sm:$0xff] %vm4491_vm7, %v4398_v12  ;;  %v4347_v12 = vld [vmem:[#allocation2 + $0x121] sm:$0xff] }
 0x514   : > { %4224 = vrot.lane.b32.xlu0 %v4149_v63, %s9679_s29  ;;  %4415 = vrot.lane.b32.xlu1 %v4341_v24, %s9680_s9 }
 0x516   : > { %v4589_v46 = vpop.permute.xlu0 %4588  ;;  %v4013_v53 = vpop.permute.xlu1 %4012 }
 0x517   : > { %4685 = vst.msk [vmem:[#allocation3] sm:$0xff] %vm4684_vm8, %v4589_v46 }
 0x518   : > { %4107 = vst.msk [vmem:[#allocation3 + $0x10] sm:$0xff] %vm4104_vm5, %v4013_v53  ;;  %4992 = vrot.lane.b32.xlu0 %v3955_v43, %s9683_s8  ;;  %4417 = vrot.lane.b32.xlu1 %v4342_v45, %s9680_s9  ;;  %v4539_v43 = vld [vmem:[#allocation2 + $0x112] sm:$0xff] }
 0x51a   : > { %v4591_v15 = vpop.permute.xlu0 %4590  ;;  %v4782_v21 = vpop.permute.xlu1 %4781 }
 0x51b   : > { %4686 = vst.msk [vmem:[#allocation3 + $0x8] sm:$0xff] %vm4684_vm8, %v4591_v15 }
 0x51c   : > { %4878 = vst.msk [vmem:[#allocation3] sm:$0xff] %vm4877_vm9, %v4782_v21  ;;  %4608 = vrot.lane.b32.xlu0 %v11146_v3, %s9681_s14  ;;  %4032 = vrot.lane.b32.xlu1 %v3956_v44, %s9678_s28  ;;  %v4540_v21 = vld [vmem:[#allocation2 + $0x122] sm:$0xff] }
 0x51e   : > { %v4015_v22 = vpop.permute.xlu0 %4014  ;;  %v4207_v31 = vpop.permute.xlu1 %4206 }
 0x51f   : > { %4108 = vst.msk [vmem:[#allocation3 + $0x18] sm:$0xff] %vm4104_vm5, %v4015_v22  ;;  %v3962_v22 = vld [vmem:[#allocation2 + $0x124] sm:$0xff] }
 0x520   : > { %4301 = vst.msk [vmem:[#allocation3 + $0x10] sm:$0xff] %vm4298_vm6, %v4207_v31  ;;  %4610 = vrot.lane.b32.xlu0 %v11148_v4, %s9681_s14  ;;  %4801 = vrot.lane.b32.xlu1 %v11246_v48, %s9682_s19  ;;  %v4151_v4 = vld [vmem:[#allocation2 + $0xf8] sm:$0xff] }
 0x521   : > { %v4343_v48 = vld [vmem:[#allocation2 + $0xf1] sm:$0xff] }
 0x522   : > { %v4784_v14 = vpop.permute.xlu0 %4783  ;;  %v4975_v30 = vpop.permute.xlu1 %4974 }
 0x523   : > { %4879 = vst.msk [vmem:[#allocation3 + $0x8] sm:$0xff] %vm4877_vm9, %v4784_v14  ;;  %v4541_v14 = vld [vmem:[#allocation2 + $0x12a] sm:$0xff] }
 0x524   : > { %5071 = vst.msk [vmem:[#allocation3] sm:$0xff] %vm5070_vm10, %v4975_v30  ;;  %4034 = vrot.lane.b32.xlu0 %v3957_v60, %s9678_s28  ;;  %4226 = vrot.lane.b32.xlu1 %v4150_v32, %s9679_s29 }
 0x526   : > { %v4209_v3 = vpop.permute.xlu0 %4208  ;;  %v4400_v25 = vpop.permute.xlu1 %4399 }
 0x527   : > { %4302 = vst.msk [vmem:[#allocation3 + $0x18] sm:$0xff] %vm4298_vm6, %v4209_v3 }
 0x528   : > { %4494 = vst.msk [vmem:[#allocation3 + $0x10] sm:$0xff] %vm4491_vm7, %v4400_v25  ;;  %4803 = vrot.lane.b32.xlu0 %v11248_v52, %s9682_s19  ;;  %4994 = vrot.lane.b32.xlu1 %v3956_v44, %s9683_s8  ;;  %v4348_v44 = vld [vmem:[#allocation2 + $0x129] sm:$0xff] }
 0x529   : > { %v3963_v25 = vld [vmem:[#allocation2 + $0x12c] sm:$0xff] }
 0x52a   : > { %v4977_v50 = vpop.permute.xlu0 %4976  ;;  %v4402_v34 = vpop.permute.xlu1 %4401 }
 0x52b   : > { %v5103_v51 = vld [vmem:[#allocation3] sm:$0xff]  ;;  %5072 = vst.msk [vmem:[#allocation3 + $0x8] sm:$0xff] %vm5070_vm10, %v4977_v50 }
 0x52c   : > { %4495 = vst.msk [vmem:[#allocation3 + $0x18] sm:$0xff] %vm4491_vm7, %v4402_v34  ;;  %9519 = vmatprep.mubr.msk.f32.mxu0 %vm5152_vm11, %v5103_v51  ;;  %4228 = vrot.lane.b32.xlu0 %v4151_v4, %s9679_s29  ;;  %v4156_v4 = vld [vmem:[#allocation2 + $0x138] sm:$0xff] }
 0x52d   : > { %4419 = vrot.lane.b32.xlu1 %v4343_v48, %s9680_s9 }
 0x52e   : > { %v4593_v52 = vpop.permute.xlu0 %4592  ;;  %v4017_v37 = vpop.permute.xlu1 %4016 }
 0x52f   : > { %4687 = vst.msk [vmem:[#allocation3 + $0x10] sm:$0xff] %vm4684_vm8, %v4593_v52 }
 0x530   : > { %4109 = vst.msk [vmem:[#allocation3 + $0x20] sm:$0xff] %vm4104_vm5, %v4017_v37  ;;  %4996 = vrot.lane.b32.xlu0 %v3957_v60, %s9683_s8 }
 0x531   : > { %4421 = vrot.lane.b32.xlu1 %v4344_v18, %s9680_s9  ;;  %v4349_v18 = vld [vmem:[#allocation2 + $0x139] sm:$0xff] }
 0x532   : > { %v4595_v40 = vpop.permute.xlu0 %4594  ;;  %v4786_v54 = vpop.permute.xlu1 %4785  ;;  %v5104_v55 = vld [vmem:[#allocation3 + $0x8] sm:$0xff] }
 0x533   : > { %4688 = vst.msk [vmem:[#allocation3 + $0x18] sm:$0xff] %vm4684_vm8, %v4595_v40  ;;  %9520 = vmatmul.mubr.msk.f32.vlgmr.msra.gmra.mxu0 %vm5152_vm11, %v5104_v55  ;;  %v3964_v55 = vld [vmem:[#allocation2 + $0x13c] sm:$0xff] }
 0x534   : > { %4880 = vst.msk [vmem:[#allocation3 + $0x10] sm:$0xff] %vm4877_vm9, %v4786_v54  ;;  %4612 = vrot.lane.b32.xlu0 %v4536_v33, %s9681_s14  ;;  %v4542_v54 = vld [vmem:[#allocation2 + $0x13a] sm:$0xff] }
 0x535   : > { %4036 = vrot.lane.b32.xlu1 %v3958_v8, %s9678_s28 }
 0x536   : > { %v4019_v58 = vpop.permute.xlu0 %4018  ;;  %v4211_v36 = vpop.permute.xlu1 %4210 }
 0x537   : > { %4110 = vst.msk [vmem:[#allocation3 + $0x28] sm:$0xff] %vm4104_vm5, %v4019_v58 }
 0x538   : > { %4303 = vst.msk [vmem:[#allocation3 + $0x20] sm:$0xff] %vm4298_vm6, %v4211_v36  ;;  %4614 = vrot.lane.b32.xlu0 %v4537_v35, %s9681_s14 }
 0x539   : > { %4805 = vrot.lane.b32.xlu1 %v11256_v61, %s9682_s19  ;;  %v4153_v61 = vld [vmem:[#allocation2 + $0x110] sm:$0xff] }
 0x53a   : > { %v4788_v2 = vpop.permute.xlu0 %4787  ;;  %v4979_v56 = vpop.permute.xlu1 %4978 }
 0x53b   : > { %4881 = vst.msk [vmem:[#allocation3 + $0x18] sm:$0xff] %vm4877_vm9, %v4788_v2 }
 0x53c   : > { %5073 = vst.msk [vmem:[#allocation3 + $0x10] sm:$0xff] %vm5070_vm10, %v4979_v56  ;;  %4038 = vrot.lane.b32.xlu0 %v3959_v59, %s9678_s28 }
 0x53d   : > { %4230 = vrot.lane.b32.xlu1 %v4152_v0, %s9679_s29  ;;  %v4735_v0 = vld [vmem:[#allocation2 + $0x13b] sm:$0xff] }
 0x53e   : > { %v4213_v7 = vpop.permute.xlu0 %4212  ;;  %v4404_v57 = vpop.permute.xlu1 %4403 }
 0x53f   : > { %4304 = vst.msk [vmem:[#allocation3 + $0x28] sm:$0xff] %vm4298_vm6, %v4213_v7  ;;  %v3965_v7 = vld [vmem:[#allocation2 + $0x144] sm:$0xff] }
 0x540   : > { %4496 = vst.msk [vmem:[#allocation3 + $0x20] sm:$0xff] %vm4491_vm7, %v4404_v57  ;;  %4807 = vrot.lane.b32.xlu0 %v11258_v5, %s9682_s19  ;;  %v4158_v57 = vld [vmem:[#allocation2 + $0x150] sm:$0xff] }
 0x541   : > { %4998 = vrot.lane.b32.xlu1 %v3958_v8, %s9683_s8  ;;  %v4350_v8 = vld [vmem:[#allocation2 + $0x141] sm:$0xff] }
 0x542   : > { %v4981_v9 = vpop.permute.xlu0 %4980  ;;  %v4406_v10 = vpop.permute.xlu1 %4405 }
 0x543   : > { %v5105_v11 = vld [vmem:[#allocation3 + $0x10] sm:$0xff]  ;;  %5074 = vst.msk [vmem:[#allocation3 + $0x18] sm:$0xff] %vm5070_vm10, %v4981_v9  ;;  %v4736_v9 = vld [vmem:[#allocation2 + $0x143] sm:$0xff] }
 0x544   : > { %4497 = vst.msk [vmem:[#allocation3 + $0x28] sm:$0xff] %vm4491_vm7, %v4406_v10  ;;  %9522 = vmatprep.mubr.msk.f32.mxu0 %vm5152_vm11, %v5105_v11  ;;  %4232 = vrot.lane.b32.xlu0 %v4153_v61, %s9679_s29 }
 0x545   : > { %4423 = vrot.lane.b32.xlu1 %v4345_v20, %s9680_s9 }
 0x546   : > { %v4597_v27 = vpop.permute.xlu0 %4596  ;;  %v4021_v5 = vpop.permute.xlu1 %4020 }
 0x547   : > { %4689 = vst.msk [vmem:[#allocation3 + $0x20] sm:$0xff] %vm4684_vm8, %v4597_v27  ;;  %v4351_v27 = vld [vmem:[#allocation2 + $0x151] sm:$0xff] }
 0x548   : > { %4111 = vst.msk [vmem:[#allocation3 + $0x30] sm:$0xff] %vm4104_vm5, %v4021_v5  ;;  %5000 = vrot.lane.b32.xlu0 %v3959_v59, %s9683_s8  ;;  %v4543_v59 = vld [vmem:[#allocation2 + $0x142] sm:$0xff] }
 0x549   : > { %4425 = vrot.lane.b32.xlu1 %v4346_v16, %s9680_s9  ;;  %v4159_v16 = vld [vmem:[#allocation2 + $0x158] sm:$0xff] }
 0x54a   : > { %v4599_v41 = vpop.permute.xlu0 %4598  ;;  %v4790_v19 = vpop.permute.xlu1 %4789  ;;  %v5106_v28 = vld [vmem:[#allocation3 + $0x18] sm:$0xff] }
 0x54b   : > { %4690 = vst.msk [vmem:[#allocation3 + $0x28] sm:$0xff] %vm4684_vm8, %v4599_v41  ;;  %9523 = vmatmul.mubr.msk.f32.gmra.mxu0 %vm5152_vm11, %v5106_v28  ;;  %v3773_v41 = vld [vmem:[#allocation2 + $0x153] sm:$0xff] }
 0x54c   : > { %4882 = vst.msk [vmem:[#allocation3 + $0x20] sm:$0xff] %vm4877_vm9, %v4790_v19  ;;  %4616 = vrot.lane.b32.xlu0 %v4538_v42, %s9681_s14 }
 0x54d   : > { %4040 = vrot.lane.b32.xlu1 %v3960_v17, %s9678_s28 }
 0x54e   : > { %v4023_v23 = vpop.permute.xlu0 %4022  ;;  %v4215_v6 = vpop.permute.xlu1 %4214 }
 0x54f   : > { %4112 = vst.msk [vmem:[#allocation3 + $0x38] sm:$0xff] %vm4104_vm5, %v4023_v23  ;;  %v4544_v23 = vld [vmem:[#allocation2 + $0x152] sm:$0xff] }
 0x550   : > { %4305 = vst.msk [vmem:[#allocation3 + $0x30] sm:$0xff] %vm4298_vm6, %v4215_v6  ;;  %4618 = vrot.lane.b32.xlu0 %v4539_v43, %s9681_s14  ;;  %v4352_v43 = vld [vmem:[#allocation2 + $0x159] sm:$0xff] }
 0x551   : > { %4809 = vrot.lane.b32.xlu1 %v11266_v26, %s9682_s19  ;;  %v4155_v26 = vld [vmem:[#allocation2 + $0x128] sm:$0xff] }
 0x552   : > { %v4792_v13 = vpop.permute.xlu0 %4791  ;;  %v4983_v63 = vpop.permute.xlu1 %4982 }
 0x553   : > { %4883 = vst.msk [vmem:[#allocation3 + $0x28] sm:$0xff] %vm4877_vm9, %v4792_v13  ;;  %v3774_v13 = vld [vmem:[#allocation2 + $0x15b] sm:$0xff] }
 0x554   : > { %5075 = vst.msk [vmem:[#allocation3 + $0x20] sm:$0xff] %vm5070_vm10, %v4983_v63  ;;  %4042 = vrot.lane.b32.xlu0 %v3961_v38, %s9678_s28  ;;  %v3966_v63 = vld [vmem:[#allocation2 + $0x154] sm:$0xff] }
 0x555   : > { %4234 = vrot.lane.b32.xlu1 %v4154_v62, %s9679_s29 }
 0x556   : > { %v4217_v24 = vpop.permute.xlu0 %4216  ;;  %v4408_v39 = vpop.permute.xlu1 %4407 }
 0x557   : > { %4306 = vst.msk [vmem:[#allocation3 + $0x38] sm:$0xff] %vm4298_vm6, %v4217_v24 }
 0x558   : > { %4498 = vst.msk [vmem:[#allocation3 + $0x30] sm:$0xff] %vm4491_vm7, %v4408_v39  ;;  %4811 = vrot.lane.b32.xlu0 %v11268_v29, %s9682_s19 }
 0x559   : > { %5002 = vrot.lane.b32.xlu1 %v3960_v17, %s9683_s8 }
 0x55a   : > { %v4985_v45 = vpop.permute.xlu0 %4984  ;;  %v4410_v46 = vpop.permute.xlu1 %4409 }
 0x55b   : > { %v5107_v53 = vld [vmem:[#allocation3 + $0x20] sm:$0xff]  ;;  %5076 = vst.msk [vmem:[#allocation3 + $0x28] sm:$0xff] %vm5070_vm10, %v4985_v45 }
 0x55c   : > { %4499 = vst.msk [vmem:[#allocation3 + $0x38] sm:$0xff] %vm4491_vm7, %v4410_v46  ;;  %9525 = vmatprep.mubr.msk.f32.mxu0 %vm5152_vm11, %v5107_v53  ;;  %4236 = vrot.lane.b32.xlu0 %v4155_v26, %s9679_s29  ;;  %v4545_v26 = vld [vmem:[#allocation2 + $0x15a] sm:$0xff]  ;;  %v4160_v53 = vld [vmem:[#allocation2 + $0x168] sm:$0xff] }
 0x55d   : > { %4427 = vrot.lane.b32.xlu1 %v4347_v12, %s9680_s9  ;;  %v3967_v46 = vld [vmem:[#allocation2 + $0x15c] sm:$0xff] }
 0x55e   : > { %v4601_v15 = vpop.permute.xlu0 %4600  ;;  %v4025_v29 = vpop.permute.xlu1 %4024 }
 0x55f   : > { %4691 = vst.msk [vmem:[#allocation3 + $0x30] sm:$0xff] %vm4684_vm8, %v4601_v15 }
 0x560   : > { %4113 = vst.msk [vmem:[#allocation3 + $0x40] sm:$0xff] %vm4104_vm5, %v4025_v29  ;;  %5004 = vrot.lane.b32.xlu0 %v3961_v38, %s9683_s8 }
 0x561   : > { %4429 = vrot.lane.b32.xlu1 %v4348_v44, %s9680_s9 }
 0x562   : > { %v4603_v31 = vpop.permute.xlu0 %4602  ;;  %v4794_v60 = vpop.permute.xlu1 %4793  ;;  %v5108_v32 = vld [vmem:[#allocation3 + $0x28] sm:$0xff] }
 0x563   : > { %4692 = vst.msk [vmem:[#allocation3 + $0x38] sm:$0xff] %vm4684_vm8, %v4603_v31  ;;  %9526 = vmatmul.mubr.msk.f32.gmra.mxu0 %vm5152_vm11, %v5108_v32  ;;  %v4161_v31 = vld [vmem:[#allocation2 + $0x170] sm:$0xff] }
 0x564   : > { %4884 = vst.msk [vmem:[#allocation3 + $0x30] sm:$0xff] %vm4877_vm9, %v4794_v60  ;;  %4620 = vrot.lane.b32.xlu0 %v4540_v21, %s9681_s14  ;;  %v4353_v60 = vld [vmem:[#allocation2 + $0x169] sm:$0xff] }
 0x565   : > { %4044 = vrot.lane.b32.xlu1 %v3962_v22, %s9678_s28 }
 0x566   : > { %v4027_v30 = vpop.permute.xlu0 %4026  ;;  %v4219_v3 = vpop.permute.xlu1 %4218 }
 0x567   : > { %4114 = vst.msk [vmem:[#allocation3 + $0x48] sm:$0xff] %vm4104_vm5, %v4027_v30  ;;  %v3775_v30 = vld [vmem:[#allocation2 + $0x16b] sm:$0xff] }
 0x568   : > { %4307 = vst.msk [vmem:[#allocation3 + $0x40] sm:$0xff] %vm4298_vm6, %v4219_v3  ;;  %4622 = vrot.lane.b32.xlu0 %v4541_v14, %s9681_s14 }
 0x569   : > { %4813 = vrot.lane.b32.xlu1 %v11276_v47, %s9682_s19  ;;  %v4157_v47 = vld [vmem:[#allocation2 + $0x140] sm:$0xff] }
 0x56a   : > { %v4796_v48 = vpop.permute.xlu0 %4795  ;;  %v4987_v50 = vpop.permute.xlu1 %4986 }
 0x56b   : > { %4885 = vst.msk [vmem:[#allocation3 + $0x38] sm:$0xff] %vm4877_vm9, %v4796_v48  ;;  %v4354_v48 = vld [vmem:[#allocation2 + $0x171] sm:$0xff] }
 0x56c   : > { %5077 = vst.msk [vmem:[#allocation3 + $0x30] sm:$0xff] %vm5070_vm10, %v4987_v50  ;;  %4046 = vrot.lane.b32.xlu0 %v3963_v25, %s9678_s28  ;;  %v4546_v50 = vld [vmem:[#allocation2 + $0x16a] sm:$0xff] }
 0x56d   : > { %4238 = vrot.lane.b32.xlu1 %v4156_v4, %s9679_s29 }
 0x56e   : > { %v4221_v34 = vpop.permute.xlu0 %4220  ;;  %v4412_v51 = vpop.permute.xlu1 %4411 }
 0x56f   : > { %4308 = vst.msk [vmem:[#allocation3 + $0x48] sm:$0xff] %vm4298_vm6, %v4221_v34 }
 0x570   : > { %4500 = vst.msk [vmem:[#allocation3 + $0x40] sm:$0xff] %vm4491_vm7, %v4412_v51  ;;  %4815 = vrot.lane.b32.xlu0 %v11278_v49, %s9682_s19 }
 0x571   : > { %5006 = vrot.lane.b32.xlu1 %v3962_v22, %s9683_s8 }
 0x572   : > { %v4989_v52 = vpop.permute.xlu0 %4988  ;;  %v4414_v37 = vpop.permute.xlu1 %4413 }
 0x573   : > { %v5109_v33 = vld [vmem:[#allocation3 + $0x30] sm:$0xff]  ;;  %5078 = vst.msk [vmem:[#allocation3 + $0x38] sm:$0xff] %vm5070_vm10, %v4989_v52 }
 0x574   : > { %4501 = vst.msk [vmem:[#allocation3 + $0x48] sm:$0xff] %vm4491_vm7, %v4414_v37  ;;  %9528 = vmatprep.mubr.msk.f32.mxu0 %vm5152_vm11, %v5109_v33  ;;  %4240 = vrot.lane.b32.xlu0 %v4157_v47, %s9679_s29  ;;  %v3776_v47 = vld [vmem:[#allocation2 + $0x173] sm:$0xff] }
 0x575   : > { %4431 = vrot.lane.b32.xlu1 %v4349_v18, %s9680_s9  ;;  %v3968_v18 = vld [vmem:[#allocation2 + $0x16c] sm:$0xff] }
 0x576   : > { %v4605_v40 = vpop.permute.xlu0 %4604  ;;  %v4029_v49 = vpop.permute.xlu1 %4028  ;;  %v4547_v33 = vld [vmem:[#allocation2 + $0x172] sm:$0xff] }
 0x577   : > { %4693 = vst.msk [vmem:[#allocation3 + $0x40] sm:$0xff] %vm4684_vm8, %v4605_v40 }
 0x578   : > { %4115 = vst.msk [vmem:[#allocation3 + $0x50] sm:$0xff] %vm4104_vm5, %v4029_v49  ;;  %5008 = vrot.lane.b32.xlu0 %v3963_v25, %s9683_s8  ;;  %v3969_v49 = vld [vmem:[#allocation2 + $0x174] sm:$0xff] }
 0x579   : > { %4433 = vrot.lane.b32.xlu1 %v4350_v8, %s9680_s9 }
 0x57a   : > { %v4607_v35 = vpop.permute.xlu0 %4606  ;;  %v4798_v58 = vpop.permute.xlu1 %4797  ;;  %v5110_v36 = vld [vmem:[#allocation3 + $0x38] sm:$0xff] }
 0x57b   : > { %4694 = vst.msk [vmem:[#allocation3 + $0x48] sm:$0xff] %vm4684_vm8, %v4607_v35  ;;  %9529 = vmatmul.mubr.msk.f32.gmra.mxu0 %vm5152_vm11, %v5110_v36 }
 0x57c   : > { %4886 = vst.msk [vmem:[#allocation3 + $0x40] sm:$0xff] %vm4877_vm9, %v4798_v58  ;;  %4624 = vrot.lane.b32.xlu0 %v4542_v54, %s9681_s14  ;;  %v4162_v54 = vld [vmem:[#allocation2 + $0x180] sm:$0xff] }
 0x57d   : > { %4048 = vrot.lane.b32.xlu1 %v3964_v55, %s9678_s28 }
 0x57e   : > { %v4031_v2 = vpop.permute.xlu0 %4030  ;;  %v4223_v56 = vpop.permute.xlu1 %4222 }
 0x57f   : > { %4116 = vst.msk [vmem:[#allocation3 + $0x58] sm:$0xff] %vm4104_vm5, %v4031_v2  ;;  %v4355_v2 = vld [vmem:[#allocation2 + $0x181] sm:$0xff] }
 0x580   : > { %4309 = vst.msk [vmem:[#allocation3 + $0x50] sm:$0xff] %vm4298_vm6, %v4223_v56  ;;  %4626 = vrot.lane.b32.xlu0 %v4543_v59, %s9681_s14 }
 0x581   : > { %4817 = vrot.lane.b32.xlu1 %v4735_v0, %s9682_s19  ;;  %v4163_v0 = vld [vmem:[#allocation2 + $0x188] sm:$0xff] }
 0x582   : > { %v4800_v61 = vpop.permute.xlu0 %4799  ;;  %v4991_v20 = vpop.permute.xlu1 %4990 }
 0x583   : > { %4887 = vst.msk [vmem:[#allocation3 + $0x48] sm:$0xff] %vm4877_vm9, %v4800_v61  ;;  %v11722_v61 = vld [vmem:[#allocation4 + $0x10] sm:$0xff] }
 0x584   : > { %5079 = vst.msk [vmem:[#allocation3 + $0x40] sm:$0xff] %vm5070_vm10, %v4991_v20  ;;  %4050 = vrot.lane.b32.xlu0 %v3965_v7, %s9678_s28  ;;  %v3777_v20 = vld [vmem:[#allocation2 + $0x183] sm:$0xff] }
 0x585   : > { %4242 = vrot.lane.b32.xlu1 %v4158_v57, %s9679_s29  ;;  %7225 = vst.msk [vmem:[#allocation5 + $0x20] sm:$0xff] %vm6790_vm12, %v11722_v61 }
 0x586   : > { %v4225_v10 = vpop.permute.xlu0 %4224  ;;  %v4416_v11 = vpop.permute.xlu1 %4415 }
 0x587   : > { %4310 = vst.msk [vmem:[#allocation3 + $0x58] sm:$0xff] %vm4298_vm6, %v4225_v10 }
 0x588   : > { %4502 = vst.msk [vmem:[#allocation3 + $0x50] sm:$0xff] %vm4491_vm7, %v4416_v11  ;;  %4819 = vrot.lane.b32.xlu0 %v4736_v9, %s9682_s19  ;;  %v4356_v11 = vld [vmem:[#allocation2 + $0x189] sm:$0xff] }
 0x589   : > { %5010 = vrot.lane.b32.xlu1 %v3964_v55, %s9683_s8 }
 0x58a   : > { %v4993_v5 = vpop.permute.xlu0 %4992  ;;  %v4418_v42 = vpop.permute.xlu1 %4417 }
 0x58b   : > { %v5111_v17 = vld [vmem:[#allocation3 + $0x40] sm:$0xff]  ;;  %5080 = vst.msk [vmem:[#allocation3 + $0x48] sm:$0xff] %vm5070_vm10, %v4993_v5 }
 0x58c   : > { %4503 = vst.msk [vmem:[#allocation3 + $0x58] sm:$0xff] %vm4491_vm7, %v4418_v42  ;;  %9531 = vmatprep.mubr.msk.f32.mxu0 %vm5152_vm11, %v5111_v17  ;;  %4244 = vrot.lane.b32.xlu0 %v4159_v16, %s9679_s29  ;;  %v4548_v16 = vld [vmem:[#allocation2 + $0x182] sm:$0xff]  ;;  %v3778_v42 = vld [vmem:[#allocation2 + $0x18b] sm:$0xff] }
 0x58d   : > { %4435 = vrot.lane.b32.xlu1 %v4351_v27, %s9680_s9  ;;  %v3970_v17 = vld [vmem:[#allocation2 + $0x184] sm:$0xff] }
 0x58e   : > { %v4609_v19 = vpop.permute.xlu0 %4608  ;;  %v4033_v28 = vpop.permute.xlu1 %4032 }
 0x58f   : > { %4695 = vst.msk [vmem:[#allocation3 + $0x50] sm:$0xff] %vm4684_vm8, %v4609_v19 }
 0x590   : > { %4117 = vst.msk [vmem:[#allocation3 + $0x60] sm:$0xff] %vm4104_vm5, %v4033_v28  ;;  %5012 = vrot.lane.b32.xlu0 %v3965_v7, %s9683_s8  ;;  %v4549_v28 = vld [vmem:[#allocation2 + $0x18a] sm:$0xff] }
 0x591   : > { %3859 = vrot.lane.b32.xlu1 %v3773_v41, %s9677_s6 }
 0x592   : > { %v4611_v6 = vpop.permute.xlu0 %4610  ;;  %v4802_v38 = vpop.permute.xlu1 %4801  ;;  %v5112_v62 = vld [vmem:[#allocation3 + $0x48] sm:$0xff] }
 0x593   : > { %4696 = vst.msk [vmem:[#allocation3 + $0x58] sm:$0xff] %vm4684_vm8, %v4611_v6  ;;  %9532 = vmatmul.mubr.msk.f32.gmra.mxu0 %vm5152_vm11, %v5112_v62  ;;  %v4164_v62 = vld [vmem:[#allocation2 + $0x198] sm:$0xff] }
 0x594   : > { %4888 = vst.msk [vmem:[#allocation3 + $0x50] sm:$0xff] %vm4877_vm9, %v4802_v38  ;;  %4437 = vrot.lane.b32.xlu0 %v4352_v43, %s9680_s9  ;;  %v3971_v38 = vld [vmem:[#allocation2 + $0x18c] sm:$0xff] }
 0x595   : > { %4628 = vrot.lane.b32.xlu1 %v4544_v23, %s9681_s14 }
 0x596   : > { %v4035_v24 = vpop.permute.xlu0 %4034  ;;  %v4227_v39 = vpop.permute.xlu1 %4226 }
 0x597   : > { %4118 = vst.msk [vmem:[#allocation3 + $0x68] sm:$0xff] %vm4104_vm5, %v4035_v24  ;;  %v11748_v24 = vld [vmem:[#allocation4 + $0x13] sm:$0xff] }
 0x598   : > { %4311 = vst.msk [vmem:[#allocation3 + $0x60] sm:$0xff] %vm4298_vm6, %v4227_v39  ;;  %3861 = vrot.lane.b32.xlu0 %v3774_v13, %s9677_s6 }
 0x599   : > { %4052 = vrot.lane.b32.xlu1 %v3966_v63, %s9678_s28  ;;  %7584 = vst.msk [vmem:[#allocation5 + $0x8] sm:$0xff] %vm6790_vm12, %v11748_v24 }
 0x59a   : > { %v4804_v12 = vpop.permute.xlu0 %4803  ;;  %v4995_v45 = vpop.permute.xlu1 %4994 }
 0x59b   : > { %4889 = vst.msk [vmem:[#allocation3 + $0x58] sm:$0xff] %vm4877_vm9, %v4804_v12 }
 0x59c   : > { %5081 = vst.msk [vmem:[#allocation3 + $0x50] sm:$0xff] %vm5070_vm10, %v4995_v45  ;;  %4630 = vrot.lane.b32.xlu0 %v4545_v26, %s9681_s14  ;;  %v4165_v45 = vld [vmem:[#allocation2 + $0x1a0] sm:$0xff] }
 0x59d   : > { %4821 = vrot.lane.b32.xlu1 %v3773_v41, %s9682_s19 }
 0x59e   : > { %v4229_v44 = vpop.permute.xlu0 %4228 }
 0x59f   : > { %v4420_v15 = vpop.permute.xlu1 %4419  ;;  %4312 = vst.msk [vmem:[#allocation3 + $0x68] sm:$0xff] %vm4298_vm6, %v4229_v44 }
 0x5a0   : > { %4504 = vst.msk [vmem:[#allocation3 + $0x60] sm:$0xff] %vm4491_vm7, %v4420_v15  ;;  %4054 = vrot.lane.b32.xlu0 %v3967_v46, %s9678_s28  ;;  %v3779_v15 = vld [vmem:[#allocation2 + $0x19b] sm:$0xff] }
 0x5a1   : > { %4246 = vrot.lane.b32.xlu1 %v4160_v53, %s9679_s29 }
 0x5a2   : > { %v4997_v29 = vpop.permute.xlu0 %4996 }
 0x5a3   : > { %v4422_v21 = vpop.permute.xlu1 %4421  ;;  %v5113_v22 = vld [vmem:[#allocation3 + $0x50] sm:$0xff]  ;;  %5082 = vst.msk [vmem:[#allocation3 + $0x58] sm:$0xff] %vm5070_vm10, %v4997_v29 }
 0x5a4   : > { %4505 = vst.msk [vmem:[#allocation3 + $0x68] sm:$0xff] %vm4491_vm7, %v4422_v21  ;;  %9534 = vmatprep.mubr.msk.f32.mxu0 %vm5152_vm11, %v5113_v22  ;;  %4823 = vrot.lane.b32.xlu0 %v3774_v13, %s9682_s19  ;;  %v4358_v22 = vld [vmem:[#allocation2 + $0x1a1] sm:$0xff] }
 0x5a5   : > { %5014 = vrot.lane.b32.xlu1 %v3966_v63, %s9683_s8 }
 0x5a6   : > { %v4613_v32 = vpop.permute.xlu0 %4612 }
 0x5a7   : > { %v4037_v14 = vpop.permute.xlu1 %4036  ;;  %4697 = vst.msk [vmem:[#allocation3 + $0x60] sm:$0xff] %vm4684_vm8, %v4613_v32 }
 0x5a8   : > { %4119 = vst.msk [vmem:[#allocation3 + $0x70] sm:$0xff] %vm4104_vm5, %v4037_v14  ;;  %4248 = vrot.lane.b32.xlu0 %v4161_v31, %s9679_s29  ;;  %v4550_v31 = vld [vmem:[#allocation2 + $0x19a] sm:$0xff]  ;;  %v3780_v14 = vld [vmem:[#allocation2 + $0x1a3] sm:$0xff] }
 0x5a9   : > { %4439 = vrot.lane.b32.xlu1 %v4353_v60, %s9680_s9 }
 0x5aa   : > { %v4615_v3 = vpop.permute.xlu0 %4614  ;;  %v5114_v4 = vld [vmem:[#allocation3 + $0x58] sm:$0xff] }
 0x5ab   : > { %v4806_v25 = vpop.permute.xlu1 %4805  ;;  %4698 = vst.msk [vmem:[#allocation3 + $0x68] sm:$0xff] %vm4684_vm8, %v4615_v3  ;;  %9535 = vmatmul.mubr.msk.f32.gmra.mxu0 %vm5152_vm11, %v5114_v4 }
 0x5ac   : > { %4890 = vst.msk [vmem:[#allocation3 + $0x60] sm:$0xff] %vm4877_vm9, %v4806_v25  ;;  %5016 = vrot.lane.b32.xlu0 %v3967_v46, %s9683_s8  ;;  %v4357_v46 = vld [vmem:[#allocation2 + $0x199] sm:$0xff] }
 0x5ad   : > { %3863 = vrot.lane.b32.xlu1 %v3775_v30, %s9677_s6 }
 0x5ae   : > { %v4039_v34 = vpop.permute.xlu0 %4038 }
 0x5af   : > { %v4231_v51 = vpop.permute.xlu1 %4230  ;;  %4120 = vst.msk [vmem:[#allocation3 + $0x78] sm:$0xff] %vm4104_vm5, %v4039_v34 }
 0x5b0   : > { %4313 = vst.msk [vmem:[#allocation3 + $0x70] sm:$0xff] %vm4298_vm6, %v4231_v51  ;;  %4441 = vrot.lane.b32.xlu0 %v4354_v48, %s9680_s9  ;;  %v4551_v48 = vld [vmem:[#allocation2 + $0x1a2] sm:$0xff] }
 0x5b1   : > { %4632 = vrot.lane.b32.xlu1 %v4546_v50, %s9681_s14  ;;  %v3973_v51 = vld [vmem:[#allocation2 + $0x1a4] sm:$0xff] }
 0x5b2   : > { %v4808_v52 = vpop.permute.xlu0 %4807 }
 0x5b3   : > { %v4999_v37 = vpop.permute.xlu1 %4998  ;;  %4891 = vst.msk [vmem:[#allocation3 + $0x68] sm:$0xff] %vm4877_vm9, %v4808_v52 }
 0x5b4   : > { %5083 = vst.msk [vmem:[#allocation3 + $0x60] sm:$0xff] %vm5070_vm10, %v4999_v37  ;;  %3865 = vrot.lane.b32.xlu0 %v3776_v47, %s9677_s6 }
 0x5b5   : > { %4056 = vrot.lane.b32.xlu1 %v3968_v18, %s9678_s28 }
 0x5b6   : > { %v4233_v8 = vpop.permute.xlu0 %4232 }
 0x5b7   : > { %v4424_v40 = vpop.permute.xlu1 %4423  ;;  %4314 = vst.msk [vmem:[#allocation3 + $0x78] sm:$0xff] %vm4298_vm6, %v4233_v8 }
 0x5b8   : > { %4506 = vst.msk [vmem:[#allocation3 + $0x70] sm:$0xff] %vm4491_vm7, %v4424_v40  ;;  %4634 = vrot.lane.b32.xlu0 %v4547_v33, %s9681_s14  ;;  %v4167_v40 = vld [vmem:[#allocation2 + $0x1b8] sm:$0xff] }
 0x5b9   : > { %4825 = vrot.lane.b32.xlu1 %v3775_v30, %s9682_s19  ;;  %v3972_v30 = vld [vmem:[#allocation2 + $0x19c] sm:$0xff] }
 0x5ba   : > { %v5001_v55 = vpop.permute.xlu0 %5000 }
 0x5bb   : > { %v4426_v35 = vpop.permute.xlu1 %4425  ;;  %v5115_v58 = vld [vmem:[#allocation3 + $0x60] sm:$0xff]  ;;  %5084 = vst.msk [vmem:[#allocation3 + $0x68] sm:$0xff] %vm5070_vm10, %v5001_v55 }
 0x5bc   : > { %4507 = vst.msk [vmem:[#allocation3 + $0x78] sm:$0xff] %vm4491_vm7, %v4426_v35  ;;  %9537 = vmatprep.mubr.msk.f32.mxu0 %vm5152_vm11, %v5115_v58  ;;  %4058 = vrot.lane.b32.xlu0 %v3969_v49, %s9678_s28  ;;  %v3781_v58 = vld [vmem:[#allocation2 + $0x1b3] sm:$0xff] }
 0x5bd   : > { %4250 = vrot.lane.b32.xlu1 %v4162_v54, %s9679_s29 }
 0x5be   : > { %v4617_v36 = vpop.permute.xlu0 %4616 }
 0x5bf   : > { %v4041_v59 = vpop.permute.xlu1 %4040  ;;  %4699 = vst.msk [vmem:[#allocation3 + $0x70] sm:$0xff] %vm4684_vm8, %v4617_v36  ;;  %v11798_v36 = vld [vmem:[%s13322_s2] ss:$0 sm:$0xff] }
 0x5c0   : > { %4121 = vst.msk [vmem:[#allocation3 + $0x80] sm:$0xff] %vm4104_vm5, %v4041_v59  ;;  %4827 = vrot.lane.b32.xlu0 %v3776_v47, %s9682_s19  ;;  %v4166_v47 = vld [vmem:[#allocation2 + $0x1b0] sm:$0xff] }
 0x5c1   : > { %5018 = vrot.lane.b32.xlu1 %v3968_v18, %s9683_s8 }
 0x5c2   : > { %v4619_v56 = vpop.permute.xlu0 %4618  ;;  %v5116_v57 = vld [vmem:[#allocation3 + $0x68] sm:$0xff] }
 0x5c3   : > { %v4810_v7 = vpop.permute.xlu1 %4809  ;;  %4700 = vst.msk [vmem:[#allocation3 + $0x78] sm:$0xff] %vm4684_vm8, %v4619_v56  ;;  %9538 = vmatmul.mubr.msk.f32.gmra.mxu0 %vm5152_vm11, %v5116_v57 }
 0x5c4   : > { %4892 = vst.msk [vmem:[#allocation3 + $0x70] sm:$0xff] %vm4877_vm9, %v4810_v7  ;;  %4252 = vrot.lane.b32.xlu0 %v4163_v0, %s9679_s29  ;;  %v5546_v7 = vlaneseq }
 0x5c5   : > { %4443 = vrot.lane.b32.xlu1 %v4355_v2, %s9680_s9  ;;  %v9684_v2 = vmov 1983009808  }
 0x5c6   : > { %v4043_v9 = vpop.permute.xlu0 %4042  ;;  %v5544_v56 = vunpack.c.l.s4 %v9684_v2 }
 0x5c7   : > { %v4235_v10 = vpop.permute.xlu1 %4234  ;;  %4122 = vst.msk [vmem:[#allocation3 + $0x88] sm:$0xff] %vm4104_vm5, %v4043_v9  ;;  %v4360_v9 = vld [vmem:[#allocation2 + $0x1b9] sm:$0xff] }
 0x5c8   : > { %4315 = vst.msk [vmem:[#allocation3 + $0x80] sm:$0xff] %vm4298_vm6, %v4235_v10  ;;  %5020 = vrot.lane.b32.xlu0 %v3969_v49, %s9683_s8  ;;  %v4359_v49 = vld [vmem:[#allocation2 + $0x1b1] sm:$0xff] }
 0x5c9   : > { %3867 = vrot.lane.b32.xlu1 %v3777_v20, %s9677_s6  ;;  %v4552_v10 = vld [vmem:[#allocation2 + $0x1b2] sm:$0xff] }
 0x5ca   : > { %v4812_v27 = vpop.permute.xlu0 %4811 }
 0x5cb   : > { %v5003_v5 = vpop.permute.xlu1 %5002  ;;  %4893 = vst.msk [vmem:[#allocation3 + $0x78] sm:$0xff] %vm4877_vm9, %v4812_v27 }
 0x5cc   : > { %5085 = vst.msk [vmem:[#allocation3 + $0x70] sm:$0xff] %vm5070_vm10, %v5003_v5  ;;  %4445 = vrot.lane.b32.xlu0 %v4356_v11, %s9680_s9 }
 0x5cd   : > { %4636 = vrot.lane.b32.xlu1 %v4548_v16, %s9681_s14 }
 0x5ce   : > { %v4237_v41 = vpop.permute.xlu0 %4236 }
 0x5cf   : > { %v4428_v19 = vpop.permute.xlu1 %4427  ;;  %4316 = vst.msk [vmem:[#allocation3 + $0x88] sm:$0xff] %vm4298_vm6, %v4237_v41 }
 0x5d0   : > { %4508 = vst.msk [vmem:[#allocation3 + $0x80] sm:$0xff] %vm4491_vm7, %v4428_v19  ;;  %3869 = vrot.lane.b32.xlu0 %v3778_v42, %s9677_s6  ;;  %v11811_v19 = vld [vmem:[#allocation2 + $0x1bb] sm:$0xff] }
 0x5d1   : > { %4060 = vrot.lane.b32.xlu1 %v3970_v17, %s9678_s28 }
 0x5d2   : > { %v5005_v43 = vpop.permute.xlu0 %5004 }
 0x5d3   : > { %v4430_v23 = vpop.permute.xlu1 %4429  ;;  %v5117_v6 = vld [vmem:[#allocation3 + $0x70] sm:$0xff]  ;;  %5086 = vst.msk [vmem:[#allocation3 + $0x78] sm:$0xff] %vm5070_vm10, %v5005_v43 }
 0x5d4   : > { %4509 = vst.msk [vmem:[#allocation3 + $0x88] sm:$0xff] %vm4491_vm7, %v4430_v23  ;;  %9540 = vmatprep.mubr.msk.f32.mxu0 %vm5152_vm11, %v5117_v6  ;;  %4638 = vrot.lane.b32.xlu0 %v4549_v28, %s9681_s14  ;;  %v11813_v28 = vld [vmem:[#allocation2 + $0x1b4] sm:$0xff] }
 0x5d5   : > { %4829 = vrot.lane.b32.xlu1 %v3777_v20, %s9682_s19 }
 0x5d6   : > { %v4621_v13 = vpop.permute.xlu0 %4620 }
 0x5d7   : > { %v4045_v63 = vpop.permute.xlu1 %4044  ;;  %4701 = vst.msk [vmem:[#allocation3 + $0x80] sm:$0xff] %vm4684_vm8, %v4621_v13  ;;  %v4553_v13 = vld [vmem:[#allocation2 + $0x1ba] sm:$0xff] }
 0x5d8   : > { %4123 = vst.msk [vmem:[#allocation3 + $0x90] sm:$0xff] %vm4104_vm5, %v4045_v63  ;;  %4062 = vrot.lane.b32.xlu0 %v3971_v38, %s9678_s28 }
 0x5d9   : > { %4254 = vrot.lane.b32.xlu1 %v4164_v62, %s9679_s29 }
 0x5da   : > { %v4623_v39 = vpop.permute.xlu0 %4622  ;;  %v5118_v12 = vld [vmem:[#allocation3 + $0x78] sm:$0xff] }
 0x5db   : > { %v4814_v26 = vpop.permute.xlu1 %4813  ;;  %4702 = vst.msk [vmem:[#allocation3 + $0x88] sm:$0xff] %vm4684_vm8, %v4623_v39  ;;  %9541 = vmatmul.mubr.msk.f32.gmra.mxu0 %vm5152_vm11, %v5118_v12 }
 0x5dc   : > { %4894 = vst.msk [vmem:[#allocation3 + $0x80] sm:$0xff] %vm4877_vm9, %v4814_v26  ;;  %4831 = vrot.lane.b32.xlu0 %v3778_v42, %s9682_s19  ;;  %v5545_v42 = vunpack.c.0.s8 %v5544_v56 }
 0x5dd   : > { %5022 = vrot.lane.b32.xlu1 %v3970_v17, %s9683_s8  ;;  %v5547_v17 = vshrl.u32 %v5546_v7, 7 }
 0x5de   : > { %v4047_v53 = vpop.permute.xlu0 %4046 }
 0x5df   : > { %v4239_v44 = vpop.permute.xlu1 %4238  ;;  %4124 = vst.msk [vmem:[#allocation3 + $0x98] sm:$0xff] %vm4104_vm5, %v4047_v53 }
 0x5e0   : > { %4317 = vst.msk [vmem:[#allocation3 + $0x90] sm:$0xff] %vm4298_vm6, %v4239_v44  ;;  %4256 = vrot.lane.b32.xlu0 %v4165_v45, %s9679_s29 }
 0x5e1   : > { %4447 = vrot.lane.b32.xlu1 %v4357_v46, %s9680_s9 }
 0x5e2   : > { %v4816_v29 = vpop.permute.xlu0 %4815 }
 0x5e3   : > { %v5007_v21 = vpop.permute.xlu1 %5006  ;;  %4895 = vst.msk [vmem:[#allocation3 + $0x88] sm:$0xff] %vm4877_vm9, %v4816_v29 }
 0x5e4   : > { %5087 = vst.msk [vmem:[#allocation3 + $0x80] sm:$0xff] %vm5070_vm10, %v5007_v21  ;;  %5024 = vrot.lane.b32.xlu0 %v3971_v38, %s9683_s8  ;;  %v11815_v38 = vsub.s32 %v5545_v42, %v5547_v17  ;;  %v11836_v21 = vld [vmem:[#allocation2 + $0x1bc] sm:$0xff] }
 0x5e5   : > { %3871 = vrot.lane.b32.xlu1 %v3779_v15, %s9677_s6 }
 0x5e6   : > { %v4241_v60 = vpop.permute.xlu0 %4240 }
 0x5e7   : > { %v4432_v32 = vpop.permute.xlu1 %4431  ;;  %4318 = vst.msk [vmem:[#allocation3 + $0x98] sm:$0xff] %vm4298_vm6, %v4241_v60 }
 0x5e8   : > { %4510 = vst.msk [vmem:[#allocation3 + $0x90] sm:$0xff] %vm4491_vm7, %v4432_v32  ;;  %4449 = vrot.lane.b32.xlu0 %v4358_v22, %s9680_s9  ;;  %v4168_v22 = vld [vmem:[#allocation2 + $0x1c8] sm:$0xff] }
 0x5e9   : > { %4640 = vrot.lane.b32.xlu1 %v4550_v31, %s9681_s14 }
 0x5ea   : > { %v5009_v3 = vpop.permute.xlu0 %5008 }
 0x5eb   : > { %v4434_v25 = vpop.permute.xlu1 %4433  ;;  %v5119_v4 = vld [vmem:[#allocation3 + $0x80] sm:$0xff]  ;;  %5088 = vst.msk [vmem:[#allocation3 + $0x88] sm:$0xff] %vm5070_vm10, %v5009_v3 }
 0x5ec   : > { %4511 = vst.msk [vmem:[#allocation3 + $0x98] sm:$0xff] %vm4491_vm7, %v4434_v25  ;;  %9543 = vmatprep.mubr.msk.f32.mxu0 %vm5152_vm11, %v5119_v4  ;;  %3873 = vrot.lane.b32.xlu0 %v3780_v14, %s9677_s6 }
 0x5ed   : > { %4064 = vrot.lane.b32.xlu1 %v3972_v30, %s9678_s28 }
 0x5ee   : > { %v4625_v50 = vpop.permute.xlu0 %4624 }
 0x5ef   : > { %v4049_v34 = vpop.permute.xlu1 %4048  ;;  %4703 = vst.msk [vmem:[#allocation3 + $0x90] sm:$0xff] %vm4684_vm8, %v4625_v50 }
 0x5f0   : > { %4125 = vst.msk [vmem:[#allocation3 + $0xa0] sm:$0xff] %vm4104_vm5, %v4049_v34  ;;  %4642 = vrot.lane.b32.xlu0 %v4551_v48, %s9681_s14 }
 0x5f1   : > { %4833 = vrot.lane.b32.xlu1 %v3779_v15, %s9682_s19 }
 0x5f2   : > { %v4627_v18 = vpop.permute.xlu0 %4626  ;;  %v5120_v37 = vld [vmem:[#allocation3 + $0x88] sm:$0xff] }
 0x5f3   : > { %v4818_v52 = vpop.permute.xlu1 %4817  ;;  %4704 = vst.msk [vmem:[#allocation3 + $0x98] sm:$0xff] %vm4684_vm8, %v4627_v18  ;;  %9544 = vmatmul.mubr.msk.f32.gmra.mxu0 %vm5152_vm11, %v5120_v37  ;;  %v9521_v35 = vpop.f32.mrf.mxu0  ;;  %v11853_v18 = vsub.s32 0, %v5547_v17 }
 0x5f4   : > { %4896 = vst.msk [vmem:[#allocation3 + $0x90] sm:$0xff] %vm4877_vm9, %v4818_v52  ;;  %4066 = vrot.lane.b32.xlu0 %v3973_v51, %s9678_s28  ;;  %v5325_v20 = vadd.f32 %v9521_v35, %v11798_v36 }
 0x5f5   : > { %4258 = vrot.lane.b32.xlu1 %v4166_v47, %s9679_s29  ;;  %v5319_v57 = vpop.f32.mrf.mxu0 }
 0x5f6   : > { %v4051_v33 = vpop.permute.xlu0 %4050  ;;  %v5320_v11 = vadd.f32 %v11798_v36, %v5319_v57  ;;  %v5479_v41 = vmax.f32 %v5325_v20, 0.0 }
 0x5f7   : > { %v4243_v8 = vpop.permute.xlu1 %4242  ;;  %4126 = vst.msk [vmem:[#allocation3 + $0xa8] sm:$0xff] %vm4104_vm5, %v4051_v33 }
 0x5f8   : > { %4319 = vst.msk [vmem:[#allocation3 + $0xa0] sm:$0xff] %vm4298_vm6, %v4243_v8  ;;  %4835 = vrot.lane.b32.xlu0 %v3780_v14, %s9682_s19  ;;  %v5478_v43 = vmax.f32 %v5320_v11, 0.0  ;;  %v5559_v62 = vcombine.high %v5479_v41, %v5479_v41  ;;  %v11824_v45 = vrot.slane %v5479_v41, %v11815_v38  ;;  %v4361_v41 = vld [vmem:[#allocation2 + $0x1c9] sm:$0xff] }
 0x5f9   : > { %5026 = vrot.lane.b32.xlu1 %v3972_v30, %s9683_s8 }
 0x5fa   : > { %v4820_v54 = vpop.permute.xlu0 %4819  ;;  %v5542_v63 = vcombine.high %v5478_v43, %v5478_v43  ;;  %v5549_v46 = vrot.slane %v5478_v43, %v11815_v38  ;;  %v11834_v15 = vrot.slane %v5559_v62, %v11815_v38  ;;  %v5574_v3 = vcombine.high %v11824_v45, %v11824_v45 }
 0x5fb   : > { %v5011_v55 = vpop.permute.xlu1 %5010  ;;  %4897 = vst.msk [vmem:[#allocation3 + $0x98] sm:$0xff] %vm4877_vm9, %v4820_v54 }
 0x5fc   : > { %5089 = vst.msk [vmem:[#allocation3 + $0x90] sm:$0xff] %vm5070_vm10, %v5011_v55  ;;  %4260 = vrot.lane.b32.xlu0 %v4167_v40, %s9679_s29  ;;  %v5556_v31 = vrot.slane %v5542_v63, %v11815_v38  ;;  %v5557_v25 = vcombine.high %v5549_v46, %v5549_v46  ;;  %v11850_v34 = vcombine.high %v11834_v15, %v11834_v15  ;;  %v9229_v47 = vrot.slane %v5549_v46, 9 }
 0x5fd   : > { %4451 = vrot.lane.b32.xlu1 %v4359_v49, %s9680_s9  ;;  %v9234_v54 = vrot.slane %v5574_v3, 9  ;;  %v9235_v55 = vrot.slane %v11834_v15, 9 }
 0x5fe   : > { %v4245_v59 = vpop.permute.xlu0 %4244  ;;  %v5558_v52 = vcombine.high %v5556_v31, %v5556_v31  ;;  %v9230_v35 = vrot.slane %v5557_v25, 9  ;;  %v9236_v7 = vrot.slane %v11850_v34, 9 }
 0x5ff   : > { %v4436_v0 = vpop.permute.xlu1 %4435  ;;  %4320 = vst.msk [vmem:[#allocation3 + $0xa8] sm:$0xff] %vm4298_vm6, %v4245_v59  ;;  %v9231_v59 = vrot.slane %v5556_v31, 9 }
 0x600   : > { %4512 = vst.msk [vmem:[#allocation3 + $0xa0] sm:$0xff] %vm4491_vm7, %v4436_v0  ;;  %5028 = vrot.lane.b32.xlu0 %v3973_v51, %s9683_s8  ;;  %v9233_v51 = vrot.slane %v11824_v45, 9  ;;  %v9232_v11 = vrot.slane %v5558_v52, 9 }
 0x601   : > { %3875 = vrot.lane.b32.xlu1 %v3781_v58, %s9677_s6  ;;  %v6600_v62 = vmax.f32 %v5556_v31, %v9231_v59 }
 0x602   : > { %v5013_v16 = vpop.permute.xlu0 %5012 }
 0x603   : > { %v3860_v27 = vpop.permute.xlu1 %3859  ;;  %v5121_v5 = vld [vmem:[#allocation3 + $0x90] sm:$0xff]  ;;  %5090 = vst.msk [vmem:[#allocation3 + $0x98] sm:$0xff] %vm5070_vm10, %v5013_v16  ;;  %v6598_v16 = vmax.f32 %v5549_v46, %v9229_v47 }
 0x604   : > { %3934 = vst.msk [vmem:[#allocation3 + $0xb0] sm:$0xff] %vm3911_vm4, %v3860_v27  ;;  %9546 = vmatprep.mubr.msk.f32.mxu0 %vm5152_vm11, %v5121_v5  ;;  %4453 = vrot.lane.b32.xlu0 %v4360_v9, %s9680_s9 }
 0x605   : > { %4644 = vrot.lane.b32.xlu1 %v4552_v10, %s9681_s14  ;;  %v4169_v10 = vld [vmem:[#allocation2 + $0x1d0] sm:$0xff] }
 0x606   : > { %v4438_v23 = vpop.permute.xlu0 %4437 }
 0x607   : > { %v4629_v6 = vpop.permute.xlu1 %4628  ;;  %4513 = vst.msk [vmem:[#allocation3 + $0xa8] sm:$0xff] %vm4491_vm7, %v4438_v23 }
 0x608   : > { %4705 = vst.msk [vmem:[#allocation3 + $0xa0] sm:$0xff] %vm4684_vm8, %v4629_v6  ;;  %3877 = vrot.lane.b32.xlu0 %v11811_v19, %s9677_s6  ;;  %s9685_s6 = smov 16  }
 0x609   : > { %4068 = vrot.lane.b32.xlu1 %v11813_v28, %s9678_s28 }
 0x60a   : > { %v3862_v39 = vpop.permute.xlu0 %3861  ;;  %v5122_v12 = vld [vmem:[#allocation3 + $0x98] sm:$0xff] }
 0x60b   : > { %v4053_v26 = vpop.permute.xlu1 %4052  ;;  %3935 = vst.msk [vmem:[#allocation3 + $0xb8] sm:$0xff] %vm3911_vm4, %v3862_v39  ;;  %v9524_v53 = vpop.f32.mrf.mxu0  ;;  %9547 = vmatmul.mubr.msk.f32.gmra.mxu0 %vm5152_vm11, %v5122_v12 }
 0x60c   : > { %4127 = vst.msk [vmem:[#allocation3 + $0xb0] sm:$0xff] %vm4104_vm5, %v4053_v26  ;;  %v5335_v44 = vadd.f32 %v9524_v53, %v11798_v36  ;;  %4646 = vrot.lane.b32.xlu0 %v4553_v13, %s9681_s14  ;;  %v6602_v53 = vmax.f32 %v11824_v45, %v9233_v51 }
 0x60d   : > { %4837 = vrot.lane.b32.xlu1 %v3781_v58, %s9682_s19  ;;  %v5329_v29 = vpop.f32.mrf.mxu0 }
 0x60e   : > { %v5481_v60 = vmax.f32 %v5335_v44, 0.0  ;;  %v5330_v32 = vadd.f32 %v11798_v36, %v5329_v29  ;;  %v4631_v14 = vpop.permute.xlu0 %4630  ;;  %v6603_v44 = vmax.f32 %v5574_v3, %v9234_v54  ;;  %v6601_v29 = vmax.f32 %v5558_v52, %v9232_v11 }
 0x60f   : > { %v4822_v30 = vpop.permute.xlu1 %4821  ;;  %4706 = vst.msk [vmem:[#allocation3 + $0xa8] sm:$0xff] %vm4684_vm8, %v4631_v14  ;;  %v4362_v14 = vld [vmem:[#allocation2 + $0x1d1] sm:$0xff] }
 0x610   : > { %4898 = vst.msk [vmem:[#allocation3 + $0xa0] sm:$0xff] %vm4877_vm9, %v4822_v30  ;;  %v5593_v4 = vcombine.high %v5481_v60, %v5481_v60  ;;  %v5600_v48 = vrot.slane %v5481_v60, %v11815_v38  ;;  %v5480_v50 = vmax.f32 %v5330_v32, 0.0  ;;  %4070 = vrot.lane.b32.xlu0 %v11836_v21, %s9678_s28  ;;  %s9686_s28 = smov 32  }
 0x611   : > { %4262 = vrot.lane.b32.xlu1 %v4168_v22, %s9679_s29 }
 0x612   : > { %v5607_v37 = vrot.slane %v5593_v4, %v11815_v38  ;;  %v5608_v33 = vcombine.high %v5600_v48, %v5600_v48  ;;  %v5576_v8 = vcombine.high %v5480_v50, %v5480_v50  ;;  %v4055_v40 = vpop.permute.xlu0 %4054  ;;  %v5583_v58 = vrot.slane %v5480_v50, %v11815_v38 }
 0x613   : > { %v4247_v49 = vpop.permute.xlu1 %4246  ;;  %4128 = vst.msk [vmem:[#allocation3 + $0xb8] sm:$0xff] %vm4104_vm5, %v4055_v40  ;;  %v9241_v2 = vrot.slane %v5600_v48, 9  ;;  %v6605_v50 = vmax.f32 %v11850_v34, %v9236_v7 }
 0x614   : > { %4321 = vst.msk [vmem:[#allocation3 + $0xb0] sm:$0xff] %vm4298_vm6, %v4247_v49  ;;  %v5609_v0 = vcombine.high %v5607_v37, %v5607_v37  ;;  %v9242_v56 = vrot.slane %v5608_v33, 9  ;;  %4839 = vrot.lane.b32.xlu0 %v11811_v19, %s9682_s19  ;;  %v5590_v57 = vrot.slane %v5576_v8, %v11815_v38  ;;  %v5591_v20 = vcombine.high %v5583_v58, %v5583_v58  ;;  %v4555_v49 = vld [vmem:[#allocation2 + $0x1d2] sm:$0xff] }
 0x615   : > { %5030 = vrot.lane.b32.xlu1 %v11813_v28, %s9683_s8  ;;  %v9237_v9 = vrot.slane %v5583_v58, 9  ;;  %v9243_v27 = vrot.slane %v5607_v37, 9  ;;  %v6599_v28 = vmax.f32 %v5557_v25, %v9230_v35  ;;  %v6610_v13 = vmax.f32 %v5600_v48, %v9241_v2  ;;  %v4747_v2 = vld [vmem:[#allocation2 + $0x1cb] sm:$0xff] }
 0x616   : > { %v9244_v5 = vrot.slane %v5609_v0, 9  ;;  %v4824_v42 = vpop.permute.xlu0 %4823  ;;  %v5592_v43 = vcombine.high %v5590_v57, %v5590_v57  ;;  %v9238_v19 = vrot.slane %v5591_v20, 9  ;;  %v9239_v23 = vrot.slane %v5590_v57, 9 }
 0x617   : > { %v5015_v17 = vpop.permute.xlu1 %5014  ;;  %v6606_v6 = vmax.f32 %v5583_v58, %v9237_v9  ;;  %4899 = vst.msk [vmem:[#allocation3 + $0xa8] sm:$0xff] %vm4877_vm9, %v4824_v42  ;;  %v6611_v63 = vmax.f32 %v5608_v33, %v9242_v56  ;;  %v6612_v22 = vmax.f32 %v5607_v37, %v9243_v27  ;;  %v6604_v48 = vmax.f32 %v11834_v15, %v9235_v55  ;;  %v4554_v33 = vld [vmem:[#allocation2 + $0x1ca] sm:$0xff]  ;;  %v4748_v9 = vld [vmem:[#allocation2 + $0x1d3] sm:$0xff] }
 0x618   : > { %5091 = vst.msk [vmem:[#allocation3 + $0xa0] sm:$0xff] %vm5070_vm10, %v5015_v17  ;;  %4264 = vrot.lane.b32.xlu0 %v4169_v10, %s9679_s29  ;;  %v9240_v39 = vrot.slane %v5592_v43, 9  ;;  %v6607_v26 = vmax.f32 %v5591_v20, %v9238_v19  ;;  %v6608_v12 = vmax.f32 %v5590_v57, %v9239_v23  ;;  %v6613_v30 = vmax.f32 %v5609_v0, %v9244_v5  ;;  %v4940_v5 = vld [vmem:[#allocation2 + $0x1cc] sm:$0xff]  ;;  %v11908_v19 = vld [vmem:[#allocation4 + $0x14] sm:$0xff]  ;;  %s9687_s29 = smov 64  }
 0x619   : > { %v6726_v46 = vmax.f32 %v6598_v16, %v6606_v6  ;;  %4455 = vrot.lane.b32.xlu1 %v4361_v41, %s9680_s9  ;;  %v6730_v47 = vmax.f32 %v6602_v53, %v6610_v13  ;;  %v6731_v45 = vmax.f32 %v6603_v44, %v6611_v63  ;;  %v6732_v8 = vmax.f32 %v6604_v48, %v6612_v22  ;;  %v7379_v48 = vld [vmem:[#allocation4 + $0x4] sm:$0xff] }
 0x61a   : > { %v4249_v60 = vpop.permute.xlu0 %4248  ;;  %v6609_v31 = vmax.f32 %v5592_v43, %v9240_v39  ;;  %v6727_v25 = vmax.f32 %v6599_v28, %v6607_v26  ;;  %v6728_v4 = vmax.f32 %v6600_v62, %v6608_v12  ;;  %v6733_v54 = vmax.f32 %v6605_v50, %v6613_v30  ;;  %v4941_v43 = vld [vmem:[#allocation2 + $0x1d4] sm:$0xff]  ;;  %v7232_v28 = vld [vmem:[#allocation4 + $0x1] sm:$0xff] }
 0x61b   : > { %v4440_v32 = vpop.permute.xlu1 %4439  ;;  %4322 = vst.msk [vmem:[#allocation3 + $0xb8] sm:$0xff] %vm4298_vm6, %v4249_v60  ;;  %v6883_v51 = vrot.slane %v6726_v46, %v11853_v18  ;;  %v6899_v35 = vrot.slane %v6730_v47, %v11853_v18  ;;  %v6903_v59 = vrot.slane %v6731_v45, %v11853_v18  ;;  %v6907_v56 = vrot.slane %v6732_v8, %v11853_v18  ;;  %v7281_v39 = vld [vmem:[#allocation4 + $0x2] sm:$0xff] }
 0x61c   : > { %4514 = vst.msk [vmem:[#allocation3 + $0xb0] sm:$0xff] %vm4491_vm7, %v4440_v32  ;;  %5032 = vrot.lane.b32.xlu0 %v11836_v21, %s9683_s8  ;;  %v6729_v3 = vmax.f32 %v6601_v29, %v6609_v31  ;;  %v6887_v52 = vrot.slane %v6727_v25, %v11853_v18  ;;  %v6891_v37 = vrot.slane %v6728_v4, %v11853_v18  ;;  %v7330_v32 = vld [vmem:[#allocation4 + $0x3] sm:$0xff] }
 0x61d   : > { %4457 = vrot.lane.b32.xlu1 %v4362_v14, %s9680_s9  ;;  %v6911_v10 = vrot.slane %v6733_v54, %v11853_v18  ;;  %v7216_v50 = vld [vmem:[#allocation4] sm:$0xff]  ;;  %s9688_s9 = smov 80  }
 0x61e   : > { %v5017_v15 = vpop.permute.xlu0 %5016  ;;  %v6895_v55 = vrot.slane %v6729_v3, %v11853_v18  ;;  %v7137_v21 = vsel %vm7136_vm14, %v6887_v52, %v6883_v51  ;;  %7224 = vst.msk [vmem:[#allocation5] sm:$0xff] %vm6790_vm12, %v7216_v50 }
 0x61f   : > { %v3864_v40 = vpop.permute.xlu1 %3863  ;;  %v5123_v34 = vld [vmem:[#allocation3 + $0xa0] sm:$0xff]  ;;  %5092 = vst.msk [vmem:[#allocation3 + $0xa8] sm:$0xff] %vm5070_vm10, %v5017_v15  ;;  %v7139_v58 = vsel %vm7138_vm15, %v6891_v37, %v7137_v21 }
 0x620   : > { %3936 = vst.msk [vmem:[#allocation3 + $0xc0] sm:$0xff] %vm3911_vm4, %v3864_v40  ;;  %9549 = vmatprep.mubr.msk.f32.mxu0 %vm5152_vm11, %v5123_v34  ;;  %4648 = vrot.lane.b32.xlu0 %v4554_v33, %s9681_s14  ;;  %v7141_v0 = vsel %vm7140_vm0, %v6895_v55, %v7139_v58 }
 0x621   : > { %4650 = vrot.lane.b32.xlu1 %v4555_v49, %s9681_s14  ;;  %v7143_v7 = vsel %vm7142_vm1, %v6899_v35, %v7141_v0  ;;  %v7478_v0 = vld [vmem:[#allocation4 + $0x11] sm:$0xff]  ;;  %s9689_s14 = smov 96  }
 0x622   : > { %v4442_v57 = vpop.permute.xlu0 %4441  ;;  %v7145_v11 = vsel %vm7144_vm2, %v6903_v59, %v7143_v7 }
 0x623   : > { %v4633_v20 = vpop.permute.xlu1 %4632  ;;  %4515 = vst.msk [vmem:[#allocation3 + $0xb8] sm:$0xff] %vm4491_vm7, %v4442_v57  ;;  %v7147_v16 = vsel %vm7146_vm3, %v6907_v56, %v7145_v11  ;;  %v9527_v62 = vpop.f32.mrf.mxu0 }
 0x624   : > { %4707 = vst.msk [vmem:[#allocation3 + $0xb0] sm:$0xff] %vm4684_vm8, %v4633_v20  ;;  %4841 = vrot.lane.b32.xlu0 %v4747_v2, %s9682_s19  ;;  %v7149_v27 = vsel %vm7148_vm13, %v6911_v10, %v7147_v16  ;;  %v5345_v44 = vadd.f32 %v9527_v62, %v11798_v36 }
 0x625   : > { %4843 = vrot.lane.b32.xlu1 %v4748_v9, %s9682_s19  ;;  %7208 = vst.msk [vmem:[#allocation4 + $0x22] sm:$0xff] %vm6790_vm12, %v7149_v27  ;;  %v5339_v12 = vpop.f32.mrf.mxu0 }
 0x626   : > { %v3866_v42 = vpop.permute.xlu0 %3865  ;;  %v5124_v41 = vld [vmem:[#allocation3 + $0xa8] sm:$0xff]  ;;  %v5340_v29 = vadd.f32 %v11798_v36, %v5339_v12  ;;  %v5483_v30 = vmax.f32 %v5345_v44, 0.0 }
 0x627   : > { %v4057_v17 = vpop.permute.xlu1 %4056  ;;  %3937 = vst.msk [vmem:[#allocation3 + $0xc8] sm:$0xff] %vm3911_vm4, %v3866_v42  ;;  %9550 = vmatmul.mubr.msk.f32.gmra.mxu0 %vm5152_vm11, %v5124_v41 }
 0x628   : > { %4129 = vst.msk [vmem:[#allocation3 + $0xc0] sm:$0xff] %vm4104_vm5, %v4057_v17  ;;  %5034 = vrot.lane.b32.xlu0 %v4940_v5, %s9683_s8  ;;  %v5482_v31 = vmax.f32 %v5340_v29, 0.0  ;;  %v5627_v45 = vcombine.high %v5483_v30, %v5483_v30  ;;  %v11942_v33 = vrot.slane %v5483_v30, %v11815_v38 }
 0x629   : > { %5036 = vrot.lane.b32.xlu1 %v4941_v43, %s9683_s8 }
 0x62a   : > { %v4635_v23 = vpop.permute.xlu0 %4634  ;;  %v5610_v3 = vcombine.high %v5482_v31, %v5482_v31  ;;  %v5617_v8 = vrot.slane %v5482_v31, %v11815_v38  ;;  %v11954_v49 = vrot.slane %v5627_v45, %v11815_v38  ;;  %v5642_v2 = vcombine.high %v11942_v33, %v11942_v33 }
 0x62b   : > { %v4826_v6 = vpop.permute.xlu1 %4825  ;;  %4708 = vst.msk [vmem:[#allocation3 + $0xb8] sm:$0xff] %vm4684_vm8, %v4635_v23  ;;  %v9249_v10 = vrot.slane %v11942_v33, 9  ;;  %v7527_v23 = vld [vmem:[#allocation4 + $0x12] sm:$0xff] }
 0x62c   : > { %4900 = vst.msk [vmem:[#allocation3 + $0xb0] sm:$0xff] %vm4877_vm9, %v4826_v6  ;;  %7608 = vrot.lane.b32.xlu0 %v11908_v19, %s9685_s6  ;;  %v7577_v26 = vld [vmem:[#allocation4 + $0x23] sm:$0xff]  ;;  %v5624_v55 = vrot.slane %v5610_v3, %v11815_v38  ;;  %v5625_v56 = vcombine.high %v5617_v8, %v5617_v8  ;;  %v11971_v9 = vcombine.high %v11954_v49, %v11954_v49  ;;  %v9245_v11 = vrot.slane %v5617_v8, 9 }
 0x62d   : > { %7248 = vrot.lane.b32.xlu1 %v7232_v28, %s9685_s6  ;;  %v11917_v46 = vld [vmem:[#allocation4 + $0x20] sm:$0xff]  ;;  %7585 = vst.msk [vmem:[#allocation5 + $0x28] sm:$0xff] %vm6790_vm12, %v7577_v26  ;;  %v9250_v6 = vrot.slane %v5642_v2, 9  ;;  %v9251_v28 = vrot.slane %v11954_v49, 9 }
 0x62e   : > { %v4059_v13 = vpop.permute.xlu0 %4058  ;;  %v7218_v53 = vld [vmem:[#allocation4 + $0x20] sm:$0xff]  ;;  %v5626_v16 = vcombine.high %v5624_v55, %v5624_v55  ;;  %v9246_v62 = vrot.slane %v5625_v56, 9 }
 0x62f   : > { %v4251_v63 = vpop.permute.xlu1 %4250  ;;  %4130 = vst.msk [vmem:[#allocation3 + $0xc8] sm:$0xff] %vm4104_vm5, %v4059_v13  ;;  %v11928_v14 = vld [vmem:[#allocation4 + $0x21] sm:$0xff] }
 0x630   : > { %4323 = vst.msk [vmem:[#allocation3 + $0xc0] sm:$0xff] %vm4298_vm6, %v4251_v63  ;;  %7656 = vrot.lane.b32.xlu0 %v11917_v46, %s9686_s28  ;;  %v11935_v47 = vld [vmem:[#allocation4 + $0x22] sm:$0xff]  ;;  %v9247_v63 = vrot.slane %v5624_v55, 9 }
 0x631   : > { %7226 = vst.msk [vmem:[#allocation5 + $0x40] sm:$0xff] %vm6790_vm12, %v7218_v53  ;;  %7297 = vrot.lane.b32.xlu1 %v7281_v39, %s9686_s28  ;;  %v11947_v40 = vld [vmem:[#allocation4 + $0x23] sm:$0xff]  ;;  %v9252_v53 = vrot.slane %v11971_v9, 9 }
 0x632   : > { %v4828_v22 = vpop.permute.xlu0 %4827  ;;  %v11964_v7 = vld [vmem:[#allocation4 + $0x24] sm:$0xff] }
 0x633   : > { %v5019_v60 = vpop.permute.xlu1 %5018  ;;  %4901 = vst.msk [vmem:[#allocation3 + $0xb8] sm:$0xff] %vm4877_vm9, %v4828_v22 }
 0x634   : > { %5093 = vst.msk [vmem:[#allocation3 + $0xb0] sm:$0xff] %vm5070_vm10, %v5019_v60  ;;  %7704 = vrot.lane.b32.xlu0 %v11928_v14, %s9675_s24  ;;  %v9248_v60 = vrot.slane %v5626_v16, 9 }
 0x635   : > { %7346 = vrot.lane.b32.xlu1 %v7330_v32, %s9675_s24  ;;  %v6614_v32 = vmax.f32 %v5617_v8, %v9245_v11 }
 0x636   : > { %v4253_v25 = vpop.permute.xlu0 %4252 }
 0x637   : > { %v4444_v4 = vpop.permute.xlu1 %4443  ;;  %4324 = vst.msk [vmem:[#allocation3 + $0xc8] sm:$0xff] %vm4298_vm6, %v4253_v25 }
 0x638   : > { %4516 = vst.msk [vmem:[#allocation3 + $0xc0] sm:$0xff] %vm4491_vm7, %v4444_v4  ;;  %7752 = vrot.lane.b32.xlu0 %v11935_v47, %s9687_s29 }
 0x639   : > { %7395 = vrot.lane.b32.xlu1 %v7379_v48, %s9687_s29 }
 0x63a   : > { %v5021_v51 = vpop.permute.xlu0 %5020 }
 0x63b   : > { %v3868_v52 = vpop.permute.xlu1 %3867  ;;  %v5125_v37 = vld [vmem:[#allocation3 + $0xb0] sm:$0xff]  ;;  %5094 = vst.msk [vmem:[#allocation3 + $0xb8] sm:$0xff] %vm5070_vm10, %v5021_v51  ;;  %v9530_v15 = vpop.f32.mrf.mxu0  ;;  %v6615_v51 = vmax.f32 %v5625_v56, %v9246_v62 }
 0x63c   : > { %3938 = vst.msk [vmem:[#allocation3 + $0xd0] sm:$0xff] %vm3911_vm4, %v3868_v52  ;;  %9552 = vmatprep.mubr.msk.f32.mxu0 %vm5152_vm11, %v5125_v37  ;;  %v5355_v34 = vadd.f32 %v9530_v15, %v11798_v36  ;;  %7800 = vrot.lane.b32.xlu0 %v11947_v40, %s9688_s9  ;;  %v6616_v52 = vmax.f32 %v5624_v55, %v9247_v63 }
 0x63d   : > { %v5349_v54 = vpop.f32.mrf.mxu0  ;;  %7445 = vrot.lane.b32.xlu1 %v11722_v61, %s9688_s9  ;;  %v6620_v55 = vmax.f32 %v11954_v49, %v9251_v28 }
 0x63e   : > { %v5485_v21 = vmax.f32 %v5355_v34, 0.0  ;;  %v5350_v35 = vadd.f32 %v11798_v36, %v5349_v54  ;;  %v4446_v58 = vpop.permute.xlu0 %4445 }
 0x63f   : > { %v4637_v59 = vpop.permute.xlu1 %4636  ;;  %4517 = vst.msk [vmem:[#allocation3 + $0xc8] sm:$0xff] %vm4491_vm7, %v4446_v58  ;;  %v6619_v58 = vmax.f32 %v5642_v2, %v9250_v6 }
 0x640   : > { %4709 = vst.msk [vmem:[#allocation3 + $0xc0] sm:$0xff] %vm4684_vm8, %v4637_v59  ;;  %v5661_v57 = vcombine.high %v5485_v21, %v5485_v21  ;;  %v5668_v61 = vrot.slane %v5485_v21, %v11815_v38  ;;  %v5484_v20 = vmax.f32 %v5350_v35, 0.0  ;;  %7848 = vrot.lane.b32.xlu0 %v11964_v7, %s9689_s14  ;;  %v6618_v35 = vmax.f32 %v11942_v33, %v9249_v10 }
 0x641   : > { %7494 = vrot.lane.b32.xlu1 %v7478_v0, %s9689_s14  ;;  %v6617_v59 = vmax.f32 %v5626_v16, %v9248_v60 }
 0x642   : > { %v5675_v27 = vrot.slane %v5661_v57, %v11815_v38  ;;  %v5676_v5 = vcombine.high %v5668_v61, %v5668_v61  ;;  %v5644_v42 = vcombine.high %v5484_v20, %v5484_v20  ;;  %v3870_v17 = vpop.permute.xlu0 %3869  ;;  %v5126_v43 = vld [vmem:[#allocation3 + $0xb8] sm:$0xff]  ;;  %v5651_v13 = vrot.slane %v5484_v20, %v11815_v38 }
 0x643   : > { %v4061_v41 = vpop.permute.xlu1 %4060  ;;  %3939 = vst.msk [vmem:[#allocation3 + $0xd8] sm:$0xff] %vm3911_vm4, %v3870_v17  ;;  %9553 = vmatmul.mubr.msk.f32.gmra.mxu0 %vm5152_vm11, %v5126_v43  ;;  %v9257_v26 = vrot.slane %v5668_v61, 9 }
 0x644   : > { %4131 = vst.msk [vmem:[#allocation3 + $0xd0] sm:$0xff] %vm4104_vm5, %v4061_v41  ;;  %v5677_v39 = vcombine.high %v5675_v27, %v5675_v27  ;;  %v9258_v12 = vrot.slane %v5676_v5, 9  ;;  %v5658_v44 = vrot.slane %v5644_v42, %v11815_v38  ;;  %v5659_v29 = vcombine.high %v5651_v13, %v5651_v13 }
 0x645   : > { %v9253_v22 = vrot.slane %v5651_v13, 9  ;;  %7543 = vrot.lane.b32.xlu1 %v7527_v23, %s9690_s17  ;;  %v9259_v30 = vrot.slane %v5675_v27, 9  ;;  %v6626_v37 = vmax.f32 %v5668_v61, %v9257_v26  ;;  %v6621_v61 = vmax.f32 %v11971_v9, %v9252_v53 }
 0x646   : > { %v9260_v31 = vrot.slane %v5677_v39, 9  ;;  %v4639_v25 = vpop.permute.xlu0 %4638  ;;  %v5660_v48 = vcombine.high %v5658_v44, %v5658_v44  ;;  %v9254_v50 = vrot.slane %v5659_v29, 9  ;;  %v9255_v45 = vrot.slane %v5658_v44, 9 }
 0x647   : > { %v4830_v4 = vpop.permute.xlu1 %4829  ;;  %v6622_v3 = vmax.f32 %v5651_v13, %v9253_v22  ;;  %4710 = vst.msk [vmem:[#allocation3 + $0xc8] sm:$0xff] %vm4684_vm8, %v4639_v25  ;;  %v6627_v15 = vmax.f32 %v5676_v5, %v9258_v12  ;;  %v6628_v57 = vmax.f32 %v5675_v27, %v9259_v30 }
 0x648   : > { %4902 = vst.msk [vmem:[#allocation3 + $0xc0] sm:$0xff] %vm4877_vm9, %v4830_v4  ;;  %v9256_v34 = vrot.slane %v5660_v48, 9  ;;  %v6623_v54 = vmax.f32 %v5659_v29, %v9254_v50  ;;  %v6624_v21 = vmax.f32 %v5658_v44, %v9255_v45  ;;  %v6629_v42 = vmax.f32 %v5677_v39, %v9260_v31 }
 0x649   : > { %v6734_v8 = vmax.f32 %v6614_v32, %v6622_v3  ;;  %7250 = vrot.lane.b32.xlu1 %v7478_v0, %s9685_s6  ;;  %v6738_v0 = vmax.f32 %v6618_v35, %v6626_v37  ;;  %v6739_v5 = vmax.f32 %v6619_v58, %v6627_v15  ;;  %v6740_v27 = vmax.f32 %v6620_v55, %v6628_v57 }
 0x64a   : > { %v4063_v20 = vpop.permute.xlu0 %4062  ;;  %v6625_v17 = vmax.f32 %v5660_v48, %v9256_v34  ;;  %v6735_v41 = vmax.f32 %v6615_v51, %v6623_v54  ;;  %v6736_v56 = vmax.f32 %v6616_v52, %v6624_v21  ;;  %v6741_v62 = vmax.f32 %v6621_v61, %v6629_v42 }
 0x64b   : > { %v4255_v11 = vpop.permute.xlu1 %4254  ;;  %4132 = vst.msk [vmem:[#allocation3 + $0xd8] sm:$0xff] %vm4104_vm5, %v4063_v20  ;;  %v6915_v2 = vrot.slane %v6734_v8, %v11853_v18  ;;  %v6931_v9 = vrot.slane %v6738_v0, %v11853_v18  ;;  %v6935_v63 = vrot.slane %v6739_v5, %v11853_v18  ;;  %v6939_v39 = vrot.slane %v6740_v27, %v11853_v18  ;;  %v8360_v5 = vld [vmem:[%s13323_s3 + $0xf0] sm:$0xff] }
 0x64c   : > { %4325 = vst.msk [vmem:[#allocation3 + $0xd0] sm:$0xff] %vm4298_vm6, %v4255_v11  ;;  %v6737_v33 = vmax.f32 %v6617_v59, %v6625_v17  ;;  %v6919_v10 = vrot.slane %v6735_v41, %v11853_v18  ;;  %v6923_v16 = vrot.slane %v6736_v56, %v11853_v18  ;;  %v6943_v44 = vrot.slane %v6741_v62, %v11853_v18  ;;  %v8345_v56 = vld [vmem:[%s13323_s3 + $0x78] sm:$0xff] }
 0x64d   : > { %7299 = vrot.lane.b32.xlu1 %v7527_v23, %s9686_s28 }
 0x64e   : > { %v4832_v43 = vpop.permute.xlu0 %4831  ;;  %v6927_v13 = vrot.slane %v6737_v33, %v11853_v18  ;;  %v7150_v49 = vsel %vm7136_vm14, %v6919_v10, %v6915_v2  ;;  %v8344_v2 = vld [vmem:[%s13323_s3 + $0x70] sm:$0xff] }
 0x64f   : > { %v5023_v6 = vpop.permute.xlu1 %5022  ;;  %4903 = vst.msk [vmem:[#allocation3 + $0xc8] sm:$0xff] %vm4877_vm9, %v4832_v43  ;;  %v7151_v28 = vsel %vm7138_vm15, %v6923_v16, %v7150_v49 }
 0x650   : > { %5095 = vst.msk [vmem:[#allocation3 + $0xc0] sm:$0xff] %vm5070_vm10, %v5023_v6  ;;  %v7152_v23 = vsel %vm7140_vm0, %v6927_v13, %v7151_v28  ;;  %v8359_v6 = vld [vmem:[%s13323_s3 + $0xe8] sm:$0xff] }
 0x651   : > { %7348 = vrot.lane.b32.xlu1 %v11748_v24, %s9675_s24  ;;  %v7153_v26 = vsel %vm7142_vm1, %v6931_v9, %v7152_v23  ;;  %v8343_v28 = vld [vmem:[%s13323_s3 + $0x68] sm:$0xff] }
 0x652   : > { %v4257_v12 = vpop.permute.xlu0 %4256  ;;  %v7154_v29 = vsel %vm7144_vm2, %v6935_v63, %v7153_v26 }
 0x653   : > { %v4448_v53 = vpop.permute.xlu1 %4447  ;;  %4326 = vst.msk [vmem:[#allocation3 + $0xd8] sm:$0xff] %vm4298_vm6, %v4257_v12  ;;  %v7155_v22 = vsel %vm7146_vm3, %v6939_v39, %v7154_v29  ;;  %v9533_v31 = vpop.f32.mrf.mxu0 }
 0x654   : > { %4518 = vst.msk [vmem:[#allocation3 + $0xd0] sm:$0xff] %vm4491_vm7, %v4448_v53  ;;  %v7156_v60 = vsel %vm7148_vm13, %v6943_v44, %v7155_v22  ;;  %v5365_v15 = vadd.f32 %v9533_v31, %v11798_v36  ;;  %v8342_v53 = vld [vmem:[%s13323_s3 + $0x60] sm:$0xff] }
 0x655   : > { %7397 = vrot.lane.b32.xlu1 %v11908_v19, %s9687_s29  ;;  %7209 = vst.msk [vmem:[#allocation4 + $0x32] sm:$0xff] %vm6790_vm12, %v7156_v60  ;;  %v5359_v48 = vpop.f32.mrf.mxu0  ;;  %v8357_v60 = vld [vmem:[%s13323_s3 + $0xd8] sm:$0xff] }
 0x656   : > { %v5025_v24 = vpop.permute.xlu0 %5024  ;;  %v5360_v34 = vadd.f32 %v11798_v36, %v5359_v48  ;;  %v5487_v8 = vmax.f32 %v5365_v15, 0.0  ;;  %v8356_v15 = vld [vmem:[%s13323_s3 + $0xd0] sm:$0xff] }
 0x657   : > { %v3872_v32 = vpop.permute.xlu1 %3871  ;;  %v5127_v30 = vld [vmem:[#allocation3 + $0xc0] sm:$0xff]  ;;  %5096 = vst.msk [vmem:[#allocation3 + $0xc8] sm:$0xff] %vm5070_vm10, %v5025_v24 }
 0x658   : > { %3940 = vst.msk [vmem:[#allocation3 + $0xe0] sm:$0xff] %vm3911_vm4, %v3872_v32  ;;  %9555 = vmatprep.mubr.msk.f32.mxu0 %vm5152_vm11, %v5127_v30  ;;  %v5486_v35 = vmax.f32 %v5360_v34, 0.0  ;;  %v5695_v20 = vcombine.high %v5487_v8, %v5487_v8  ;;  %v12066_v55 = vrot.slane %v5487_v8, %v11815_v38 }
 0x65a   : > { %v4450_v25 = vpop.permute.xlu0 %4449  ;;  %v5678_v11 = vcombine.high %v5486_v35, %v5486_v35  ;;  %v12069_v61 = vrot.slane %v5486_v35, %v11815_v38  ;;  %v12081_v10 = vrot.slane %v5695_v20, %v11815_v38  ;;  %v12099_v63 = vcombine.high %v12066_v55, %v12066_v55  ;;  %v8340_v35 = vld [vmem:[%s13323_s3 + $0x50] sm:$0xff] }
 0x65b   : > { %v4641_v4 = vpop.permute.xlu1 %4640  ;;  %4519 = vst.msk [vmem:[#allocation3 + $0xd8] sm:$0xff] %vm4491_vm7, %v4450_v25  ;;  %v9265_v29 = vrot.slane %v12066_v55, 9 }
 0x65c   : > { %4711 = vst.msk [vmem:[#allocation3 + $0xd0] sm:$0xff] %vm4684_vm8, %v4641_v4  ;;  %v12022_v19 = vld [vmem:[#allocation4 + $0x30] sm:$0xff]  ;;  %v12084_v16 = vrot.slane %v5678_v11, %v11815_v38  ;;  %v12103_v23 = vcombine.high %v12069_v61, %v12069_v61  ;;  %v12116_v44 = vcombine.high %v12081_v10, %v12081_v10  ;;  %v9261_v24 = vrot.slane %v12069_v61, 9  ;;  %v8355_v11 = vld [vmem:[%s13323_s3 + $0xc8] sm:$0xff] }
 0x65d   : > { %v12024_v50 = vld [vmem:[#allocation4 + $0x33] sm:$0xff]  ;;  %7897 = vrot.lane.b32.xlu0 %v12022_v19, %s9690_s17 }
 0x65e   : > { %7802 = vrot.lane.b32.xlu1 %v12024_v50, %s9688_s9  ;;  %v3874_v45 = vpop.permute.xlu0 %3873  ;;  %v5128_v51 = vld [vmem:[#allocation3 + $0xc8] sm:$0xff]  ;;  %7586 = vst.msk [vmem:[#allocation5 + $0x48] sm:$0xff] %vm6790_vm12, %v12024_v50  ;;  %v7219_v52 = vld [vmem:[#allocation4 + $0x30] sm:$0xff]  ;;  %v12121_v22 = vcombine.high %v12084_v16, %v12084_v16  ;;  %v9263_v34 = vrot.slane %v12084_v16, 9 }
 0x65f   : > { %v4065_v3 = vpop.permute.xlu1 %4064  ;;  %3941 = vst.msk [vmem:[#allocation3 + $0xe8] sm:$0xff] %vm3911_vm4, %v3874_v45  ;;  %9556 = vmatmul.mubr.msk.f32.gmra.mxu0 %vm5152_vm11, %v5128_v51  ;;  %v7929_v37 = vld [vmem:[#allocation4 + $0x31] sm:$0xff]  ;;  %v9267_v51 = vrot.slane %v12081_v10, 9 }
 0x660   : > { %4133 = vst.msk [vmem:[#allocation3 + $0xe0] sm:$0xff] %vm4104_vm5, %v4065_v3  ;;  %v12045_v58 = vld [vmem:[#allocation4 + $0x34] sm:$0xff]  ;;  %v9266_v3 = vrot.slane %v12099_v63, 9 }
 0x661   : > { %7227 = vst.msk [vmem:[#allocation5 + $0x60] sm:$0xff] %vm6790_vm12, %v7219_v52  ;;  %7937 = vst.msk [vmem:[#allocation5 + $0x10] sm:$0xff] %vm6790_vm12, %v7929_v37  ;;  %7610 = vrot.lane.b32.xlu0 %v11964_v7, %s9685_s6  ;;  %v12056_v42 = vld [vmem:[#allocation4 + $0x31] sm:$0xff]  ;;  %v9262_v52 = vrot.slane %v12103_v23, 9 }
 0x662   : > { %7447 = vrot.lane.b32.xlu1 %v11917_v46, %s9688_s9  ;;  %v4643_v54 = vpop.permute.xlu0 %4642  ;;  %v8361_v46 = vld [vmem:[%s13323_s3 + $0xf8] sm:$0xff] }
 0x663   : > { %v4834_v21 = vpop.permute.xlu1 %4833  ;;  %4712 = vst.msk [vmem:[#allocation3 + $0xd8] sm:$0xff] %vm4684_vm8, %v4643_v54  ;;  %9443 = vmatprep.subr.mxu1 %v8361_v46  ;;  %v12086_v43 = vld [vmem:[#allocation4 + $0x32] sm:$0xff] }
 0x664   : > { %4904 = vst.msk [vmem:[#allocation3 + $0xd0] sm:$0xff] %vm4877_vm9, %v4834_v21  ;;  %9444 = vmatpush3.msra.mxu1 %v8345_v56  ;;  %v8341_v45 = vld [vmem:[%s13323_s3 + $0x58] sm:$0xff] }
 0x665   : > { %7658 = vrot.lane.b32.xlu0 %v12022_v19, %s9686_s28  ;;  %9445 = vmatprep.subr.mxu1 %v8360_v5 }
 0x666   : > { %7850 = vrot.lane.b32.xlu1 %v12045_v58, %s9689_s14  ;;  %v4067_v59 = vpop.permute.xlu0 %4066  ;;  %9446 = vmatpush3.msra.mxu1 %v8344_v2  ;;  %v8339_v2 = vld [vmem:[%s13323_s3 + $0x48] sm:$0xff] }
 0x667   : > { %v4259_v57 = vpop.permute.xlu1 %4258  ;;  %4134 = vst.msk [vmem:[#allocation3 + $0xe8] sm:$0xff] %vm4104_vm5, %v4067_v59  ;;  %9447 = vmatprep.subr.mxu1 %v8359_v6  ;;  %v9268_v59 = vrot.slane %v12116_v44, 9 }
 0x668   : > { %4327 = vst.msk [vmem:[#allocation3 + $0xe0] sm:$0xff] %vm4298_vm6, %v4259_v57  ;;  %9448 = vmatpush3.msra.mxu1 %v8343_v28  ;;  %v6632_v28 = vmax.f32 %v12084_v16, %v9263_v34 }
 0x669   : > { %7706 = vrot.lane.b32.xlu0 %v12056_v42, %s9675_s24 }
 0x66a   : > { %7496 = vrot.lane.b32.xlu1 %v11928_v14, %s9689_s14  ;;  %v4836_v17 = vpop.permute.xlu0 %4835 }
 0x66b   : > { %v5027_v41 = vpop.permute.xlu1 %5026  ;;  %4905 = vst.msk [vmem:[#allocation3 + $0xd8] sm:$0xff] %vm4877_vm9, %v4836_v17  ;;  %v9536_v0 = vpop.f32.mrf.mxu0  ;;  %v9264_v17 = vrot.slane %v12121_v22, 9 }
 0x66c   : > { %5097 = vst.msk [vmem:[#allocation3 + $0xd0] sm:$0xff] %vm5070_vm10, %v5027_v41  ;;  %v5375_v33 = vadd.f32 %v9536_v0, %v11798_v36  ;;  %v6630_v41 = vmax.f32 %v12069_v61, %v9261_v24  ;;  %v8338_v61 = vld [vmem:[%s13323_s3 + $0x40] sm:$0xff] }
 0x66d   : > { %v5369_v27 = vpop.f32.mrf.mxu0  ;;  %7754 = vrot.lane.b32.xlu0 %v12086_v43, %s9687_s29  ;;  %v6633_v16 = vmax.f32 %v12121_v22, %v9264_v17  ;;  %v8334_v17 = vld [vmem:[%s13323_s3 + $0x20] sm:$0xff] }
 0x66e   : > { %v5489_v62 = vmax.f32 %v5375_v33, 0.0  ;;  %v5370_v13 = vadd.f32 %v11798_v36, %v5369_v27  ;;  %v4261_v49 = vpop.permute.xlu0 %4260  ;;  %v8358_v36 = vld [vmem:[%s13323_s3 + $0xe0] sm:$0xff] }
 0x66f   : > { %v4452_v9 = vpop.permute.xlu1 %4451  ;;  %4328 = vst.msk [vmem:[#allocation3 + $0xe8] sm:$0xff] %vm4298_vm6, %v4261_v49  ;;  %9449 = vmatprep.subr.mxu1 %v8358_v36  ;;  %v8353_v49 = vld [vmem:[%s13323_s3 + $0xb8] sm:$0xff] }
 0x670   : > { %4520 = vst.msk [vmem:[#allocation3 + $0xe0] sm:$0xff] %vm4491_vm7, %v4452_v9  ;;  %v5729_v39 = vcombine.high %v5489_v62, %v5489_v62  ;;  %v5736_v26 = vrot.slane %v5489_v62, %v11815_v38  ;;  %v5488_v12 = vmax.f32 %v5370_v13, 0.0  ;;  %9450 = vmatpush3.msra.mxu1 %v8342_v53  ;;  %v6631_v9 = vmax.f32 %v12103_v23, %v9262_v52 }
 0x671   : > { %7612 = vrot.lane.b32.xlu0 %v12045_v58, %s9685_s6  ;;  %9451 = vmatprep.subr.mxu1 %v8357_v60  ;;  %v6635_v23 = vmax.f32 %v12099_v63, %v9266_v3  ;;  %v6636_v63 = vmax.f32 %v12081_v10, %v9267_v51  ;;  %v8351_v3 = vld [vmem:[%s13323_s3 + $0xa8] sm:$0xff] }
 0x672   : > { %v12128_v32 = vrot.slane %v5729_v39, %v11815_v38  ;;  %v5744_v30 = vcombine.high %v5736_v26, %v5736_v26  ;;  %v5712_v31 = vcombine.high %v5488_v12, %v5488_v12  ;;  %v5029_v25 = vpop.permute.xlu0 %5028  ;;  %v5719_v37 = vrot.slane %v5488_v12, %v11815_v38  ;;  %9452 = vmatpush3.msra.mxu1 %v8341_v45  ;;  %v8352_v45 = vld [vmem:[%s13323_s3 + $0xb0] sm:$0xff]  ;;  %v8335_v10 = vld [vmem:[%s13323_s3 + $0x28] sm:$0xff] }
 0x673   : > { %v3876_v4 = vpop.permute.xlu1 %3875  ;;  %v5129_v48 = vld [vmem:[#allocation3 + $0xd0] sm:$0xff]  ;;  %5098 = vst.msk [vmem:[#allocation3 + $0xd8] sm:$0xff] %vm5070_vm10, %v5029_v25  ;;  %v9273_v21 = vrot.slane %v5736_v26, 9  ;;  %9453 = vmatprep.subr.mxu1 %v8356_v15  ;;  %v6634_v25 = vmax.f32 %v12066_v55, %v9265_v29  ;;  %v6637_v29 = vmax.f32 %v12116_v44, %v9268_v59 }
 0x674   : > { %3942 = vst.msk [vmem:[#allocation3 + $0xf0] sm:$0xff] %vm3911_vm4, %v3876_v4  ;;  %9558 = vmatprep.mubr.msk.f32.mxu0 %vm5152_vm11, %v5129_v48  ;;  %v5745_v54 = vcombine.high %v12128_v32, %v12128_v32  ;;  %v9274_v8 = vrot.slane %v5744_v30, 9  ;;  %v5726_v57 = vrot.slane %v5712_v31, %v11815_v38  ;;  %v5727_v46 = vcombine.high %v5719_v37, %v5719_v37  ;;  %v8337_v31 = vld [vmem:[%s13323_s3 + $0x38] sm:$0xff]  ;;  %v8336_v55 = vld [vmem:[%s13323_s3 + $0x30] sm:$0xff] }
 0x675   : > { %v9269_v20 = vrot.slane %v5719_v37, 9  ;;  %9454 = vmatpush3.msra.mxu1 %v8340_v35  ;;  %v9275_v56 = vrot.slane %v12128_v32, 9  ;;  %7252 = vrot.lane.b32.xlu0 %v11928_v14, %s9685_s6  ;;  %v8354_v14 = vld [vmem:[%s13323_s3 + $0xc0] sm:$0xff]  ;;  %v6642_v36 = vmax.f32 %v5736_v26, %v9273_v21 }
 0x676   : > { %v9276_v0 = vrot.slane %v5745_v54, 9  ;;  %v4454_v5 = vpop.permute.xlu0 %4453  ;;  %9455 = vmatprep.subr.mxu1 %v8355_v11  ;;  %v5728_v27 = vcombine.high %v5726_v57, %v5726_v57  ;;  %v9270_v6 = vrot.slane %v5727_v46, 9  ;;  %v9271_v62 = vrot.slane %v5726_v57, 9 }
 0x677   : > { %v4645_v33 = vpop.permute.xlu1 %4644  ;;  %v6638_v13 = vmax.f32 %v5719_v37, %v9269_v20  ;;  %4521 = vst.msk [vmem:[#allocation3 + $0xe8] sm:$0xff] %vm4491_vm7, %v4454_v5  ;;  %9456 = vmatpush3.msra.mxu1 %v8339_v2  ;;  %v6643_v39 = vmax.f32 %v5744_v30, %v9274_v8  ;;  %v6644_v26 = vmax.f32 %v12128_v32, %v9275_v56  ;;  %v8333_v2 = vld [vmem:[%s13323_s3 + $0x18] sm:$0xff] }
 0x678   : > { %4713 = vst.msk [vmem:[#allocation3 + $0xe0] sm:$0xff] %vm4684_vm8, %v4645_v33  ;;  %9457 = vmatprep.subr.mxu1 %v8354_v14  ;;  %v9272_v12 = vrot.slane %v5728_v27, 9  ;;  %v6639_v53 = vmax.f32 %v5727_v46, %v9270_v6  ;;  %v6640_v60 = vmax.f32 %v5726_v57, %v9271_v62  ;;  %v6645_v52 = vmax.f32 %v5745_v54, %v9276_v0  ;;  %v8350_v57 = vld [vmem:[%s13323_s3 + $0xa0] sm:$0xff]  ;;  %v8349_v0 = vld [vmem:[%s13323_s3 + $0x98] sm:$0xff]  ;;  %v8348_v14 = vld [vmem:[%s13323_s3 + $0x90] sm:$0xff] }
 0x679   : > { %v6742_v24 = vmax.f32 %v6630_v41, %v6638_v13  ;;  %9458 = vmatpush3.msra.mxu1 %v8338_v61  ;;  %v6746_v22 = vmax.f32 %v6634_v25, %v6642_v36  ;;  %v6747_v32 = vmax.f32 %v6635_v23, %v6643_v39  ;;  %v6748_v44 = vmax.f32 %v6636_v63, %v6644_v26  ;;  %v8347_v39 = vld [vmem:[%s13323_s3 + $0x88] sm:$0xff] }
 0x67a   : > { %v3878_v30 = vpop.permute.xlu0 %3877  ;;  %v5130_v48 = vld [vmem:[#allocation3 + $0xd8] sm:$0xff]  ;;  %9459 = vmatprep.subr.mxu1 %v8353_v49  ;;  %v6641_v37 = vmax.f32 %v5728_v27, %v9272_v12  ;;  %v6743_v15 = vmax.f32 %v6631_v9, %v6639_v53  ;;  %v6744_v34 = vmax.f32 %v6632_v28, %v6640_v60  ;;  %v6749_v46 = vmax.f32 %v6637_v29, %v6645_v52  ;;  %v8332_v9 = vld [vmem:[%s13323_s3 + $0x10] sm:$0xff]  ;;  %v8331_v60 = vld [vmem:[%s13323_s3 + $0x8] sm:$0xff] }
 0x67b   : > { %v4069_v4 = vpop.permute.xlu1 %4068  ;;  %3943 = vst.msk [vmem:[#allocation3 + $0xf8] sm:$0xff] %vm3911_vm4, %v3878_v30  ;;  %9559 = vmatmul.mubr.msk.f32.gmra.mxu0 %vm5152_vm11, %v5130_v48  ;;  %9460 = vmatpush3.msra.mxu1 %v8337_v31  ;;  %v6947_v21 = vrot.slane %v6742_v24, %v11853_v18  ;;  %v6963_v41 = vrot.slane %v6746_v22, %v11853_v18  ;;  %v8346_v24 = vld [vmem:[%s13323_s3 + $0x80] sm:$0xff]  ;;  %vm7272_vm4 = vcmask 261248  }
 0x67c   : > { %4135 = vst.msk [vmem:[#allocation3 + $0xf0] sm:$0xff] %vm4104_vm5, %v4069_v4  ;;  %v6745_v54 = vmax.f32 %v6633_v16, %v6641_v37  ;;  %v6951_v8 = vrot.slane %v6743_v15, %v11853_v18  ;;  %v6955_v35 = vrot.slane %v6744_v34, %v11853_v18  ;;  %9461 = vmatprep.subr.mxu1 %v8352_v45  ;;  %v8330_v31 = vld [vmem:[%s13323_s3] sm:$0xff] }
 0x67d   : > { %9462 = vmatpush3.msra.mxu1 %v8336_v55  ;;  %v6967_v5 = vrot.slane %v6747_v32, %v11853_v18  ;;  %v6971_v27 = vrot.slane %v6748_v44, %v11853_v18  ;;  %v6975_v61 = vrot.slane %v6749_v46, %v11853_v18  ;;  %v12288_v55 = vld [vmem:[%s13322_s2] ss:$0 sm:$0xff] }
 0x67e   : > { %v4647_v51 = vpop.permute.xlu0 %4646  ;;  %v6959_v20 = vrot.slane %v6745_v54, %v11853_v18  ;;  %v7157_v11 = vsel %vm7136_vm14, %v6951_v8, %v6947_v21  ;;  %9463 = vmatprep.subr.mxu1 %v8351_v3 }
 0x67f   : > { %v4838_v59 = vpop.permute.xlu1 %4837  ;;  %4714 = vst.msk [vmem:[#allocation3 + $0xe8] sm:$0xff] %vm4684_vm8, %v4647_v51  ;;  %v7158_v56 = vsel %vm7138_vm15, %v6955_v35, %v7157_v11  ;;  %9464 = vmatpush3.msra.mxu1 %v8335_v10 }
 0x680   : > { %4906 = vst.msk [vmem:[#allocation3 + $0xe0] sm:$0xff] %vm4877_vm9, %v4838_v59  ;;  %v7159_v33 = vsel %vm7140_vm0, %v6959_v20, %v7158_v56  ;;  %9465 = vmatprep.subr.mxu1 %v8350_v57 }
 0x681   : > { %v7160_v6 = vsel %vm7142_vm1, %v6963_v41, %v7159_v33  ;;  %9466 = vmatpush3.msra.mxu1 %v8334_v17 }
 0x682   : > { %v4071_v62 = vpop.permute.xlu0 %4070  ;;  %v7161_v49 = vsel %vm7144_vm2, %v6967_v5, %v7160_v6  ;;  %9467 = vmatprep.subr.mxu1 %v8349_v0 }
 0x683   : > { %v4263_v13 = vpop.permute.xlu1 %4262  ;;  %4136 = vst.msk [vmem:[#allocation3 + $0xf8] sm:$0xff] %vm4104_vm5, %v4071_v62  ;;  %v7162_v28 = vsel %vm7146_vm3, %v6971_v27, %v7161_v49  ;;  %9468 = vmatpush3.msra.mxu1 %v8333_v2  ;;  %v9539_v25 = vpop.f32.mrf.mxu0  ;;  %vm7321_vm5 = vcmask 392448  }
 0x684   : > { %4329 = vst.msk [vmem:[#allocation3 + $0xf0] sm:$0xff] %vm4298_vm6, %v4263_v13  ;;  %v7163_v36 = vsel %vm7148_vm13, %v6975_v61, %v7162_v28  ;;  %9469 = vmatprep.subr.mxu1 %v8348_v14  ;;  %v5385_v63 = vadd.f32 %v12288_v55, %v9539_v25 }
 0x685   : > { %7210 = vst.msk [vmem:[#allocation4 + $0x42] sm:$0xff] %vm6790_vm12, %v7163_v36  ;;  %9470 = vmatpush3.msra.mxu1 %v8332_v9  ;;  %v5379_v4 = vpop.f32.mrf.mxu0 }
 0x686   : > { %v4840_v12 = vpop.permute.xlu0 %4839  ;;  %9471 = vmatprep.subr.mxu1 %v8347_v39  ;;  %v5380_v29 = vadd.f32 %v12288_v55, %v5379_v4  ;;  %v5491_v3 = vmax.f32 %v5385_v63, 0.0 }
 0x687   : > { %v5031_v53 = vpop.permute.xlu1 %5030  ;;  %4907 = vst.msk [vmem:[#allocation3 + $0xe8] sm:$0xff] %vm4877_vm9, %v4840_v12  ;;  %9472 = vmatpush3.msra.mxu1 %v8331_v60 }
 0x688   : > { %5099 = vst.msk [vmem:[#allocation3 + $0xe0] sm:$0xff] %vm5070_vm10, %v5031_v53  ;;  %9473 = vmatprep.subr.mxu1 %v8346_v24  ;;  %v5490_v54 = vmax.f32 %v5380_v29, 0.0  ;;  %v5763_v10 = vcombine.high %v5491_v3, %v5491_v3  ;;  %v12312_v51 = vrot.slane %v5491_v3, %v11815_v38 }
 0x689   : > { %9474 = vmatpush3.msra.mxu1 %v8330_v31 }
 0x68a   : > { %v4265_v23 = vpop.permute.xlu0 %4264  ;;  %9567 = vmatprep.subr.mxu1 %v9659_v1  ;;  %v5746_v44 = vcombine.high %v5490_v54, %v5490_v54  ;;  %v5753_v59 = vrot.slane %v5490_v54, %v11815_v38  ;;  %v12319_v11 = vrot.slane %v5763_v10, %v11815_v38  ;;  %v12333_v33 = vcombine.high %v12312_v51, %v12312_v51 }
 0x68b   : > { %4330 = vst.msk [vmem:[#allocation3 + $0xf8] sm:$0xff] %vm4298_vm6, %v4265_v23  ;;  %v4456_v16 = vpop.permute.xlu1 %4455  ;;  %vm7370_vm6 = vcmask 523648   ;;  %v9281_v14 = vrot.slane %v12312_v51, 9 }
 0x68c   : > { %4522 = vst.msk [vmem:[#allocation3 + $0xf0] sm:$0xff] %vm4491_vm7, %v4456_v16  ;;  %v12260_v26 = vld [vmem:[#allocation4 + $0x40] sm:$0xff]  ;;  %v5761_v2 = vcombine.high %v5753_v59, %v5753_v59  ;;  %v9277_v49 = vrot.slane %v5753_v59, 9  ;;  %v9282_v53 = vrot.slane %v12333_v33, 9  ;;  %v9283_v60 = vrot.slane %v12319_v11, 9 }
 0x68d   : > { %v12262_v30 = vld [vmem:[#allocation4 + $0x43] sm:$0xff]  ;;  %7899 = vrot.lane.b32.xlu1 %v12260_v26, %s9690_s17  ;;  %7660 = vrot.lane.b32.xlu0 %v12260_v26, %s9686_s28 }
 0x68e   : > { %v5033_v48 = vpop.permute.xlu0 %5032  ;;  %v12268_v52 = vld [vmem:[#allocation4 + $0x44] sm:$0xff]  ;;  %7587 = vst.msk [vmem:[#allocation5 + $0x68] sm:$0xff] %vm6790_vm12, %v12262_v30  ;;  %v9278_v24 = vrot.slane %v5761_v2, 9  ;;  %v6646_v54 = vmax.f32 %v5753_v59, %v9277_v49 }
 0x68f   : > { %v5131_v45 = vld [vmem:[#allocation3 + $0xe0] sm:$0xff]  ;;  %5100 = vst.msk [vmem:[#allocation3 + $0xe8] sm:$0xff] %vm5070_vm10, %v5033_v48  ;;  %v4458_v37 = vpop.permute.xlu1 %4457 }
 0x690   : > { %9561 = vmatprep.mubr.msk.f32.mxu0 %vm5152_vm11, %v5131_v45  ;;  %8290 = vst.msk [vmem:[#allocation5 + $0x18] sm:$0xff] %vm6790_vm12, %v12268_v52  ;;  %v12276_v15 = vld [vmem:[#allocation4 + $0x40] sm:$0xff] }
 0x691   : > { %v12278_v34 = vld [vmem:[#allocation4 + $0x41] sm:$0xff]  ;;  %4523 = vst.msk [vmem:[#allocation3 + $0xf8] sm:$0xff] %vm4491_vm7, %v4458_v37  ;;  %7545 = vrot.lane.b32.xlu1 %v11935_v47, %s9690_s17  ;;  %7301 = vrot.lane.b32.xlu0 %v11935_v47, %s9686_s28  ;;  %vm7419_vm7 = vcmask 654848  }
 0x692   : > { %7228 = vst.msk [vmem:[#allocation5 + $0x80] sm:$0xff] %vm6790_vm12, %v12276_v15  ;;  %7938 = vst.msk [vmem:[#allocation5 + $0x30] sm:$0xff] %vm6790_vm12, %v12278_v34  ;;  %v4649_v22 = vpop.permute.xlu0 %4648  ;;  %v12298_v21 = vld [vmem:[#allocation4 + $0x41] sm:$0xff] }
 0x693   : > { %4715 = vst.msk [vmem:[#allocation3 + $0xf0] sm:$0xff] %vm4684_vm8, %v4649_v22  ;;  %v4651_v32 = vpop.permute.xlu1 %4650  ;;  %v12324_v41 = vld [vmem:[#allocation4 + $0x42] sm:$0xff] }
 0x694   : > { %4716 = vst.msk [vmem:[#allocation3 + $0xf8] sm:$0xff] %vm4684_vm8, %v4651_v32  ;;  %vm7469_vm8 = vcmask 786048  }
 0x695   : > { %7399 = vrot.lane.b32.xlu1 %v11964_v7, %s9687_s29  ;;  %7708 = vrot.lane.b32.xlu0 %v12298_v21, %s9675_s24 }
 0x696   : > { %v4842_v8 = vpop.permute.xlu0 %4841  ;;  %v5132_v35 = vld [vmem:[#allocation3 + $0xe8] sm:$0xff] }
 0x697   : > { %4908 = vst.msk [vmem:[#allocation3 + $0xf0] sm:$0xff] %vm4877_vm9, %v4842_v8  ;;  %v4844_v47 = vpop.permute.xlu1 %4843  ;;  %9562 = vmatmul.mubr.msk.f32.gmra.mxu0 %vm5152_vm11, %v5132_v35  ;;  %v8301_v37 = vld [vmem:[#allocation5 + $0x18] sm:$0xff] }
 0x698   : > { %4909 = vst.msk [vmem:[#allocation3 + $0xf8] sm:$0xff] %vm4877_vm9, %v4844_v47  ;;  %vm7518_vm9 = vcmask 917248  }
 0x699   : > { %7804 = vrot.lane.b32.xlu1 %v12262_v30, %s9688_s9  ;;  %7350 = vrot.lane.b32.xlu0 %v11947_v40, %s9675_s24  ;;  %v12322_v40 = vrot.slane %v5746_v44, %v11815_v38 }
 0x69a   : > { %v5035_v7 = vpop.permute.xlu0 %5034 }
 0x69b   : > { %5101 = vst.msk [vmem:[#allocation3 + $0xf0] sm:$0xff] %vm5070_vm10, %v5035_v7  ;;  %v5037_v57 = vpop.permute.xlu1 %5036  ;;  %v9542_v46 = vpop.f32.mrf.mxu0  ;;  %v5762_v61 = vcombine.high %v12322_v40, %v12322_v40  ;;  %v9279_v16 = vrot.slane %v12322_v40, 9 }
 0x69c   : > { %5102 = vst.msk [vmem:[#allocation3 + $0xf8] sm:$0xff] %vm5070_vm10, %v5037_v57  ;;  %v5395_v20 = vadd.f32 %v12288_v55, %v9542_v46  ;;  %vm7567_vm10 = vcmask 1048448  }
 0x69d   : > { %v5389_v17 = vpop.f32.mrf.mxu0  ;;  %7756 = vrot.lane.b32.xlu0 %v12324_v41, %s9687_s29  ;;  %7449 = vrot.lane.b32.xlu1 %v12022_v19, %s9688_s9  ;;  %v12340_v19 = vcombine.high %v12319_v11, %v12319_v11  ;;  %v9280_v3 = vrot.slane %v5762_v61, 9 }
 0x69e   : > { %v5493_v56 = vmax.f32 %v5395_v20, 0.0  ;;  %v5390_v0 = vadd.f32 %v12288_v55, %v5389_v17  ;;  %v7609_v5 = vpop.permute.xlu0 %7608  ;;  %v6647_v20 = vmax.f32 %v5761_v2, %v9278_v24  ;;  %v6648_v17 = vmax.f32 %v12322_v40, %v9279_v16 }
 0x69f   : > { %7632 = vst.msk [vmem:[#allocation5 + $0x8] sm:$0xff] %vm7272_vm4, %v7609_v5  ;;  %v7249_v27 = vpop.permute.xlu1 %7248  ;;  %v9284_v63 = vrot.slane %v12340_v19, 9  ;;  %v6649_v49 = vmax.f32 %v5762_v61, %v9280_v3 }
 0x6a0   : > { %v5797_v6 = vcombine.high %v5493_v56, %v5493_v56  ;;  %v5804_v62 = vrot.slane %v5493_v56, %v11815_v38  ;;  %v5492_v13 = vmax.f32 %v5390_v0, 0.0  ;;  %7273 = vst.msk [vmem:[#allocation5] sm:$0xff] %vm7272_vm4, %v7249_v27 }
 0x6a1   : > { %7614 = vrot.lane.b32.xlu0 %v12268_v52, %s9685_s6  ;;  %7852 = vrot.lane.b32.xlu1 %v12268_v52, %s9689_s14 }
 0x6a2   : > { %v5811_v9 = vrot.slane %v5797_v6, %v11815_v38  ;;  %v5812_v28 = vcombine.high %v5804_v62, %v5804_v62  ;;  %v5780_v36 = vcombine.high %v5492_v13, %v5492_v13  ;;  %v7657_v39 = vpop.permute.xlu0 %7656  ;;  %v5133_v12 = vld [vmem:[#allocation3 + $0xf0] sm:$0xff]  ;;  %v5787_v31 = vrot.slane %v5492_v13, %v11815_v38 }
 0x6a3   : > { %7680 = vst.msk [vmem:[#allocation5 + $0x8] sm:$0xff] %vm7321_vm5, %v7657_v39  ;;  %9564 = vmatprep.mubr.msk.f32.mxu0 %vm5152_vm11, %v5133_v12  ;;  %v5134_v25 = vld [vmem:[#allocation3 + $0xf8] sm:$0xff]  ;;  %v7298_v23 = vpop.permute.xlu1 %7297  ;;  %v9289_v48 = vrot.slane %v5804_v62, 9  ;;  %v6651_v13 = vmax.f32 %v12333_v33, %v9282_v53 }
 0x6a4   : > { %v5813_v4 = vcombine.high %v5811_v9, %v5811_v9  ;;  %v9290_v45 = vrot.slane %v5812_v28, 9  ;;  %9565 = vmatmul.mubr.msk.f32.gmra.mxu0 %vm5152_vm11, %v5134_v25  ;;  %7322 = vst.msk [vmem:[#allocation5] sm:$0xff] %vm7321_vm5, %v7298_v23  ;;  %v5794_v29 = vrot.slane %v5780_v36, %v11815_v38  ;;  %v5795_v22 = vcombine.high %v5787_v31, %v5787_v31 }
 0x6a5   : > { %v9285_v32 = vrot.slane %v5787_v31, 9  ;;  %9358 = vmatprep.mubr.msk.f32.mxu0 %vm6790_vm12, %v8301_v37  ;;  %v9291_v8 = vrot.slane %v5811_v9, 9  ;;  %7498 = vrot.lane.b32.xlu1 %v12056_v42, %s9689_s14  ;;  %v6658_v59 = vmax.f32 %v5804_v62, %v9289_v48  ;;  %v6652_v62 = vmax.f32 %v12319_v11, %v9283_v60 }
 0x6a6   : > { %v9292_v35 = vrot.slane %v5813_v4, 9  ;;  %7254 = vrot.lane.b32.xlu0 %v12056_v42, %s9685_s6  ;;  %v7705_v47 = vpop.permute.xlu0 %7704  ;;  %v5796_v10 = vcombine.high %v5794_v29, %v5794_v29  ;;  %v9286_v44 = vrot.slane %v5795_v22, 9  ;;  %v9287_v7 = vrot.slane %v5794_v29, 9 }
 0x6a7   : > { %v6654_v57 = vmax.f32 %v5787_v31, %v9285_v32  ;;  %7728 = vst.msk [vmem:[#allocation5 + $0x8] sm:$0xff] %vm7370_vm6, %v7705_v47  ;;  %v7347_v46 = vpop.permute.xlu1 %7346  ;;  %v6659_v56 = vmax.f32 %v5812_v28, %v9290_v45  ;;  %v6650_v42 = vmax.f32 %v12312_v51, %v9281_v14  ;;  %v6660_v36 = vmax.f32 %v5811_v9, %v9291_v8 }
 0x6a8   : > { %7371 = vst.msk [vmem:[#allocation5] sm:$0xff] %vm7370_vm6, %v7347_v46  ;;  %v9288_v0 = vrot.slane %v5796_v10, 9  ;;  %v6655_v5 = vmax.f32 %v5795_v22, %v9286_v44  ;;  %v6656_v27 = vmax.f32 %v5794_v29, %v9287_v7  ;;  %v6661_v12 = vmax.f32 %v5813_v4, %v9292_v35 }
 0x6a9   : > { %v6750_v6 = vmax.f32 %v6646_v54, %v6654_v57  ;;  %v6653_v28 = vmax.f32 %v12340_v19, %v9284_v63  ;;  %v6754_v25 = vmax.f32 %v6650_v42, %v6658_v59  ;;  %v6755_v23 = vmax.f32 %v6651_v13, %v6659_v56 }
 0x6aa   : > { %v7753_v39 = vpop.permute.xlu0 %7752  ;;  %v6657_v31 = vmax.f32 %v5796_v10, %v9288_v0  ;;  %v6751_v2 = vmax.f32 %v6647_v20, %v6655_v5  ;;  %v6752_v24 = vmax.f32 %v6648_v17, %v6656_v27  ;;  %v6756_v9 = vmax.f32 %v6652_v62, %v6660_v36 }
 0x6ab   : > { %7776 = vst.msk [vmem:[#allocation5 + $0x8] sm:$0xff] %vm7419_vm7, %v7753_v39  ;;  %v7396_v40 = vpop.permute.xlu1 %7395  ;;  %v6979_v33 = vrot.slane %v6750_v6, %v11853_v18  ;;  %v6757_v16 = vmax.f32 %v6653_v28, %v6661_v12  ;;  %v6995_v60 = vrot.slane %v6754_v25, %v11853_v18  ;;  %v6999_v45 = vrot.slane %v6755_v23, %v11853_v18 }
 0x6ac   : > { %7420 = vst.msk [vmem:[#allocation5] sm:$0xff] %vm7419_vm7, %v7396_v40  ;;  %v6753_v51 = vmax.f32 %v6649_v49, %v6657_v31  ;;  %v6983_v14 = vrot.slane %v6751_v2, %v11853_v18  ;;  %v6987_v61 = vrot.slane %v6752_v24, %v11853_v18  ;;  %v7003_v63 = vrot.slane %v6756_v9, %v11853_v18 }
 0x6ad   : > { %v7007_v32 = vrot.slane %v6757_v16, %v11853_v18  ;;  %vm9123_vm11 = vcmask 261120  }
 0x6ae   : > { %v7801_v53 = vpop.permute.xlu0 %7800  ;;  %v6991_v4 = vrot.slane %v6753_v51, %v11853_v18  ;;  %v7164_v11 = vsel %vm7136_vm14, %v6983_v14, %v6979_v33 }
 0x6af   : > { %7824 = vst.msk [vmem:[#allocation5 + $0x8] sm:$0xff] %vm7469_vm8, %v7801_v53  ;;  %v7446_v19 = vpop.permute.xlu1 %7445  ;;  %v7165_v48 = vsel %vm7138_vm15, %v6987_v61, %v7164_v11 }
 0x6b0   : > { %7470 = vst.msk [vmem:[#allocation5] sm:$0xff] %vm7469_vm8, %v7446_v19  ;;  %v7166_v37 = vsel %vm7140_vm0, %v6991_v4, %v7165_v48 }
 0x6b1   : > { %v7167_v29 = vsel %vm7142_vm1, %v6995_v60, %v7166_v37 }
 0x6b2   : > { %v7849_v22 = vpop.permute.xlu0 %7848  ;;  %v7168_v3 = vsel %vm7144_vm2, %v6999_v45, %v7167_v29 }
 0x6b3   : > { %7872 = vst.msk [vmem:[#allocation5 + $0x8] sm:$0xff] %vm7518_vm9, %v7849_v22  ;;  %v7495_v54 = vpop.permute.xlu1 %7494  ;;  %v7169_v8 = vsel %vm7146_vm3, %v7003_v63, %v7168_v3  ;;  %v9545_v10 = vpop.f32.mrf.mxu0 }
 0x6b4   : > { %7519 = vst.msk [vmem:[#allocation5] sm:$0xff] %vm7518_vm9, %v7495_v54  ;;  %v7170_v35 = vsel %vm7148_vm13, %v7007_v32, %v7169_v8  ;;  %v5405_v0 = vadd.f32 %v12288_v55, %v9545_v10 }
 0x6b5   : > { %7211 = vst.msk [vmem:[#allocation4 + $0x52] sm:$0xff] %vm6790_vm12, %v7170_v35  ;;  %v5399_v46 = vpop.f32.mrf.mxu0 }
 0x6b6   : > { %v5400_v5 = vadd.f32 %v12288_v55, %v5399_v46  ;;  %v5495_v6 = vmax.f32 %v5405_v0, 0.0 }
 0x6b7   : > { %v7544_v47 = vpop.permute.xlu1 %7543 }
 0x6b8   : > { %7568 = vst.msk [vmem:[#allocation5] sm:$0xff] %vm7567_vm10, %v7544_v47  ;;  %v5494_v42 = vmax.f32 %v5400_v5, 0.0  ;;  %v5831_v36 = vcombine.high %v5495_v6, %v5495_v6 }
 0x6ba   : > { %v5814_v39 = vcombine.high %v5494_v42, %v5494_v42  ;;  %v5821_v12 = vrot.slane %v5494_v42, %v11815_v38  ;;  %v12443_v2 = vrot.slane %v5831_v36, %v11815_v38 }
 0x6bb   : > { %v7251_v44 = vpop.permute.xlu1 %7250 }
 0x6bc   : > { %7274 = vst.msk [vmem:[#allocation5 + $0x20] sm:$0xff] %vm7272_vm4, %v7251_v44  ;;  %v12396_v7 = vld [vmem:[#allocation4 + $0x50] sm:$0xff]  ;;  %v5828_v24 = vrot.slane %v5814_v39, %v11815_v38  ;;  %v5829_v23 = vcombine.high %v5821_v12, %v5821_v12  ;;  %v5847_v53 = vcombine.high %v12443_v2, %v12443_v2  ;;  %v9293_v11 = vrot.slane %v5821_v12, 9 }
 0x6bd   : > { %v12398_v57 = vld [vmem:[#allocation4 + $0x53] sm:$0xff]  ;;  %7901 = vrot.lane.b32.xlu1 %v12396_v7, %s9690_s17  ;;  %7662 = vrot.lane.b32.xlu0 %v12396_v7, %s9686_s28  ;;  %v9299_v37 = vrot.slane %v12443_v2, 9 }
 0x6be   : > { %7588 = vst.msk [vmem:[#allocation5 + $0x88] sm:$0xff] %vm6790_vm12, %v12398_v57  ;;  %v12406_v20 = vld [vmem:[#allocation4 + $0x50] sm:$0xff]  ;;  %v9294_v63 = vrot.slane %v5829_v23, 9  ;;  %v9295_v22 = vrot.slane %v5828_v24, 9  ;;  %v9300_v47 = vrot.slane %v5847_v53, 9  ;;  %v6662_v0 = vmax.f32 %v5821_v12, %v9293_v11 }
 0x6bf   : > { %v7300_v17 = vpop.permute.xlu1 %7299  ;;  %7229 = vst.msk [vmem:[#allocation5 + $0xa0] sm:$0xff] %vm6790_vm12, %v12406_v20  ;;  %v12411_v59 = vld [vmem:[#allocation4 + $0x54] sm:$0xff]  ;;  %v8298_v39 = vld [vmem:[#allocation5] sm:$0xff] }
 0x6c0   : > { %7323 = vst.msk [vmem:[#allocation5 + $0x20] sm:$0xff] %vm7321_vm5, %v7300_v17  ;;  %v12413_v56 = vld [vmem:[#allocation4 + $0x51] sm:$0xff] }
 0x6c1   : > { %7939 = vst.msk [vmem:[#allocation5 + $0x50] sm:$0xff] %vm6790_vm12, %v12413_v56  ;;  %8291 = vst.msk [vmem:[#allocation5 + $0x38] sm:$0xff] %vm6790_vm12, %v12411_v59  ;;  %7547 = vrot.lane.b32.xlu1 %v12086_v43, %s9690_s17  ;;  %7303 = vrot.lane.b32.xlu0 %v12086_v43, %s9686_s28  ;;  %v12426_v13 = vld [vmem:[#allocation4 + $0x51] sm:$0xff]  ;;  %v12438_v43 = vrot.slane %v5495_v6, %v11815_v38 }
 0x6c2   : > { %v12446_v62 = vld [vmem:[#allocation4 + $0x52] sm:$0xff] }
 0x6c3   : > { %v7349_v27 = vpop.permute.xlu1 %7348  ;;  %v9297_v16 = vrot.slane %v12438_v43, 9  ;;  %v12462_v4 = vld [vmem:[#allocation4 + $0x54] sm:$0xff] }
 0x6c4   : > { %7372 = vst.msk [vmem:[#allocation5 + $0x20] sm:$0xff] %vm7370_vm6, %v7349_v27 }
 0x6c5   : > { %7401 = vrot.lane.b32.xlu1 %v12045_v58, %s9687_s29  ;;  %7710 = vrot.lane.b32.xlu0 %v12426_v13, %s9675_s24 }
 0x6c7   : > { %v7398_v49 = vpop.permute.xlu1 %7397 }
 0x6c8   : > { %7421 = vst.msk [vmem:[#allocation5 + $0x20] sm:$0xff] %vm7419_vm7, %v7398_v49 }
 0x6c9   : > { %7806 = vrot.lane.b32.xlu1 %v12398_v57, %s9688_s9  ;;  %7352 = vrot.lane.b32.xlu0 %v12024_v50, %s9675_s24  ;;  %v5846_v50 = vcombine.high %v12438_v43, %v12438_v43 }
 0x6cb   : > { %v9548_v58 = vpop.f32.mrf.mxu0  ;;  %v9298_v45 = vrot.slane %v5846_v50, 9 }
 0x6cc   : > { %v5415_v31 = vadd.f32 %v12288_v55, %v9548_v58  ;;  %v6663_v58 = vmax.f32 %v5829_v23, %v9294_v63  ;;  %v6668_v63 = vmax.f32 %v12443_v2, %v9299_v37 }
 0x6cd   : > { %v5409_v40 = vpop.f32.mrf.mxu0  ;;  %7451 = vrot.lane.b32.xlu1 %v12260_v26, %s9688_s9  ;;  %7758 = vrot.lane.b32.xlu0 %v12446_v62, %s9687_s29  ;;  %v5830_v26 = vcombine.high %v5828_v24, %v5828_v24 }
 0x6ce   : > { %v5497_v28 = vmax.f32 %v5415_v31, 0.0  ;;  %v5410_v25 = vadd.f32 %v12288_v55, %v5409_v40  ;;  %v6664_v31 = vmax.f32 %v5828_v24, %v9295_v22  ;;  %v6669_v22 = vmax.f32 %v5847_v53, %v9300_v47 }
 0x6cf   : > { %v7898_v61 = vpop.permute.xlu0 %7897  ;;  %v9296_v17 = vrot.slane %v5830_v26, 9 }
 0x6d0   : > { %v5865_v51 = vcombine.high %v5497_v28, %v5497_v28  ;;  %v5872_v33 = vrot.slane %v5497_v28, %v11815_v38  ;;  %v5496_v14 = vmax.f32 %v5410_v25, 0.0  ;;  %v12456_v9 = vpop.permute.xlu1 %7802  ;;  %7921 = vst.msk [vmem:[#allocation5 + $0x8] sm:$0xff] %vm7567_vm10, %v7898_v61 }
 0x6d1   : > { %7854 = vrot.lane.b32.xlu1 %v12462_v4, %s9689_s14  ;;  %7616 = vrot.lane.b32.xlu0 %v12462_v4, %s9685_s6 }
 0x6d2   : > { %v5879_v19 = vrot.slane %v5865_v51, %v11815_v38  ;;  %v5880_v60 = vcombine.high %v5872_v33, %v5872_v33  ;;  %v5848_v48 = vcombine.high %v5496_v14, %v5496_v14  ;;  %v5855_v29 = vrot.slane %v5496_v14, %v11815_v38 }
 0x6d3   : > { %v9305_v3 = vrot.slane %v5872_v33, 9  ;;  %v7611_v8 = vpop.permute.xlu0 %7610 }
 0x6d4   : > { %v5881_v32 = vcombine.high %v5879_v19, %v5879_v19  ;;  %v9306_v54 = vrot.slane %v5880_v60, 9  ;;  %v7448_v35 = vpop.permute.xlu1 %7447  ;;  %v5862_v10 = vrot.slane %v5848_v48, %v11815_v38  ;;  %v5863_v44 = vcombine.high %v5855_v29, %v5855_v29  ;;  %7633 = vst.msk [vmem:[#allocation5 + $0x28] sm:$0xff] %vm7272_vm4, %v7611_v8 }
 0x6d5   : > { %v9301_v46 = vrot.slane %v5855_v29, 9  ;;  %7471 = vst.msk [vmem:[#allocation5 + $0x20] sm:$0xff] %vm7469_vm8, %v7448_v35  ;;  %v9307_v5 = vrot.slane %v5879_v19, 9  ;;  %7500 = vrot.lane.b32.xlu1 %v12298_v21, %s9689_s14  ;;  %7256 = vrot.lane.b32.xlu0 %v12298_v21, %s9685_s6  ;;  %v6674_v40 = vmax.f32 %v5872_v33, %v9305_v3  ;;  %v6666_v21 = vmax.f32 %v12438_v43, %v9297_v16 }
 0x6d6   : > { %v9308_v27 = vrot.slane %v5881_v32, 9  ;;  %v5864_v6 = vcombine.high %v5862_v10, %v5862_v10  ;;  %v9302_v42 = vrot.slane %v5863_v44, 9  ;;  %v9303_v49 = vrot.slane %v5862_v10, 9 }
 0x6d7   : > { %v6670_v36 = vmax.f32 %v5855_v29, %v9301_v46  ;;  %v6675_v28 = vmax.f32 %v5880_v60, %v9306_v54  ;;  %v7659_v51 = vpop.permute.xlu0 %7658  ;;  %v8299_v12 = vld [vmem:[#allocation5 + $0x8] sm:$0xff]  ;;  %v6667_v8 = vmax.f32 %v5846_v50, %v9298_v45  ;;  %v6665_v35 = vmax.f32 %v5830_v26, %v9296_v17 }
 0x6d8   : > { %v7851_v25 = vpop.permute.xlu1 %7850  ;;  %v9304_v14 = vrot.slane %v5864_v6, 9  ;;  %v6671_v61 = vmax.f32 %v5863_v44, %v9302_v42  ;;  %v6672_v11 = vmax.f32 %v5862_v10, %v9303_v49  ;;  %7681 = vst.msk [vmem:[#allocation5 + $0x28] sm:$0xff] %vm7321_vm5, %v7659_v51  ;;  %8475 = vmatprep.mubr.f32.mxu1 %v8299_v12  ;;  %v6676_v29 = vmax.f32 %v5879_v19, %v9307_v5 }
 0x6d9   : > { %v6758_v48 = vmax.f32 %v6662_v0, %v6670_v36  ;;  %8476 = vmatmul.mubr.f32.vlgmr.msra.gmra.mxu1 %v8298_v39  ;;  %v6677_v23 = vmax.f32 %v5881_v32, %v9308_v27  ;;  %v6762_v3 = vmax.f32 %v6666_v21, %v6674_v40  ;;  %v6763_v54 = vmax.f32 %v6667_v8, %v6675_v28 }
 0x6da   : > { %v6673_v24 = vmax.f32 %v5864_v6, %v9304_v14  ;;  %v6759_v33 = vmax.f32 %v6663_v58, %v6671_v61  ;;  %v6760_v60 = vmax.f32 %v6664_v31, %v6672_v11  ;;  %v6764_v16 = vmax.f32 %v6668_v63, %v6676_v29 }
 0x6db   : > { %v7707_v44 = vpop.permute.xlu0 %7706  ;;  %v7011_v0 = vrot.slane %v6758_v48, %v11853_v18  ;;  %v6765_v26 = vmax.f32 %v6669_v22, %v6677_v23  ;;  %v7027_v19 = vrot.slane %v6762_v3, %v11853_v18  ;;  %v7031_v32 = vrot.slane %v6763_v54, %v11853_v18 }
 0x6dc   : > { %v7497_v10 = vpop.permute.xlu1 %7496  ;;  %v6761_v46 = vmax.f32 %v6665_v35, %v6673_v24  ;;  %v7015_v43 = vrot.slane %v6759_v33, %v11853_v18  ;;  %v7019_v50 = vrot.slane %v6760_v60, %v11853_v18  ;;  %7729 = vst.msk [vmem:[#allocation5 + $0x28] sm:$0xff] %vm7370_vm6, %v7707_v44  ;;  %v7035_v17 = vrot.slane %v6764_v16, %v11853_v18 }
 0x6dd   : > { %7520 = vst.msk [vmem:[#allocation5 + $0x20] sm:$0xff] %vm7518_vm9, %v7497_v10  ;;  %v7039_v27 = vrot.slane %v6765_v26, %v11853_v18 }
 0x6de   : > { %v7023_v2 = vrot.slane %v6761_v46, %v11853_v18  ;;  %v7171_v53 = vsel %vm7136_vm14, %v7015_v43, %v7011_v0 }
 0x6df   : > { %v7172_v45 = vsel %vm7138_vm15, %v7019_v50, %v7171_v53  ;;  %v7755_v37 = vpop.permute.xlu0 %7754 }
 0x6e0   : > { %v7173_v47 = vsel %vm7140_vm0, %v7023_v2, %v7172_v45  ;;  %7777 = vst.msk [vmem:[#allocation5 + $0x28] sm:$0xff] %vm7419_vm7, %v7755_v37 }
 0x6e1   : > { %v7174_v5 = vsel %vm7142_vm1, %v7027_v19, %v7173_v47  ;;  %7825 = vst.msk [vmem:[#allocation5 + $0x28] sm:$0xff] %vm7469_vm8, %v12456_v9 }
 0x6e2   : > { %v7175_v6 = vsel %vm7144_vm2, %v7031_v32, %v7174_v5  ;;  %7873 = vst.msk [vmem:[#allocation5 + $0x28] sm:$0xff] %vm7518_vm9, %v7851_v25 }
 0x6e3   : > { %v7176_v42 = vsel %vm7146_vm3, %v7035_v17, %v7175_v6  ;;  %v7613_v49 = vpop.permute.xlu0 %7612 }
 0x6e4   : > { %v7177_v36 = vsel %vm7148_vm13, %v7039_v27, %v7176_v42  ;;  %7634 = vst.msk [vmem:[#allocation5 + $0x48] sm:$0xff] %vm7272_vm4, %v7613_v49 }
 0x6e5   : > { %7212 = vst.msk [vmem:[#allocation4 + $0x62] sm:$0xff] %vm6790_vm12, %v7177_v36 }
 0x6e7   : > { %v7253_v39 = vpop.permute.xlu0 %7252  ;;  %v9551_v25 = vpop.f32.mrf.mxu0 }
 0x6e8   : > { %7275 = vst.msk [vmem:[#allocation5 + $0x40] sm:$0xff] %vm7272_vm4, %v7253_v39  ;;  %v5425_v14 = vadd.f32 %v12288_v55, %v9551_v25 }
 0x6e9   : > { %v5419_v12 = vpop.f32.mrf.mxu0 }
 0x6ea   : > { %v5420_v61 = vadd.f32 %v12288_v55, %v5419_v12 }
 0x6ec   : > { %v12505_v58 = vld [vmem:[#allocation4 + $0x60] sm:$0xff]  ;;  %v5498_v48 = vmax.f32 %v5420_v61, 0.0 }
 0x6ed   : > { %v12507_v9 = vld [vmem:[#allocation4 + $0x63] sm:$0xff]  ;;  %7903 = vrot.lane.b32.xlu1 %v12505_v58, %s9690_s17  ;;  %7664 = vrot.lane.b32.xlu0 %v12505_v58, %s9686_s28 }
 0x6ee   : > { %7589 = vst.msk [vmem:[#allocation5 + $0xa8] sm:$0xff] %vm6790_vm12, %v12507_v9  ;;  %v12515_v31 = vld [vmem:[#allocation4 + $0x60] sm:$0xff]  ;;  %v5889_v29 = vrot.slane %v5498_v48, %v11815_v38 }
 0x6ef   : > { %7230 = vst.msk [vmem:[#allocation5 + $0xc0] sm:$0xff] %vm6790_vm12, %v12515_v31  ;;  %v8284_v40 = vld [vmem:[#allocation4 + $0x64] sm:$0xff] }
 0x6f0   : > { %v7932_v28 = vld [vmem:[#allocation4 + $0x61] sm:$0xff]  ;;  %8292 = vst.msk [vmem:[#allocation5 + $0x58] sm:$0xff] %vm6790_vm12, %v8284_v40  ;;  %v5897_v46 = vcombine.high %v5889_v29, %v5889_v29  ;;  %v9309_v45 = vrot.slane %v5889_v29, 9 }
 0x6f1   : > { %7940 = vst.msk [vmem:[#allocation5 + $0x70] sm:$0xff] %vm6790_vm12, %v7932_v28  ;;  %7549 = vrot.lane.b32.xlu1 %v12324_v41, %s9690_s17  ;;  %7305 = vrot.lane.b32.xlu0 %v12324_v41, %s9686_s28  ;;  %v12525_v51 = vld [vmem:[#allocation4 + $0x61] sm:$0xff]  ;;  %v5499_v41 = vmax.f32 %v5425_v14, 0.0 }
 0x6f2   : > { %v12537_v11 = vld [vmem:[#allocation4 + $0x62] sm:$0xff]  ;;  %v9310_v27 = vrot.slane %v5897_v46, 9 }
 0x6f3   : > { %v5899_v8 = vcombine.high %v5499_v41, %v5499_v41  ;;  %v12545_v35 = vld [vmem:[#allocation4 + $0x64] sm:$0xff] }
 0x6f5   : > { %7403 = vrot.lane.b32.xlu1 %v12268_v52, %s9687_s29  ;;  %7712 = vrot.lane.b32.xlu0 %v12525_v51, %s9675_s24  ;;  %v12557_v63 = vrot.slane %v5899_v8, %v11815_v38 }
 0x6f7   : > { %v5915_v53 = vcombine.high %v12557_v63, %v12557_v63  ;;  %v9315_v5 = vrot.slane %v12557_v63, 9 }
 0x6f9   : > { %7808 = vrot.lane.b32.xlu1 %v12507_v9, %s9688_s9  ;;  %7354 = vrot.lane.b32.xlu0 %v12262_v30, %s9675_s24  ;;  %v5882_v30 = vcombine.high %v5498_v48, %v5498_v48  ;;  %v9316_v12 = vrot.slane %v5915_v53, 9 }
 0x6fb   : > { %v5896_v3 = vrot.slane %v5882_v30, %v11815_v38 }
 0x6fd   : > { %7453 = vrot.lane.b32.xlu1 %v12396_v7, %s9688_s9  ;;  %7760 = vrot.lane.b32.xlu0 %v12537_v11, %s9687_s29  ;;  %v12552_v7 = vrot.slane %v5499_v41, %v11815_v38  ;;  %v9311_v42 = vrot.slane %v5896_v3, 9 }
 0x6ff   : > { %v7900_v52 = vpop.permute.xlu1 %7899  ;;  %v7661_v21 = vpop.permute.xlu0 %7660  ;;  %v5914_v44 = vcombine.high %v12552_v7, %v12552_v7  ;;  %v9313_v19 = vrot.slane %v12552_v7, 9 }
 0x700   : > { %7922 = vst.msk [vmem:[#allocation5 + $0x28] sm:$0xff] %vm7567_vm10, %v7900_v52  ;;  %v6678_v52 = vmax.f32 %v5889_v29, %v9309_v45 }
 0x701   : > { %7682 = vst.msk [vmem:[#allocation5 + $0x48] sm:$0xff] %vm7321_vm5, %v7661_v21  ;;  %7856 = vrot.lane.b32.xlu1 %v12545_v35, %s9689_s14  ;;  %7618 = vrot.lane.b32.xlu0 %v12545_v35, %s9685_s6  ;;  %v9314_v17 = vrot.slane %v5914_v44, 9  ;;  %v6682_v29 = vmax.f32 %v12552_v7, %v9313_v19 }
 0x703   : > { %v9554_v23 = vpop.f32.mrf.mxu0  ;;  %v7546_v33 = vpop.permute.xlu1 %7545 }
 0x704   : > { %v5435_v24 = vadd.f32 %v12288_v55, %v9554_v23  ;;  %v7302_v60 = vpop.permute.xlu0 %7301  ;;  %7569 = vst.msk [vmem:[#allocation5 + $0x20] sm:$0xff] %vm7567_vm10, %v7546_v33 }
 0x705   : > { %7324 = vst.msk [vmem:[#allocation5 + $0x40] sm:$0xff] %vm7321_vm5, %v7302_v60  ;;  %v5429_v22 = vpop.f32.mrf.mxu0  ;;  %7502 = vrot.lane.b32.xlu1 %v12426_v13, %s9689_s14  ;;  %7258 = vrot.lane.b32.xlu0 %v12426_v13, %s9685_s6  ;;  %v5898_v13 = vcombine.high %v5896_v3, %v5896_v3  ;;  %v6679_v60 = vmax.f32 %v5897_v46, %v9310_v27 }
 0x706   : > { %v5501_v54 = vmax.f32 %v5435_v24, 0.0  ;;  %v5430_v10 = vadd.f32 %v12288_v55, %v5429_v22  ;;  %v6680_v22 = vmax.f32 %v5896_v3, %v9311_v42  ;;  %v6684_v27 = vmax.f32 %v12557_v63, %v9315_v5 }
 0x707   : > { %v7400_v16 = vpop.permute.xlu1 %7399  ;;  %v8303_v2 = vld [vmem:[#allocation5 + $0x28] sm:$0xff]  ;;  %v9312_v48 = vrot.slane %v5898_v13, 9 }
 0x708   : > { %v5933_v0 = vcombine.high %v5501_v54, %v5501_v54  ;;  %v5940_v43 = vrot.slane %v5501_v54, %v11815_v38  ;;  %v5500_v50 = vmax.f32 %v5430_v10, 0.0  ;;  %v7709_v26 = vpop.permute.xlu0 %7708  ;;  %8480 = vmatprep.mubr.f32.mxu1 %v8303_v2 }
 0x709   : > { %7730 = vst.msk [vmem:[#allocation5 + $0x48] sm:$0xff] %vm7370_vm6, %v7709_v26  ;;  %v6681_v45 = vmax.f32 %v5898_v13, %v9312_v48 }
 0x70a   : > { %v5947_v37 = vrot.slane %v5933_v0, %v11815_v38  ;;  %v5948_v32 = vcombine.high %v5940_v43, %v5940_v43  ;;  %v5916_v47 = vcombine.high %v5500_v50, %v5500_v50  ;;  %v5923_v6 = vrot.slane %v5500_v50, %v11815_v38 }
 0x70b   : > { %v9321_v36 = vrot.slane %v5940_v43, 9  ;;  %v7805_v40 = vpop.permute.xlu1 %7804  ;;  %v8302_v25 = vld [vmem:[#allocation5 + $0x20] sm:$0xff] }
 0x70c   : > { %v5949_v49 = vcombine.high %v5947_v37, %v5947_v37  ;;  %v9322_v39 = vrot.slane %v5948_v32, 9  ;;  %v7351_v28 = vpop.permute.xlu0 %7350  ;;  %v5930_v14 = vrot.slane %v5916_v47, %v11815_v38  ;;  %v5931_v61 = vcombine.high %v5923_v6, %v5923_v6  ;;  %8481 = vmatmul.mubr.f32.gmra.mxu1 %v8302_v25 }
 0x70d   : > { %v9317_v41 = vrot.slane %v5923_v6, 9  ;;  %7373 = vst.msk [vmem:[#allocation5 + $0x40] sm:$0xff] %vm7370_vm6, %v7351_v28  ;;  %v9323_v21 = vrot.slane %v5947_v37, 9  ;;  %v6690_v54 = vmax.f32 %v5940_v43, %v9321_v36 }
 0x70e   : > { %v9324_v8 = vrot.slane %v5949_v49, 9  ;;  %7422 = vst.msk [vmem:[#allocation5 + $0x40] sm:$0xff] %vm7419_vm7, %v7400_v16  ;;  %v5932_v30 = vcombine.high %v5930_v14, %v5930_v14  ;;  %v9318_v23 = vrot.slane %v5931_v61, 9  ;;  %v9319_v24 = vrot.slane %v5930_v14, 9 }
 0x70f   : > { %v6686_v33 = vmax.f32 %v5923_v6, %v9317_v41  ;;  %v6691_v10 = vmax.f32 %v5948_v32, %v9322_v39  ;;  %v7450_v50 = vpop.permute.xlu1 %7449  ;;  %v6683_v16 = vmax.f32 %v5914_v44, %v9314_v17  ;;  %v6692_v25 = vmax.f32 %v5947_v37, %v9323_v21 }
 0x710   : > { %v7757_v0 = vpop.permute.xlu0 %7756  ;;  %v9320_v26 = vrot.slane %v5932_v30, 9  ;;  %v6687_v2 = vmax.f32 %v5931_v61, %v9318_v23  ;;  %v6688_v47 = vmax.f32 %v5930_v14, %v9319_v24  ;;  %7472 = vst.msk [vmem:[#allocation5 + $0x40] sm:$0xff] %vm7469_vm8, %v7450_v50  ;;  %v6693_v3 = vmax.f32 %v5949_v49, %v9324_v8 }
 0x711   : > { %v6766_v28 = vmax.f32 %v6678_v52, %v6686_v33  ;;  %7778 = vst.msk [vmem:[#allocation5 + $0x48] sm:$0xff] %vm7419_vm7, %v7757_v0  ;;  %v6685_v6 = vmax.f32 %v5915_v53, %v9316_v12  ;;  %v6770_v42 = vmax.f32 %v6682_v29, %v6690_v54  ;;  %v6771_v36 = vmax.f32 %v6683_v16, %v6691_v10 }
 0x712   : > { %7826 = vst.msk [vmem:[#allocation5 + $0x48] sm:$0xff] %vm7469_vm8, %v7805_v40  ;;  %v6689_v46 = vmax.f32 %v5932_v30, %v9320_v26  ;;  %v6767_v43 = vmax.f32 %v6679_v60, %v6687_v2  ;;  %v6768_v32 = vmax.f32 %v6680_v22, %v6688_v47  ;;  %v6772_v19 = vmax.f32 %v6684_v27, %v6692_v25 }
 0x713   : > { %v7853_v14 = vpop.permute.xlu1 %7852  ;;  %v7043_v41 = vrot.slane %v6766_v28, %v11853_v18  ;;  %v6773_v13 = vmax.f32 %v6685_v6, %v6693_v3  ;;  %v7059_v37 = vrot.slane %v6770_v42, %v11853_v18  ;;  %v7063_v40 = vrot.slane %v6771_v36, %v11853_v18 }
 0x714   : > { %v7615_v39 = vpop.permute.xlu0 %7614  ;;  %v6769_v61 = vmax.f32 %v6681_v45, %v6689_v46  ;;  %v7047_v7 = vrot.slane %v6767_v43, %v11853_v18  ;;  %v7051_v44 = vrot.slane %v6768_v32, %v11853_v18  ;;  %7874 = vst.msk [vmem:[#allocation5 + $0x48] sm:$0xff] %vm7518_vm9, %v7853_v14  ;;  %v7067_v48 = vrot.slane %v6772_v19, %v11853_v18 }
 0x715   : > { %7635 = vst.msk [vmem:[#allocation5 + $0x68] sm:$0xff] %vm7272_vm4, %v7615_v39  ;;  %v7071_v21 = vrot.slane %v6773_v13, %v11853_v18 }
 0x716   : > { %v7055_v63 = vrot.slane %v6769_v61, %v11853_v18  ;;  %v7178_v53 = vsel %vm7136_vm14, %v7047_v7, %v7043_v41 }
 0x717   : > { %v7179_v17 = vsel %vm7138_vm15, %v7051_v44, %v7178_v53  ;;  %v7499_v5 = vpop.permute.xlu1 %7498 }
 0x718   : > { %v7255_v49 = vpop.permute.xlu0 %7254  ;;  %v7180_v12 = vsel %vm7140_vm0, %v7055_v63, %v7179_v17  ;;  %7521 = vst.msk [vmem:[#allocation5 + $0x40] sm:$0xff] %vm7518_vm9, %v7499_v5 }
 0x719   : > { %7276 = vst.msk [vmem:[#allocation5 + $0x60] sm:$0xff] %vm7272_vm4, %v7255_v49  ;;  %v7181_v52 = vsel %vm7142_vm1, %v7059_v37, %v7180_v12 }
 0x71a   : > { %v7182_v8 = vsel %vm7144_vm2, %v7063_v40, %v7181_v52 }
 0x71b   : > { %v7183_v30 = vsel %vm7146_vm3, %v7067_v48, %v7182_v8 }
 0x71c   : > { %v7184_v23 = vsel %vm7148_vm13, %v7071_v21, %v7183_v30 }
 0x71d   : > { %7213 = vst.msk [vmem:[#allocation4 + $0x72] sm:$0xff] %vm6790_vm12, %v7184_v23 }
 0x71f   : > { %v9557_v54 = vpop.f32.mrf.mxu0 }
 0x720   : > { %v5445_v2 = vadd.f32 %v12288_v55, %v9557_v54 }
 0x721   : > { %v5439_v0 = vpop.f32.mrf.mxu0 }
 0x722   : > { %v5503_v28 = vmax.f32 %v5445_v2, 0.0 }
 0x724   : > { %v12605_v24 = vld [vmem:[#allocation4 + $0x70] sm:$0xff] }
 0x725   : > { %v12607_v33 = vld [vmem:[#allocation4 + $0x73] sm:$0xff]  ;;  %7905 = vrot.lane.b32.xlu1 %v12605_v24, %s9690_s17  ;;  %7666 = vrot.lane.b32.xlu0 %v12605_v24, %s9686_s28  ;;  %7231 = vst.msk [vmem:[#allocation5 + $0xe0] sm:$0xff] %vm6790_vm12, %v12605_v24 }
 0x726   : > { %7590 = vst.msk [vmem:[#allocation5 + $0xc8] sm:$0xff] %vm6790_vm12, %v12607_v33  ;;  %v7933_v60 = vld [vmem:[#allocation4 + $0x71] sm:$0xff] }
 0x727   : > { %7941 = vst.msk [vmem:[#allocation5 + $0x90] sm:$0xff] %vm6790_vm12, %v7933_v60  ;;  %v8285_v22 = vld [vmem:[#allocation4 + $0x74] sm:$0xff] }
 0x728   : > { %8293 = vst.msk [vmem:[#allocation5 + $0x78] sm:$0xff] %vm6790_vm12, %v8285_v22  ;;  %v12623_v10 = vld [vmem:[#allocation4 + $0x71] sm:$0xff] }
 0x729   : > { %7551 = vrot.lane.b32.xlu1 %v12446_v62, %s9690_s17  ;;  %7307 = vrot.lane.b32.xlu0 %v12446_v62, %s9686_s28  ;;  %v5440_v62 = vadd.f32 %v12288_v55, %v5439_v0  ;;  %v12639_v29 = vld [vmem:[#allocation4 + $0x72] sm:$0xff] }
 0x72a   : > { %v12646_v46 = vld [vmem:[#allocation4 + $0x74] sm:$0xff] }
 0x72b   : > { %v5502_v16 = vmax.f32 %v5440_v62, 0.0 }
 0x72d   : > { %7405 = vrot.lane.b32.xlu1 %v12462_v4, %s9687_s29  ;;  %7714 = vrot.lane.b32.xlu0 %v12623_v10, %s9675_s24  ;;  %v5950_v43 = vcombine.high %v5502_v16, %v5502_v16  ;;  %v5957_v32 = vrot.slane %v5502_v16, %v11815_v38 }
 0x72f   : > { %v7902_v50 = vpop.permute.xlu1 %7901  ;;  %v7663_v26 = vpop.permute.xlu0 %7662  ;;  %v5964_v41 = vrot.slane %v5950_v43, %v11815_v38  ;;  %v5965_v13 = vcombine.high %v5957_v32, %v5957_v32  ;;  %v9325_v40 = vrot.slane %v5957_v32, 9 }
 0x730   : > { %7923 = vst.msk [vmem:[#allocation5 + $0x48] sm:$0xff] %vm7567_vm10, %v7902_v50 }
 0x731   : > { %7683 = vst.msk [vmem:[#allocation5 + $0x68] sm:$0xff] %vm7321_vm5, %v7663_v26  ;;  %7810 = vrot.lane.b32.xlu1 %v12607_v33, %s9688_s9  ;;  %7356 = vrot.lane.b32.xlu0 %v12398_v57, %s9675_s24  ;;  %v5967_v57 = vcombine.high %v5503_v28, %v5503_v28  ;;  %v9326_v30 = vrot.slane %v5965_v13, 9  ;;  %v9327_v60 = vrot.slane %v5964_v41, 9  ;;  %v6694_v16 = vmax.f32 %v5957_v32, %v9325_v40 }
 0x733   : > { %v7548_v4 = vpop.permute.xlu1 %7547  ;;  %v7304_v47 = vpop.permute.xlu0 %7303  ;;  %v12658_v14 = vrot.slane %v5967_v57, %v11815_v38 }
 0x734   : > { %7570 = vst.msk [vmem:[#allocation5 + $0x40] sm:$0xff] %vm7567_vm10, %v7548_v4 }
 0x735   : > { %7325 = vst.msk [vmem:[#allocation5 + $0x60] sm:$0xff] %vm7321_vm5, %v7304_v47  ;;  %7455 = vrot.lane.b32.xlu1 %v12505_v58, %s9688_s9  ;;  %7762 = vrot.lane.b32.xlu0 %v12639_v29, %s9687_s29  ;;  %v12653_v58 = vrot.slane %v5503_v28, %v11815_v38  ;;  %v5983_v49 = vcombine.high %v12658_v14, %v12658_v14  ;;  %v9331_v8 = vrot.slane %v12658_v14, 9 }
 0x737   : > { %v7402_v45 = vpop.permute.xlu1 %7401  ;;  %v7711_v25 = vpop.permute.xlu0 %7710  ;;  %v8307_v3 = vld [vmem:[#allocation5 + $0x48] sm:$0xff]  ;;  %v5982_v19 = vcombine.high %v12653_v58, %v12653_v58  ;;  %v9332_v2 = vrot.slane %v5983_v49, 9 }
 0x738   : > { %7731 = vst.msk [vmem:[#allocation5 + $0x68] sm:$0xff] %vm7370_vm6, %v7711_v25  ;;  %8485 = vmatprep.mubr.f32.mxu1 %v8307_v3 }
 0x739   : > { %7858 = vrot.lane.b32.xlu1 %v12646_v46, %s9689_s14  ;;  %7620 = vrot.lane.b32.xlu0 %v12646_v46, %s9685_s6  ;;  %v9330_v21 = vrot.slane %v5982_v19, 9 }
 0x73b   : > { %v9560_v27 = vpop.f32.mrf.mxu0  ;;  %v7807_v42 = vpop.permute.xlu1 %7806  ;;  %v8306_v39 = vld [vmem:[#allocation5 + $0x40] sm:$0xff] }
 0x73c   : > { %v5455_v6 = vadd.f32 %v12288_v55, %v9560_v27  ;;  %v7353_v36 = vpop.permute.xlu0 %7352  ;;  %8486 = vmatmul.mubr.f32.gmra.mxu1 %v8306_v39 }
 0x73d   : > { %7374 = vst.msk [vmem:[#allocation5 + $0x60] sm:$0xff] %vm7370_vm6, %v7353_v36  ;;  %v5449_v61 = vpop.f32.mrf.mxu0  ;;  %7504 = vrot.lane.b32.xlu1 %v12525_v51, %s9689_s14  ;;  %7260 = vrot.lane.b32.xlu0 %v12525_v51, %s9685_s6  ;;  %v5966_v51 = vcombine.high %v5964_v41, %v5964_v41 }
 0x73e   : > { %v5505_v7 = vmax.f32 %v5455_v6, 0.0  ;;  %7423 = vst.msk [vmem:[#allocation5 + $0x60] sm:$0xff] %vm7419_vm7, %v7402_v45  ;;  %v5450_v44 = vadd.f32 %v12288_v55, %v5449_v61  ;;  %v9329_v55 = vrot.slane %v12653_v58, 9  ;;  %v6695_v6 = vmax.f32 %v5965_v13, %v9326_v30 }
 0x73f   : > { %v7452_v17 = vpop.permute.xlu1 %7451  ;;  %v9328_v28 = vrot.slane %v5966_v51, 9  ;;  %v6701_v30 = vmax.f32 %v5983_v49, %v9332_v2 }
 0x740   : > { %v6001_v63 = vcombine.high %v5505_v7, %v5505_v7  ;;  %v6008_v53 = vrot.slane %v5505_v7, %v11815_v38  ;;  %v5504_v37 = vmax.f32 %v5450_v44, 0.0  ;;  %v7759_v5 = vpop.permute.xlu0 %7758  ;;  %7473 = vst.msk [vmem:[#allocation5 + $0x60] sm:$0xff] %vm7469_vm8, %v7452_v17  ;;  %v6698_v32 = vmax.f32 %v12653_v58, %v9329_v55 }
 0x741   : > { %7779 = vst.msk [vmem:[#allocation5 + $0x68] sm:$0xff] %vm7419_vm7, %v7759_v5  ;;  %v6699_v5 = vmax.f32 %v5982_v19, %v9330_v21  ;;  %v6697_v40 = vmax.f32 %v5966_v51, %v9328_v28 }
 0x742   : > { %v6015_v12 = vrot.slane %v6001_v63, %v11815_v38  ;;  %v6016_v48 = vcombine.high %v6008_v53, %v6008_v53  ;;  %v5984_v52 = vcombine.high %v5504_v37, %v5504_v37  ;;  %7827 = vst.msk [vmem:[#allocation5 + $0x68] sm:$0xff] %vm7469_vm8, %v7807_v42  ;;  %v5991_v23 = vrot.slane %v5504_v37, %v11815_v38 }
 0x743   : > { %v9337_v54 = vrot.slane %v6008_v53, 9  ;;  %v7855_v50 = vpop.permute.xlu1 %7854  ;;  %v6696_v42 = vmax.f32 %v5964_v41, %v9327_v60 }
 0x744   : > { %v6017_v22 = vcombine.high %v6015_v12, %v6015_v12  ;;  %v9338_v0 = vrot.slane %v6016_v48, 9  ;;  %v7617_v26 = vpop.permute.xlu0 %7616  ;;  %v5998_v62 = vrot.slane %v5984_v52, %v11815_v38  ;;  %v5999_v4 = vcombine.high %v5991_v23, %v5991_v23  ;;  %7875 = vst.msk [vmem:[#allocation5 + $0x68] sm:$0xff] %vm7518_vm9, %v7855_v50 }
 0x745   : > { %v9333_v47 = vrot.slane %v5991_v23, 9  ;;  %7636 = vst.msk [vmem:[#allocation5 + $0x88] sm:$0xff] %vm7272_vm4, %v7617_v26  ;;  %v9339_v45 = vrot.slane %v6015_v12, 9  ;;  %v6706_v36 = vmax.f32 %v6008_v53, %v9337_v54 }
 0x746   : > { %v9340_v25 = vrot.slane %v6017_v22, 9  ;;  %v6000_v3 = vcombine.high %v5998_v62, %v5998_v62  ;;  %v9334_v57 = vrot.slane %v5999_v4, 9  ;;  %v9335_v43 = vrot.slane %v5998_v62, 9 }
 0x747   : > { %v6702_v27 = vmax.f32 %v5991_v23, %v9333_v47  ;;  %v6707_v39 = vmax.f32 %v6016_v48, %v9338_v0  ;;  %v7501_v61 = vpop.permute.xlu1 %7500  ;;  %v6708_v52 = vmax.f32 %v6015_v12, %v9339_v45  ;;  %v6700_v48 = vmax.f32 %v12658_v14, %v9331_v8 }
 0x748   : > { %v7257_v7 = vpop.permute.xlu0 %7256  ;;  %v9336_v44 = vrot.slane %v6000_v3, 9  ;;  %v6703_v63 = vmax.f32 %v5999_v4, %v9334_v57  ;;  %v6704_v37 = vmax.f32 %v5998_v62, %v9335_v43  ;;  %7522 = vst.msk [vmem:[#allocation5 + $0x60] sm:$0xff] %vm7518_vm9, %v7501_v61  ;;  %v6709_v23 = vmax.f32 %v6017_v22, %v9340_v25  ;;  %v9647_v25 = vld [vmem:[%s13322_s2] ss:$0 sm:$0xff] }
 0x749   : > { %v6774_v17 = vmax.f32 %v6694_v16, %v6702_v27  ;;  %7277 = vst.msk [vmem:[#allocation5 + $0x80] sm:$0xff] %vm7272_vm4, %v7257_v7  ;;  %v6778_v60 = vmax.f32 %v6698_v32, %v6706_v36  ;;  %v6779_v54 = vmax.f32 %v6699_v5, %v6707_v39  ;;  %v6780_v58 = vmax.f32 %v6700_v48, %v6708_v52 }
 0x74a   : > { %v6705_v13 = vmax.f32 %v6000_v3, %v9336_v44  ;;  %v6775_v41 = vmax.f32 %v6695_v6, %v6703_v63  ;;  %v6776_v53 = vmax.f32 %v6696_v42, %v6704_v37  ;;  %v6781_v19 = vmax.f32 %v6701_v30, %v6709_v23 }
 0x74b   : > { %v7075_v50 = vrot.slane %v6774_v17, %v11853_v18  ;;  %v7091_v12 = vrot.slane %v6778_v60, %v11853_v18  ;;  %v7095_v49 = vrot.slane %v6779_v54, %v11853_v18  ;;  %v7099_v8 = vrot.slane %v6780_v58, %v11853_v18 }
 0x74c   : > { %v6777_v0 = vmax.f32 %v6697_v40, %v6705_v13  ;;  %v7079_v26 = vrot.slane %v6775_v41, %v11853_v18  ;;  %v7083_v62 = vrot.slane %v6776_v53, %v11853_v18  ;;  %v7103_v2 = vrot.slane %v6781_v19, %v11853_v18 }
 0x74e   : > { %v7087_v55 = vrot.slane %v6777_v0, %v11853_v18  ;;  %v7185_v51 = vsel %vm7136_vm14, %v7079_v26, %v7075_v50 }
 0x74f   : > { %v7186_v14 = vsel %vm7138_vm15, %v7083_v62, %v7185_v51 }
 0x750   : > { %v7187_v21 = vsel %vm7140_vm0, %v7087_v55, %v7186_v14 }
 0x751   : > { %v7188_v22 = vsel %vm7142_vm1, %v7091_v12, %v7187_v21 }
 0x752   : > { %v7189_v4 = vsel %vm7144_vm2, %v7095_v49, %v7188_v22 }
 0x753   : > { %v7190_v47 = vsel %vm7146_vm3, %v7099_v8, %v7189_v4 }
 0x754   : > { %v7191_v28 = vsel %vm7148_vm13, %v7103_v2, %v7190_v47 }
 0x755   : > { %7214 = vst.msk [vmem:[#allocation4 + $0x82] sm:$0xff] %vm6790_vm12, %v7191_v28 }
 0x757   : > { %v9563_v16 = vpop.f32.mrf.mxu0 }
 0x758   : > { %v5465_v3 = vadd.f32 %v9647_v25, %v9563_v16 }
 0x759   : > { %v5459_v45 = vpop.f32.mrf.mxu0 }
 0x75a   : > { %v5460_v57 = vadd.f32 %v9647_v25, %v5459_v45  ;;  %v5507_v36 = vmax.f32 %v5465_v3, 0.0 }
 0x75c   : > { %v12706_v43 = vld [vmem:[#allocation4 + $0x80] sm:$0xff]  ;;  %v5506_v39 = vmax.f32 %v5460_v57, 0.0  ;;  %v6035_v44 = vcombine.high %v5507_v36, %v5507_v36  ;;  %v12731_v32 = vrot.slane %v5507_v36, %v11815_v38 }
 0x75d   : > { %v12708_v27 = vld [vmem:[#allocation4 + $0x81] sm:$0xff]  ;;  %7907 = vrot.lane.b32.xlu1 %v12706_v43, %s9690_s17  ;;  %7668 = vrot.lane.b32.xlu0 %v12706_v43, %s9686_s28 }
 0x75e   : > { %v12710_v6 = vld [vmem:[#allocation4 + $0x83] sm:$0xff]  ;;  %7942 = vst.msk [vmem:[#allocation5 + $0xb0] sm:$0xff] %vm6790_vm12, %v12708_v27  ;;  %v6018_v63 = vcombine.high %v5506_v39, %v5506_v39  ;;  %v6025_v5 = vrot.slane %v5506_v39, %v11815_v38  ;;  %v6050_v54 = vcombine.high %v12731_v32, %v12731_v32  ;;  %v9345_v58 = vrot.slane %v12731_v32, 9 }
 0x75f   : > { %v12716_v42 = vld [vmem:[#allocation4 + $0x84] sm:$0xff]  ;;  %7591 = vst.msk [vmem:[#allocation5 + $0xe8] sm:$0xff] %vm6790_vm12, %v12710_v6  ;;  %v7904_v61 = vpop.permute.xlu1 %7903  ;;  %v7665_v7 = vpop.permute.xlu0 %7664 }
 0x760   : > { %8294 = vst.msk [vmem:[#allocation5 + $0x98] sm:$0xff] %vm6790_vm12, %v12716_v42  ;;  %v6032_v13 = vrot.slane %v6018_v63, %v11815_v38  ;;  %v6033_v0 = vcombine.high %v6025_v5, %v6025_v5  ;;  %v9341_v19 = vrot.slane %v6025_v5, 9  ;;  %v9346_v22 = vrot.slane %v6050_v54, 9  ;;  %v12761_v28 = vld [vmem:[#allocation4 + $0x82] sm:$0xff] }
 0x761   : > { %7924 = vst.msk [vmem:[#allocation5 + $0x68] sm:$0xff] %vm7567_vm10, %v7904_v61  ;;  %7553 = vrot.lane.b32.xlu1 %v12537_v11, %s9690_s17  ;;  %7309 = vrot.lane.b32.xlu0 %v12537_v11, %s9686_s28  ;;  %v12741_v11 = vrot.slane %v6035_v44, %v11815_v38 }
 0x762   : > { %7684 = vst.msk [vmem:[#allocation5 + $0x88] sm:$0xff] %vm7321_vm5, %v7665_v7  ;;  %v6034_v55 = vcombine.high %v6032_v13, %v6032_v13  ;;  %v9342_v4 = vrot.slane %v6033_v0, 9  ;;  %v9343_v16 = vrot.slane %v6032_v13, 9  ;;  %v6710_v44 = vmax.f32 %v6025_v5, %v9341_v19 }
 0x763   : > { %v7550_v37 = vpop.permute.xlu1 %7549  ;;  %v7306_v17 = vpop.permute.xlu0 %7305  ;;  %v12754_v62 = vcombine.high %v12741_v11, %v12741_v11  ;;  %v9347_v2 = vrot.slane %v12741_v11, 9 }
 0x764   : > { %7571 = vst.msk [vmem:[#allocation5 + $0x60] sm:$0xff] %vm7567_vm10, %v7550_v37  ;;  %v9566_v40 = vpop.f32.mrf.mxu0  ;;  %v9344_v7 = vrot.slane %v6034_v55, 9 }
 0x765   : > { %7326 = vst.msk [vmem:[#allocation5 + $0x80] sm:$0xff] %vm7321_vm5, %v7306_v17  ;;  %v5475_v52 = vadd.f32 %v9647_v25, %v9566_v40  ;;  %7407 = vrot.lane.b32.xlu1 %v12545_v35, %s9687_s29  ;;  %7716 = vrot.lane.b32.xlu0 %v12708_v27, %s9675_s24  ;;  %v9348_v57 = vrot.slane %v12754_v62, 9 }
 0x766   : > { %v5469_v23 = vpop.f32.mrf.mxu0 }
 0x767   : > { %v5509_v41 = vmax.f32 %v5475_v52, 0.0  ;;  %v5470_v53 = vadd.f32 %v9647_v25, %v5469_v23  ;;  %v7404_v48 = vpop.permute.xlu1 %7403  ;;  %v7713_v30 = vpop.permute.xlu0 %7712 }
 0x768   : > { %v8311_v60 = vld [vmem:[#allocation5 + $0x68] sm:$0xff]  ;;  %7732 = vst.msk [vmem:[#allocation5 + $0x88] sm:$0xff] %vm7370_vm6, %v7713_v30  ;;  %v6712_v30 = vmax.f32 %v6032_v13, %v9343_v16 }
 0x769   : > { %8490 = vmatprep.mubr.f32.mxu1 %v8311_v60  ;;  %v6069_v35 = vcombine.high %v5509_v41, %v5509_v41  ;;  %v6076_v50 = vrot.slane %v5509_v41, %v11815_v38  ;;  %v5508_v26 = vmax.f32 %v5470_v53, 0.0  ;;  %7812 = vrot.lane.b32.xlu1 %v12710_v6, %s9688_s9 }
 0x76a   : > { %7358 = vrot.lane.b32.xlu0 %v12507_v9, %s9675_s24 }
 0x76b   : > { %v6083_v51 = vrot.slane %v6069_v35, %v11815_v38  ;;  %v6084_v12 = vcombine.high %v6076_v50, %v6076_v50  ;;  %v6052_v14 = vcombine.high %v5508_v26, %v5508_v26  ;;  %v7809_v49 = vpop.permute.xlu1 %7808  ;;  %v7355_v21 = vpop.permute.xlu0 %7354  ;;  %v8310_v8 = vld [vmem:[#allocation5 + $0x60] sm:$0xff]  ;;  %v6059_v47 = vrot.slane %v5508_v26, %v11815_v38 }
 0x76c   : > { %7375 = vst.msk [vmem:[#allocation5 + $0x80] sm:$0xff] %vm7370_vm6, %v7355_v21  ;;  %8491 = vmatmul.mubr.f32.gmra.mxu1 %v8310_v8  ;;  %v9353_v25 = vrot.slane %v6076_v50, 9  ;;  %v6714_v21 = vmax.f32 %v12731_v32, %v9345_v58  ;;  %v6715_v8 = vmax.f32 %v6050_v54, %v9346_v22  ;;  %v6716_v32 = vmax.f32 %v12741_v11, %v9347_v2 }
 0x76d   : > { %v6085_v45 = vcombine.high %v6083_v51, %v6083_v51  ;;  %v9354_v3 = vrot.slane %v6084_v12, 9  ;;  %7424 = vst.msk [vmem:[#allocation5 + $0x80] sm:$0xff] %vm7419_vm7, %v7404_v48  ;;  %7457 = vrot.lane.b32.xlu1 %v12605_v24, %s9688_s9  ;;  %v6066_v36 = vrot.slane %v6052_v14, %v11815_v38  ;;  %v6067_v39 = vcombine.high %v6059_v47, %v6059_v47 }
 0x76e   : > { %7764 = vrot.lane.b32.xlu0 %v12761_v28, %s9687_s29  ;;  %v9349_v61 = vrot.slane %v6059_v47, 9  ;;  %v9355_v63 = vrot.slane %v6083_v51, 9  ;;  %v6711_v48 = vmax.f32 %v6033_v0, %v9342_v4  ;;  %v6722_v60 = vmax.f32 %v6076_v50, %v9353_v25 }
 0x76f   : > { %v9356_v37 = vrot.slane %v6085_v45, 9  ;;  %v7454_v17 = vpop.permute.xlu1 %7453  ;;  %v7761_v40 = vpop.permute.xlu0 %7760  ;;  %v6068_v52 = vcombine.high %v6066_v36, %v6066_v36  ;;  %v9350_v23 = vrot.slane %v6067_v39, 9  ;;  %v9351_v41 = vrot.slane %v6066_v36, 9 }
 0x770   : > { %v6718_v53 = vmax.f32 %v6059_v47, %v9349_v61  ;;  %7474 = vst.msk [vmem:[#allocation5 + $0x80] sm:$0xff] %vm7469_vm8, %v7454_v17  ;;  %v6723_v35 = vmax.f32 %v6084_v12, %v9354_v3  ;;  %v6713_v47 = vmax.f32 %v6034_v55, %v9344_v7  ;;  %v6724_v0 = vmax.f32 %v6083_v51, %v9355_v63  ;;  %v12778_v12 = vld [vmem:[#allocation4 + $0xa1] sm:$0xff] }
 0x771   : > { %7780 = vst.msk [vmem:[#allocation5 + $0x88] sm:$0xff] %vm7419_vm7, %v7761_v40  ;;  %7860 = vrot.lane.b32.xlu1 %v12716_v42, %s9689_s14  ;;  %v9352_v5 = vrot.slane %v6068_v52, 9  ;;  %v6719_v26 = vmax.f32 %v6067_v39, %v9350_v23  ;;  %v6720_v19 = vmax.f32 %v6066_v36, %v9351_v41  ;;  %v6717_v54 = vmax.f32 %v12754_v62, %v9348_v57 }
 0x772   : > { %7828 = vst.msk [vmem:[#allocation5 + $0x88] sm:$0xff] %vm7469_vm8, %v7809_v49  ;;  %v6782_v14 = vmax.f32 %v6710_v44, %v6718_v53  ;;  %7622 = vrot.lane.b32.xlu0 %v12716_v42, %s9685_s6  ;;  %v6725_v49 = vmax.f32 %v6085_v45, %v9356_v37  ;;  %v6786_v58 = vmax.f32 %v6714_v21, %v6722_v60  ;;  %v12808_v53 = vld [vmem:[#allocation4 + $0xa4] sm:$0xff]  ;;  %v8372_v21 = vld [vmem:[%s13323_s3 + $0x150] sm:$0xff] }
 0x773   : > { %v7857_v13 = vpop.permute.xlu1 %7856  ;;  %v7619_v50 = vpop.permute.xlu0 %7618  ;;  %v6721_v4 = vmax.f32 %v6068_v52, %v9352_v5  ;;  %v6783_v16 = vmax.f32 %v6711_v48, %v6719_v26  ;;  %v6784_v25 = vmax.f32 %v6712_v30, %v6720_v19  ;;  %7944 = vst.msk [vmem:[#allocation5 + $0xf0] sm:$0xff] %vm6790_vm12, %v12778_v12  ;;  %v6787_v55 = vmax.f32 %v6715_v8, %v6723_v35  ;;  %v8377_v35 = vld [vmem:[%s13323_s3 + $0x178] sm:$0xff]  ;;  %v8376_v5 = vld [vmem:[%s13323_s3 + $0x170] sm:$0xff]  ;;  %v8375_v26 = vld [vmem:[%s13323_s3 + $0x168] sm:$0xff] }
 0x774   : > { %7876 = vst.msk [vmem:[#allocation5 + $0x88] sm:$0xff] %vm7518_vm9, %v7857_v13  ;;  %v7107_v22 = vrot.slane %v6782_v14, %v11853_v18  ;;  %v6788_v36 = vmax.f32 %v6716_v32, %v6724_v0  ;;  %v6789_v2 = vmax.f32 %v6717_v54, %v6725_v49  ;;  %v7123_v61 = vrot.slane %v6786_v58, %v11853_v18  ;;  %v8374_v19 = vld [vmem:[%s13323_s3 + $0x160] sm:$0xff]  ;;  %v8373_v14 = vld [vmem:[%s13323_s3 + $0x158] sm:$0xff]  ;;  %v8371_v0 = vld [vmem:[%s13323_s3 + $0x148] sm:$0xff] }
 0x775   : > { %7637 = vst.msk [vmem:[#allocation5 + $0xa8] sm:$0xff] %vm7272_vm4, %v7619_v50  ;;  %7506 = vrot.lane.b32.xlu1 %v12623_v10, %s9689_s14  ;;  %v6785_v51 = vmax.f32 %v6713_v47, %v6721_v4  ;;  %v7111_v45 = vrot.slane %v6783_v16, %v11853_v18  ;;  %v7115_v3 = vrot.slane %v6784_v25, %v11853_v18  ;;  %v12866_v8 = vld [vmem:[#allocation4 + $0x52] sm:$0xff]  ;;  %v12879_v49 = vld [vmem:[#allocation4 + $0xa0] sm:$0xff] }
 0x776   : > { %7262 = vrot.lane.b32.xlu0 %v12623_v10, %s9685_s6  ;;  %v7127_v44 = vrot.slane %v6787_v55, %v11853_v18  ;;  %v7131_v37 = vrot.slane %v6788_v36, %v11853_v18  ;;  %v7135_v40 = vrot.slane %v6789_v2, %v11853_v18  ;;  %8296 = vst.msk [vmem:[#allocation5 + $0xd8] sm:$0xff] %vm6790_vm12, %v12808_v53  ;;  %v8370_v16 = vld [vmem:[%s13323_s3 + $0x140] sm:$0xff]  ;;  %v8369_v58 = vld [vmem:[%s13323_s3 + $0x138] sm:$0xff] }
 0x777   : > { %v7503_v39 = vpop.permute.xlu1 %7502  ;;  %v7259_v11 = vpop.permute.xlu0 %7258  ;;  %v7119_v62 = vrot.slane %v6785_v51, %v11853_v18  ;;  %v7192_v57 = vsel %vm7136_vm14, %v7111_v45, %v7107_v22  ;;  %9585 = vmatpush1.msra.mxu1 %v8377_v35  ;;  %8517 = vmatpush1.msra.mxu0 %v8377_v35  ;;  %v8368_v22 = vld [vmem:[%s13323_s3 + $0x130] sm:$0xff]  ;;  %v8362_v35 = vld [vmem:[%s13323_s3 + $0x100] sm:$0xff] }
 0x778   : > { %7523 = vst.msk [vmem:[#allocation5 + $0x80] sm:$0xff] %vm7518_vm9, %v7503_v39  ;;  %v7193_v7 = vsel %vm7138_vm15, %v7115_v3, %v7192_v57  ;;  %9568 = vmatprep.subr.mxu1 %v9659_v1  ;;  %8518 = vmatprep.subr.mxu0 %v9659_v1  ;;  %v8367_v39 = vld [vmem:[%s13323_s3 + $0x128] sm:$0xff]  ;;  %v8366_v57 = vld [vmem:[%s13323_s3 + $0x120] sm:$0xff] }
 0x779   : > { %7278 = vst.msk [vmem:[#allocation5 + $0xa0] sm:$0xff] %vm7272_vm4, %v7259_v11  ;;  %v7194_v63 = vsel %vm7140_vm0, %v7119_v62, %v7193_v7  ;;  %9586 = vmatpush1.msra.mxu1 %v8376_v5  ;;  %8519 = vmatpush1.msra.mxu0 %v8376_v5  ;;  %v7996_v5 = vld [vmem:[#allocation4 + $0x63] sm:$0xff] }
 0x77a   : > { %v7195_v17 = vsel %vm7142_vm1, %v7123_v61, %v7194_v63  ;;  %9569 = vmatprep.subr.mxu1 %v9659_v1  ;;  %8520 = vmatprep.subr.mxu0 %v9659_v1  ;;  %v9648_v61 = vld [vmem:[#allocation4 + $0x61] sm:$0xff]  ;;  %v8365_v63 = vld [vmem:[%s13323_s3 + $0x118] sm:$0xff] }
 0x77b   : > { %v7196_v52 = vsel %vm7144_vm2, %v7127_v44, %v7195_v17  ;;  %9587 = vmatpush1.msra.mxu1 %v8375_v26  ;;  %8521 = vmatpush1.msra.mxu0 %v8375_v26  ;;  %v9649_v17 = vld [vmem:[#allocation4 + $0x62] sm:$0xff] }
 0x77c   : > { %v7197_v23 = vsel %vm7146_vm3, %v7131_v37, %v7196_v52  ;;  %9570 = vmatprep.subr.mxu1 %v9659_v1  ;;  %8522 = vmatprep.subr.mxu0 %v9659_v1  ;;  %v8364_v37 = vld [vmem:[%s13323_s3 + $0x110] sm:$0xff]  ;;  %v8378_v26 = vld [vmem:[%s13323_s3 + $0x180] sm:$0xff] }
 0x77d   : > { %v7198_v41 = vsel %vm7148_vm13, %v7135_v40, %v7197_v23  ;;  %9588 = vmatpush1.msra.mxu1 %v8374_v19  ;;  %8523 = vmatpush1.msra.mxu0 %v8374_v19  ;;  %v8363_v23 = vld [vmem:[%s13323_s3 + $0x108] sm:$0xff] }
 0x77e   : > { %7215 = vst.msk [vmem:[#allocation4 + $0x92] sm:$0xff] %vm6790_vm12, %v7198_v41  ;;  %9571 = vmatprep.subr.mxu1 %v9659_v1  ;;  %8524 = vmatprep.subr.mxu0 %v9659_v1  ;;  %v9650_v19 = vld [vmem:[#allocation4 + $0x64] sm:$0xff] }
 0x77f   : > { %9589 = vmatpush1.msra.mxu1 %v8373_v14  ;;  %8525 = vmatpush1.msra.mxu0 %v8373_v14 }
 0x780   : > { %9572 = vmatprep.subr.mxu1 %v9659_v1  ;;  %8526 = vmatprep.subr.mxu0 %v9659_v1 }
 0x781   : > { %9590 = vmatpush1.msra.mxu1 %v8372_v21  ;;  %8527 = vmatpush1.msra.mxu0 %v8372_v21 }
 0x782   : > { %9573 = vmatprep.subr.mxu1 %v9659_v1  ;;  %8528 = vmatprep.subr.mxu0 %v9659_v1 }
 0x783   : > { %9591 = vmatpush1.msra.mxu1 %v8371_v0  ;;  %8529 = vmatpush1.msra.mxu0 %v8371_v0 }
 0x784   : > { %9574 = vmatprep.subr.mxu1 %v9659_v1  ;;  %8530 = vmatprep.subr.mxu0 %v9659_v1 }
 0x785   : > { %v12812_v48 = vld [vmem:[#allocation4 + $0x90] sm:$0xff]  ;;  %9592 = vmatpush1.msra.mxu1 %v8370_v16  ;;  %8531 = vmatpush1.msra.mxu0 %v8370_v16  ;;  %v7994_v16 = vld [vmem:[#allocation4 + $0x43] sm:$0xff] }
 0x786   : > { %v12814_v30 = vld [vmem:[#allocation4 + $0x91] sm:$0xff]  ;;  %7909 = vrot.lane.b32.xlu1 %v12812_v48, %s9690_s17  ;;  %7670 = vrot.lane.b32.xlu0 %v12812_v48, %s9686_s28 }
 0x787   : > { %v12820_v60 = vld [vmem:[#allocation4 + $0x94] sm:$0xff]  ;;  %7943 = vst.msk [vmem:[#allocation5 + $0xd0] sm:$0xff] %vm6790_vm12, %v12814_v30  ;;  %9575 = vmatprep.subr.mxu1 %v9659_v1  ;;  %8532 = vmatprep.subr.mxu0 %v9659_v1 }
 0x788   : > { %8295 = vst.msk [vmem:[#allocation5 + $0xb8] sm:$0xff] %vm6790_vm12, %v12820_v60  ;;  %v12868_v47 = vld [vmem:[#allocation4 + $0x92] sm:$0xff]  ;;  %9593 = vmatpush1.msra.mxu1 %v8369_v58  ;;  %8533 = vmatpush1.msra.mxu0 %v8369_v58 }
 0x789   : > { %v12886_v25 = vld [vmem:[#allocation4 + $0x93] sm:$0xff]  ;;  %9576 = vmatprep.subr.mxu1 %v9659_v1  ;;  %8534 = vmatprep.subr.mxu0 %v9659_v1 }
 0x78a   : > { %7555 = vrot.lane.b32.xlu1 %v12639_v29, %s9690_s17  ;;  %7311 = vrot.lane.b32.xlu0 %v12639_v29, %s9686_s28 }
 0x78b   : > { %9594 = vmatpush1.msra.mxu1 %v8368_v22  ;;  %8535 = vmatpush1.msra.mxu0 %v8368_v22  ;;  %v7952_v22 = vld [vmem:[#allocation4 + $0xa2] sm:$0xff] }
 0x78c   : > { %9577 = vmatprep.subr.mxu1 %v9659_v1  ;;  %8536 = vmatprep.subr.mxu0 %v9659_v1 }
 0x78d   : > { %9595 = vmatpush1.msra.mxu1 %v8367_v39  ;;  %8537 = vmatpush1.msra.mxu0 %v8367_v39  ;;  %v8145_v39 = vld [vmem:[#allocation4 + $0xb1] sm:$0xff] }
 0x78e   : > { %7409 = vrot.lane.b32.xlu1 %v12646_v46, %s9687_s29  ;;  %7718 = vrot.lane.b32.xlu0 %v12814_v30, %s9675_s24 }
 0x78f   : > { %9578 = vmatprep.subr.mxu1 %v9659_v1  ;;  %8538 = vmatprep.subr.mxu0 %v9659_v1 }
 0x790   : > { %9596 = vmatpush1.msra.mxu1 %v8366_v57  ;;  %8539 = vmatpush1.msra.mxu0 %v8366_v57 }
 0x791   : > { %9579 = vmatprep.subr.mxu1 %v9659_v1  ;;  %8540 = vmatprep.subr.mxu0 %v9659_v1 }
 0x792   : > { %7459 = vrot.lane.b32.xlu1 %v12706_v43, %s9688_s9  ;;  %7360 = vrot.lane.b32.xlu0 %v12607_v33, %s9675_s24 }
 0x793   : > { %9597 = vmatpush1.msra.mxu1 %v8365_v63  ;;  %8541 = vmatpush1.msra.mxu0 %v8365_v63 }
 0x794   : > { %9580 = vmatprep.subr.mxu1 %v9659_v1  ;;  %8542 = vmatprep.subr.mxu0 %v9659_v1 }
 0x795   : > { %9598 = vmatpush1.msra.mxu1 %v8364_v37  ;;  %8543 = vmatpush1.msra.mxu0 %v8364_v37  ;;  %v8193_v37 = vld [vmem:[#allocation4 + $0xb2] sm:$0xff] }
 0x796   : > { %7965 = vrot.lane.b32.xlu1 %v12866_v8, %s9685_s6  ;;  %7766 = vrot.lane.b32.xlu0 %v12868_v47, %s9687_s29 }
 0x797   : > { %v7906_v13 = vpop.permute.xlu1 %7905  ;;  %v7667_v50 = vpop.permute.xlu0 %7666  ;;  %9581 = vmatprep.subr.mxu1 %v9659_v1  ;;  %8544 = vmatprep.subr.mxu0 %v9659_v1 }
 0x798   : > { %7925 = vst.msk [vmem:[#allocation5 + $0x88] sm:$0xff] %vm7567_vm10, %v7906_v13  ;;  %9599 = vmatpush1.msra.mxu1 %v8363_v23  ;;  %8545 = vmatpush1.msra.mxu0 %v8363_v23 }
 0x799   : > { %7685 = vst.msk [vmem:[#allocation5 + $0xa8] sm:$0xff] %vm7321_vm5, %v7667_v50  ;;  %v9475_v4 = vpop.f32.mrf.mxu1  ;;  %9582 = vmatprep.subr.mxu1 %v9659_v1  ;;  %8546 = vmatprep.subr.mxu0 %v9659_v1 }
 0x79a   : > { %7911 = vrot.lane.b32.xlu1 %v12879_v49, %s9690_s17  ;;  %7814 = vrot.lane.b32.xlu0 %v12886_v25, %s9688_s9 }
 0x79b   : > { %v7552_v32 = vpop.permute.xlu1 %7551  ;;  %v7308_v54 = vpop.permute.xlu0 %7307  ;;  %9600 = vmatpush1.msra.mxu1 %v8362_v35  ;;  %8547 = vmatpush1.msra.mxu0 %v8362_v35 }
 0x79c   : > { %7572 = vst.msk [vmem:[#allocation5 + $0x80] sm:$0xff] %vm7567_vm10, %v7552_v32  ;;  %v9476_v55 = vpop.f32.mrf.mxu1  ;;  %9583 = vmatprep.subr.mxu1 %v9659_v1  ;;  %8576 = vmatprep.subr.mxu0 %v9659_v1 }
 0x79d   : > { %7327 = vst.msk [vmem:[#allocation5 + $0xa0] sm:$0xff] %vm7321_vm5, %v7308_v54  ;;  %v12899_v51 = vadd.f32 %v9476_v55, %v9475_v4 }
 0x79e   : > { %7557 = vrot.lane.b32.xlu1 %v12761_v28, %s9690_s17  ;;  %7862 = vrot.lane.b32.xlu0 %v12820_v60, %s9689_s14 }
 0x79f   : > { %v7406_v45 = vpop.permute.xlu1 %7405  ;;  %v7715_v3 = vpop.permute.xlu0 %7714  ;;  %v8315_v36 = vld [vmem:[#allocation5 + $0x88] sm:$0xff] }
 0x7a0   : > { %7733 = vst.msk [vmem:[#allocation5 + $0xa8] sm:$0xff] %vm7370_vm6, %v7715_v3  ;;  %8495 = vmatprep.mubr.f32.mxu1 %v8315_v36 }
 0x7a2   : > { %8110 = vrot.lane.b32.xlu1 %v12515_v31, %s9687_s29  ;;  %7508 = vrot.lane.b32.xlu0 %v12708_v27, %s9689_s14  ;;  %v12927_v31 = vld [vmem:[#allocation4 + $0x53] sm:$0xff] }
 0x7a3   : > { %v7811_v11 = vpop.permute.xlu1 %7810  ;;  %v7357_v2 = vpop.permute.xlu0 %7356  ;;  %v8314_v62 = vld [vmem:[#allocation5 + $0x80] sm:$0xff] }
 0x7a4   : > { %7376 = vst.msk [vmem:[#allocation5 + $0xa0] sm:$0xff] %vm7370_vm6, %v7357_v2  ;;  %8496 = vmatmul.mubr.f32.gmra.mxu1 %v8314_v62 }
 0x7a5   : > { %7425 = vst.msk [vmem:[#allocation5 + $0xa0] sm:$0xff] %vm7419_vm7, %v7406_v45 }
 0x7a6   : > { %8158 = vrot.lane.b32.xlu1 %v9648_v61, %s9688_s9  ;;  %8013 = vrot.lane.b32.xlu0 %v12927_v31, %s9686_s28 }
 0x7a7   : > { %v7456_v7 = vpop.permute.xlu1 %7455  ;;  %v7763_v44 = vpop.permute.xlu0 %7762 }
 0x7a8   : > { %7475 = vst.msk [vmem:[#allocation5 + $0xa0] sm:$0xff] %vm7469_vm8, %v7456_v7  ;;  %v8097_v7 = vld [vmem:[#allocation4 + $0xb0] sm:$0xff] }
 0x7a9   : > { %7781 = vst.msk [vmem:[#allocation5 + $0xa8] sm:$0xff] %vm7419_vm7, %v7763_v44 }
 0x7aa   : > { %7829 = vst.msk [vmem:[#allocation5 + $0xa8] sm:$0xff] %vm7469_vm8, %v7811_v11  ;;  %8206 = vrot.lane.b32.xlu1 %v9649_v17, %s9689_s14  ;;  %8061 = vrot.lane.b32.xlu0 %v12411_v59, %s9675_s24 }
 0x7ab   : > { %v7859_v40 = vpop.permute.xlu1 %7858  ;;  %v7621_v52 = vpop.permute.xlu0 %7620 }
 0x7ac   : > { %7877 = vst.msk [vmem:[#allocation5 + $0xa8] sm:$0xff] %vm7518_vm9, %v7859_v40 }
 0x7ad   : > { %7638 = vst.msk [vmem:[#allocation5 + $0xc8] sm:$0xff] %vm7272_vm4, %v7621_v52 }
 0x7ae   : > { %8254 = vrot.lane.b32.xlu1 %v12507_v9, %s9690_s17  ;;  %7967 = vrot.lane.b32.xlu0 %v9649_v17, %s9685_s6  ;;  %v8379_v9 = vld [vmem:[%s13323_s3 + $0x188] sm:$0xff] }
 0x7af   : > { %v7505_v59 = vpop.permute.xlu1 %7504  ;;  %v7261_v41 = vpop.permute.xlu0 %7260  ;;  %9601 = vmatpush2.msra.mxu1 %v8379_v9  ;;  %8577 = vmatpush2.msra.mxu0 %v8379_v9 }
 0x7b0   : > { %7524 = vst.msk [vmem:[#allocation5 + $0xa0] sm:$0xff] %vm7518_vm9, %v7505_v59  ;;  %9584 = vmatprep.subr.mxu1 %v9659_v1  ;;  %8578 = vmatprep.subr.mxu0 %v9659_v1  ;;  %v7993_v1 = vld [vmem:[#allocation4 + $0x33] sm:$0xff] }
 0x7b1   : > { %7279 = vst.msk [vmem:[#allocation5 + $0xc0] sm:$0xff] %vm7272_vm4, %v7261_v41  ;;  %9602 = vmatpush2.msra.mxu1 %v8378_v26  ;;  %8579 = vmatpush2.msra.mxu0 %v8378_v26  ;;  %v8309_v26 = vld [vmem:[#allocation5 + $0x58] sm:$0xff] }
 0x7b2   : > { %7969 = vrot.lane.b32.xlu1 %v12639_v29, %s9685_s6  ;;  %8015 = vrot.lane.b32.xlu0 %v7996_v5, %s9686_s28 }
 0x7b6   : > { %8017 = vrot.lane.b32.xlu1 %v12607_v33, %s9686_s28  ;;  %8063 = vrot.lane.b32.xlu0 %v9650_v19, %s9675_s24 }
 0x7ba   : > { %8065 = vrot.lane.b32.xlu1 %v12646_v46, %s9675_s24  ;;  %8112 = vrot.lane.b32.xlu0 %v12605_v24, %s9687_s29  ;;  %v7945_v46 = vld [vmem:[#allocation4 + $0x32] sm:$0xff] }
 0x7be   : > { %8114 = vrot.lane.b32.xlu1 %v12706_v43, %s9687_s29  ;;  %8160 = vrot.lane.b32.xlu0 %v12623_v10, %s9688_s9 }
 0x7c2   : > { %7971 = vrot.lane.b32.xlu1 %v12761_v28, %s9685_s6  ;;  %8208 = vrot.lane.b32.xlu0 %v12639_v29, %s9689_s14 }
 0x7c6   : > { %8009 = vrot.lane.b32.xlu1 %v7993_v1, %s9686_s28  ;;  %8256 = vrot.lane.b32.xlu0 %v12607_v33, %s9690_s17 }
 0x7ca   : > { %8210 = vrot.lane.b32.xlu1 %v12761_v28, %s9689_s14  ;;  %7961 = vrot.lane.b32.xlu0 %v7945_v46, %s9685_s6 }
 0x7cc   : > { %v9478_v24 = vpop.f32.mrf.mxu1 }
 0x7ce   : > { %v9479_v10 = vpop.f32.mrf.mxu1  ;;  %8067 = vrot.lane.b32.xlu1 %v12716_v42, %s9675_s24  ;;  %8162 = vrot.lane.b32.xlu0 %v12708_v27, %s9688_s9  ;;  %v7946_v42 = vld [vmem:[#allocation4 + $0x42] sm:$0xff]  ;;  %v8041_v27 = vld [vmem:[#allocation4 + $0x34] sm:$0xff] }
 0x7cf   : > { %v13001_v43 = vadd.f32 %v9479_v10, %v9478_v24  ;;  %v7908_v29 = vpop.permute.xlu1 %7907  ;;  %v7669_v14 = vpop.permute.xlu0 %7668 }
 0x7d0   : > { %7926 = vst.msk [vmem:[#allocation5 + $0xa8] sm:$0xff] %vm7567_vm10, %v7908_v29 }
 0x7d1   : > { %7686 = vst.msk [vmem:[#allocation5 + $0xc8] sm:$0xff] %vm7321_vm5, %v7669_v14 }
 0x7d2   : > { %8106 = vrot.lane.b32.xlu1 %v12276_v15, %s9687_s29  ;;  %8019 = vrot.lane.b32.xlu0 %v12710_v6, %s9686_s28 }
 0x7d3   : > { %v7554_v33 = vpop.permute.xlu1 %7553  ;;  %v7310_v28 = vpop.permute.xlu0 %7309 }
 0x7d4   : > { %7573 = vst.msk [vmem:[#allocation5 + $0xa0] sm:$0xff] %vm7567_vm10, %v7554_v33  ;;  %v8313_v33 = vld [vmem:[#allocation5 + $0x78] sm:$0xff] }
 0x7d5   : > { %7328 = vst.msk [vmem:[#allocation5 + $0xc0] sm:$0xff] %vm7321_vm5, %v7310_v28 }
 0x7d6   : > { %7963 = vrot.lane.b32.xlu1 %v7946_v42, %s9685_s6  ;;  %8057 = vrot.lane.b32.xlu0 %v8041_v27, %s9675_s24 }
 0x7d7   : > { %v7408_v21 = vpop.permute.xlu1 %7407  ;;  %v7717_v0 = vpop.permute.xlu0 %7716  ;;  %v8319_v13 = vld [vmem:[#allocation5 + $0xa8] sm:$0xff] }
 0x7d8   : > { %7734 = vst.msk [vmem:[#allocation5 + $0xc8] sm:$0xff] %vm7370_vm6, %v7717_v0  ;;  %8500 = vmatprep.mubr.f32.mxu1 %v8319_v13 }
 0x7da   : > { %8154 = vrot.lane.b32.xlu1 %v12278_v34, %s9688_s9  ;;  %8258 = vrot.lane.b32.xlu0 %v12710_v6, %s9690_s17 }
 0x7db   : > { %v7813_v15 = vpop.permute.xlu1 %7812  ;;  %v8318_v4 = vld [vmem:[#allocation5 + $0xa0] sm:$0xff] }
 0x7dc   : > { %v7359_v50 = vpop.permute.xlu0 %7358  ;;  %8501 = vmatmul.mubr.f32.gmra.mxu1 %v8318_v4 }
 0x7dd   : > { %7377 = vst.msk [vmem:[#allocation5 + $0xc0] sm:$0xff] %vm7370_vm6, %v7359_v50 }
 0x7de   : > { %7426 = vst.msk [vmem:[#allocation5 + $0xc0] sm:$0xff] %vm7419_vm7, %v7408_v21  ;;  %8011 = vrot.lane.b32.xlu1 %v7994_v16, %s9686_s28  ;;  %8116 = vrot.lane.b32.xlu0 %v12812_v48, %s9687_s29  ;;  %v8042_v48 = vld [vmem:[#allocation4 + $0x44] sm:$0xff] }
 0x7df   : > { %v7458_v32 = vpop.permute.xlu1 %7457 }
 0x7e0   : > { %v7765_v54 = vpop.permute.xlu0 %7764  ;;  %7476 = vst.msk [vmem:[#allocation5 + $0xc0] sm:$0xff] %vm7469_vm8, %v7458_v32 }
 0x7e1   : > { %7782 = vst.msk [vmem:[#allocation5 + $0xc8] sm:$0xff] %vm7419_vm7, %v7765_v54 }
 0x7e2   : > { %7830 = vst.msk [vmem:[#allocation5 + $0xc8] sm:$0xff] %vm7469_vm8, %v7813_v15  ;;  %8202 = vrot.lane.b32.xlu1 %v7946_v42, %s9689_s14  ;;  %7973 = vrot.lane.b32.xlu0 %v12868_v47, %s9685_s6 }
 0x7e3   : > { %v7861_v34 = vpop.permute.xlu1 %7860 }
 0x7e4   : > { %7878 = vst.msk [vmem:[#allocation5 + $0xc8] sm:$0xff] %vm7518_vm9, %v7861_v34  ;;  %v7623_v6 = vpop.permute.xlu0 %7622 }
 0x7e5   : > { %7639 = vst.msk [vmem:[#allocation5 + $0xe8] sm:$0xff] %vm7272_vm4, %v7623_v6 }
 0x7e6   : > { %8059 = vrot.lane.b32.xlu1 %v8042_v48, %s9675_s24  ;;  %8164 = vrot.lane.b32.xlu0 %v12814_v30, %s9688_s9 }
 0x7e7   : > { %v7507_v58 = vpop.permute.xlu1 %7506 }
 0x7e8   : > { %7525 = vst.msk [vmem:[#allocation5 + $0xc0] sm:$0xff] %vm7518_vm9, %v7507_v58  ;;  %v7263_v55 = vpop.permute.xlu0 %7262 }
 0x7e9   : > { %7280 = vst.msk [vmem:[#allocation5 + $0xe0] sm:$0xff] %vm7272_vm4, %v7263_v55  ;;  %v8317_v55 = vld [vmem:[#allocation5 + $0x98] sm:$0xff] }
 0x7ea   : > { %8250 = vrot.lane.b32.xlu1 %v7994_v16, %s9690_s17  ;;  %8021 = vrot.lane.b32.xlu0 %v12886_v25, %s9686_s28 }
 0x7ee   : > { %8108 = vrot.lane.b32.xlu1 %v12406_v20, %s9687_s29  ;;  %8212 = vrot.lane.b32.xlu0 %v12868_v47, %s9689_s14 }
 0x7f2   : > { %7975 = vrot.lane.b32.xlu1 %v7952_v22, %s9685_s6  ;;  %8069 = vrot.lane.b32.xlu0 %v12820_v60, %s9675_s24 }
 0x7f6   : > { %8166 = vrot.lane.b32.xlu1 %v12778_v12, %s9688_s9  ;;  %8260 = vrot.lane.b32.xlu0 %v12886_v25, %s9690_s17 }
 0x7f8   : > { %v7910_v30 = vpop.permute.xlu1 %7909  ;;  %v7671_v45 = vpop.permute.xlu0 %7670 }
 0x7f9   : > { %7927 = vst.msk [vmem:[#allocation5 + $0xc8] sm:$0xff] %vm7567_vm10, %v7910_v30 }
 0x7fa   : > { %7687 = vst.msk [vmem:[#allocation5 + $0xe8] sm:$0xff] %vm7321_vm5, %v7671_v45  ;;  %8204 = vrot.lane.b32.xlu1 %v12866_v8, %s9689_s14  ;;  %8118 = vrot.lane.b32.xlu0 %v12879_v49, %s9687_s29  ;;  %v8000_v8 = vld [vmem:[#allocation4 + $0xa3] sm:$0xff] }
 0x7fc   : > { %v9481_v20 = vpop.f32.mrf.mxu1  ;;  %v7556_v60 = vpop.permute.xlu1 %7555 }
 0x7fd   : > { %v7312_v47 = vpop.permute.xlu0 %7311  ;;  %7574 = vst.msk [vmem:[#allocation5 + $0xc0] sm:$0xff] %vm7567_vm10, %v7556_v60 }
 0x7fe   : > { %7329 = vst.msk [vmem:[#allocation5 + $0xe0] sm:$0xff] %vm7321_vm5, %v7312_v47  ;;  %v9482_v12 = vpop.f32.mrf.mxu1  ;;  %8156 = vrot.lane.b32.xlu0 %v12413_v56, %s9688_s9  ;;  %8071 = vrot.lane.b32.xlu1 %v12808_v53, %s9675_s24  ;;  %v8289_v56 = vld [vmem:[#allocation4 + $0xb4] sm:$0xff] }
 0x7ff   : > { %v13062_v25 = vadd.f32 %v9482_v12, %v9481_v20  ;;  %v8241_v53 = vld [vmem:[#allocation4 + $0xb3] sm:$0xff]  ;;  %8297 = vst.msk [vmem:[#allocation5 + $0xf8] sm:$0xff] %vm6790_vm12, %v8289_v56 }
 0x800   : > { %v7410_v3 = vpop.permute.xlu1 %7409  ;;  %v8323_v49 = vld [vmem:[#allocation5 + $0xc8] sm:$0xff] }
 0x801   : > { %v7719_v36 = vpop.permute.xlu0 %7718  ;;  %8505 = vmatprep.mubr.f32.mxu1 %v8323_v49 }
 0x802   : > { %7735 = vst.msk [vmem:[#allocation5 + $0xe8] sm:$0xff] %vm7370_vm6, %v7719_v36  ;;  %8023 = vrot.lane.b32.xlu0 %v8000_v8, %s9686_s28  ;;  %8262 = vrot.lane.b32.xlu1 %v8000_v8, %s9690_s17 }
 0x804   : > { %v7460_v11 = vpop.permute.xlu1 %7459  ;;  %v8322_v62 = vld [vmem:[#allocation5 + $0xc0] sm:$0xff] }
 0x805   : > { %v7361_v2 = vpop.permute.xlu0 %7360  ;;  %8506 = vmatmul.mubr.f32.gmra.mxu1 %v8322_v62 }
 0x806   : > { %7378 = vst.msk [vmem:[#allocation5 + $0xe0] sm:$0xff] %vm7370_vm6, %v7361_v2  ;;  %8214 = vrot.lane.b32.xlu0 %v7952_v22, %s9689_s14  ;;  %8168 = vrot.lane.b32.xlu1 %v8145_v39, %s9688_s9  ;;  %v8321_v39 = vld [vmem:[#allocation5 + $0xb8] sm:$0xff] }
 0x807   : > { %7427 = vst.msk [vmem:[#allocation5 + $0xe0] sm:$0xff] %vm7419_vm7, %v7410_v3 }
 0x808   : > { %7477 = vst.msk [vmem:[#allocation5 + $0xe0] sm:$0xff] %vm7469_vm8, %v7460_v11  ;;  %v7966_v57 = vpop.permute.xlu1 %7965 }
 0x809   : > { %v7767_v61 = vpop.permute.xlu0 %7766  ;;  %7987 = vst.msk [vmem:[#allocation5 + $0x50] sm:$0xff] %vm7272_vm4, %v7966_v57 }
 0x80a   : > { %7783 = vst.msk [vmem:[#allocation5 + $0xe8] sm:$0xff] %vm7419_vm7, %v7767_v61  ;;  %8252 = vrot.lane.b32.xlu0 %v12927_v31, %s9690_s17  ;;  %8264 = vrot.lane.b32.xlu1 %v8241_v53, %s9690_s17 }
 0x80c   : > { %v7912_v44 = vpop.permute.xlu1 %7911 }
 0x80d   : > { %v7815_v63 = vpop.permute.xlu0 %7814 }
 0x80e   : > { %7831 = vst.msk [vmem:[#allocation5 + $0xe8] sm:$0xff] %vm7469_vm8, %v7815_v63  ;;  %8120 = vrot.lane.b32.xlu0 %v8097_v7, %s9687_s29 }
 0x810   : > { %v7558_v17 = vpop.permute.xlu1 %7557 }
 0x811   : > { %v7863_v40 = vpop.permute.xlu0 %7862 }
 0x812   : > { %7879 = vst.msk [vmem:[#allocation5 + $0xe8] sm:$0xff] %vm7518_vm9, %v7863_v40  ;;  %8216 = vrot.lane.b32.xlu0 %v8193_v37, %s9689_s14 }
 0x813   : > { %7928 = vst.msk [vmem:[#allocation5 + $0xe8] sm:$0xff] %vm7567_vm10, %v7912_v44 }
 0x814   : > { %v8111_v52 = vpop.permute.xlu1 %8110 }
 0x815   : > { %v7509_v31 = vpop.permute.xlu0 %7508 }
 0x816   : > { %7526 = vst.msk [vmem:[#allocation5 + $0xe0] sm:$0xff] %vm7518_vm9, %v7509_v31 }
 0x817   : > { %7575 = vst.msk [vmem:[#allocation5 + $0xe0] sm:$0xff] %vm7567_vm10, %v7558_v17  ;;  %v8305_v17 = vld [vmem:[#allocation5 + $0x38] sm:$0xff] }
 0x818   : > { %v8159_v23 = vpop.permute.xlu1 %8158 }
 0x819   : > { %v8014_v59 = vpop.permute.xlu0 %8013 }
 0x81a   : > { %8035 = vst.msk [vmem:[#allocation5 + $0x50] sm:$0xff] %vm7321_vm5, %v8014_v59  ;;  %v8327_v41 = vld [vmem:[#allocation5 + $0xe8] sm:$0xff] }
 0x81b   : > { %8510 = vmatprep.mubr.f32.mxu1 %v8327_v41  ;;  %v8325_v41 = vld [vmem:[#allocation5 + $0xd8] sm:$0xff] }
 0x81c   : > { %v8207_v35 = vpop.permute.xlu1 %8206 }
 0x81d   : > { %v8062_v5 = vpop.permute.xlu0 %8061 }
 0x81e   : > { %8083 = vst.msk [vmem:[#allocation5 + $0x50] sm:$0xff] %vm7370_vm6, %v8062_v5  ;;  %v8326_v9 = vld [vmem:[#allocation5 + $0xe0] sm:$0xff] }
 0x81f   : > { %8132 = vst.msk [vmem:[#allocation5 + $0x50] sm:$0xff] %vm7419_vm7, %v8111_v52  ;;  %8511 = vmatmul.mubr.f32.gmra.mxu1 %v8326_v9 }
 0x820   : > { %8180 = vst.msk [vmem:[#allocation5 + $0x50] sm:$0xff] %vm7469_vm8, %v8159_v23  ;;  %9360 = vmatprep.mubr.msk.f32.mxu1 %vm6790_vm12, %v8309_v26  ;;  %v8255_v19 = vpop.permute.xlu1 %8254 }
 0x821   : > { %8228 = vst.msk [vmem:[#allocation5 + $0x50] sm:$0xff] %vm7518_vm9, %v8207_v35  ;;  %v7968_v1 = vpop.permute.xlu0 %7967 }
 0x822   : > { %8276 = vst.msk [vmem:[#allocation5 + $0x50] sm:$0xff] %vm7567_vm10, %v8255_v19 }
 0x823   : > { %7988 = vst.msk [vmem:[#allocation5 + $0x70] sm:$0xff] %vm7272_vm4, %v7968_v1 }
 0x824   : > { %v7970_v46 = vpop.permute.xlu1 %7969 }
 0x825   : > { %v8016_v24 = vpop.permute.xlu0 %8015  ;;  %7989 = vst.msk [vmem:[#allocation5 + $0x90] sm:$0xff] %vm7272_vm4, %v7970_v46 }
 0x826   : > { %8036 = vst.msk [vmem:[#allocation5 + $0x70] sm:$0xff] %vm7321_vm5, %v8016_v24 }
 0x828   : > { %v8018_v10 = vpop.permute.xlu1 %8017 }
 0x829   : > { %v8064_v29 = vpop.permute.xlu0 %8063  ;;  %v8308_v14 = vld [vmem:[#allocation5 + $0x50] sm:$0xff]  ;;  %8037 = vst.msk [vmem:[#allocation5 + $0x90] sm:$0xff] %vm7321_vm5, %v8018_v10 }
 0x82a   : > { %8084 = vst.msk [vmem:[#allocation5 + $0x70] sm:$0xff] %vm7370_vm6, %v8064_v29  ;;  %8591 = vmatmul.mubr.f32.vlgmr.msra.gmra.mxu1 %v8308_v14  ;;  %v8329_v29 = vld [vmem:[#allocation5 + $0xf8] sm:$0xff] }
 0x82b   : > { %9361 = vmatprep.mubr.msk.f32.mxu1 %vm6790_vm12, %v8313_v33 }
 0x82c   : > { %v9484_v28 = vpop.f32.mrf.mxu1  ;;  %v8066_v42 = vpop.permute.xlu1 %8065 }
 0x82d   : > { %v8113_v27 = vpop.permute.xlu0 %8112  ;;  %8085 = vst.msk [vmem:[#allocation5 + $0x90] sm:$0xff] %vm7370_vm6, %v8066_v42 }
 0x82e   : > { %8133 = vst.msk [vmem:[#allocation5 + $0x70] sm:$0xff] %vm7419_vm7, %v8113_v27  ;;  %v9485_v21 = vpop.f32.mrf.mxu1 }
 0x82f   : > { %v13104_v0 = vadd.f32 %v9485_v21, %v9484_v28 }
 0x830   : > { %v8115_v13 = vpop.permute.xlu1 %8114 }
 0x831   : > { %v8161_v15 = vpop.permute.xlu0 %8160  ;;  %8134 = vst.msk [vmem:[#allocation5 + $0x90] sm:$0xff] %vm7419_vm7, %v8115_v13 }
 0x832   : > { %8181 = vst.msk [vmem:[#allocation5 + $0x70] sm:$0xff] %vm7469_vm8, %v8161_v15 }
 0x834   : > { %v7972_v50 = vpop.permute.xlu1 %7971 }
 0x835   : > { %v8209_v4 = vpop.permute.xlu0 %8208  ;;  %7990 = vst.msk [vmem:[#allocation5 + $0xb0] sm:$0xff] %vm7272_vm4, %v7972_v50 }
 0x836   : > { %8229 = vst.msk [vmem:[#allocation5 + $0x70] sm:$0xff] %vm7518_vm9, %v8209_v4 }
 0x838   : > { %v8010_v16 = vpop.permute.xlu1 %8009 }
 0x839   : > { %v8257_v32 = vpop.permute.xlu0 %8256 }
 0x83a   : > { %8277 = vst.msk [vmem:[#allocation5 + $0x70] sm:$0xff] %vm7567_vm10, %v8257_v32 }
 0x83c   : > { %v8211_v54 = vpop.permute.xlu1 %8210 }
 0x83d   : > { %v7962_v34 = vpop.permute.xlu0 %7961 }
 0x83e   : > { %7985 = vst.msk [vmem:[#allocation5 + $0x10] sm:$0xff] %vm7272_vm4, %v7962_v34 }
 0x83f   : > { %8033 = vst.msk [vmem:[#allocation5 + $0x10] sm:$0xff] %vm7321_vm5, %v8010_v16 }
 0x840   : > { %v8068_v6 = vpop.permute.xlu1 %8067 }
 0x841   : > { %v8163_v48 = vpop.permute.xlu0 %8162  ;;  %v8312_v58 = vld [vmem:[#allocation5 + $0x70] sm:$0xff] }
 0x842   : > { %8182 = vst.msk [vmem:[#allocation5 + $0x90] sm:$0xff] %vm7469_vm8, %v8163_v48  ;;  %8596 = vmatmul.mubr.f32.gmra.mxu1 %v8312_v58 }
 0x843   : > { %8230 = vst.msk [vmem:[#allocation5 + $0x90] sm:$0xff] %vm7518_vm9, %v8211_v54  ;;  %9362 = vmatprep.mubr.msk.f32.mxu1 %vm6790_vm12, %v8317_v55 }
 0x844   : > { %v8107_v22 = vpop.permute.xlu1 %8106 }
 0x845   : > { %v8020_v30 = vpop.permute.xlu0 %8019 }
 0x846   : > { %8038 = vst.msk [vmem:[#allocation5 + $0xb0] sm:$0xff] %vm7321_vm5, %v8020_v30 }
 0x847   : > { %8086 = vst.msk [vmem:[#allocation5 + $0xb0] sm:$0xff] %vm7370_vm6, %v8068_v6  ;;  %v13162_v6 = vld [vmem:[%s13324_s4] ss:$0 sm:$0xff] }
 0x848   : > { %v7964_v45 = vpop.permute.xlu1 %7963  ;;  %v8488_v48 = vadd.f32 %v13062_v25, %v13162_v6 }
 0x849   : > { %v8058_v20 = vpop.permute.xlu0 %8057  ;;  %7986 = vst.msk [vmem:[#allocation5 + $0x30] sm:$0xff] %vm7272_vm4, %v7964_v45 }
 0x84a   : > { %8081 = vst.msk [vmem:[#allocation5 + $0x10] sm:$0xff] %vm7370_vm6, %v8058_v20 }
 0x84b   : > { %8130 = vst.msk [vmem:[#allocation5 + $0x10] sm:$0xff] %vm7419_vm7, %v8107_v22 }
 0x84c   : > { %v8155_v60 = vpop.permute.xlu1 %8154 }
 0x84d   : > { %v8259_v47 = vpop.permute.xlu0 %8258  ;;  %8178 = vst.msk [vmem:[#allocation5 + $0x10] sm:$0xff] %vm7469_vm8, %v8155_v60  ;;  %v8493_v60 = vadd.f32 %v13104_v0, %v13162_v6 }
 0x84e   : > { %8278 = vst.msk [vmem:[#allocation5 + $0x90] sm:$0xff] %vm7567_vm10, %v8259_v47 }
 0x850   : > { %v8012_v12 = vpop.permute.xlu1 %8011 }
 0x851   : > { %v8117_v8 = vpop.permute.xlu0 %8116  ;;  %8034 = vst.msk [vmem:[#allocation5 + $0x30] sm:$0xff] %vm7321_vm5, %v8012_v12 }
 0x852   : > { %8135 = vst.msk [vmem:[#allocation5 + $0xb0] sm:$0xff] %vm7419_vm7, %v8117_v8 }
 0x854   : > { %v8203_v3 = vpop.permute.xlu1 %8202 }
 0x855   : > { %v7974_v36 = vpop.permute.xlu0 %7973  ;;  %v8316_v49 = vld [vmem:[#allocation5 + $0x90] sm:$0xff]  ;;  %8226 = vst.msk [vmem:[#allocation5 + $0x10] sm:$0xff] %vm7518_vm9, %v8203_v3 }
 0x856   : > { %7991 = vst.msk [vmem:[#allocation5 + $0xd0] sm:$0xff] %vm7272_vm4, %v7974_v36  ;;  %8601 = vmatmul.mubr.f32.gmra.mxu1 %v8316_v49 }
 0x857   : > { %9363 = vmatprep.mubr.msk.f32.mxu1 %vm6790_vm12, %v8321_v39 }
 0x858   : > { %v8060_v11 = vpop.permute.xlu1 %8059 }
 0x859   : > { %v8165_v2 = vpop.permute.xlu0 %8164  ;;  %8082 = vst.msk [vmem:[#allocation5 + $0x30] sm:$0xff] %vm7370_vm6, %v8060_v11 }
 0x85a   : > { %8183 = vst.msk [vmem:[#allocation5 + $0xb0] sm:$0xff] %vm7469_vm8, %v8165_v2 }
 0x85c   : > { %v8251_v62 = vpop.permute.xlu1 %8250 }
 0x85d   : > { %v8022_v56 = vpop.permute.xlu0 %8021  ;;  %8274 = vst.msk [vmem:[#allocation5 + $0x10] sm:$0xff] %vm7567_vm10, %v8251_v62 }
 0x85e   : > { %8039 = vst.msk [vmem:[#allocation5 + $0xd0] sm:$0xff] %vm7321_vm5, %v8022_v56 }
 0x860   : > { %v8109_v53 = vpop.permute.xlu1 %8108 }
 0x861   : > { %v8213_v57 = vpop.permute.xlu0 %8212  ;;  %8131 = vst.msk [vmem:[#allocation5 + $0x30] sm:$0xff] %vm7419_vm7, %v8109_v53 }
 0x862   : > { %8231 = vst.msk [vmem:[#allocation5 + $0xb0] sm:$0xff] %vm7518_vm9, %v8213_v57 }
 0x864   : > { %v9487_v61 = vpop.f32.mrf.mxu1  ;;  %v7976_v7 = vpop.permute.xlu1 %7975  ;;  %v8300_v63 = vld [vmem:[#allocation5 + $0x10] sm:$0xff] }
 0x865   : > { %v8070_v44 = vpop.permute.xlu0 %8069  ;;  %7992 = vst.msk [vmem:[#allocation5 + $0xf0] sm:$0xff] %vm7272_vm4, %v7976_v7  ;;  %8581 = vmatmul.mubr.f32.vlgmr.msra.gmra.mxu0 %v8300_v63 }
 0x866   : > { %8087 = vst.msk [vmem:[#allocation5 + $0xd0] sm:$0xff] %vm7370_vm6, %v8070_v44  ;;  %v9488_v37 = vpop.f32.mrf.mxu1  ;;  %9359 = vmatprep.mubr.msk.f32.mxu0 %vm6790_vm12, %v8305_v17 }
 0x867   : > { %v13136_v40 = vadd.f32 %v9488_v37, %v9487_v61 }
 0x868   : > { %v8167_v52 = vpop.permute.xlu1 %8166 }
 0x869   : > { %v8261_v31 = vpop.permute.xlu0 %8260 }
 0x86a   : > { %8279 = vst.msk [vmem:[#allocation5 + $0xb0] sm:$0xff] %vm7567_vm10, %v8261_v31 }
 0x86c   : > { %v8205_v59 = vpop.permute.xlu1 %8204 }
 0x86d   : > { %v8119_v23 = vpop.permute.xlu0 %8118 }
 0x86e   : > { %8136 = vst.msk [vmem:[#allocation5 + $0xd0] sm:$0xff] %vm7419_vm7, %v8119_v23 }
 0x86f   : > { %8184 = vst.msk [vmem:[#allocation5 + $0xd0] sm:$0xff] %vm7469_vm8, %v8167_v52 }
 0x870   : > { %v8072_v9 = vpop.permute.xlu1 %8071 }
 0x871   : > { %v8157_v35 = vpop.permute.xlu0 %8156  ;;  %v8320_v5 = vld [vmem:[#allocation5 + $0xb0] sm:$0xff] }
 0x872   : > { %8179 = vst.msk [vmem:[#allocation5 + $0x30] sm:$0xff] %vm7469_vm8, %v8157_v35  ;;  %8606 = vmatmul.mubr.f32.gmra.mxu1 %v8320_v5 }
 0x873   : > { %8227 = vst.msk [vmem:[#allocation5 + $0x30] sm:$0xff] %vm7518_vm9, %v8205_v59  ;;  %9364 = vmatprep.mubr.msk.f32.mxu1 %vm6790_vm12, %v8325_v41 }
 0x874   : > { %v8263_v19 = vpop.permute.xlu1 %8262 }
 0x875   : > { %v8024_v26 = vpop.permute.xlu0 %8023 }
 0x876   : > { %8040 = vst.msk [vmem:[#allocation5 + $0xf0] sm:$0xff] %vm7321_vm5, %v8024_v26 }
 0x877   : > { %8088 = vst.msk [vmem:[#allocation5 + $0xf0] sm:$0xff] %vm7370_vm6, %v8072_v9 }
 0x878   : > { %v8169_v24 = vpop.permute.xlu1 %8168 }
 0x879   : > { %v8215_v1 = vpop.permute.xlu0 %8214 }
 0x87a   : > { %8232 = vst.msk [vmem:[#allocation5 + $0xd0] sm:$0xff] %vm7518_vm9, %v8215_v1 }
 0x87b   : > { %8280 = vst.msk [vmem:[#allocation5 + $0xd0] sm:$0xff] %vm7567_vm10, %v8263_v19 }
 0x87c   : > { %v8265_v33 = vpop.permute.xlu1 %8264 }
 0x87d   : > { %v8253_v46 = vpop.permute.xlu0 %8252 }
 0x87e   : > { %8275 = vst.msk [vmem:[#allocation5 + $0x30] sm:$0xff] %vm7567_vm10, %v8253_v46 }
 0x881   : > { %v8121_v10 = vpop.permute.xlu0 %8120 }
 0x882   : > { %8137 = vst.msk [vmem:[#allocation5 + $0xf0] sm:$0xff] %vm7419_vm7, %v8121_v10  ;;  %v8324_v14 = vld [vmem:[#allocation5 + $0xd0] sm:$0xff]  ;;  %v8498_v10 = vadd.f32 %v13136_v40, %v13162_v6 }
 0x883   : > { %8185 = vst.msk [vmem:[#allocation5 + $0xf0] sm:$0xff] %vm7469_vm8, %v8169_v24  ;;  %8611 = vmatmul.mubr.f32.gmra.mxu1 %v8324_v14 }
 0x884   : > { %9365 = vmatprep.mubr.msk.f32.mxu1 %vm6790_vm12, %v8329_v29  ;;  %vm9133_vm12 = vcmask 253952  }
 0x885   : > { %v8217_v28 = vpop.permute.xlu0 %8216  ;;  %v8304_v42 = vld [vmem:[#allocation5 + $0x30] sm:$0xff] }
 0x886   : > { %8233 = vst.msk [vmem:[#allocation5 + $0xf0] sm:$0xff] %vm7518_vm9, %v8217_v28  ;;  %8586 = vmatmul.mubr.f32.gmra.mxu0 %v8304_v42 }
 0x887   : > { %8281 = vst.msk [vmem:[#allocation5 + $0xf0] sm:$0xff] %vm7567_vm10, %v8265_v33 }
 0x88e   : > { %v8328_v27 = vld [vmem:[#allocation5 + $0xf0] sm:$0xff] }
 0x88f   : > { %8616 = vmatmul.mubr.f32.gmra.mxu1 %v8328_v27 }
 0x89c   : > { %v9490_v21 = vpop.f32.mrf.mxu1 }
 0x89e   : > { %v9491_v13 = vpop.f32.mrf.mxu1 }
 0x89f   : > { %v9492_v15 = vadd.f32 %v9491_v13, %v9490_v21 }
 0x8a1   : > { %v8503_v21 = vadd.f32 %v9492_v15, %v13162_v6 }
 0x8c5   : > { %v9493_v50 = vpop.f32.mrf.mxu1 }
 0x8c7   : > { %v9494_v4 = vpop.f32.mrf.mxu1 }
 0x8c8   : > { %v13155_v16 = vadd.f32 %v9494_v4, %v9493_v50 }
 0x8df   : > { %v9496_v32 = vpop.f32.mrf.mxu1 }
 0x8e1   : > { %v9497_v54 = vpop.f32.mrf.mxu1 }
 0x8e2   : > { %v13157_v34 = vadd.f32 %v9497_v54, %v9496_v32  ;;  %v8950_v32 = vld [vmem:[%s13325_s5 + $0x8] sm:$0xff] }
 0x8ea   : > { %v8592_v58 = vpop.f32.mrf.mxu1 }
 0x8eb   : > { %v8593_v55 = vadd.f32 %v8592_v58, %v8488_v48  ;;  %v8949_v58 = vld [vmem:[%s13325_s5] sm:$0xff] }
 0x8ec   : > { %v8594_v22 = vpop.f32.mrf.mxu1 }
 0x8ed   : > { %v8623_v30 = vmax.f32 %v8593_v55, 0.0 }
 0x8ef   : > { %v8671_v45 = vcombine.high %v8623_v30, %v8623_v30  ;;  %v8678_v20 = vrot.slane %v8623_v30, %v11815_v38  ;;  %v8977_v30 = vrot.slane %v8950_v32, %v11815_v38 }
 0x8f1   : > { %v8685_v47 = vrot.slane %v8671_v45, %v11815_v38  ;;  %v8686_v3 = vcombine.high %v8678_v20, %v8678_v20  ;;  %v9374_v11 = vrot.slane %v8678_v20, 9 }
 0x8f3   : > { %v8687_v39 = vcombine.high %v8685_v47, %v8685_v47  ;;  %v9375_v62 = vrot.slane %v8686_v3, 9  ;;  %v9376_v56 = vrot.slane %v8685_v47, 9  ;;  %v13172_v0 = vmax.f32 %v8678_v20, %v9374_v11 }
 0x8f5   : > { %v9377_v7 = vrot.slane %v8687_v39, 9  ;;  %v13176_v52 = vmax.f32 %v8686_v3, %v9375_v62  ;;  %v13178_v31 = vmax.f32 %v8685_v47, %v9376_v56  ;;  %v8478_v47 = vadd.f32 %v12899_v51, %v13162_v6 }
 0x8f7   : > { %v13186_v5 = vmax.f32 %v8687_v39, %v9377_v7  ;;  %v8991_v7 = vrot.slane %v8977_v30, 1 }
 0x902   : > { %v8597_v12 = vpop.f32.mrf.mxu1 }
 0x903   : > { %v8598_v8 = vadd.f32 %v8597_v12, %v8493_v60  ;;  %v8953_v12 = vcombine.high %v8949_v58, %v8949_v58 }
 0x904   : > { %v8599_v36 = vpop.f32.mrf.mxu1 }
 0x905   : > { %v8624_v49 = vmax.f32 %v8598_v8, 0.0 }
 0x907   : > { %v8688_v25 = vcombine.high %v8624_v49, %v8624_v49  ;;  %v8695_v2 = vrot.slane %v8624_v49, %v11815_v38 }
 0x909   : > { %v8702_v53 = vrot.slane %v8688_v25, %v11815_v38  ;;  %v8703_v57 = vcombine.high %v8695_v2, %v8695_v2  ;;  %v9378_v61 = vrot.slane %v8695_v2, 9  ;;  %v8985_v25 = vcombine.high %v8977_v30, %v8977_v30 }
 0x90b   : > { %v8704_v44 = vcombine.high %v8702_v53, %v8702_v53  ;;  %v9379_v63 = vrot.slane %v8703_v57, 9  ;;  %v9380_v37 = vrot.slane %v8702_v53, 9  ;;  %v13174_v17 = vmax.f32 %v8695_v2, %v9378_v61 }
 0x90d   : > { %v9381_v23 = vrot.slane %v8704_v44, 9  ;;  %v13180_v59 = vmax.f32 %v8703_v57, %v9379_v63  ;;  %v13182_v41 = vmax.f32 %v8702_v53, %v9380_v37  ;;  %v8937_v35 = vmax.f32 %v13172_v0, %v13174_v17 }
 0x90f   : > { %v13188_v9 = vmax.f32 %v8704_v44, %v9381_v23  ;;  %v8938_v26 = vmax.f32 %v13176_v52, %v13180_v59  ;;  %v8939_v19 = vmax.f32 %v13178_v31, %v13182_v41  ;;  %v8970_v44 = vcombine.high %v8950_v32, %v8950_v32 }
 0x911   : > { %v8940_v1 = vmax.f32 %v13186_v5, %v13188_v9 }
 0x916   : > { %v8602_v46 = vpop.f32.mrf.mxu1 }
 0x917   : > { %v8603_v29 = vadd.f32 %v8602_v46, %v8498_v10  ;;  %v8992_v10 = vrot.slane %v8985_v25, 1 }
 0x918   : > { %v8604_v24 = vpop.f32.mrf.mxu1 }
 0x919   : > { %v8625_v28 = vmax.f32 %v8603_v29, 0.0 }
 0x91b   : > { %v8705_v42 = vcombine.high %v8625_v28, %v8625_v28  ;;  %v8712_v27 = vrot.slane %v8625_v28, %v11815_v38 }
 0x91d   : > { %v8719_v13 = vrot.slane %v8705_v42, %v11815_v38  ;;  %v8720_v54 = vcombine.high %v8712_v27, %v8712_v27  ;;  %v9382_v22 = vrot.slane %v8712_v27, 9  ;;  %v8967_v42 = vrot.slane %v8953_v12, %v11815_v38 }
 0x91f   : > { %v8721_v55 = vcombine.high %v8719_v13, %v8719_v13  ;;  %v9383_v20 = vrot.slane %v8720_v54, 9  ;;  %v9384_v60 = vrot.slane %v8719_v13, 9  ;;  %v8917_v39 = vmax.f32 %v8712_v27, %v9382_v22 }
 0x920   : > { %v13214_v27 = vrot.slane %v8949_v58, %v11815_v38 }
 0x921   : > { %v9385_v49 = vrot.slane %v8721_v55, 9  ;;  %v8918_v57 = vmax.f32 %v8720_v54, %v9383_v20  ;;  %v8919_v61 = vmax.f32 %v8719_v13, %v9384_v60  ;;  %v8483_v20 = vadd.f32 %v13001_v43, %v13162_v6 }
 0x923   : > { %v8920_v46 = vmax.f32 %v8721_v55, %v9385_v49 }
 0x925   : > { %v8582_v14 = vpop.f32.mrf.mxu0 }
 0x926   : > { %v8583_v11 = vadd.f32 %v8582_v14, %v8478_v47 }
 0x927   : > { %v8584_v33 = vpop.f32.mrf.mxu0 }
 0x928   : > { %v8621_v24 = vmax.f32 %v8583_v11, 0.0  ;;  %v8989_v11 = vrot.slane %v8967_v42, 1 }
 0x92a   : > { %v8637_v32 = vcombine.high %v8621_v24, %v8621_v24  ;;  %v8644_v54 = vrot.slane %v8621_v24, %v11815_v38  ;;  %v13254_v0 = vmul.f32 %v8989_v11, %v8938_v26  ;;  %v8513_v24 = vadd.f32 %v13157_v34, %v13162_v6 }
 0x932   : > { %v8607_v50 = vpop.f32.mrf.mxu1 }
 0x933   : > { %v8608_v4 = vadd.f32 %v8607_v50, %v8503_v21 }
 0x934   : > { %v8609_v48 = vpop.f32.mrf.mxu1 }
 0x935   : > { %v8626_v40 = vmax.f32 %v8608_v4, 0.0  ;;  %v13217_v4 = vrot.slane %v8970_v44, %v11815_v38  ;;  %v8508_v48 = vadd.f32 %v13155_v16, %v13162_v6  ;;  %v13231_v16 = vcombine.high %v13214_v27, %v13214_v27 }
 0x937   : > { %v8722_v15 = vcombine.high %v8626_v40, %v8626_v40  ;;  %v8729_v45 = vrot.slane %v8626_v40, %v11815_v38  ;;  %v8993_v44 = vrot.slane %v13217_v4, 1 }
 0x939   : > { %v8736_v8 = vrot.slane %v8722_v15, %v11815_v38  ;;  %v8737_v3 = vcombine.high %v8729_v45, %v8729_v45  ;;  %v9386_v36 = vrot.slane %v8729_v45, 9  ;;  %v8969_v15 = vcombine.high %v8967_v42, %v8967_v42 }
 0x93b   : > { %v8738_v2 = vcombine.high %v8736_v8, %v8736_v8  ;;  %v9387_v62 = vrot.slane %v8737_v3, 9  ;;  %v9388_v56 = vrot.slane %v8736_v8, 9  ;;  %v8921_v53 = vmax.f32 %v8729_v45, %v9386_v36 }
 0x93c   : > { %v8652_v36 = vcombine.high %v8644_v54, %v8644_v54 }
 0x93d   : > { %v9389_v63 = vrot.slane %v8738_v2, 9  ;;  %v8922_v37 = vmax.f32 %v8737_v3, %v9387_v62  ;;  %v8923_v51 = vmax.f32 %v8736_v8, %v9388_v56  ;;  %v8941_v23 = vmax.f32 %v8917_v39, %v8921_v53 }
 0x93e   : > { %v13235_v8 = vcombine.high %v13217_v4, %v13217_v4  ;;  %v8651_v3 = vrot.slane %v8637_v32, %v11815_v38  ;;  %v8990_v62 = vrot.slane %v8969_v15, 1  ;;  %v13245_v56 = vmul.f32 %v8967_v42, %v8937_v35 }
 0x93f   : > { %v8924_v29 = vmax.f32 %v8738_v2, %v9389_v63  ;;  %v8942_v33 = vmax.f32 %v8918_v57, %v8922_v37  ;;  %v8943_v28 = vmax.f32 %v8919_v61, %v8923_v51  ;;  %v9019_v14 = vmul.f32 %v8977_v30, %v8941_v23 }
 0x940   : > { %v8987_v53 = vrot.slane %v13214_v27, 1  ;;  %v8994_v63 = vrot.slane %v13235_v8, 1  ;;  %v8653_v37 = vcombine.high %v8651_v3, %v8651_v3  ;;  %v9366_v51 = vrot.slane %v8644_v54, 9 }
 0x941   : > { %v8944_v21 = vmax.f32 %v8920_v46, %v8924_v29  ;;  %v9020_v13 = vmul.f32 %v8991_v7, %v8942_v33  ;;  %v9021_v50 = vmul.f32 %v8985_v25, %v8943_v28  ;;  %v9078_v55 = vrot.slane %v9019_v14, %v11853_v18 }
 0x942   : > { %v8988_v7 = vrot.slane %v13231_v16, 1  ;;  %v9367_v23 = vrot.slane %v8652_v36, 9  ;;  %v9062_v29 = vrot.slane %v13245_v56, %v11853_v18  ;;  %v9368_v33 = vrot.slane %v8651_v3, 9 }
 0x943   : > { %v9022_v40 = vmul.f32 %v8992_v10, %v8944_v21  ;;  %v9082_v22 = vrot.slane %v9020_v13, %v11853_v18  ;;  %v9086_v58 = vrot.slane %v9021_v50, %v11853_v18  ;;  %v8612_v30 = vpop.f32.mrf.mxu1  ;;  %v13262_v10 = vmul.f32 %v8969_v15, %v8939_v19 }
 0x944   : > { %v8613_v45 = vadd.f32 %v8612_v30, %v8508_v48  ;;  %v13270_v52 = vmul.f32 %v8990_v62, %v8940_v1  ;;  %v9369_v6 = vrot.slane %v8653_v37, 9  ;;  %v8901_v14 = vmax.f32 %v8644_v54, %v9366_v51 }
 0x945   : > { %v9090_v60 = vrot.slane %v9022_v40, %v11853_v18  ;;  %v9114_v47 = vsel %vm7136_vm14, %v9082_v22, %v9078_v55  ;;  %v8614_v12 = vpop.f32.mrf.mxu1  ;;  %v8902_v31 = vmax.f32 %v8652_v36, %v9367_v23  ;;  %v8903_v32 = vmax.f32 %v8651_v3, %v9368_v33 }
 0x946   : > { %v9115_v49 = vsel %vm7138_vm15, %v9086_v58, %v9114_v47  ;;  %v8627_v39 = vmax.f32 %v8613_v45, 0.0  ;;  %v8587_v43 = vpop.f32.mrf.mxu0  ;;  %v9066_v54 = vrot.slane %v13254_v0, %v11853_v18  ;;  %v8904_v30 = vmax.f32 %v8653_v37, %v9369_v6 }
 0x947   : > { %v8588_v25 = vadd.f32 %v8587_v43, %v8483_v20  ;;  %v13240_v2 = vsel %vm7140_vm0, %v9090_v60, %v9115_v49  ;;  %v9070_v6 = vrot.slane %v13262_v10, %v11853_v18 }
 0x948   : > { %v8589_v57 = vpop.f32.mrf.mxu0  ;;  %v8739_v46 = vcombine.high %v8627_v39, %v8627_v39  ;;  %v8746_v28 = vrot.slane %v8627_v39, %v11815_v38 }
 0x949   : > { %v8622_v61 = vmax.f32 %v8588_v25, 0.0 }
 0x94a   : > { %v8753_v41 = vrot.slane %v8739_v46, %v11815_v38  ;;  %v8754_v48 = vcombine.high %v8746_v28, %v8746_v28  ;;  %v9390_v40 = vrot.slane %v8746_v28, 9 }
 0x94b   : > { %v8654_v17 = vcombine.high %v8622_v61, %v8622_v61  ;;  %v8661_v35 = vrot.slane %v8622_v61, %v11815_v38 }
 0x94c   : > { %v8755_v15 = vcombine.high %v8753_v41, %v8753_v41  ;;  %v9391_v3 = vrot.slane %v8754_v48, 9  ;;  %v9392_v36 = vrot.slane %v8753_v41, 9  ;;  %v8925_v43 = vmax.f32 %v8746_v28, %v9390_v40 }
 0x94d   : > { %v8668_v59 = vrot.slane %v8654_v17, %v11815_v38  ;;  %v8669_v26 = vcombine.high %v8661_v35, %v8661_v35  ;;  %v9370_v34 = vrot.slane %v8661_v35, 9 }
 0x94e   : > { %v9393_v57 = vrot.slane %v8755_v15, 9  ;;  %v8926_v28 = vmax.f32 %v8754_v48, %v9391_v3 }
 0x94f   : > { %v8670_v19 = vcombine.high %v8668_v59, %v8668_v59  ;;  %v9371_v42 = vrot.slane %v8669_v26, 9  ;;  %v9372_v21 = vrot.slane %v8668_v59, 9  ;;  %v8905_v13 = vmax.f32 %v8661_v35, %v9370_v34  ;;  %v8617_v50 = vpop.f32.mrf.mxu1 }
 0x950   : > { %v8618_v5 = vadd.f32 %v8617_v50, %v8513_v24 }
 0x951   : > { %v9373_v9 = vrot.slane %v8670_v19, 9  ;;  %v8906_v1 = vmax.f32 %v8669_v26, %v9371_v42  ;;  %v8907_v55 = vmax.f32 %v8668_v59, %v9372_v21  ;;  %v8933_v22 = vmax.f32 %v8901_v14, %v8905_v13  ;;  %v8619_v58 = vpop.f32.mrf.mxu1 }
 0x952   : > { %v8628_v45 = vmax.f32 %v8618_v5, 0.0  ;;  %v8928_v14 = vmax.f32 %v8755_v15, %v9393_v57 }
 0x953   : > { %v8908_v20 = vmax.f32 %v8670_v19, %v9373_v9  ;;  %v8934_v60 = vmax.f32 %v8902_v31, %v8906_v1  ;;  %v8935_v47 = vmax.f32 %v8903_v32, %v8907_v55  ;;  %v9011_v12 = vmul.f32 %v13214_v27, %v8933_v22 }
 0x954   : > { %v8756_v49 = vcombine.high %v8628_v45, %v8628_v45  ;;  %v8763_v39 = vrot.slane %v8628_v45, %v11815_v38  ;;  %v9074_v32 = vrot.slane %v13270_v52, %v11853_v18 }
 0x955   : > { %v8936_v11 = vmax.f32 %v8904_v30, %v8908_v20  ;;  %v9012_v25 = vmul.f32 %v8987_v53, %v8934_v60  ;;  %v9013_v62 = vmul.f32 %v13231_v16, %v8935_v47  ;;  %v9046_v46 = vrot.slane %v9011_v12, %v11853_v18 }
 0x956   : > { %v8770_v61 = vrot.slane %v8756_v49, %v11815_v38  ;;  %v8771_v37 = vcombine.high %v8763_v39, %v8763_v39  ;;  %v9394_v51 = vrot.slane %v8763_v39, 9  ;;  %v8927_v53 = vmax.f32 %v8753_v41, %v9392_v36 }
 0x957   : > { %v9014_v23 = vmul.f32 %v8988_v7, %v8936_v11  ;;  %v9050_v27 = vrot.slane %v9012_v25, %v11853_v18  ;;  %v9054_v0 = vrot.slane %v9013_v62, %v11853_v18 }
 0x958   : > { %v8772_v17 = vcombine.high %v8770_v61, %v8770_v61  ;;  %v9395_v35 = vrot.slane %v8771_v37, 9  ;;  %v9396_v24 = vrot.slane %v8770_v61, 9  ;;  %v8929_v33 = vmax.f32 %v8763_v39, %v9394_v51 }
 0x959   : > { %v9058_v16 = vrot.slane %v9014_v23, %v11853_v18  ;;  %v9107_v59 = vsel %vm7136_vm14, %v9050_v27, %v9046_v46  ;;  %vm9139_vm14 = vcmask 0  }
 0x95a   : > { %v9108_v38 = vsel %vm7138_vm15, %v9054_v0, %v9107_v59  ;;  %v9397_v26 = vrot.slane %v8772_v17, 9  ;;  %v8930_v7 = vmax.f32 %v8771_v37, %v9395_v35  ;;  %v8931_v34 = vmax.f32 %v8770_v61, %v9396_v24 }
 0x95b   : > { %v8945_v31 = vmax.f32 %v8925_v43, %v8929_v33  ;;  %v9109_v19 = vsel %vm7140_vm0, %v9058_v16, %v9108_v38 }
 0x95c   : > { %v8932_v42 = vmax.f32 %v8772_v17, %v9397_v26  ;;  %v8946_v21 = vmax.f32 %v8926_v28, %v8930_v7  ;;  %v8947_v13 = vmax.f32 %v8927_v53, %v8931_v34  ;;  %v9110_v41 = vsel %vm7142_vm1, %v9062_v29, %v9109_v19 }
 0x95d   : > { %v9023_v50 = vmul.f32 %v13217_v4, %v8945_v31  ;;  %v9111_v48 = vsel %vm7144_vm2, %v9066_v54, %v9110_v41 }
 0x95e   : > { %v8948_v10 = vmax.f32 %v8928_v14, %v8932_v42  ;;  %v9024_v40 = vmul.f32 %v8993_v44, %v8946_v21  ;;  %v9025_v5 = vmul.f32 %v13235_v8, %v8947_v13  ;;  %v9112_v9 = vsel %vm7146_vm3, %v9070_v6, %v9111_v48 }
 0x95f   : > { %v9094_v1 = vrot.slane %v9023_v50, %v11853_v18  ;;  %v9113_v56 = vsel %vm7148_vm13, %v9074_v32, %v9112_v9 }
 0x960   : > { %v9026_v29 = vmul.f32 %v8994_v63, %v8948_v10  ;;  %v9098_v55 = vrot.slane %v9024_v40, %v11853_v18  ;;  %v9102_v52 = vrot.slane %v9025_v5, %v11853_v18  ;;  %v9124_v30 = vsel %vm9123_vm11, %v9113_v56, 0.0 }
 0x961   : > { %v9117_v22 = vsel %vm7142_vm1, %v9094_v1, %v13240_v2 }
 0x962   : > { %v9106_v4 = vrot.slane %v9026_v29, %v11853_v18  ;;  %v9118_v44 = vsel %vm7144_vm2, %v9098_v55, %v9117_v22  ;;  %v9137_v18 = vld [vmem:[#allocation6] sm:$0x1] }
 0x963   : > { %v9119_v58 = vsel %vm7146_vm3, %v9102_v52, %v9118_v44 }
 0x964   : > { %v9120_v54 = vsel %vm7148_vm13, %v9106_v4, %v9119_v58 }
 0x965   : > { %v9125_v8 = vsel %vm9123_vm11, %v9120_v54, 0.0 }
 0x966   : > { %v9126_v63 = vadd.f32 %v9125_v8, %v9124_v30 }
 0x968   : > { %v9127_v15 = vrot.slane %v9126_v63, 4 }
 0x96a   : > { %v9128_v45 = vadd.f32 %v9127_v15, %v9126_v63 }
 0x96c   : > { %v9129_v20 = vrot.slane %v9128_v45, 2 }
 0x96e   : > { %v9130_v60 = vadd.f32 %v9129_v20, %v9128_v45 }
 0x970   : > { %v9131_v47 = vrot.slane %v9130_v60, 1 }
 0x972   : > { %v9132_v2 = vadd.f32 %v9131_v47, %v9130_v60 }
 0x974   : > { %v9134_v12 = vsel %vm9133_vm12, %v9132_v2, 0.0 }
 0x975   : > { %9135 = vadd.xlane.f32.xlu0 %v9134_v12 }
 0x9fe   : > { %v9136_v3 = vpop.xlane.xlu0 %9135 }
 0x9ff   : > { %v9138_v36 = vadd.f32 %v9137_v18, %v9136_v3 }
 0xa01   : > { %9140 = vst.msk [vmem:[%s276_s18] sm:$0x1] %vm9139_vm14, %v9138_v36 }
 0xa02 PF: > { %s19_s26 = sadd.s32 1, %s9657_s26  }
 0xa03   : > { %p16_p4 = scmp.ge.s32.totalorder %s19_s26, 4  }
 0xa05   :  { %18 = sbr.rel (!%p16_p4) target bundleno = 3 (0x3), region = 86 }

</bundles_post_ra>
